<compile_context>
chip_gen: v7x
topology: tpu7x:2x2x1
jax: 0.10.0
libtpu: 0.0.40
codegen_flags: <defaults>
</compile_context>

<pallas_src>
import jax
import jax.numpy as jnp
from jax.experimental import pallas as pl
from jax.experimental.pallas import tpu as pltpu

K = 3            # kernel size (stride=1, padding=1)
LANE = 128       # TPU lane width
_VMEM_STEP_BUDGET = 10 * 1024 * 1024   # per-grid-step VMEM target (bytes)


def _round_up(a, b):
    return -(-a // b) * b


def _dwconv_kernel(w_ref, b_ref, x_ref, top_ref, bot_ref, o_ref, xp_ref):
    # w_ref  : (9,) f32 SMEM   (scalar-prefetched, flattened 3x3 filter)
    # b_ref  : (1,) f32 SMEM   (scalar-prefetched bias)
    # x_ref  : (TH, W, S, L)   f32 VMEM  main H-strip of the input
    # top_ref: (1,  W, S, L)   f32 VMEM  row above the strip (clamped at h=0)
    # bot_ref: (1,  W, S, L)   f32 VMEM  row below the strip (clamped at last)
    # o_ref  : (TH, W, S, L)   f32 VMEM  output strip
    # xp_ref : (TH+2, W+2, S, L) f32 VMEM zero-padded scratch tile
    TH, W, S, L = o_ref.shape
    h = pl.program_id(1)
    last_h = pl.num_programs(1) - 1

    # ---- Build the padded tile: halo-only writes, no full-tile memset. ----
    # Left/right halo columns (also cover all 4 corners).
    zeros_col = jnp.zeros((TH + 2, 1, S, L), jnp.float32)
    xp_ref[:, 0:1, :, :] = zeros_col
    xp_ref[:, W + 1:W + 2, :, :] = zeros_col

    zeros_row = jnp.zeros((1, W, S, L), jnp.float32)

    # Top halo row: zeros at the image top, else the last row of the strip above.
    @pl.when(h == 0)
    def _():
        xp_ref[0:1, 1:W + 1, :, :] = zeros_row

    @pl.when(h > 0)
    def _():
        xp_ref[0:1, 1:W + 1, :, :] = top_ref[...]

    # Bottom halo row: zeros at the image bottom, else the first row below.
    @pl.when(h == last_h)
    def _():
        xp_ref[TH + 1:TH + 2, 1:W + 1, :, :] = zeros_row

    @pl.when(h < last_h)
    def _():
        xp_ref[TH + 1:TH + 2, 1:W + 1, :, :] = bot_ref[...]

    # Interior copy (aligned: H and W are leading dims in this layout).
    xp_ref[1:TH + 1, 1:W + 1, :, :] = x_ref[...]

    # ---- Unrolled 3x3 cross-correlation (matches nn.Conv2d semantics). ----
    # Bias folded into the first tap; all 9 taps are aligned leading-dim reads.
    acc = w_ref[0] * xp_ref[0:TH, 0:W, :, :] + b_ref[0]
    for t in range(1, K * K):
        i, j = t // K, t % K
        acc = acc + w_ref[t] * xp_ref[i:i + TH, j:j + W, :, :]
    o_ref[...] = acc


def _choose_tiling(H, W, S_total, lane):
    """Pick (s_blk, n_blocks, th, h_blocks) under the per-step VMEM budget."""
    # Sublane-axis block size must be a multiple of 8 or the full S extent.
    if S_total <= 8 or S_total % 8 != 0:
        s_cands = [S_total]
    else:
        s_cands = [c for c in (32, 16, 8) if S_total % c == 0]

    def tile_bytes(s):
        # VMEM footprint of one (h, w) cell of a block; padded to the native
        # (8, 128) f32 tile when s / lane are smaller than that.
        return _round_up(s, 8) * _round_up(lane, LANE) * 4

    # Per-step VMEM in (h, w)-cell units:
    #   in + out, double-buffered:        4 * th * W
    #   top/bot halo rows, double-buffered: 4 * W
    #   padded scratch (single buffer):   (th + 2) * (W + 2)
    # => th * (5W + 2) + (6W + 4) cells.
    s_blk = s_cands[-1]
    for s in s_cands:                      # largest first
        if (H * (5 * W + 2) + 6 * W + 4) * tile_bytes(s) <= _VMEM_STEP_BUDGET:
            s_blk = s
            break

    tb = tile_bytes(s_blk)
    th_max = (_VMEM_STEP_BUDGET // tb - (6 * W + 4)) // (5 * W + 2)
    th_max = max(1, min(H, th_max))

    n_blocks = S_total // s_blk
    th_cap = th_max
    if n_blocks == 1 and H >= 2:
        # Guarantee >= 2 grid steps so both v7x TensorCores get work and the
        # DMA pipeline has something to overlap with.
        th_cap = min(th_cap, (H + 1) // 2)
    th_cap = max(1, th_cap)
    # Largest divisor of H <= th_cap -> exact tiling, no partial blocks (keeps
    # the halo index math exact; no OOB-padded rows feeding valid outputs).
    th = max(d for d in range(1, th_cap + 1) if H % d == 0)
    return s_blk, n_blocks, th, H // th


def depthwise_conv_hwn(xt, weight, bias):
    """Shared-filter 3x3 depthwise conv on a lane-dense (H, W, N) activation.

    Callers that keep activations in this layout across surrounding ops avoid
    the NCHW<->HWN HBM relayout entirely (review option (b))."""
    H, W, N = xt.shape
    xt = xt.astype(jnp.float32)

    # Lane-axis layout: keep N on lanes.  N < 128 stays unpadded (full-extent
    # last dim is always a legal block dim); N >= 128 is padded to a multiple
    # of 128 so the N axis can be tiled with lane-aligned blocks.
    if N % LANE == 0:
        lane, n_pad = LANE, N
    elif N < LANE:
        lane, n_pad = N, N
    else:
        lane, n_pad = LANE, _round_up(N, LANE)
        # One extra HBM pass; only hit when N > 128 and N % 128 != 0.
        xt = jnp.pad(xt, ((0, 0), (0, 0), (0, n_pad - N)))
    S_total = n_pad // lane
    x4 = xt.reshape(H, W, S_total, lane)       # contiguous split -> free

    s_blk, n_blocks, th, h_blocks = _choose_tiling(H, W, S_total, lane)

    w_flat = weight.reshape(-1).astype(jnp.float32)   # (9,)
    b = jnp.asarray(bias, jnp.float32).reshape(1)     # (1,)

    def main_map(n, h, w_s, b_s):
        return (h, 0, n, 0)

    def top_map(n, h, w_s, b_s):
        # Row just above the strip (clamped; overridden with zeros at h == 0).
        return (jnp.maximum(h * th - 1, 0), 0, n, 0)

    def bot_map(n, h, w_s, b_s):
        # Row just below the strip (clamped; overridden with zeros at h == last).
        return (jnp.minimum((h + 1) * th, H - 1), 0, n, 0)

    out = pl.pallas_call(
        _dwconv_kernel,
        out_shape=jax.ShapeDtypeStruct((H, W, S_total, lane), jnp.float32),
        grid_spec=pltpu.PrefetchScalarGridSpec(
            num_scalar_prefetch=2,                     # weights + bias -> SMEM
            grid=(n_blocks, h_blocks),
            in_specs=[
                pl.BlockSpec((th, W, s_blk, lane), main_map),   # main H-strip
                pl.BlockSpec((1, W, s_blk, lane), top_map),     # top halo row
                pl.BlockSpec((1, W, s_blk, lane), bot_map),     # bottom halo row
            ],
            out_specs=pl.BlockSpec((th, W, s_blk, lane), main_map),
            scratch_shapes=[
                pltpu.VMEM((th + 2, W + 2, s_blk, lane), jnp.float32)],
        ),
        compiler_params=pltpu.CompilerParams(
            dimension_semantics=("parallel", "parallel"),
            vmem_limit_bytes=32 * 1024 * 1024),
    )(w_flat, b, x4, x4, x4)

    return out.reshape(H, W, n_pad)[:, :, :N]


def depthwise_conv(x, weight, bias):
    """x: (B, C, H, W); weight: (3, 3); bias: scalar.
    Matches nn.Conv2d(1, 1, 3, stride=1, padding=1) applied per image plane."""
    B, C, H, W = x.shape
    N = B * C
    # NCHW -> lane-dense (H, W, N) relayout (one HBM read+write pass each way).
    # This plumbing is only needed by the NCHW contract; in a fused pipeline
    # keep activations in (H, W, N) and call depthwise_conv_hwn directly.
    xt = x.reshape(N, H, W).astype(jnp.float32).transpose(1, 2, 0)
    out = depthwise_conv_hwn(xt, weight, bias)
    return out.transpose(2, 0, 1).reshape(B, C, H, W).astype(x.dtype)


if __name__ == "__main__":
    key = jax.random.PRNGKey(0)
    kx, kw, kb = jax.random.split(key, 3)

    B, C, H, W = 2, 4, 16, 16
    x = jax.random.normal(kx, (B, C, H, W), dtype=jnp.float32)

    # Deterministic init matching Conv2d(1, 1, 3) parameter shapes:
    # weight (1,1,3,3) -> (3,3); bias (1,) -> scalar.  PyTorch-style U(-b, b).
    fan_in = 1 * K * K
    bound = 1.0 / (fan_in ** 0.5)
    weight = jax.random.uniform(kw, (K, K), jnp.float32, -bound, bound)
    bias = jax.random.uniform(kb, (), jnp.float32, -bound, bound)

    out = depthwise_conv(x, weight, bias)
    out = jax.block_until_ready(out)

    # Plain-JAX reference (same cross-correlation semantics as nn.Conv2d).
    xr = x.reshape(B * C, 1, H, W)
    ref = jax.lax.conv_general_dilated(
        xr, weight.reshape(1, 1, K, K),
        window_strides=(1, 1), padding=((1, 1), (1, 1)),
        dimension_numbers=("NCHW", "OIHW", "NCHW")) + bias
    ref = ref.reshape(B, C, H, W)
    assert out.shape == (B, C, H, W)
    assert jnp.allclose(out, ref, atol=1e-5, rtol=1e-5)

    print("KERNEL_OK")
</pallas_src>

<mosaic_0001>
module attributes {stable_mosaic.version = 11 : i64} {
  func.func @_dwconv_kernel(%arg0: i32, %arg1: i32, %arg2: memref<9xf32, #tpu.memory_space<smem>>, %arg3: memref<1xf32, #tpu.memory_space<smem>>, %arg4: memref<8x16x1x8xf32, #tpu.memory_space<vmem>>, %arg5: memref<1x16x1x8xf32, #tpu.memory_space<vmem>>, %arg6: memref<1x16x1x8xf32, #tpu.memory_space<vmem>>, %arg7: memref<8x16x1x8xf32, #tpu.memory_space<vmem>>, %arg8: memref<10x18x1x8xf32, #tpu.memory_space<vmem>>) attributes {dimension_semantics = [#tpu.dimension_semantics<parallel>, #tpu.dimension_semantics<parallel>], iteration_bounds = array<i64: 1, 2>, scalar_prefetch = 2 : i64, scratch_operands = 1 : i64, tpu.core_type = #tpu.core_type<tc>, window_params = [{transform_indices = @transform_0, window_bounds = array<i64: 8, 16, 1, 8>}, {transform_indices = @transform_1, window_bounds = array<i64: 1, 16, 1, 8>}, {transform_indices = @transform_2, window_bounds = array<i64: 1, 16, 1, 8>}, {transform_indices = @transform_3, window_bounds = array<i64: 8, 16, 1, 8>}]} {
    %cst = arith.constant 0.000000e+00 : f32
    %0 = vector.broadcast %cst : f32 to vector<10x1x1x8xf32>
    %c0 = arith.constant 0 : index
    %c0_0 = arith.constant 0 : index
    %c0_1 = arith.constant 0 : index
    %c0_2 = arith.constant 0 : index
    %1 = vector.load %arg8[%c0, %c0_0, %c0_1, %c0_2] : memref<10x18x1x8xf32, #tpu.memory_space<vmem>>, vector<10x1x1x8xf32>
    tpu.vector_store %arg8[%c0, %c0_0, %c0_1, %c0_2], %0 {strides = array<i32>} : memref<10x18x1x8xf32, #tpu.memory_space<vmem>>, vector<10x1x1x8xf32>,
    %c0_3 = arith.constant 0 : index
    %c17 = arith.constant 17 : index
    %c0_4 = arith.constant 0 : index
    %c0_5 = arith.constant 0 : index
    %2 = vector.load %arg8[%c0_3, %c17, %c0_4, %c0_5] : memref<10x18x1x8xf32, #tpu.memory_space<vmem>>, vector<10x1x1x8xf32>
    tpu.vector_store %arg8[%c0_3, %c17, %c0_4, %c0_5], %0 {strides = array<i32>} : memref<10x18x1x8xf32, #tpu.memory_space<vmem>>, vector<10x1x1x8xf32>,
    %cst_6 = arith.constant 0.000000e+00 : f32
    %3 = vector.broadcast %cst_6 : f32 to vector<1x16x1x8xf32>
    %c0_i32 = arith.constant 0 : i32
    %4 = arith.cmpi eq, %arg1, %c0_i32 : i32
    %5 = arith.extui %4 : i1 to i32
    %c0_i32_7 = arith.constant 0 : i32
    %6 = arith.cmpi ne, %5, %c0_i32_7 : i32
    scf.if %6 {
      %c0_63 = arith.constant 0 : index
      %c1_64 = arith.constant 1 : index
      %c0_65 = arith.constant 0 : index
      %c0_66 = arith.constant 0 : index
      %66 = vector.load %arg8[%c0_63, %c1_64, %c0_65, %c0_66] : memref<10x18x1x8xf32, #tpu.memory_space<vmem>>, vector<1x16x1x8xf32>
      tpu.vector_store %arg8[%c0_63, %c1_64, %c0_65, %c0_66], %3 {strides = array<i32>} : memref<10x18x1x8xf32, #tpu.memory_space<vmem>>, vector<1x16x1x8xf32>,
    } else {
    }
    %c0_i32_8 = arith.constant 0 : i32
    %7 = arith.cmpi sgt, %arg1, %c0_i32_8 : i32
    %8 = arith.extui %7 : i1 to i32
    %c0_i32_9 = arith.constant 0 : i32
    %9 = arith.cmpi ne, %8, %c0_i32_9 : i32
    scf.if %9 {
      %c0_63 = arith.constant 0 : index
      %c0_64 = arith.constant 0 : index
      %c0_65 = arith.constant 0 : index
      %c0_66 = arith.constant 0 : index
      %66 = vector.load %arg5[%c0_63, %c0_64, %c0_65, %c0_66] : memref<1x16x1x8xf32, #tpu.memory_space<vmem>>, vector<1x16x1x8xf32>
      %c0_67 = arith.constant 0 : index
      %c1_68 = arith.constant 1 : index
      %c0_69 = arith.constant 0 : index
      %c0_70 = arith.constant 0 : index
      %67 = vector.load %arg8[%c0_67, %c1_68, %c0_69, %c0_70] : memref<10x18x1x8xf32, #tpu.memory_space<vmem>>, vector<1x16x1x8xf32>
      tpu.vector_store %arg8[%c0_67, %c1_68, %c0_69, %c0_70], %66 {strides = array<i32>} : memref<10x18x1x8xf32, #tpu.memory_space<vmem>>, vector<1x16x1x8xf32>,
    } else {
    }
    %c1_i32 = arith.constant 1 : i32
    %10 = arith.cmpi eq, %arg1, %c1_i32 : i32
    %11 = arith.extui %10 : i1 to i32
    %c0_i32_10 = arith.constant 0 : i32
    %12 = arith.cmpi ne, %11, %c0_i32_10 : i32
    scf.if %12 {
      %c9 = arith.constant 9 : index
      %c1_63 = arith.constant 1 : index
      %c0_64 = arith.constant 0 : index
      %c0_65 = arith.constant 0 : index
      %66 = vector.load %arg8[%c9, %c1_63, %c0_64, %c0_65] : memref<10x18x1x8xf32, #tpu.memory_space<vmem>>, vector<1x16x1x8xf32>
      tpu.vector_store %arg8[%c9, %c1_63, %c0_64, %c0_65], %3 {strides = array<i32>} : memref<10x18x1x8xf32, #tpu.memory_space<vmem>>, vector<1x16x1x8xf32>,
    } else {
    }
    %c1_i32_11 = arith.constant 1 : i32
    %13 = arith.cmpi slt, %arg1, %c1_i32_11 : i32
    %14 = arith.extui %13 : i1 to i32
    %c0_i32_12 = arith.constant 0 : i32
    %15 = arith.cmpi ne, %14, %c0_i32_12 : i32
    scf.if %15 {
      %c0_63 = arith.constant 0 : index
      %c0_64 = arith.constant 0 : index
      %c0_65 = arith.constant 0 : index
      %c0_66 = arith.constant 0 : index
      %66 = vector.load %arg6[%c0_63, %c0_64, %c0_65, %c0_66] : memref<1x16x1x8xf32, #tpu.memory_space<vmem>>, vector<1x16x1x8xf32>
      %c9 = arith.constant 9 : index
      %c1_67 = arith.constant 1 : index
      %c0_68 = arith.constant 0 : index
      %c0_69 = arith.constant 0 : index
      %67 = vector.load %arg8[%c9, %c1_67, %c0_68, %c0_69] : memref<10x18x1x8xf32, #tpu.memory_space<vmem>>, vector<1x16x1x8xf32>
      tpu.vector_store %arg8[%c9, %c1_67, %c0_68, %c0_69], %66 {strides = array<i32>} : memref<10x18x1x8xf32, #tpu.memory_space<vmem>>, vector<1x16x1x8xf32>,
    } else {
    }
    %c0_13 = arith.constant 0 : index
    %c0_14 = arith.constant 0 : index
    %c0_15 = arith.constant 0 : index
    %c0_16 = arith.constant 0 : index
    %16 = vector.load %arg4[%c0_13, %c0_14, %c0_15, %c0_16] : memref<8x16x1x8xf32, #tpu.memory_space<vmem>>, vector<8x16x1x8xf32>
    %c1 = arith.constant 1 : index
    %c1_17 = arith.constant 1 : index
    %c0_18 = arith.constant 0 : index
    %c0_19 = arith.constant 0 : index
    %17 = vector.load %arg8[%c1, %c1_17, %c0_18, %c0_19] : memref<10x18x1x8xf32, #tpu.memory_space<vmem>>, vector<8x16x1x8xf32>
    tpu.vector_store %arg8[%c1, %c1_17, %c0_18, %c0_19], %16 {strides = array<i32>} : memref<10x18x1x8xf32, #tpu.memory_space<vmem>>, vector<8x16x1x8xf32>,
    %c0_20 = arith.constant 0 : index
    %18 = memref.load %arg2[%c0_20] : memref<9xf32, #tpu.memory_space<smem>>
    %c0_21 = arith.constant 0 : index
    %c0_22 = arith.constant 0 : index
    %c0_23 = arith.constant 0 : index
    %c0_24 = arith.constant 0 : index
    %19 = vector.load %arg8[%c0_21, %c0_22, %c0_23, %c0_24] : memref<10x18x1x8xf32, #tpu.memory_space<vmem>>, vector<8x16x1x8xf32>
    %20 = vector.broadcast %18 : f32 to vector<8x16x1x8xf32>
    %21 = arith.mulf %20, %19 : vector<8x16x1x8xf32>
    %c0_25 = arith.constant 0 : index
    %22 = memref.load %arg3[%c0_25] : memref<1xf32, #tpu.memory_space<smem>>
    %23 = vector.broadcast %22 : f32 to vector<8x16x1x8xf32>
    %24 = arith.addf %21, %23 : vector<8x16x1x8xf32>
    %c1_26 = arith.constant 1 : index
    %25 = memref.load %arg2[%c1_26] : memref<9xf32, #tpu.memory_space<smem>>
    %c0_27 = arith.constant 0 : index
    %c1_28 = arith.constant 1 : index
    %c0_29 = arith.constant 0 : index
    %c0_30 = arith.constant 0 : index
    %26 = vector.load %arg8[%c0_27, %c1_28, %c0_29, %c0_30] : memref<10x18x1x8xf32, #tpu.memory_space<vmem>>, vector<8x16x1x8xf32>
    %27 = vector.broadcast %25 : f32 to vector<8x16x1x8xf32>
    %28 = arith.mulf %27, %26 : vector<8x16x1x8xf32>
    %29 = arith.addf %24, %28 : vector<8x16x1x8xf32>
    %c2 = arith.constant 2 : index
    %30 = memref.load %arg2[%c2] : memref<9xf32, #tpu.memory_space<smem>>
    %c0_31 = arith.constant 0 : index
    %c2_32 = arith.constant 2 : index
    %c0_33 = arith.constant 0 : index
    %c0_34 = arith.constant 0 : index
    %31 = vector.load %arg8[%c0_31, %c2_32, %c0_33, %c0_34] : memref<10x18x1x8xf32, #tpu.memory_space<vmem>>, vector<8x16x1x8xf32>
    %32 = vector.broadcast %30 : f32 to vector<8x16x1x8xf32>
    %33 = arith.mulf %32, %31 : vector<8x16x1x8xf32>
    %34 = arith.addf %29, %33 : vector<8x16x1x8xf32>
    %c3 = arith.constant 3 : index
    %35 = memref.load %arg2[%c3] : memref<9xf32, #tpu.memory_space<smem>>
    %c1_35 = arith.constant 1 : index
    %c0_36 = arith.constant 0 : index
    %c0_37 = arith.constant 0 : index
    %c0_38 = arith.constant 0 : index
    %36 = vector.load %arg8[%c1_35, %c0_36, %c0_37, %c0_38] : memref<10x18x1x8xf32, #tpu.memory_space<vmem>>, vector<8x16x1x8xf32>
    %37 = vector.broadcast %35 : f32 to vector<8x16x1x8xf32>
    %38 = arith.mulf %37, %36 : vector<8x16x1x8xf32>
    %39 = arith.addf %34, %38 : vector<8x16x1x8xf32>
    %c4 = arith.constant 4 : index
    %40 = memref.load %arg2[%c4] : memref<9xf32, #tpu.memory_space<smem>>
    %c1_39 = arith.constant 1 : index
    %c1_40 = arith.constant 1 : index
    %c0_41 = arith.constant 0 : index
    %c0_42 = arith.constant 0 : index
    %41 = vector.load %arg8[%c1_39, %c1_40, %c0_41, %c0_42] : memref<10x18x1x8xf32, #tpu.memory_space<vmem>>, vector<8x16x1x8xf32>
    %42 = vector.broadcast %40 : f32 to vector<8x16x1x8xf32>
    %43 = arith.mulf %42, %41 : vector<8x16x1x8xf32>
    %44 = arith.addf %39, %43 : vector<8x16x1x8xf32>
    %c5 = arith.constant 5 : index
    %45 = memref.load %arg2[%c5] : memref<9xf32, #tpu.memory_space<smem>>
    %c1_43 = arith.constant 1 : index
    %c2_44 = arith.constant 2 : index
    %c0_45 = arith.constant 0 : index
    %c0_46 = arith.constant 0 : index
    %46 = vector.load %arg8[%c1_43, %c2_44, %c0_45, %c0_46] : memref<10x18x1x8xf32, #tpu.memory_space<vmem>>, vector<8x16x1x8xf32>
    %47 = vector.broadcast %45 : f32 to vector<8x16x1x8xf32>
    %48 = arith.mulf %47, %46 : vector<8x16x1x8xf32>
    %49 = arith.addf %44, %48 : vector<8x16x1x8xf32>
    %c6 = arith.constant 6 : index
    %50 = memref.load %arg2[%c6] : memref<9xf32, #tpu.memory_space<smem>>
    %c2_47 = arith.constant 2 : index
    %c0_48 = arith.constant 0 : index
    %c0_49 = arith.constant 0 : index
    %c0_50 = arith.constant 0 : index
    %51 = vector.load %arg8[%c2_47, %c0_48, %c0_49, %c0_50] : memref<10x18x1x8xf32, #tpu.memory_space<vmem>>, vector<8x16x1x8xf32>
    %52 = vector.broadcast %50 : f32 to vector<8x16x1x8xf32>
    %53 = arith.mulf %52, %51 : vector<8x16x1x8xf32>
    %54 = arith.addf %49, %53 : vector<8x16x1x8xf32>
    %c7 = arith.constant 7 : index
    %55 = memref.load %arg2[%c7] : memref<9xf32, #tpu.memory_space<smem>>
    %c2_51 = arith.constant 2 : index
    %c1_52 = arith.constant 1 : index
    %c0_53 = arith.constant 0 : index
    %c0_54 = arith.constant 0 : index
    %56 = vector.load %arg8[%c2_51, %c1_52, %c0_53, %c0_54] : memref<10x18x1x8xf32, #tpu.memory_space<vmem>>, vector<8x16x1x8xf32>
    %57 = vector.broadcast %55 : f32 to vector<8x16x1x8xf32>
    %58 = arith.mulf %57, %56 : vector<8x16x1x8xf32>
    %59 = arith.addf %54, %58 : vector<8x16x1x8xf32>
    %c8 = arith.constant 8 : index
    %60 = memref.load %arg2[%c8] : memref<9xf32, #tpu.memory_space<smem>>
    %c2_55 = arith.constant 2 : index
    %c2_56 = arith.constant 2 : index
    %c0_57 = arith.constant 0 : index
    %c0_58 = arith.constant 0 : index
    %61 = vector.load %arg8[%c2_55, %c2_56, %c0_57, %c0_58] : memref<10x18x1x8xf32, #tpu.memory_space<vmem>>, vector<8x16x1x8xf32>
    %62 = vector.broadcast %60 : f32 to vector<8x16x1x8xf32>
    %63 = arith.mulf %62, %61 : vector<8x16x1x8xf32>
    %64 = arith.addf %59, %63 : vector<8x16x1x8xf32>
    %c0_59 = arith.constant 0 : index
    %c0_60 = arith.constant 0 : index
    %c0_61 = arith.constant 0 : index
    %c0_62 = arith.constant 0 : index
    %65 = vector.load %arg7[%c0_59, %c0_60, %c0_61, %c0_62] : memref<8x16x1x8xf32, #tpu.memory_space<vmem>>, vector<8x16x1x8xf32>
    tpu.vector_store %arg7[%c0_59, %c0_60, %c0_61, %c0_62], %64 {strides = array<i32>} : memref<8x16x1x8xf32, #tpu.memory_space<vmem>>, vector<8x16x1x8xf32>,
    return
  }
  func.func @transform_0(%arg0: i32, %arg1: i32, %arg2: memref<9xf32, #tpu.memory_space<smem>>, %arg3: memref<1xf32, #tpu.memory_space<smem>>) -> (i32, i32, i32, i32) {
    %c0_i32 = arith.constant 0 : i32
    %c0_i32_0 = arith.constant 0 : i32
    %c0_i32_1 = arith.constant 0 : i32
    return %arg1, %c0_i32, %arg0, %c0_i32_0 : i32, i32, i32, i32
  }
  func.func @transform_1(%arg0: i32, %arg1: i32, %arg2: memref<9xf32, #tpu.memory_space<smem>>, %arg3: memref<1xf32, #tpu.memory_space<smem>>) -> (i32, i32, i32, i32) {
    %c8_i32 = arith.constant 8 : i32
    %0 = arith.muli %arg1, %c8_i32 : i32
    %c1_i32 = arith.constant 1 : i32
    %1 = arith.subi %0, %c1_i32 : i32
    %c0_i32 = arith.constant 0 : i32
    %2 = arith.maxsi %1, %c0_i32 : i32
    %c0_i32_0 = arith.constant 0 : i32
    %c0_i32_1 = arith.constant 0 : i32
    %c0_i32_2 = arith.constant 0 : i32
    return %2, %c0_i32_0, %arg0, %c0_i32_1 : i32, i32, i32, i32
  }
  func.func @transform_2(%arg0: i32, %arg1: i32, %arg2: memref<9xf32, #tpu.memory_space<smem>>, %arg3: memref<1xf32, #tpu.memory_space<smem>>) -> (i32, i32, i32, i32) {
    %c1_i32 = arith.constant 1 : i32
    %0 = arith.addi %arg1, %c1_i32 : i32
    %c8_i32 = arith.constant 8 : i32
    %1 = arith.muli %0, %c8_i32 : i32
    %c15_i32 = arith.constant 15 : i32
    %2 = arith.minsi %1, %c15_i32 : i32
    %c0_i32 = arith.constant 0 : i32
    %c0_i32_0 = arith.constant 0 : i32
    %c0_i32_1 = arith.constant 0 : i32
    return %2, %c0_i32, %arg0, %c0_i32_0 : i32, i32, i32, i32
  }
  func.func @transform_3(%arg0: i32, %arg1: i32, %arg2: memref<9xf32, #tpu.memory_space<smem>>, %arg3: memref<1xf32, #tpu.memory_space<smem>>) -> (i32, i32, i32, i32) {
    %c0_i32 = arith.constant 0 : i32
    %c0_i32_0 = arith.constant 0 : i32
    %c0_i32_1 = arith.constant 0 : i32
    return %arg1, %c0_i32, %arg0, %c0_i32_0 : i32, i32, i32, i32
  }
}

</mosaic_0001>

<bundles_post_ra>
// kernel: tpu_custom_call.1
= control target key start
LH: loop header
LB: loop body
LE: loop exit
PB: predicated region body
PF: predicated region fallthrough
CT: control target
= control target key end

     0   :  { %s6600_s0 = inlined_call_operand.vmem [shape: f32[9], index: 0, kind: input, shape index: {}]   ;;  %s6601_s1 = inlined_call_operand.<no memory space> [shape: f32[1], index: 1, kind: input, shape index: {}]   ;;  %s6602_s2 = inlined_call_operand.vmem [shape: f32[16,16,1,8], index: 2, kind: input, shape index: {}]   ;;  %s6603_s3 = inlined_call_operand.vmem [shape: f32[16,16,1,8], index: 3, kind: input, shape index: {}]   ;;  %s6604_s4 = inlined_call_operand.vmem [shape: f32[16,16,1,8], index: 4, kind: input, shape index: {}]   ;;  %s6605_s5 = inlined_call_operand.vmem [shape: f32[16,16,1,8], index: 5, kind: output, shape index: {}]  }
   0x1   :  { %s10_s20 = sshll.u32 %s6600_s0, 4  ;;  %14 = sst [smem:[#allocation5]] %s6601_s1  ;;  %s11_s20 = int_to_ptr.vmem [resolvable:$true] %s10_s20 }
   0x2   :  { %s4518_s23 = scalar_lea.vmem %s11_s20, 16  ;;  %p4523_p1 = scmp.lt.s32.totalorder %s11_s20, %s11_s20 }
   0x3   :  { %p4519_p0 = scmp.ne.s32.totalorder %s11_s20, %s4518_s23  ;;  %p4524_p2 = scmp.lt.s32.totalorder %s4518_s23, %s4518_s23 }
   0x5   :  { %p4525_p3 = por %p4524_p2, %p4523_p1 }
   0x7   :  { %p4526_p4 = pnand %p4525_p3, %p4519_p0 }
   0x9   :  { %4529 = shalt.err (!%p4526_p4)  }
   0xa   :  { %s4556_s24 = smov [#allocation4]  }
   0xb   :  { %13 = dma.vmem_to_smem %s11_s20, 16, %s4556_s24, [#allocation3] }
   0xc   :  { %4542 = dma.done.wait [#allocation3], 16 }
   0xd   :  { %4543 = vsyncadd [#allocation3], 4294967280 }
   0xe   :  { %16 = sfence }
   0xf   :  { %s4596_s25 = smov 0   ;;  %s4598_s0 = smov 0  }
  0x10   :  { %s4600_s26 = smov 0  }
  0x11 LB: > { %s31_s1 = sadd.s32 1, %s4550_s0  ;;  %p4450_p5 = scmp.ge.s32.totalorder %s4554_s26, 1  ;;  %s4554_s26 = sphi %s4600_s26, %s22_s26   ;;  %s4550_s0 = sphi %s4598_s0, %s6607_s0   ;;  %s4546_s25 = sphi %s4596_s25, %s6606_s25  }
  0x12   : > { %p32_p6 = scmp.ge.s32.totalorder %s31_s1, 2  ;;  %p226_p7 = scmp.lt.s32.totalorder %s4554_s26, 3 }
  0x14   : > { %s6609_s1 = smov (%p32_p6, %s31_s1), 0  ;;  %p227_p8 = pnand %p4450_p5, %p226_p7 }
  0x15   : > { %s4617_s27 = sshll.u32 (!%p227_p8), %s4546_s25, 3  ;;  %vm326_vm0 = vcmask (!%p227_p8), 57344   ;;  %v4557_v0 = vmov (!%p227_p8), 0.0   ;;  %p4468_p13 = scmp.ne.s32.totalorder (!%p227_p8), %s4546_s25, 0 }
  0x16   : > { %230 = sbr.rel (%p227_p8) target bundleno = 757 (0x2f5), region = 32  ;;  %p279_p9 = scmp.lt.s32.totalorder (!%p227_p8), %s4617_s27, 15  ;;  %327 = vst.msk [vmem:[#allocation2] sm:$0x1] (!%p227_p8), %vm326_vm0, %v4557_v0  ;;  %328 = vst.msk [vmem:[#allocation2 + $0x12] sm:$0x1] (!%p227_p8), %vm326_vm0, %v4557_v0 }
  0x17   : > { %s4621_s28 = sadd.s32 (!%p227_p8), 4294967295, %s4617_s27  ;;  %329 = vst.msk [vmem:[#allocation2 + $0x24] sm:$0x1] (!%p227_p8), %vm326_vm0, %v4557_v0  ;;  %330 = vst.msk [vmem:[#allocation2 + $0x36] sm:$0x1] (!%p227_p8), %vm326_vm0, %v4557_v0  ;;  %s4489_s6 = sadd.s32 (!%p227_p8), 8, %s4617_s27 }
  0x18   : > { %331 = vst.msk [vmem:[#allocation2 + $0x48] sm:$0x1] (!%p227_p8), %vm326_vm0, %v4557_v0  ;;  %332 = vst.msk [vmem:[#allocation2 + $0x5a] sm:$0x1] (!%p227_p8), %vm326_vm0, %v4557_v0  ;;  %p289_p10 = scmp.gt.s32.totalorder (!%p227_p8), %s4621_s28, 0  ;;  %p4455_p11 = scmp.lt.s32.totalorder (!%p227_p8), %s4621_s28, 15 }
  0x19   : > { %333 = vst.msk [vmem:[#allocation2 + $0x6c] sm:$0x1] (!%p227_p8), %vm326_vm0, %v4557_v0  ;;  %334 = vst.msk [vmem:[#allocation2 + $0x7e] sm:$0x1] (!%p227_p8), %vm326_vm0, %v4557_v0  ;;  %p304_p12 = scmp.lt.s32.totalorder (!%p227_p8), %s4489_s6, 15 }
  0x1a   : > { %335 = vst.msk [vmem:[#allocation2 + $0x90] sm:$0x1] (!%p227_p8), %vm326_vm0, %v4557_v0  ;;  %336 = vst.msk [vmem:[#allocation2 + $0xa2] sm:$0x1] (!%p227_p8), %vm326_vm0, %v4557_v0 }
  0x1b   : > { %338 = vst.msk [vmem:[#allocation2 + $0x11] sm:$0x1] (!%p227_p8), %vm326_vm0, %v4557_v0  ;;  %339 = vst.msk [vmem:[#allocation2 + $0x23] sm:$0x1] (!%p227_p8), %vm326_vm0, %v4557_v0 }
  0x1c   : > { %340 = vst.msk [vmem:[#allocation2 + $0x35] sm:$0x1] (!%p227_p8), %vm326_vm0, %v4557_v0  ;;  %341 = vst.msk [vmem:[#allocation2 + $0x47] sm:$0x1] (!%p227_p8), %vm326_vm0, %v4557_v0 }
  0x1d   : > { %342 = vst.msk [vmem:[#allocation2 + $0x59] sm:$0x1] %vm326_vm0, %v4557_v0  ;;  %343 = vst.msk [vmem:[#allocation2 + $0x6b] sm:$0x1] %vm326_vm0, %v4557_v0  ;;  %s280_s29 = scalar_select %p279_p9, %s4617_s27, 15 }
  0x1e   : > { %344 = vst.msk [vmem:[#allocation2 + $0x7d] sm:$0x1] %vm326_vm0, %v4557_v0  ;;  %345 = vst.msk [vmem:[#allocation2 + $0x8f] sm:$0x1] %vm326_vm0, %v4557_v0  ;;  %s6611_s28 = smov (!%p289_p10, %s4621_s28), 0  ;;  %s6615_s6 = smov (!%p304_p12, %s4489_s6), 15 }
  0x1f   : > { %346 = vst.msk [vmem:[#allocation2 + $0xa1] sm:$0x1] %vm326_vm0, %v4557_v0  ;;  %347 = vst.msk [vmem:[#allocation2 + $0xb3] sm:$0x1] %vm326_vm0, %v4557_v0  ;;  %s4452_s30 = sshll.u32 %s280_s29, 4  ;;  %s6613_s28 = smov (!%p4455_p11, %s6611_s28), 15 }
  0x20   : > { %s4653_s9 = scalar_lea.vmem %s6602_s2, %s4452_s30  ;;  %s4460_s10 = sshll.u32 %s6613_s28, 4  ;;  %v4558_v1 = vmov (!%p4468_p13), 0.0  }
  0x21   : > { %s4658_s13 = scalar_lea.vmem %s6605_s5, %s4452_s30  ;;  %s4663_s16 = scalar_lea.vmem %s6603_s3, %s4460_s10  ;;  %353 = vst.msk [vmem:[#allocation2 + $0x1] sm:$0x1] (!%p4468_p13), %vm326_vm0, %v4558_v1  ;;  %354 = vst.msk [vmem:[#allocation2 + $0x2] sm:$0x1] (!%p4468_p13), %vm326_vm0, %v4558_v1 }
  0x22   : > { %s6617_s6 = smov (!%p304_p12, %s6615_s6), 15  ;;  %351 = sbr.rel (%p4468_p13) target bundleno = 42 (0x2a), region = 36 }
  0x23   : > { %s4465_s17 = sshll.u32 %s6617_s6, 4  ;;  %355 = vst.msk [vmem:[#allocation2 + $0x3] sm:$0x1] (!%p4468_p13), %vm326_vm0, %v4558_v1  ;;  %356 = vst.msk [vmem:[#allocation2 + $0x4] sm:$0x1] (!%p4468_p13), %vm326_vm0, %v4558_v1 }
  0x24   : > { %s4668_s20 = scalar_lea.vmem %s6604_s4, %s4465_s17  ;;  %357 = vst.msk [vmem:[#allocation2 + $0x5] sm:$0x1] (!%p4468_p13), %vm326_vm0, %v4558_v1  ;;  %358 = vst.msk [vmem:[#allocation2 + $0x6] sm:$0x1] (!%p4468_p13), %vm326_vm0, %v4558_v1 }
  0x25   : > { %359 = vst.msk [vmem:[#allocation2 + $0x7] sm:$0x1] (!%p4468_p13), %vm326_vm0, %v4558_v1  ;;  %360 = vst.msk [vmem:[#allocation2 + $0x8] sm:$0x1] (!%p4468_p13), %vm326_vm0, %v4558_v1 }
  0x26   : > { %361 = vst.msk [vmem:[#allocation2 + $0x9] sm:$0x1] (!%p4468_p13), %vm326_vm0, %v4558_v1  ;;  %362 = vst.msk [vmem:[#allocation2 + $0xa] sm:$0x1] (!%p4468_p13), %vm326_vm0, %v4558_v1 }
  0x27   : > { %363 = vst.msk [vmem:[#allocation2 + $0xb] sm:$0x1] (!%p4468_p13), %vm326_vm0, %v4558_v1  ;;  %364 = vst.msk [vmem:[#allocation2 + $0xc] sm:$0x1] (!%p4468_p13), %vm326_vm0, %v4558_v1 }
  0x28   : > { %365 = vst.msk [vmem:[#allocation2 + $0xd] sm:$0x1] (!%p4468_p13), %vm326_vm0, %v4558_v1  ;;  %366 = vst.msk [vmem:[#allocation2 + $0xe] sm:$0x1] (!%p4468_p13), %vm326_vm0, %v4558_v1 }
  0x29   : > { %367 = vst.msk [vmem:[#allocation2 + $0xf] sm:$0x1] %vm326_vm0, %v4558_v1  ;;  %368 = vst.msk [vmem:[#allocation2 + $0x10] sm:$0x1] %vm326_vm0, %v4558_v1 }
  0x2a PF: > { %p4469_p0 = scmp.le.s32.totalorder %s4546_s25, 0 }
  0x2b   : > { %v373_v2 = vld [vmem:[%s4663_s16] sm:$0x1] (!%p4469_p0)  ;;  %v374_v3 = vld [vmem:[%s4663_s16 + $0x1] sm:$0x1] (!%p4469_p0)  ;;  %v375_v4 = vld [vmem:[%s4663_s16 + $0x2] sm:$0x1] (!%p4469_p0) }
  0x2c   : > { %372 = sbr.rel (%p4469_p0) target bundleno = 55 (0x37), region = 40  ;;  %390 = vst.msk [vmem:[#allocation2 + $0x1] sm:$0x1] (!%p4469_p0), %vm326_vm0, %v373_v2  ;;  %391 = vst.msk [vmem:[#allocation2 + $0x2] sm:$0x1] (!%p4469_p0), %vm326_vm0, %v374_v3 }
  0x2d   : > { %392 = vst.msk [vmem:[#allocation2 + $0x3] sm:$0x1] (!%p4469_p0), %vm326_vm0, %v375_v4  ;;  %v376_v5 = vld [vmem:[%s4663_s16 + $0x3] sm:$0x1] (!%p4469_p0)  ;;  %v377_v6 = vld [vmem:[%s4663_s16 + $0x4] sm:$0x1] (!%p4469_p0) }
  0x2e   : > { %v378_v7 = vld [vmem:[%s4663_s16 + $0x5] sm:$0x1] (!%p4469_p0)  ;;  %393 = vst.msk [vmem:[#allocation2 + $0x4] sm:$0x1] (!%p4469_p0), %vm326_vm0, %v376_v5  ;;  %394 = vst.msk [vmem:[#allocation2 + $0x5] sm:$0x1] (!%p4469_p0), %vm326_vm0, %v377_v6 }
  0x2f   : > { %395 = vst.msk [vmem:[#allocation2 + $0x6] sm:$0x1] (!%p4469_p0), %vm326_vm0, %v378_v7  ;;  %v379_v8 = vld [vmem:[%s4663_s16 + $0x6] sm:$0x1] (!%p4469_p0)  ;;  %v380_v9 = vld [vmem:[%s4663_s16 + $0x7] sm:$0x1] (!%p4469_p0) }
  0x30   : > { %v381_v10 = vld [vmem:[%s4663_s16 + $0x8] sm:$0x1] (!%p4469_p0)  ;;  %396 = vst.msk [vmem:[#allocation2 + $0x7] sm:$0x1] (!%p4469_p0), %vm326_vm0, %v379_v8  ;;  %397 = vst.msk [vmem:[#allocation2 + $0x8] sm:$0x1] (!%p4469_p0), %vm326_vm0, %v380_v9 }
  0x31   : > { %398 = vst.msk [vmem:[#allocation2 + $0x9] sm:$0x1] (!%p4469_p0), %vm326_vm0, %v381_v10  ;;  %v382_v11 = vld [vmem:[%s4663_s16 + $0x9] sm:$0x1] (!%p4469_p0)  ;;  %v383_v12 = vld [vmem:[%s4663_s16 + $0xa] sm:$0x1] (!%p4469_p0) }
  0x32   : > { %v384_v13 = vld [vmem:[%s4663_s16 + $0xb] sm:$0x1] (!%p4469_p0)  ;;  %399 = vst.msk [vmem:[#allocation2 + $0xa] sm:$0x1] (!%p4469_p0), %vm326_vm0, %v382_v11  ;;  %400 = vst.msk [vmem:[#allocation2 + $0xb] sm:$0x1] (!%p4469_p0), %vm326_vm0, %v383_v12 }
  0x33   : > { %401 = vst.msk [vmem:[#allocation2 + $0xc] sm:$0x1] %vm326_vm0, %v384_v13  ;;  %v385_v14 = vld [vmem:[%s4663_s16 + $0xc] sm:$0x1]  ;;  %v386_v15 = vld [vmem:[%s4663_s16 + $0xd] sm:$0x1] }
  0x34   : > { %v387_v16 = vld [vmem:[%s4663_s16 + $0xe] sm:$0x1]  ;;  %402 = vst.msk [vmem:[#allocation2 + $0xd] sm:$0x1] %vm326_vm0, %v385_v14  ;;  %403 = vst.msk [vmem:[#allocation2 + $0xe] sm:$0x1] %vm326_vm0, %v386_v15 }
  0x35   : > { %404 = vst.msk [vmem:[#allocation2 + $0xf] sm:$0x1] %vm326_vm0, %v387_v16  ;;  %v388_v17 = vld [vmem:[%s4663_s16 + $0xf] sm:$0x1] }
  0x36   : > { %405 = vst.msk [vmem:[#allocation2 + $0x10] sm:$0x1] %vm326_vm0, %v388_v17 }
  0x37 PF: > { %p4470_p1 = scmp.ne.s32.totalorder %s4546_s25, 1 }
  0x38   : > { %v4559_v18 = vmov (!%p4470_p1), 0.0  }
  0x39   : > { %409 = sbr.rel (%p4470_p1) target bundleno = 65 (0x41), region = 44  ;;  %411 = vst.msk [vmem:[#allocation2 + $0xa3] sm:$0x1] (!%p4470_p1), %vm326_vm0, %v4559_v18  ;;  %412 = vst.msk [vmem:[#allocation2 + $0xa4] sm:$0x1] (!%p4470_p1), %vm326_vm0, %v4559_v18 }
  0x3a   : > { %413 = vst.msk [vmem:[#allocation2 + $0xa5] sm:$0x1] (!%p4470_p1), %vm326_vm0, %v4559_v18  ;;  %414 = vst.msk [vmem:[#allocation2 + $0xa6] sm:$0x1] (!%p4470_p1), %vm326_vm0, %v4559_v18 }
  0x3b   : > { %415 = vst.msk [vmem:[#allocation2 + $0xa7] sm:$0x1] (!%p4470_p1), %vm326_vm0, %v4559_v18  ;;  %416 = vst.msk [vmem:[#allocation2 + $0xa8] sm:$0x1] (!%p4470_p1), %vm326_vm0, %v4559_v18 }
  0x3c   : > { %417 = vst.msk [vmem:[#allocation2 + $0xa9] sm:$0x1] (!%p4470_p1), %vm326_vm0, %v4559_v18  ;;  %418 = vst.msk [vmem:[#allocation2 + $0xaa] sm:$0x1] (!%p4470_p1), %vm326_vm0, %v4559_v18 }
  0x3d   : > { %419 = vst.msk [vmem:[#allocation2 + $0xab] sm:$0x1] (!%p4470_p1), %vm326_vm0, %v4559_v18  ;;  %420 = vst.msk [vmem:[#allocation2 + $0xac] sm:$0x1] (!%p4470_p1), %vm326_vm0, %v4559_v18 }
  0x3e   : > { %421 = vst.msk [vmem:[#allocation2 + $0xad] sm:$0x1] (!%p4470_p1), %vm326_vm0, %v4559_v18  ;;  %422 = vst.msk [vmem:[#allocation2 + $0xae] sm:$0x1] (!%p4470_p1), %vm326_vm0, %v4559_v18 }
  0x3f   : > { %423 = vst.msk [vmem:[#allocation2 + $0xaf] sm:$0x1] (!%p4470_p1), %vm326_vm0, %v4559_v18  ;;  %424 = vst.msk [vmem:[#allocation2 + $0xb0] sm:$0x1] (!%p4470_p1), %vm326_vm0, %v4559_v18 }
  0x40   : > { %425 = vst.msk [vmem:[#allocation2 + $0xb1] sm:$0x1] %vm326_vm0, %v4559_v18  ;;  %426 = vst.msk [vmem:[#allocation2 + $0xb2] sm:$0x1] %vm326_vm0, %v4559_v18 }
  0x41 PF: > { %p4471_p2 = scmp.ge.s32.totalorder %s4546_s25, 1 }
  0x42   : > { %v431_v19 = vld [vmem:[%s4668_s20] sm:$0x1] (!%p4471_p2)  ;;  %v432_v20 = vld [vmem:[%s4668_s20 + $0x1] sm:$0x1] (!%p4471_p2)  ;;  %v433_v21 = vld [vmem:[%s4668_s20 + $0x2] sm:$0x1] (!%p4471_p2) }
  0x43   : > { %430 = sbr.rel (%p4471_p2) target bundleno = 78 (0x4e), region = 48  ;;  %448 = vst.msk [vmem:[#allocation2 + $0xa3] sm:$0x1] (!%p4471_p2), %vm326_vm0, %v431_v19  ;;  %449 = vst.msk [vmem:[#allocation2 + $0xa4] sm:$0x1] (!%p4471_p2), %vm326_vm0, %v432_v20 }
  0x44   : > { %450 = vst.msk [vmem:[#allocation2 + $0xa5] sm:$0x1] (!%p4471_p2), %vm326_vm0, %v433_v21  ;;  %v434_v22 = vld [vmem:[%s4668_s20 + $0x3] sm:$0x1] (!%p4471_p2)  ;;  %v435_v23 = vld [vmem:[%s4668_s20 + $0x4] sm:$0x1] (!%p4471_p2) }
  0x45   : > { %v436_v24 = vld [vmem:[%s4668_s20 + $0x5] sm:$0x1] (!%p4471_p2)  ;;  %451 = vst.msk [vmem:[#allocation2 + $0xa6] sm:$0x1] (!%p4471_p2), %vm326_vm0, %v434_v22  ;;  %452 = vst.msk [vmem:[#allocation2 + $0xa7] sm:$0x1] (!%p4471_p2), %vm326_vm0, %v435_v23 }
  0x46   : > { %453 = vst.msk [vmem:[#allocation2 + $0xa8] sm:$0x1] (!%p4471_p2), %vm326_vm0, %v436_v24  ;;  %v437_v25 = vld [vmem:[%s4668_s20 + $0x6] sm:$0x1] (!%p4471_p2)  ;;  %v438_v26 = vld [vmem:[%s4668_s20 + $0x7] sm:$0x1] (!%p4471_p2) }
  0x47   : > { %v439_v27 = vld [vmem:[%s4668_s20 + $0x8] sm:$0x1] (!%p4471_p2)  ;;  %454 = vst.msk [vmem:[#allocation2 + $0xa9] sm:$0x1] (!%p4471_p2), %vm326_vm0, %v437_v25  ;;  %455 = vst.msk [vmem:[#allocation2 + $0xaa] sm:$0x1] (!%p4471_p2), %vm326_vm0, %v438_v26 }
  0x48   : > { %456 = vst.msk [vmem:[#allocation2 + $0xab] sm:$0x1] (!%p4471_p2), %vm326_vm0, %v439_v27  ;;  %v440_v28 = vld [vmem:[%s4668_s20 + $0x9] sm:$0x1] (!%p4471_p2)  ;;  %v441_v29 = vld [vmem:[%s4668_s20 + $0xa] sm:$0x1] (!%p4471_p2) }
  0x49   : > { %v442_v30 = vld [vmem:[%s4668_s20 + $0xb] sm:$0x1] (!%p4471_p2)  ;;  %457 = vst.msk [vmem:[#allocation2 + $0xac] sm:$0x1] (!%p4471_p2), %vm326_vm0, %v440_v28  ;;  %458 = vst.msk [vmem:[#allocation2 + $0xad] sm:$0x1] (!%p4471_p2), %vm326_vm0, %v441_v29 }
  0x4a   : > { %459 = vst.msk [vmem:[#allocation2 + $0xae] sm:$0x1] %vm326_vm0, %v442_v30  ;;  %v443_v31 = vld [vmem:[%s4668_s20 + $0xc] sm:$0x1]  ;;  %v444_v32 = vld [vmem:[%s4668_s20 + $0xd] sm:$0x1] }
  0x4b   : > { %v445_v33 = vld [vmem:[%s4668_s20 + $0xe] sm:$0x1]  ;;  %460 = vst.msk [vmem:[#allocation2 + $0xaf] sm:$0x1] %vm326_vm0, %v443_v31  ;;  %461 = vst.msk [vmem:[#allocation2 + $0xb0] sm:$0x1] %vm326_vm0, %v444_v32 }
  0x4c   : > { %462 = vst.msk [vmem:[#allocation2 + $0xb1] sm:$0x1] %vm326_vm0, %v445_v33  ;;  %v446_v34 = vld [vmem:[%s4668_s20 + $0xf] sm:$0x1] }
  0x4d   : > { %463 = vst.msk [vmem:[#allocation2 + $0xb2] sm:$0x1] %vm326_vm0, %v446_v34 }
  0x4e PF: > { %v464_v35 = vld [vmem:[%s4653_s9] sm:$0x1]  ;;  %v465_v36 = vld [vmem:[%s4653_s9 + $0x1] sm:$0x1]  ;;  %v466_v37 = vld [vmem:[%s4653_s9 + $0x2] sm:$0x1] }
  0x4f   : > { %593 = vst.msk [vmem:[#allocation2 + $0x13] sm:$0x1] %vm326_vm0, %v464_v35  ;;  %594 = vst.msk [vmem:[#allocation2 + $0x14] sm:$0x1] %vm326_vm0, %v465_v36  ;;  %v467_v38 = vld [vmem:[%s4653_s9 + $0x3] sm:$0x1] }
  0x50   : > { %595 = vst.msk [vmem:[#allocation2 + $0x15] sm:$0x1] %vm326_vm0, %v466_v37  ;;  %v468_v39 = vld [vmem:[%s4653_s9 + $0x4] sm:$0x1]  ;;  %v469_v40 = vld [vmem:[%s4653_s9 + $0x5] sm:$0x1] }
  0x51   : > { %596 = vst.msk [vmem:[#allocation2 + $0x16] sm:$0x1] %vm326_vm0, %v467_v38  ;;  %597 = vst.msk [vmem:[#allocation2 + $0x17] sm:$0x1] %vm326_vm0, %v468_v39  ;;  %v470_v41 = vld [vmem:[%s4653_s9 + $0x6] sm:$0x1] }
  0x52   : > { %598 = vst.msk [vmem:[#allocation2 + $0x18] sm:$0x1] %vm326_vm0, %v469_v40  ;;  %v471_v42 = vld [vmem:[%s4653_s9 + $0x7] sm:$0x1]  ;;  %v472_v43 = vld [vmem:[%s4653_s9 + $0x8] sm:$0x1] }
  0x53   : > { %599 = vst.msk [vmem:[#allocation2 + $0x19] sm:$0x1] %vm326_vm0, %v470_v41  ;;  %600 = vst.msk [vmem:[#allocation2 + $0x1a] sm:$0x1] %vm326_vm0, %v471_v42  ;;  %v473_v44 = vld [vmem:[%s4653_s9 + $0x9] sm:$0x1] }
  0x54   : > { %601 = vst.msk [vmem:[#allocation2 + $0x1b] sm:$0x1] %vm326_vm0, %v472_v43  ;;  %v474_v45 = vld [vmem:[%s4653_s9 + $0xa] sm:$0x1]  ;;  %v475_v46 = vld [vmem:[%s4653_s9 + $0xb] sm:$0x1] }
  0x55   : > { %602 = vst.msk [vmem:[#allocation2 + $0x1c] sm:$0x1] %vm326_vm0, %v473_v44  ;;  %603 = vst.msk [vmem:[#allocation2 + $0x1d] sm:$0x1] %vm326_vm0, %v474_v45  ;;  %v476_v47 = vld [vmem:[%s4653_s9 + $0xc] sm:$0x1] }
  0x56   : > { %604 = vst.msk [vmem:[#allocation2 + $0x1e] sm:$0x1] %vm326_vm0, %v475_v46  ;;  %v477_v48 = vld [vmem:[%s4653_s9 + $0xd] sm:$0x1]  ;;  %v478_v49 = vld [vmem:[%s4653_s9 + $0xe] sm:$0x1] }
  0x57   : > { %605 = vst.msk [vmem:[#allocation2 + $0x1f] sm:$0x1] %vm326_vm0, %v476_v47  ;;  %606 = vst.msk [vmem:[#allocation2 + $0x20] sm:$0x1] %vm326_vm0, %v477_v48  ;;  %v480_v50 = vld [vmem:[%s4653_s9 + $0x10] sm:$0x1] }
  0x58   : > { %607 = vst.msk [vmem:[#allocation2 + $0x21] sm:$0x1] %vm326_vm0, %v478_v49  ;;  %v481_v51 = vld [vmem:[%s4653_s9 + $0x11] sm:$0x1]  ;;  %v482_v52 = vld [vmem:[%s4653_s9 + $0x12] sm:$0x1] }
  0x59   : > { %609 = vst.msk [vmem:[#allocation2 + $0x25] sm:$0x1] %vm326_vm0, %v480_v50  ;;  %610 = vst.msk [vmem:[#allocation2 + $0x26] sm:$0x1] %vm326_vm0, %v481_v51  ;;  %v483_v53 = vld [vmem:[%s4653_s9 + $0x13] sm:$0x1] }
  0x5a   : > { %611 = vst.msk [vmem:[#allocation2 + $0x27] sm:$0x1] %vm326_vm0, %v482_v52  ;;  %v484_v54 = vld [vmem:[%s4653_s9 + $0x14] sm:$0x1]  ;;  %v485_v55 = vld [vmem:[%s4653_s9 + $0x15] sm:$0x1] }
  0x5b   : > { %612 = vst.msk [vmem:[#allocation2 + $0x28] sm:$0x1] %vm326_vm0, %v483_v53  ;;  %613 = vst.msk [vmem:[#allocation2 + $0x29] sm:$0x1] %vm326_vm0, %v484_v54  ;;  %v486_v56 = vld [vmem:[%s4653_s9 + $0x16] sm:$0x1] }
  0x5c   : > { %614 = vst.msk [vmem:[#allocation2 + $0x2a] sm:$0x1] %vm326_vm0, %v485_v55  ;;  %v487_v57 = vld [vmem:[%s4653_s9 + $0x17] sm:$0x1]  ;;  %v488_v58 = vld [vmem:[%s4653_s9 + $0x18] sm:$0x1] }
  0x5d   : > { %615 = vst.msk [vmem:[#allocation2 + $0x2b] sm:$0x1] %vm326_vm0, %v486_v56  ;;  %616 = vst.msk [vmem:[#allocation2 + $0x2c] sm:$0x1] %vm326_vm0, %v487_v57  ;;  %v489_v59 = vld [vmem:[%s4653_s9 + $0x19] sm:$0x1] }
  0x5e   : > { %617 = vst.msk [vmem:[#allocation2 + $0x2d] sm:$0x1] %vm326_vm0, %v488_v58  ;;  %v490_v60 = vld [vmem:[%s4653_s9 + $0x1a] sm:$0x1]  ;;  %v491_v61 = vld [vmem:[%s4653_s9 + $0x1b] sm:$0x1] }
  0x5f   : > { %618 = vst.msk [vmem:[#allocation2 + $0x2e] sm:$0x1] %vm326_vm0, %v489_v59  ;;  %619 = vst.msk [vmem:[#allocation2 + $0x2f] sm:$0x1] %vm326_vm0, %v490_v60  ;;  %v492_v62 = vld [vmem:[%s4653_s9 + $0x1c] sm:$0x1] }
  0x60   : > { %620 = vst.msk [vmem:[#allocation2 + $0x30] sm:$0x1] %vm326_vm0, %v491_v61  ;;  %v493_v63 = vld [vmem:[%s4653_s9 + $0x1d] sm:$0x1]  ;;  %v494_v0 = vld [vmem:[%s4653_s9 + $0x1e] sm:$0x1] }
  0x61   : > { %621 = vst.msk [vmem:[#allocation2 + $0x31] sm:$0x1] %vm326_vm0, %v492_v62  ;;  %622 = vst.msk [vmem:[#allocation2 + $0x32] sm:$0x1] %vm326_vm0, %v493_v63  ;;  %v496_v1 = vld [vmem:[%s4653_s9 + $0x20] sm:$0x1] }
  0x62   : > { %623 = vst.msk [vmem:[#allocation2 + $0x33] sm:$0x1] %vm326_vm0, %v494_v0  ;;  %v497_v2 = vld [vmem:[%s4653_s9 + $0x21] sm:$0x1]  ;;  %v498_v3 = vld [vmem:[%s4653_s9 + $0x22] sm:$0x1] }
  0x63   : > { %625 = vst.msk [vmem:[#allocation2 + $0x37] sm:$0x1] %vm326_vm0, %v496_v1  ;;  %626 = vst.msk [vmem:[#allocation2 + $0x38] sm:$0x1] %vm326_vm0, %v497_v2  ;;  %v499_v4 = vld [vmem:[%s4653_s9 + $0x23] sm:$0x1] }
  0x64   : > { %627 = vst.msk [vmem:[#allocation2 + $0x39] sm:$0x1] %vm326_vm0, %v498_v3  ;;  %v500_v5 = vld [vmem:[%s4653_s9 + $0x24] sm:$0x1]  ;;  %v501_v6 = vld [vmem:[%s4653_s9 + $0x25] sm:$0x1] }
  0x65   : > { %628 = vst.msk [vmem:[#allocation2 + $0x3a] sm:$0x1] %vm326_vm0, %v499_v4  ;;  %629 = vst.msk [vmem:[#allocation2 + $0x3b] sm:$0x1] %vm326_vm0, %v500_v5  ;;  %v502_v7 = vld [vmem:[%s4653_s9 + $0x26] sm:$0x1] }
  0x66   : > { %630 = vst.msk [vmem:[#allocation2 + $0x3c] sm:$0x1] %vm326_vm0, %v501_v6  ;;  %v503_v8 = vld [vmem:[%s4653_s9 + $0x27] sm:$0x1]  ;;  %v504_v9 = vld [vmem:[%s4653_s9 + $0x28] sm:$0x1] }
  0x67   : > { %631 = vst.msk [vmem:[#allocation2 + $0x3d] sm:$0x1] %vm326_vm0, %v502_v7  ;;  %632 = vst.msk [vmem:[#allocation2 + $0x3e] sm:$0x1] %vm326_vm0, %v503_v8  ;;  %v505_v10 = vld [vmem:[%s4653_s9 + $0x29] sm:$0x1] }
  0x68   : > { %633 = vst.msk [vmem:[#allocation2 + $0x3f] sm:$0x1] %vm326_vm0, %v504_v9  ;;  %v506_v11 = vld [vmem:[%s4653_s9 + $0x2a] sm:$0x1]  ;;  %v507_v12 = vld [vmem:[%s4653_s9 + $0x2b] sm:$0x1] }
  0x69   : > { %634 = vst.msk [vmem:[#allocation2 + $0x40] sm:$0x1] %vm326_vm0, %v505_v10  ;;  %635 = vst.msk [vmem:[#allocation2 + $0x41] sm:$0x1] %vm326_vm0, %v506_v11  ;;  %v508_v13 = vld [vmem:[%s4653_s9 + $0x2c] sm:$0x1] }
  0x6a   : > { %636 = vst.msk [vmem:[#allocation2 + $0x42] sm:$0x1] %vm326_vm0, %v507_v12  ;;  %v509_v14 = vld [vmem:[%s4653_s9 + $0x2d] sm:$0x1]  ;;  %v510_v15 = vld [vmem:[%s4653_s9 + $0x2e] sm:$0x1] }
  0x6b   : > { %637 = vst.msk [vmem:[#allocation2 + $0x43] sm:$0x1] %vm326_vm0, %v508_v13  ;;  %638 = vst.msk [vmem:[#allocation2 + $0x44] sm:$0x1] %vm326_vm0, %v509_v14  ;;  %v512_v16 = vld [vmem:[%s4653_s9 + $0x30] sm:$0x1] }
  0x6c   : > { %639 = vst.msk [vmem:[#allocation2 + $0x45] sm:$0x1] %vm326_vm0, %v510_v15  ;;  %v513_v17 = vld [vmem:[%s4653_s9 + $0x31] sm:$0x1]  ;;  %v514_v18 = vld [vmem:[%s4653_s9 + $0x32] sm:$0x1] }
  0x6d   : > { %641 = vst.msk [vmem:[#allocation2 + $0x49] sm:$0x1] %vm326_vm0, %v512_v16  ;;  %642 = vst.msk [vmem:[#allocation2 + $0x4a] sm:$0x1] %vm326_vm0, %v513_v17  ;;  %v515_v19 = vld [vmem:[%s4653_s9 + $0x33] sm:$0x1] }
  0x6e   : > { %643 = vst.msk [vmem:[#allocation2 + $0x4b] sm:$0x1] %vm326_vm0, %v514_v18  ;;  %v516_v20 = vld [vmem:[%s4653_s9 + $0x34] sm:$0x1]  ;;  %v517_v21 = vld [vmem:[%s4653_s9 + $0x35] sm:$0x1] }
  0x6f   : > { %644 = vst.msk [vmem:[#allocation2 + $0x4c] sm:$0x1] %vm326_vm0, %v515_v19  ;;  %645 = vst.msk [vmem:[#allocation2 + $0x4d] sm:$0x1] %vm326_vm0, %v516_v20  ;;  %v518_v22 = vld [vmem:[%s4653_s9 + $0x36] sm:$0x1] }
  0x70   : > { %646 = vst.msk [vmem:[#allocation2 + $0x4e] sm:$0x1] %vm326_vm0, %v517_v21  ;;  %v519_v23 = vld [vmem:[%s4653_s9 + $0x37] sm:$0x1]  ;;  %v520_v24 = vld [vmem:[%s4653_s9 + $0x38] sm:$0x1] }
  0x71   : > { %647 = vst.msk [vmem:[#allocation2 + $0x4f] sm:$0x1] %vm326_vm0, %v518_v22  ;;  %648 = vst.msk [vmem:[#allocation2 + $0x50] sm:$0x1] %vm326_vm0, %v519_v23  ;;  %v521_v25 = vld [vmem:[%s4653_s9 + $0x39] sm:$0x1] }
  0x72   : > { %649 = vst.msk [vmem:[#allocation2 + $0x51] sm:$0x1] %vm326_vm0, %v520_v24  ;;  %v522_v26 = vld [vmem:[%s4653_s9 + $0x3a] sm:$0x1]  ;;  %v523_v27 = vld [vmem:[%s4653_s9 + $0x3b] sm:$0x1] }
  0x73   : > { %650 = vst.msk [vmem:[#allocation2 + $0x52] sm:$0x1] %vm326_vm0, %v521_v25  ;;  %651 = vst.msk [vmem:[#allocation2 + $0x53] sm:$0x1] %vm326_vm0, %v522_v26  ;;  %v524_v28 = vld [vmem:[%s4653_s9 + $0x3c] sm:$0x1] }
  0x74   : > { %652 = vst.msk [vmem:[#allocation2 + $0x54] sm:$0x1] %vm326_vm0, %v523_v27  ;;  %v525_v29 = vld [vmem:[%s4653_s9 + $0x3d] sm:$0x1]  ;;  %v526_v30 = vld [vmem:[%s4653_s9 + $0x3e] sm:$0x1] }
  0x75   : > { %653 = vst.msk [vmem:[#allocation2 + $0x55] sm:$0x1] %vm326_vm0, %v524_v28  ;;  %654 = vst.msk [vmem:[#allocation2 + $0x56] sm:$0x1] %vm326_vm0, %v525_v29  ;;  %v528_v31 = vld [vmem:[%s4653_s9 + $0x40] sm:$0x1] }
  0x76   : > { %655 = vst.msk [vmem:[#allocation2 + $0x57] sm:$0x1] %vm326_vm0, %v526_v30  ;;  %v529_v32 = vld [vmem:[%s4653_s9 + $0x41] sm:$0x1]  ;;  %v530_v33 = vld [vmem:[%s4653_s9 + $0x42] sm:$0x1] }
  0x77   : > { %657 = vst.msk [vmem:[#allocation2 + $0x5b] sm:$0x1] %vm326_vm0, %v528_v31  ;;  %658 = vst.msk [vmem:[#allocation2 + $0x5c] sm:$0x1] %vm326_vm0, %v529_v32  ;;  %v531_v34 = vld [vmem:[%s4653_s9 + $0x43] sm:$0x1] }
  0x78   : > { %659 = vst.msk [vmem:[#allocation2 + $0x5d] sm:$0x1] %vm326_vm0, %v530_v33  ;;  %v532_v35 = vld [vmem:[%s4653_s9 + $0x44] sm:$0x1]  ;;  %v533_v36 = vld [vmem:[%s4653_s9 + $0x45] sm:$0x1] }
  0x79   : > { %660 = vst.msk [vmem:[#allocation2 + $0x5e] sm:$0x1] %vm326_vm0, %v531_v34  ;;  %661 = vst.msk [vmem:[#allocation2 + $0x5f] sm:$0x1] %vm326_vm0, %v532_v35  ;;  %v534_v37 = vld [vmem:[%s4653_s9 + $0x46] sm:$0x1] }
  0x7a   : > { %662 = vst.msk [vmem:[#allocation2 + $0x60] sm:$0x1] %vm326_vm0, %v533_v36  ;;  %v535_v38 = vld [vmem:[%s4653_s9 + $0x47] sm:$0x1]  ;;  %v536_v39 = vld [vmem:[%s4653_s9 + $0x48] sm:$0x1] }
  0x7b   : > { %663 = vst.msk [vmem:[#allocation2 + $0x61] sm:$0x1] %vm326_vm0, %v534_v37  ;;  %664 = vst.msk [vmem:[#allocation2 + $0x62] sm:$0x1] %vm326_vm0, %v535_v38  ;;  %v537_v40 = vld [vmem:[%s4653_s9 + $0x49] sm:$0x1] }
  0x7c   : > { %665 = vst.msk [vmem:[#allocation2 + $0x63] sm:$0x1] %vm326_vm0, %v536_v39  ;;  %v538_v41 = vld [vmem:[%s4653_s9 + $0x4a] sm:$0x1]  ;;  %v539_v42 = vld [vmem:[%s4653_s9 + $0x4b] sm:$0x1] }
  0x7d   : > { %666 = vst.msk [vmem:[#allocation2 + $0x64] sm:$0x1] %vm326_vm0, %v537_v40  ;;  %667 = vst.msk [vmem:[#allocation2 + $0x65] sm:$0x1] %vm326_vm0, %v538_v41  ;;  %v540_v43 = vld [vmem:[%s4653_s9 + $0x4c] sm:$0x1] }
  0x7e   : > { %668 = vst.msk [vmem:[#allocation2 + $0x66] sm:$0x1] %vm326_vm0, %v539_v42  ;;  %v541_v44 = vld [vmem:[%s4653_s9 + $0x4d] sm:$0x1]  ;;  %v542_v45 = vld [vmem:[%s4653_s9 + $0x4e] sm:$0x1] }
  0x7f   : > { %669 = vst.msk [vmem:[#allocation2 + $0x67] sm:$0x1] %vm326_vm0, %v540_v43  ;;  %670 = vst.msk [vmem:[#allocation2 + $0x68] sm:$0x1] %vm326_vm0, %v541_v44  ;;  %v544_v46 = vld [vmem:[%s4653_s9 + $0x50] sm:$0x1] }
  0x80   : > { %671 = vst.msk [vmem:[#allocation2 + $0x69] sm:$0x1] %vm326_vm0, %v542_v45  ;;  %v545_v47 = vld [vmem:[%s4653_s9 + $0x51] sm:$0x1]  ;;  %v546_v48 = vld [vmem:[%s4653_s9 + $0x52] sm:$0x1] }
  0x81   : > { %673 = vst.msk [vmem:[#allocation2 + $0x6d] sm:$0x1] %vm326_vm0, %v544_v46  ;;  %674 = vst.msk [vmem:[#allocation2 + $0x6e] sm:$0x1] %vm326_vm0, %v545_v47  ;;  %v547_v49 = vld [vmem:[%s4653_s9 + $0x53] sm:$0x1] }
  0x82   : > { %675 = vst.msk [vmem:[#allocation2 + $0x6f] sm:$0x1] %vm326_vm0, %v546_v48  ;;  %v548_v50 = vld [vmem:[%s4653_s9 + $0x54] sm:$0x1]  ;;  %v549_v51 = vld [vmem:[%s4653_s9 + $0x55] sm:$0x1] }
  0x83   : > { %676 = vst.msk [vmem:[#allocation2 + $0x70] sm:$0x1] %vm326_vm0, %v547_v49  ;;  %677 = vst.msk [vmem:[#allocation2 + $0x71] sm:$0x1] %vm326_vm0, %v548_v50  ;;  %v550_v52 = vld [vmem:[%s4653_s9 + $0x56] sm:$0x1] }
  0x84   : > { %678 = vst.msk [vmem:[#allocation2 + $0x72] sm:$0x1] %vm326_vm0, %v549_v51  ;;  %v551_v53 = vld [vmem:[%s4653_s9 + $0x57] sm:$0x1]  ;;  %v552_v54 = vld [vmem:[%s4653_s9 + $0x58] sm:$0x1] }
  0x85   : > { %679 = vst.msk [vmem:[#allocation2 + $0x73] sm:$0x1] %vm326_vm0, %v550_v52  ;;  %680 = vst.msk [vmem:[#allocation2 + $0x74] sm:$0x1] %vm326_vm0, %v551_v53  ;;  %v553_v55 = vld [vmem:[%s4653_s9 + $0x59] sm:$0x1] }
  0x86   : > { %681 = vst.msk [vmem:[#allocation2 + $0x75] sm:$0x1] %vm326_vm0, %v552_v54  ;;  %v554_v56 = vld [vmem:[%s4653_s9 + $0x5a] sm:$0x1]  ;;  %v555_v57 = vld [vmem:[%s4653_s9 + $0x5b] sm:$0x1] }
  0x87   : > { %682 = vst.msk [vmem:[#allocation2 + $0x76] sm:$0x1] %vm326_vm0, %v553_v55  ;;  %683 = vst.msk [vmem:[#allocation2 + $0x77] sm:$0x1] %vm326_vm0, %v554_v56  ;;  %v556_v58 = vld [vmem:[%s4653_s9 + $0x5c] sm:$0x1] }
  0x88   : > { %684 = vst.msk [vmem:[#allocation2 + $0x78] sm:$0x1] %vm326_vm0, %v555_v57  ;;  %v557_v59 = vld [vmem:[%s4653_s9 + $0x5d] sm:$0x1]  ;;  %v558_v60 = vld [vmem:[%s4653_s9 + $0x5e] sm:$0x1] }
  0x89   : > { %685 = vst.msk [vmem:[#allocation2 + $0x79] sm:$0x1] %vm326_vm0, %v556_v58  ;;  %686 = vst.msk [vmem:[#allocation2 + $0x7a] sm:$0x1] %vm326_vm0, %v557_v59  ;;  %v560_v61 = vld [vmem:[%s4653_s9 + $0x60] sm:$0x1] }
  0x8a   : > { %687 = vst.msk [vmem:[#allocation2 + $0x7b] sm:$0x1] %vm326_vm0, %v558_v60  ;;  %v561_v62 = vld [vmem:[%s4653_s9 + $0x61] sm:$0x1]  ;;  %v562_v63 = vld [vmem:[%s4653_s9 + $0x62] sm:$0x1] }
  0x8b   : > { %689 = vst.msk [vmem:[#allocation2 + $0x7f] sm:$0x1] %vm326_vm0, %v560_v61  ;;  %690 = vst.msk [vmem:[#allocation2 + $0x80] sm:$0x1] %vm326_vm0, %v561_v62  ;;  %v563_v0 = vld [vmem:[%s4653_s9 + $0x63] sm:$0x1] }
  0x8c   : > { %691 = vst.msk [vmem:[#allocation2 + $0x81] sm:$0x1] %vm326_vm0, %v562_v63  ;;  %v564_v1 = vld [vmem:[%s4653_s9 + $0x64] sm:$0x1]  ;;  %v565_v2 = vld [vmem:[%s4653_s9 + $0x65] sm:$0x1] }
  0x8d   : > { %692 = vst.msk [vmem:[#allocation2 + $0x82] sm:$0x1] %vm326_vm0, %v563_v0  ;;  %693 = vst.msk [vmem:[#allocation2 + $0x83] sm:$0x1] %vm326_vm0, %v564_v1  ;;  %v566_v3 = vld [vmem:[%s4653_s9 + $0x66] sm:$0x1] }
  0x8e   : > { %694 = vst.msk [vmem:[#allocation2 + $0x84] sm:$0x1] %vm326_vm0, %v565_v2  ;;  %v567_v4 = vld [vmem:[%s4653_s9 + $0x67] sm:$0x1]  ;;  %v568_v5 = vld [vmem:[%s4653_s9 + $0x68] sm:$0x1] }
  0x8f   : > { %695 = vst.msk [vmem:[#allocation2 + $0x85] sm:$0x1] %vm326_vm0, %v566_v3  ;;  %696 = vst.msk [vmem:[#allocation2 + $0x86] sm:$0x1] %vm326_vm0, %v567_v4  ;;  %v569_v6 = vld [vmem:[%s4653_s9 + $0x69] sm:$0x1] }
  0x90   : > { %697 = vst.msk [vmem:[#allocation2 + $0x87] sm:$0x1] %vm326_vm0, %v568_v5  ;;  %v570_v7 = vld [vmem:[%s4653_s9 + $0x6a] sm:$0x1]  ;;  %v571_v8 = vld [vmem:[%s4653_s9 + $0x6b] sm:$0x1] }
  0x91   : > { %698 = vst.msk [vmem:[#allocation2 + $0x88] sm:$0x1] %vm326_vm0, %v569_v6  ;;  %699 = vst.msk [vmem:[#allocation2 + $0x89] sm:$0x1] %vm326_vm0, %v570_v7  ;;  %v572_v9 = vld [vmem:[%s4653_s9 + $0x6c] sm:$0x1] }
  0x92   : > { %700 = vst.msk [vmem:[#allocation2 + $0x8a] sm:$0x1] %vm326_vm0, %v571_v8  ;;  %v573_v10 = vld [vmem:[%s4653_s9 + $0x6d] sm:$0x1]  ;;  %v574_v11 = vld [vmem:[%s4653_s9 + $0x6e] sm:$0x1] }
  0x93   : > { %701 = vst.msk [vmem:[#allocation2 + $0x8b] sm:$0x1] %vm326_vm0, %v572_v9  ;;  %702 = vst.msk [vmem:[#allocation2 + $0x8c] sm:$0x1] %vm326_vm0, %v573_v10  ;;  %v479_v12 = vld [vmem:[%s4653_s9 + $0xf] sm:$0x1] }
  0x94   : > { %703 = vst.msk [vmem:[#allocation2 + $0x8d] sm:$0x1] %vm326_vm0, %v574_v11  ;;  %v495_v13 = vld [vmem:[%s4653_s9 + $0x1f] sm:$0x1]  ;;  %v511_v14 = vld [vmem:[%s4653_s9 + $0x2f] sm:$0x1] }
  0x95   : > { %608 = vst.msk [vmem:[#allocation2 + $0x22] sm:$0x1] %vm326_vm0, %v479_v12  ;;  %624 = vst.msk [vmem:[#allocation2 + $0x34] sm:$0x1] %vm326_vm0, %v495_v13  ;;  %v527_v15 = vld [vmem:[%s4653_s9 + $0x3f] sm:$0x1] }
  0x96   : > { %640 = vst.msk [vmem:[#allocation2 + $0x46] sm:$0x1] %vm326_vm0, %v511_v14  ;;  %v543_v16 = vld [vmem:[%s4653_s9 + $0x4f] sm:$0x1]  ;;  %v559_v17 = vld [vmem:[%s4653_s9 + $0x5f] sm:$0x1] }
  0x97   : > { %656 = vst.msk [vmem:[#allocation2 + $0x58] sm:$0x1] %vm326_vm0, %v527_v15  ;;  %672 = vst.msk [vmem:[#allocation2 + $0x6a] sm:$0x1] %vm326_vm0, %v543_v16  ;;  %v575_v18 = vld [vmem:[%s4653_s9 + $0x6f] sm:$0x1] }
  0x98   : > { %688 = vst.msk [vmem:[#allocation2 + $0x7c] sm:$0x1] %vm326_vm0, %v559_v17  ;;  %v576_v19 = vld [vmem:[%s4653_s9 + $0x70] sm:$0x1]  ;;  %v577_v20 = vld [vmem:[%s4653_s9 + $0x71] sm:$0x1] }
  0x99   : > { %704 = vst.msk [vmem:[#allocation2 + $0x8e] sm:$0x1] %vm326_vm0, %v575_v18  ;;  %705 = vst.msk [vmem:[#allocation2 + $0x91] sm:$0x1] %vm326_vm0, %v576_v19  ;;  %v578_v21 = vld [vmem:[%s4653_s9 + $0x72] sm:$0x1] }
  0x9a   : > { %706 = vst.msk [vmem:[#allocation2 + $0x92] sm:$0x1] %vm326_vm0, %v577_v20  ;;  %v579_v22 = vld [vmem:[%s4653_s9 + $0x73] sm:$0x1]  ;;  %v580_v23 = vld [vmem:[%s4653_s9 + $0x74] sm:$0x1] }
  0x9b   : > { %707 = vst.msk [vmem:[#allocation2 + $0x93] sm:$0x1] %vm326_vm0, %v578_v21  ;;  %708 = vst.msk [vmem:[#allocation2 + $0x94] sm:$0x1] %vm326_vm0, %v579_v22  ;;  %v581_v24 = vld [vmem:[%s4653_s9 + $0x75] sm:$0x1] }
  0x9c   : > { %709 = vst.msk [vmem:[#allocation2 + $0x95] sm:$0x1] %vm326_vm0, %v580_v23  ;;  %v582_v25 = vld [vmem:[%s4653_s9 + $0x76] sm:$0x1]  ;;  %v583_v26 = vld [vmem:[%s4653_s9 + $0x77] sm:$0x1] }
  0x9d   : > { %710 = vst.msk [vmem:[#allocation2 + $0x96] sm:$0x1] %vm326_vm0, %v581_v24  ;;  %711 = vst.msk [vmem:[#allocation2 + $0x97] sm:$0x1] %vm326_vm0, %v582_v25  ;;  %v584_v27 = vld [vmem:[%s4653_s9 + $0x78] sm:$0x1] }
  0x9e   : > { %712 = vst.msk [vmem:[#allocation2 + $0x98] sm:$0x1] %vm326_vm0, %v583_v26  ;;  %v585_v28 = vld [vmem:[%s4653_s9 + $0x79] sm:$0x1]  ;;  %v586_v29 = vld [vmem:[%s4653_s9 + $0x7a] sm:$0x1] }
  0x9f   : > { %713 = vst.msk [vmem:[#allocation2 + $0x99] sm:$0x1] %vm326_vm0, %v584_v27  ;;  %714 = vst.msk [vmem:[#allocation2 + $0x9a] sm:$0x1] %vm326_vm0, %v585_v28  ;;  %v587_v30 = vld [vmem:[%s4653_s9 + $0x7b] sm:$0x1] }
  0xa0   : > { %715 = vst.msk [vmem:[#allocation2 + $0x9b] sm:$0x1] %vm326_vm0, %v586_v29  ;;  %v588_v31 = vld [vmem:[%s4653_s9 + $0x7c] sm:$0x1]  ;;  %v589_v32 = vld [vmem:[%s4653_s9 + $0x7d] sm:$0x1] }
  0xa1   : > { %716 = vst.msk [vmem:[#allocation2 + $0x9c] sm:$0x1] %vm326_vm0, %v587_v30  ;;  %717 = vst.msk [vmem:[#allocation2 + $0x9d] sm:$0x1] %vm326_vm0, %v588_v31  ;;  %v590_v33 = vld [vmem:[%s4653_s9 + $0x7e] sm:$0x1] }
  0xa2   : > { %718 = vst.msk [vmem:[#allocation2 + $0x9e] sm:$0x1] %vm326_vm0, %v589_v32  ;;  %v591_v34 = vld [vmem:[%s4653_s9 + $0x7f] sm:$0x1]  ;;  %s721_s21 = sld [smem:[#allocation4]]  ;;  %s4472_s23 = sld [smem:[#allocation4 + $0x1]] }
  0xa3   : > { %719 = vst.msk [vmem:[#allocation2 + $0x9f] sm:$0x1] %vm326_vm0, %v590_v33  ;;  %720 = vst.msk [vmem:[#allocation2 + $0xa0] sm:$0x1] %vm326_vm0, %v591_v34  ;;  %s979_s22 = sld [smem:[#allocation5]]  ;;  %s4473_s24 = sld [smem:[#allocation4 + $0x2]] }
  0xa4   : > { %s4474_s25 = sld [smem:[#allocation4 + $0x3]]  ;;  %s4475_s27 = sld [smem:[#allocation4 + $0x4]]  ;;  %v722_v35 = vld [vmem:[#allocation2] sm:$0x1]  ;;  %v1111_v36 = vld [vmem:[#allocation2 + $0x1] sm:$0x1] }
  0xa5   : > { %s4476_s28 = sld [smem:[#allocation4 + $0x5]]  ;;  %s5026_s29 = sld [smem:[#allocation4 + $0x7]]  ;;  %v1498_v38 = vld [vmem:[#allocation2 + $0x2] sm:$0x1]  ;;  %v723_v42 = vld [vmem:[#allocation2 + $0x1] sm:$0x1] }
  0xa6   : > { %s5030_s30 = sld [smem:[#allocation4 + $0x6]]  ;;  %s5032_s6 = sld [smem:[#allocation4 + $0x8]]  ;;  %v1112_v43 = vld [vmem:[#allocation2 + $0x2] sm:$0x1]  ;;  %v1885_v46 = vld [vmem:[#allocation2 + $0x12] sm:$0x1] }
  0xa7   : > { %v1499_v53 = vld [vmem:[#allocation2 + $0x3] sm:$0x1]  ;;  %v2271_v56 = vld [vmem:[#allocation2 + $0x13] sm:$0x1]  ;;  %v2658_v58 = vld [vmem:[#allocation2 + $0x14] sm:$0x1] }
  0xa8   : > { %v5028_v37 = vstv %s721_s21  ;;  %v5037_v41 = vstv %s4472_s23  ;;  %v3045_v60 = vld [vmem:[#allocation2 + $0x24] sm:$0x1]  ;;  %v1886_v62 = vld [vmem:[#allocation2 + $0x13] sm:$0x1]  ;;  %v724_v63 = vld [vmem:[#allocation2 + $0x2] sm:$0x1] }
  0xa9   : > { %v851_v39 = vmul.f32 %v5028_v37, %v722_v35  ;;  %v5035_v40 = vstv %s979_s22  ;;  %v1240_v44 = vmul.f32 %v5037_v41, %v1111_v36  ;;  %v5040_v45 = vstv %s4473_s24  ;;  %v3432_v1 = vld [vmem:[#allocation2 + $0x25] sm:$0x1]  ;;  %v2272_v4 = vld [vmem:[#allocation2 + $0x14] sm:$0x1]  ;;  %v1113_v5 = vld [vmem:[#allocation2 + $0x3] sm:$0x1] }
  0xaa   : > { %v852_v47 = vmul.f32 %v5028_v37, %v723_v42  ;;  %v1241_v48 = vmul.f32 %v5037_v41, %v1112_v43  ;;  %v1627_v50 = vmul.f32 %v5040_v45, %v1498_v38  ;;  %v5046_v51 = vstv %s4474_s25  ;;  %v3819_v9 = vld [vmem:[#allocation2 + $0x26] sm:$0x1]  ;;  %v1500_v11 = vld [vmem:[#allocation2 + $0x4] sm:$0x1]  ;;  %v2659_v15 = vld [vmem:[#allocation2 + $0x15] sm:$0x1] }
  0xab   : > { %v981_v49 = vadd.f32 %v5035_v40, %v851_v39  ;;  %v2014_v55 = vmul.f32 %v5046_v51, %v1885_v46  ;;  %v5050_v57 = vstv %s4475_s27  ;;  %v5052_v59 = vstv %s4476_s28  ;;  %v3046_v16 = vld [vmem:[#allocation2 + $0x25] sm:$0x1]  ;;  %v725_v18 = vld [vmem:[#allocation2 + $0x3] sm:$0x1]  ;;  %v1114_v23 = vld [vmem:[#allocation2 + $0x4] sm:$0x1] }
  0xac   : > { %v982_v52 = vadd.f32 %v5035_v40, %v852_v47  ;;  %v5055_v2 = vstv %s5026_s29  ;;  %v1628_v3 = vmul.f32 %v5040_v45, %v1499_v53  ;;  %v2400_v6 = vmul.f32 %v5050_v57, %v2271_v56  ;;  %v3433_v26 = vld [vmem:[#allocation2 + $0x26] sm:$0x1]  ;;  %v3820_v27 = vld [vmem:[#allocation2 + $0x27] sm:$0x1]  ;;  %v1501_v30 = vld [vmem:[#allocation2 + $0x5] sm:$0x1] }
  0xad   : > { %v1368_v54 = vadd.f32 %v1240_v44, %v981_v49  ;;  %v2787_v7 = vmul.f32 %v5052_v59, %v2658_v58  ;;  %v5061_v8 = vstv %s5030_s30  ;;  %v5064_v10 = vstv %s5032_s6  ;;  %v1887_v34 = vld [vmem:[#allocation2 + $0x14] sm:$0x1]  ;;  %v2273_v42 = vld [vmem:[#allocation2 + $0x15] sm:$0x1]  ;;  %v2660_v43 = vld [vmem:[#allocation2 + $0x16] sm:$0x1] }
  0xae   : > { %v1369_v61 = vadd.f32 %v1241_v48, %v982_v52  ;;  %v2015_v14 = vmul.f32 %v5046_v51, %v1886_v62  ;;  %v853_v17 = vmul.f32 %v5028_v37, %v724_v63  ;;  %v3174_v19 = vmul.f32 %v5061_v8, %v3045_v60  ;;  %v3047_v44 = vld [vmem:[#allocation2 + $0x26] sm:$0x1]  ;;  %v726_v52 = vld [vmem:[#allocation2 + $0x4] sm:$0x1]  ;;  %v1888_v58 = vld [vmem:[#allocation2 + $0x15] sm:$0x1] }
  0xaf   : > { %v1755_v0 = vadd.f32 %v1627_v50, %v1368_v54  ;;  %v3561_v20 = vmul.f32 %v5055_v2, %v3432_v1  ;;  %v2401_v21 = vmul.f32 %v5050_v57, %v2272_v4  ;;  %v1242_v22 = vmul.f32 %v5037_v41, %v1113_v5  ;;  %v1115_v60 = vld [vmem:[#allocation2 + $0x5] sm:$0x1] }
  0xb0   : > { %v1756_v13 = vadd.f32 %v1628_v3, %v1369_v61  ;;  %v983_v28 = vadd.f32 %v5035_v40, %v853_v17  ;;  %v1629_v29 = vmul.f32 %v5040_v45, %v1500_v11  ;;  %v3948_v31 = vmul.f32 %v5064_v10, %v3819_v9  ;;  %v1502_v61 = vld [vmem:[#allocation2 + $0x6] sm:$0x1]  ;;  %v2274_v9 = vld [vmem:[#allocation2 + $0x16] sm:$0x1] }
  0xb1   : > { %v2142_v12 = vadd.f32 %v2014_v55, %v1755_v0  ;;  %v2788_v32 = vmul.f32 %v5052_v59, %v2659_v15  ;;  %v3175_v33 = vmul.f32 %v5061_v8, %v3046_v16  ;;  %v854_v35 = vmul.f32 %v5028_v37, %v725_v18 }
  0xb2   : > { %v2143_v25 = vadd.f32 %v2015_v14, %v1756_v13  ;;  %v1370_v39 = vadd.f32 %v1242_v22, %v983_v28  ;;  %v1243_v46 = vmul.f32 %v5037_v41, %v1114_v23  ;;  %v3562_v47 = vmul.f32 %v5055_v2, %v3433_v26  ;;  %v2661_v14 = vld [vmem:[#allocation2 + $0x17] sm:$0x1]  ;;  %v727_v22 = vld [vmem:[#allocation2 + $0x5] sm:$0x1]  ;;  %v1116_v23 = vld [vmem:[#allocation2 + $0x6] sm:$0x1] }
  0xb3   : > { %v2528_v24 = vadd.f32 %v2400_v6, %v2142_v12  ;;  %v3949_v48 = vmul.f32 %v5064_v10, %v3820_v27  ;;  %v984_v49 = vadd.f32 %v5035_v40, %v854_v35  ;;  %v1630_v50 = vmul.f32 %v5040_v45, %v1501_v30  ;;  %v3434_v6 = vld [vmem:[#allocation2 + $0x27] sm:$0x1]  ;;  %v3435_v28 = vld [vmem:[#allocation2 + $0x28] sm:$0x1] }
  0xb4   : > { %v2529_v38 = vadd.f32 %v2401_v21, %v2143_v25  ;;  %v1757_v55 = vadd.f32 %v1629_v29, %v1370_v39  ;;  %v2016_v56 = vmul.f32 %v5046_v51, %v1887_v34  ;;  %v2402_v62 = vmul.f32 %v5050_v57, %v2273_v42  ;;  %v1889_v29 = vld [vmem:[#allocation2 + $0x16] sm:$0x1]  ;;  %v1503_v35 = vld [vmem:[#allocation2 + $0x7] sm:$0x1]  ;;  %v2275_v39 = vld [vmem:[#allocation2 + $0x17] sm:$0x1] }
  0xb5   : > { %v2915_v36 = vadd.f32 %v2787_v7, %v2528_v24  ;;  %v2789_v63 = vmul.f32 %v5052_v59, %v2660_v43  ;;  %v3176_v0 = vmul.f32 %v5061_v8, %v3047_v44  ;;  %v1371_v1 = vadd.f32 %v1243_v46, %v984_v49  ;;  %v3821_v7 = vld [vmem:[#allocation2 + $0x28] sm:$0x1]  ;;  %v2662_v42 = vld [vmem:[#allocation2 + $0x18] sm:$0x1] }
  0xb6   : > { %v2916_v54 = vadd.f32 %v2788_v32, %v2529_v38  ;;  %v2144_v5 = vadd.f32 %v2016_v56, %v1757_v55  ;;  %v855_v11 = vmul.f32 %v5028_v37, %v726_v52  ;;  %v2017_v13 = vmul.f32 %v5046_v51, %v1888_v58  ;;  %v728_v52 = vld [vmem:[#allocation2 + $0x6] sm:$0x1]  ;;  %v1890_v58 = vld [vmem:[#allocation2 + $0x17] sm:$0x1] }
  0xb7   : > { %v3302_v53 = vadd.f32 %v3174_v19, %v2915_v36  ;;  %v1758_v12 = vadd.f32 %v1630_v50, %v1371_v1  ;;  %v1244_v15 = vmul.f32 %v5037_v41, %v1115_v60  ;;  %v1631_v16 = vmul.f32 %v5040_v45, %v1502_v61  ;;  %v3049_v50 = vld [vmem:[#allocation2 + $0x28] sm:$0x1]  ;;  %v1117_v60 = vld [vmem:[#allocation2 + $0x7] sm:$0x1] }
  0xb8   : > { %v3303_v4 = vadd.f32 %v3175_v33, %v2916_v54  ;;  %v2530_v19 = vadd.f32 %v2402_v62, %v2144_v5  ;;  %v985_v21 = vadd.f32 %v5035_v40, %v855_v11  ;;  %v3563_v24 = vmul.f32 %v5055_v2, %v3434_v6  ;;  %v3822_v33 = vld [vmem:[#allocation2 + $0x29] sm:$0x1]  ;;  %v1504_v1 = vld [vmem:[#allocation2 + $0x8] sm:$0x1]  ;;  %v3823_v6 = vld [vmem:[#allocation2 + $0x2a] sm:$0x1] }
  0xb9   : > { %v3689_v3 = vadd.f32 %v3561_v20, %v3302_v53  ;;  %v3048_v20 = vld [vmem:[#allocation2 + $0x27] sm:$0x1]  ;;  %v3950_v25 = vmul.f32 %v5064_v10, %v3821_v7  ;;  %v2145_v26 = vadd.f32 %v2017_v13, %v1758_v12  ;;  %v2403_v27 = vmul.f32 %v5050_v57, %v2274_v9  ;;  %v3436_v5 = vld [vmem:[#allocation2 + $0x29] sm:$0x1]  ;;  %v2276_v9 = vld [vmem:[#allocation2 + $0x18] sm:$0x1] }
  0xba   : > { %v3690_v18 = vadd.f32 %v3562_v47, %v3303_v4  ;;  %v2790_v32 = vmul.f32 %v5052_v59, %v2661_v14  ;;  %v1372_v34 = vadd.f32 %v1244_v15, %v985_v21  ;;  %v3177_v38 = vmul.f32 %v5061_v8, %v3048_v20  ;;  %v2663_v15 = vld [vmem:[#allocation2 + $0x19] sm:$0x1] }
  0xbb   : > { %v4076_v17 = vadd.f32 %v3948_v31, %v3689_v3  ;;  %v2917_v31 = vadd.f32 %v2789_v63, %v2530_v19  ;;  %v2531_v36 = vadd.f32 %v2403_v27, %v2145_v26  ;;  %v856_v43 = vmul.f32 %v5028_v37, %v727_v22  ;;  %v3050_v19 = vld [vmem:[#allocation2 + $0x29] sm:$0x1]  ;;  %v729_v22 = vld [vmem:[#allocation2 + $0x7] sm:$0x1] }
  0xbc   : > { %v4077_v30 = vadd.f32 %v3949_v48, %v3690_v18  ;;  %v1245_v44 = vmul.f32 %v5037_v41, %v1116_v23  ;;  %v3564_v47 = vmul.f32 %v5055_v2, %v3435_v28  ;;  %v1759_v48 = vadd.f32 %v1631_v16, %v1372_v34  ;;  %v1118_v23 = vld [vmem:[#allocation2 + $0x8] sm:$0x1]  ;;  %v3437_v28 = vld [vmem:[#allocation2 + $0x2a] sm:$0x1] }
  0xbd   : > { %4204 = vst.msk [vmem:[%s4658_s13] sm:$0x1] %vm326_vm0, %v4076_v17  ;;  %v3304_v46 = vadd.f32 %v3176_v0, %v2917_v31  ;;  %v2018_v49 = vmul.f32 %v5046_v51, %v1889_v29  ;;  %v2918_v53 = vadd.f32 %v2790_v32, %v2531_v36  ;;  %v3951_v54 = vmul.f32 %v5064_v10, %v3822_v33  ;;  %v1891_v29 = vld [vmem:[#allocation2 + $0x18] sm:$0x1]  ;;  %v3824_v33 = vld [vmem:[#allocation2 + $0x2b] sm:$0x1] }
  0xbe   : > { %4205 = vst.msk [vmem:[%s4658_s13 + $0x1] sm:$0x1] %vm326_vm0, %v4077_v30  ;;  %v986_v55 = vadd.f32 %v5035_v40, %v856_v43  ;;  %v1632_v56 = vmul.f32 %v5040_v45, %v1503_v35  ;;  %v2404_v63 = vmul.f32 %v5050_v57, %v2275_v39  ;;  %v2791_v0 = vmul.f32 %v5052_v59, %v2662_v42  ;;  %v1505_v35 = vld [vmem:[#allocation2 + $0x9] sm:$0x1]  ;;  %v2277_v39 = vld [vmem:[#allocation2 + $0x19] sm:$0x1] }
  0xbf   : > { %v3691_v61 = vadd.f32 %v3563_v24, %v3304_v46  ;;  %v2146_v62 = vadd.f32 %v2018_v49, %v1759_v48  ;;  %v3305_v3 = vadd.f32 %v3177_v38, %v2918_v53  ;;  %v3178_v4 = vmul.f32 %v5061_v8, %v3049_v50  ;;  %v2664_v42 = vld [vmem:[#allocation2 + $0x1a] sm:$0x1]  ;;  %v3051_v50 = vld [vmem:[#allocation2 + $0x2a] sm:$0x1] }
  0xc0   : > { %v1373_v7 = vadd.f32 %v1245_v44, %v986_v55  ;;  %v857_v11 = vmul.f32 %v5028_v37, %v728_v52  ;;  %v2019_v14 = vmul.f32 %v5046_v51, %v1890_v58  ;;  %v1246_v16 = vmul.f32 %v5037_v41, %v1117_v60  ;;  %v730_v52 = vld [vmem:[#allocation2 + $0x8] sm:$0x1]  ;;  %v3438_v55 = vld [vmem:[#allocation2 + $0x2b] sm:$0x1]  ;;  %v1119_v60 = vld [vmem:[#allocation2 + $0x9] sm:$0x1] }
  0xc1   : > { %v4078_v12 = vadd.f32 %v3950_v25, %v3691_v61  ;;  %v2532_v13 = vadd.f32 %v2404_v63, %v2146_v62  ;;  %v3692_v17 = vadd.f32 %v3564_v47, %v3305_v3  ;;  %v1633_v21 = vmul.f32 %v5040_v45, %v1504_v1  ;;  %v1892_v1 = vld [vmem:[#allocation2 + $0x19] sm:$0x1]  ;;  %v1506_v3 = vld [vmem:[#allocation2 + $0xa] sm:$0x1] }
  0xc2   : > { %v1760_v18 = vadd.f32 %v1632_v56, %v1373_v7  ;;  %v987_v20 = vadd.f32 %v5035_v40, %v857_v11  ;;  %v3565_v25 = vmul.f32 %v5055_v2, %v3436_v5  ;;  %v3952_v26 = vmul.f32 %v5064_v10, %v3823_v6  ;;  %v3825_v6 = vld [vmem:[#allocation2 + $0x2c] sm:$0x1] }
  0xc3   : > { %4206 = vst.msk [vmem:[%s4658_s13 + $0x2] sm:$0x1] %vm326_vm0, %v4078_v12  ;;  %v2919_v24 = vadd.f32 %v2791_v0, %v2532_v13  ;;  %v2405_v27 = vmul.f32 %v5050_v57, %v2276_v9  ;;  %v4079_v30 = vadd.f32 %v3951_v54, %v3692_v17  ;;  %v2792_v32 = vmul.f32 %v5052_v59, %v2663_v15  ;;  %v2278_v9 = vld [vmem:[#allocation2 + $0x1a] sm:$0x1]  ;;  %v2665_v15 = vld [vmem:[#allocation2 + $0x1b] sm:$0x1] }
  0xc4   : > { %v2147_v31 = vadd.f32 %v2019_v14, %v1760_v18  ;;  %v1374_v34 = vadd.f32 %v1246_v16, %v987_v20  ;;  %v3179_v38 = vmul.f32 %v5061_v8, %v3050_v19  ;;  %v858_v43 = vmul.f32 %v5028_v37, %v729_v22  ;;  %v3052_v16 = vld [vmem:[#allocation2 + $0x2b] sm:$0x1]  ;;  %v731_v22 = vld [vmem:[#allocation2 + $0x9] sm:$0x1] }
  0xc5   : > { %v3306_v36 = vadd.f32 %v3178_v4, %v2919_v24  ;;  %v1247_v44 = vmul.f32 %v5037_v41, %v1118_v23  ;;  %4207 = vst.msk [vmem:[%s4658_s13 + $0x3] sm:$0x1] %vm326_vm0, %v4079_v30  ;;  %v3566_v47 = vmul.f32 %v5055_v2, %v3437_v28  ;;  %v2020_v49 = vmul.f32 %v5046_v51, %v1891_v29  ;;  %v1120_v23 = vld [vmem:[#allocation2 + $0xa] sm:$0x1]  ;;  %v3439_v28 = vld [vmem:[#allocation2 + $0x2c] sm:$0x1] }
  0xc6   : > { %v2533_v46 = vadd.f32 %v2405_v27, %v2147_v31  ;;  %v1761_v48 = vadd.f32 %v1633_v21, %v1374_v34  ;;  %v3953_v54 = vmul.f32 %v5064_v10, %v3824_v33  ;;  %v988_v56 = vadd.f32 %v5035_v40, %v858_v43  ;;  %v1893_v29 = vld [vmem:[#allocation2 + $0x1a] sm:$0x1]  ;;  %v3826_v33 = vld [vmem:[#allocation2 + $0x2d] sm:$0x1] }
  0xc7   : > { %v3693_v53 = vadd.f32 %v3565_v25, %v3306_v36  ;;  %v1634_v58 = vmul.f32 %v5040_v45, %v1505_v35  ;;  %v2406_v63 = vmul.f32 %v5050_v57, %v2277_v39  ;;  %v2793_v0 = vmul.f32 %v5052_v59, %v2664_v42  ;;  %v1507_v35 = vld [vmem:[#allocation2 + $0xb] sm:$0x1]  ;;  %v2279_v39 = vld [vmem:[#allocation2 + $0x1b] sm:$0x1]  ;;  %v2666_v42 = vld [vmem:[#allocation2 + $0x1c] sm:$0x1] }
  0xc8   : > { %v2920_v61 = vadd.f32 %v2792_v32, %v2533_v46  ;;  %v2148_v62 = vadd.f32 %v2020_v49, %v1761_v48  ;;  %v3180_v5 = vmul.f32 %v5061_v8, %v3051_v50  ;;  %v1375_v7 = vadd.f32 %v1247_v44, %v988_v56  ;;  %v3053_v50 = vld [vmem:[#allocation2 + $0x2c] sm:$0x1] }
  0xc9   : > { %v4080_v4 = vadd.f32 %v3952_v26, %v3693_v53  ;;  %v859_v11 = vmul.f32 %v5028_v37, %v730_v52  ;;  %v3567_v14 = vmul.f32 %v5055_v2, %v3438_v55  ;;  %v1248_v17 = vmul.f32 %v5037_v41, %v1119_v60  ;;  %v732_v52 = vld [vmem:[#allocation2 + $0xa] sm:$0x1]  ;;  %v3440_v55 = vld [vmem:[#allocation2 + $0x2d] sm:$0x1]  ;;  %v1121_v60 = vld [vmem:[#allocation2 + $0xb] sm:$0x1] }
  0xca   : > { %v3307_v12 = vadd.f32 %v3179_v38, %v2920_v61  ;;  %v2534_v13 = vadd.f32 %v2406_v63, %v2148_v62  ;;  %v1762_v18 = vadd.f32 %v1634_v58, %v1375_v7  ;;  %v2021_v19 = vmul.f32 %v5046_v51, %v1892_v1  ;;  %v1894_v1 = vld [vmem:[#allocation2 + $0x1b] sm:$0x1] }
  0xcb   : > { %4208 = vst.msk [vmem:[%s4658_s13 + $0x4] sm:$0x1] %vm326_vm0, %v4080_v4  ;;  %v989_v20 = vadd.f32 %v5035_v40, %v859_v11  ;;  %v1635_v21 = vmul.f32 %v5040_v45, %v1506_v3  ;;  %v3954_v26 = vmul.f32 %v5064_v10, %v3825_v6  ;;  %v2407_v27 = vmul.f32 %v5050_v57, %v2278_v9  ;;  %v1508_v3 = vld [vmem:[#allocation2 + $0xc] sm:$0x1]  ;;  %v3827_v6 = vld [vmem:[#allocation2 + $0x2e] sm:$0x1] }
  0xcc   : > { %v3694_v24 = vadd.f32 %v3566_v47, %v3307_v12  ;;  %v2921_v25 = vadd.f32 %v2793_v0, %v2534_v13  ;;  %v2149_v30 = vadd.f32 %v2021_v19, %v1762_v18  ;;  %v2794_v31 = vmul.f32 %v5052_v59, %v2665_v15  ;;  %v2280_v9 = vld [vmem:[#allocation2 + $0x1c] sm:$0x1]  ;;  %v2667_v15 = vld [vmem:[#allocation2 + $0x1d] sm:$0x1] }
  0xcd   : > { %v3181_v32 = vmul.f32 %v5061_v8, %v3052_v16  ;;  %v1376_v34 = vadd.f32 %v1248_v17, %v989_v20  ;;  %v860_v43 = vmul.f32 %v5028_v37, %v731_v22  ;;  %v1249_v44 = vmul.f32 %v5037_v41, %v1120_v23  ;;  %v3054_v16 = vld [vmem:[#allocation2 + $0x2d] sm:$0x1]  ;;  %v733_v22 = vld [vmem:[#allocation2 + $0xb] sm:$0x1]  ;;  %v1122_v23 = vld [vmem:[#allocation2 + $0xc] sm:$0x1] }
  0xce   : > { %v4081_v36 = vadd.f32 %v3953_v54, %v3694_v24  ;;  %v3308_v38 = vadd.f32 %v3180_v5, %v2921_v25  ;;  %v2535_v46 = vadd.f32 %v2407_v27, %v2149_v30  ;;  %v3568_v47 = vmul.f32 %v5055_v2, %v3439_v28  ;;  %v3441_v28 = vld [vmem:[#allocation2 + $0x2e] sm:$0x1] }
  0xcf   : > { %v1763_v48 = vadd.f32 %v1635_v21, %v1376_v34  ;;  %v2022_v49 = vmul.f32 %v5046_v51, %v1893_v29  ;;  %v3955_v54 = vmul.f32 %v5064_v10, %v3826_v33  ;;  %v990_v56 = vadd.f32 %v5035_v40, %v860_v43  ;;  %v1895_v29 = vld [vmem:[#allocation2 + $0x1c] sm:$0x1]  ;;  %v3828_v33 = vld [vmem:[#allocation2 + $0x2f] sm:$0x1] }
  0xd0   : > { %4209 = vst.msk [vmem:[%s4658_s13 + $0x5] sm:$0x1] %vm326_vm0, %v4081_v36  ;;  %v3695_v53 = vadd.f32 %v3567_v14, %v3308_v38  ;;  %v1636_v58 = vmul.f32 %v5040_v45, %v1507_v35  ;;  %v2922_v61 = vadd.f32 %v2794_v31, %v2535_v46  ;;  %v2408_v63 = vmul.f32 %v5050_v57, %v2279_v39  ;;  %v1509_v35 = vld [vmem:[#allocation2 + $0xd] sm:$0x1]  ;;  %v2281_v39 = vld [vmem:[#allocation2 + $0x1d] sm:$0x1] }
  0xd1   : > { %v2150_v62 = vadd.f32 %v2022_v49, %v1763_v48  ;;  %v2795_v0 = vmul.f32 %v5052_v59, %v2666_v42  ;;  %v3182_v5 = vmul.f32 %v5061_v8, %v3053_v50  ;;  %v1377_v7 = vadd.f32 %v1249_v44, %v990_v56  ;;  %v2668_v42 = vld [vmem:[#allocation2 + $0x1e] sm:$0x1]  ;;  %v3055_v50 = vld [vmem:[#allocation2 + $0x2e] sm:$0x1] }
  0xd2   : > { %v4082_v4 = vadd.f32 %v3954_v26, %v3695_v53  ;;  %v861_v11 = vmul.f32 %v5028_v37, %v732_v52  ;;  %v3309_v12 = vadd.f32 %v3181_v32, %v2922_v61  ;;  %v3569_v14 = vmul.f32 %v5055_v2, %v3440_v55  ;;  %v734_v52 = vld [vmem:[#allocation2 + $0xc] sm:$0x1]  ;;  %v3442_v55 = vld [vmem:[#allocation2 + $0x2f] sm:$0x1] }
  0xd3   : > { %v2536_v13 = vadd.f32 %v2408_v63, %v2150_v62  ;;  %v1250_v17 = vmul.f32 %v5037_v41, %v1121_v60  ;;  %v1764_v18 = vadd.f32 %v1636_v58, %v1377_v7  ;;  %v2023_v19 = vmul.f32 %v5046_v51, %v1894_v1  ;;  %v1123_v60 = vld [vmem:[#allocation2 + $0xd] sm:$0x1]  ;;  %v1896_v1 = vld [vmem:[#allocation2 + $0x1d] sm:$0x1] }
  0xd4   : > { %4210 = vst.msk [vmem:[%s4658_s13 + $0x6] sm:$0x1] %vm326_vm0, %v4082_v4  ;;  %v991_v20 = vadd.f32 %v5035_v40, %v861_v11  ;;  %v1637_v21 = vmul.f32 %v5040_v45, %v1508_v3  ;;  %v3696_v24 = vadd.f32 %v3568_v47, %v3309_v12  ;;  %v3956_v26 = vmul.f32 %v5064_v10, %v3827_v6  ;;  %v1510_v3 = vld [vmem:[#allocation2 + $0xe] sm:$0x1]  ;;  %v3829_v6 = vld [vmem:[#allocation2 + $0x30] sm:$0x1] }
  0xd5   : > { %v2923_v25 = vadd.f32 %v2795_v0, %v2536_v13  ;;  %v2409_v27 = vmul.f32 %v5050_v57, %v2280_v9  ;;  %v2151_v30 = vadd.f32 %v2023_v19, %v1764_v18  ;;  %v2796_v31 = vmul.f32 %v5052_v59, %v2667_v15  ;;  %v2282_v9 = vld [vmem:[#allocation2 + $0x1e] sm:$0x1]  ;;  %v2669_v15 = vld [vmem:[#allocation2 + $0x1f] sm:$0x1] }
  0xd6   : > { %v3183_v32 = vmul.f32 %v5061_v8, %v3054_v16  ;;  %v1378_v34 = vadd.f32 %v1250_v17, %v991_v20  ;;  %v4083_v36 = vadd.f32 %v3955_v54, %v3696_v24  ;;  %v862_v43 = vmul.f32 %v5028_v37, %v733_v22  ;;  %v3056_v16 = vld [vmem:[#allocation2 + $0x2f] sm:$0x1]  ;;  %v735_v22 = vld [vmem:[#allocation2 + $0xd] sm:$0x1] }
  0xd7   : > { %v3310_v38 = vadd.f32 %v3182_v5, %v2923_v25  ;;  %v1251_v44 = vmul.f32 %v5037_v41, %v1122_v23  ;;  %v2537_v46 = vadd.f32 %v2409_v27, %v2151_v30  ;;  %v3570_v47 = vmul.f32 %v5055_v2, %v3441_v28  ;;  %v1124_v23 = vld [vmem:[#allocation2 + $0xe] sm:$0x1]  ;;  %v3443_v28 = vld [vmem:[#allocation2 + $0x30] sm:$0x1] }
  0xd8   : > { %v1765_v48 = vadd.f32 %v1637_v21, %v1378_v34  ;;  %v2024_v49 = vmul.f32 %v5046_v51, %v1895_v29  ;;  %4211 = vst.msk [vmem:[%s4658_s13 + $0x7] sm:$0x1] %vm326_vm0, %v4083_v36  ;;  %v3957_v54 = vmul.f32 %v5064_v10, %v3828_v33  ;;  %v992_v56 = vadd.f32 %v5035_v40, %v862_v43  ;;  %v1897_v29 = vld [vmem:[#allocation2 + $0x1e] sm:$0x1]  ;;  %v3830_v33 = vld [vmem:[#allocation2 + $0x31] sm:$0x1] }
  0xd9   : > { %v3697_v53 = vadd.f32 %v3569_v14, %v3310_v38  ;;  %v1638_v58 = vmul.f32 %v5040_v45, %v1509_v35  ;;  %v2924_v61 = vadd.f32 %v2796_v31, %v2537_v46  ;;  %v2410_v63 = vmul.f32 %v5050_v57, %v2281_v39  ;;  %v1511_v35 = vld [vmem:[#allocation2 + $0xf] sm:$0x1]  ;;  %v2283_v39 = vld [vmem:[#allocation2 + $0x1f] sm:$0x1] }
  0xda   : > { %v2152_v62 = vadd.f32 %v2024_v49, %v1765_v48  ;;  %v2797_v0 = vmul.f32 %v5052_v59, %v2668_v42  ;;  %v3184_v5 = vmul.f32 %v5061_v8, %v3055_v50  ;;  %v1379_v7 = vadd.f32 %v1251_v44, %v992_v56  ;;  %v2670_v42 = vld [vmem:[#allocation2 + $0x20] sm:$0x1]  ;;  %v3057_v50 = vld [vmem:[#allocation2 + $0x30] sm:$0x1] }
  0xdb   : > { %v4084_v4 = vadd.f32 %v3956_v26, %v3697_v53  ;;  %v863_v11 = vmul.f32 %v5028_v37, %v734_v52  ;;  %v3311_v12 = vadd.f32 %v3183_v32, %v2924_v61  ;;  %v3571_v14 = vmul.f32 %v5055_v2, %v3442_v55  ;;  %v736_v52 = vld [vmem:[#allocation2 + $0xe] sm:$0x1]  ;;  %v3444_v55 = vld [vmem:[#allocation2 + $0x31] sm:$0x1] }
  0xdc   : > { %v2538_v13 = vadd.f32 %v2410_v63, %v2152_v62  ;;  %v1252_v17 = vmul.f32 %v5037_v41, %v1123_v60  ;;  %v1766_v18 = vadd.f32 %v1638_v58, %v1379_v7  ;;  %v2025_v19 = vmul.f32 %v5046_v51, %v1896_v1  ;;  %v1125_v60 = vld [vmem:[#allocation2 + $0xf] sm:$0x1]  ;;  %v1898_v1 = vld [vmem:[#allocation2 + $0x1f] sm:$0x1] }
  0xdd   : > { %4212 = vst.msk [vmem:[%s4658_s13 + $0x8] sm:$0x1] %vm326_vm0, %v4084_v4  ;;  %v993_v20 = vadd.f32 %v5035_v40, %v863_v11  ;;  %v1639_v21 = vmul.f32 %v5040_v45, %v1510_v3  ;;  %v3698_v24 = vadd.f32 %v3570_v47, %v3311_v12  ;;  %v3958_v26 = vmul.f32 %v5064_v10, %v3829_v6  ;;  %v1512_v3 = vld [vmem:[#allocation2 + $0x10] sm:$0x1]  ;;  %v3831_v6 = vld [vmem:[#allocation2 + $0x32] sm:$0x1] }
  0xde   : > { %v2925_v25 = vadd.f32 %v2797_v0, %v2538_v13  ;;  %v2411_v27 = vmul.f32 %v5050_v57, %v2282_v9  ;;  %v2153_v30 = vadd.f32 %v2025_v19, %v1766_v18  ;;  %v2798_v31 = vmul.f32 %v5052_v59, %v2669_v15  ;;  %v2284_v9 = vld [vmem:[#allocation2 + $0x20] sm:$0x1]  ;;  %v2671_v15 = vld [vmem:[#allocation2 + $0x21] sm:$0x1] }
  0xdf   : > { %v3185_v32 = vmul.f32 %v5061_v8, %v3056_v16  ;;  %v1380_v34 = vadd.f32 %v1252_v17, %v993_v20  ;;  %v4085_v36 = vadd.f32 %v3957_v54, %v3698_v24  ;;  %v864_v43 = vmul.f32 %v5028_v37, %v735_v22  ;;  %v3058_v16 = vld [vmem:[#allocation2 + $0x31] sm:$0x1]  ;;  %v737_v22 = vld [vmem:[#allocation2 + $0xf] sm:$0x1] }
  0xe0   : > { %v3312_v38 = vadd.f32 %v3184_v5, %v2925_v25  ;;  %v1253_v44 = vmul.f32 %v5037_v41, %v1124_v23  ;;  %v2539_v46 = vadd.f32 %v2411_v27, %v2153_v30  ;;  %v3572_v47 = vmul.f32 %v5055_v2, %v3443_v28  ;;  %v1126_v23 = vld [vmem:[#allocation2 + $0x10] sm:$0x1]  ;;  %v3445_v28 = vld [vmem:[#allocation2 + $0x32] sm:$0x1] }
  0xe1   : > { %v1767_v48 = vadd.f32 %v1639_v21, %v1380_v34  ;;  %v2026_v49 = vmul.f32 %v5046_v51, %v1897_v29  ;;  %4213 = vst.msk [vmem:[%s4658_s13 + $0x9] sm:$0x1] %vm326_vm0, %v4085_v36  ;;  %v3959_v54 = vmul.f32 %v5064_v10, %v3830_v33  ;;  %v994_v56 = vadd.f32 %v5035_v40, %v864_v43  ;;  %v1899_v29 = vld [vmem:[#allocation2 + $0x20] sm:$0x1]  ;;  %v3832_v33 = vld [vmem:[#allocation2 + $0x33] sm:$0x1] }
  0xe2   : > { %v3699_v53 = vadd.f32 %v3571_v14, %v3312_v38  ;;  %v1640_v58 = vmul.f32 %v5040_v45, %v1511_v35  ;;  %v2926_v61 = vadd.f32 %v2798_v31, %v2539_v46  ;;  %v2412_v63 = vmul.f32 %v5050_v57, %v2283_v39  ;;  %v1513_v35 = vld [vmem:[#allocation2 + $0x11] sm:$0x1]  ;;  %v2285_v39 = vld [vmem:[#allocation2 + $0x21] sm:$0x1] }
  0xe3   : > { %v2154_v62 = vadd.f32 %v2026_v49, %v1767_v48  ;;  %v2799_v0 = vmul.f32 %v5052_v59, %v2670_v42  ;;  %v3186_v5 = vmul.f32 %v5061_v8, %v3057_v50  ;;  %v1381_v7 = vadd.f32 %v1253_v44, %v994_v56  ;;  %v2672_v42 = vld [vmem:[#allocation2 + $0x22] sm:$0x1]  ;;  %v3059_v50 = vld [vmem:[#allocation2 + $0x32] sm:$0x1] }
  0xe4   : > { %v4086_v4 = vadd.f32 %v3958_v26, %v3699_v53  ;;  %v865_v11 = vmul.f32 %v5028_v37, %v736_v52  ;;  %v3313_v12 = vadd.f32 %v3185_v32, %v2926_v61  ;;  %v3573_v14 = vmul.f32 %v5055_v2, %v3444_v55  ;;  %v738_v52 = vld [vmem:[#allocation2 + $0x12] sm:$0x1]  ;;  %v3446_v55 = vld [vmem:[#allocation2 + $0x33] sm:$0x1] }
  0xe5   : > { %v2540_v13 = vadd.f32 %v2412_v63, %v2154_v62  ;;  %v1254_v17 = vmul.f32 %v5037_v41, %v1125_v60  ;;  %v1768_v18 = vadd.f32 %v1640_v58, %v1381_v7  ;;  %v2027_v19 = vmul.f32 %v5046_v51, %v1898_v1  ;;  %v1127_v60 = vld [vmem:[#allocation2 + $0x13] sm:$0x1]  ;;  %v3833_v1 = vld [vmem:[#allocation2 + $0x34] sm:$0x1]  ;;  %v2286_v7 = vld [vmem:[#allocation2 + $0x22] sm:$0x1] }
  0xe6   : > { %4214 = vst.msk [vmem:[%s4658_s13 + $0xa] sm:$0x1] %vm326_vm0, %v4086_v4  ;;  %v995_v20 = vadd.f32 %v5035_v40, %v865_v11  ;;  %v1641_v21 = vmul.f32 %v5040_v45, %v1512_v3  ;;  %v3700_v24 = vadd.f32 %v3572_v47, %v3313_v12  ;;  %v3960_v26 = vmul.f32 %v5064_v10, %v3831_v6  ;;  %v1900_v3 = vld [vmem:[#allocation2 + $0x21] sm:$0x1] }
  0xe7   : > { %v2927_v25 = vadd.f32 %v2799_v0, %v2540_v13  ;;  %v2413_v27 = vmul.f32 %v5050_v57, %v2284_v9  ;;  %v2155_v30 = vadd.f32 %v2027_v19, %v1768_v18  ;;  %v2800_v31 = vmul.f32 %v5052_v59, %v2671_v15  ;;  %v2673_v9 = vld [vmem:[#allocation2 + $0x23] sm:$0x1] }
  0xe8   : > { %v3187_v32 = vmul.f32 %v5061_v8, %v3058_v16  ;;  %v1382_v34 = vadd.f32 %v1254_v17, %v995_v20  ;;  %v4087_v36 = vadd.f32 %v3959_v54, %v3700_v24  ;;  %v866_v43 = vmul.f32 %v5028_v37, %v737_v22  ;;  %v1514_v16 = vld [vmem:[#allocation2 + $0x14] sm:$0x1]  ;;  %v1901_v17 = vld [vmem:[#allocation2 + $0x24] sm:$0x1] }
  0xe9   : > { %v3314_v38 = vadd.f32 %v3186_v5, %v2927_v25  ;;  %v1255_v44 = vmul.f32 %v5037_v41, %v1126_v23  ;;  %v2541_v46 = vadd.f32 %v2413_v27, %v2155_v30  ;;  %v3574_v47 = vmul.f32 %v5055_v2, %v3445_v28  ;;  %v754_v22 = vld [vmem:[#allocation2 + $0x24] sm:$0x1]  ;;  %v1143_v23 = vld [vmem:[#allocation2 + $0x25] sm:$0x1]  ;;  %v3060_v28 = vld [vmem:[#allocation2 + $0x33] sm:$0x1] }
  0xea   : > { %v1769_v48 = vadd.f32 %v1641_v21, %v1382_v34  ;;  %v2028_v49 = vmul.f32 %v5046_v51, %v1899_v29  ;;  %4215 = vst.msk [vmem:[%s4658_s13 + $0xb] sm:$0x1] %vm326_vm0, %v4087_v36  ;;  %v3961_v54 = vmul.f32 %v5064_v10, %v3832_v33  ;;  %v996_v56 = vadd.f32 %v5035_v40, %v866_v43  ;;  %v3447_v29 = vld [vmem:[#allocation2 + $0x34] sm:$0x1] }
  0xeb   : > { %v3701_v53 = vadd.f32 %v3573_v14, %v3314_v38  ;;  %v1642_v58 = vmul.f32 %v5040_v45, %v1513_v35  ;;  %v2928_v61 = vadd.f32 %v2800_v31, %v2541_v46  ;;  %v2414_v63 = vmul.f32 %v5050_v57, %v2285_v39  ;;  %v3834_v31 = vld [vmem:[#allocation2 + $0x35] sm:$0x1]  ;;  %v2287_v35 = vld [vmem:[#allocation2 + $0x25] sm:$0x1]  ;;  %v2674_v39 = vld [vmem:[#allocation2 + $0x26] sm:$0x1] }
  0xec   : > { %v2156_v62 = vadd.f32 %v2028_v49, %v1769_v48  ;;  %v2801_v0 = vmul.f32 %v5052_v59, %v2672_v42  ;;  %v3188_v5 = vmul.f32 %v5061_v8, %v3059_v50  ;;  %v1383_v6 = vadd.f32 %v1255_v44, %v996_v56  ;;  %v1530_v44 = vld [vmem:[#allocation2 + $0x26] sm:$0x1]  ;;  %v1917_v50 = vld [vmem:[#allocation2 + $0x36] sm:$0x1] }
  0xed   : > { %v4088_v4 = vadd.f32 %v3960_v26, %v3701_v53  ;;  %v867_v11 = vmul.f32 %v5028_v37, %v738_v52  ;;  %v3315_v12 = vadd.f32 %v3187_v32, %v2928_v61  ;;  %v3575_v14 = vmul.f32 %v5055_v2, %v3446_v55  ;;  %v770_v52 = vld [vmem:[#allocation2 + $0x36] sm:$0x1] }
  0xee   : > { %v2542_v13 = vadd.f32 %v2414_v63, %v2156_v62  ;;  %v1256_v15 = vmul.f32 %v5037_v41, %v1127_v60  ;;  %v3962_v18 = vmul.f32 %v5064_v10, %v3833_v1  ;;  %v1770_v19 = vadd.f32 %v1642_v58, %v1383_v6  ;;  %v3061_v56 = vld [vmem:[#allocation2 + $0x36] sm:$0x1]  ;;  %v1159_v60 = vld [vmem:[#allocation2 + $0x37] sm:$0x1] }
  0xef   : > { %4216 = vst.msk [vmem:[%s4658_s13 + $0xc] sm:$0x1] %vm326_vm0, %v4088_v4  ;;  %v2029_v20 = vmul.f32 %v5046_v51, %v1900_v3  ;;  %v997_v21 = vadd.f32 %v5035_v40, %v867_v11  ;;  %v3702_v24 = vadd.f32 %v3574_v47, %v3315_v12  ;;  %v2415_v26 = vmul.f32 %v5050_v57, %v2286_v7  ;;  %v3835_v4 = vld [vmem:[#allocation2 + $0x38] sm:$0x1]  ;;  %v2303_v7 = vld [vmem:[#allocation2 + $0x37] sm:$0x1] }
  0xf0   : > { %v2929_v25 = vadd.f32 %v2801_v0, %v2542_v13  ;;  %v2802_v27 = vmul.f32 %v5052_v59, %v2673_v9  ;;  %v1643_v33 = vmul.f32 %v5040_v45, %v1514_v16  ;;  %v2030_v34 = vmul.f32 %v5046_v51, %v1901_v17  ;;  %v3448_v0 = vld [vmem:[#allocation2 + $0x37] sm:$0x1]  ;;  %v1933_v16 = vld [vmem:[#allocation2 + $0x48] sm:$0x1] }
  0xf1   : > { %v2157_v30 = vadd.f32 %v2029_v20, %v1770_v19  ;;  %v1384_v32 = vadd.f32 %v1256_v15, %v997_v21  ;;  %v4089_v36 = vadd.f32 %v3961_v54, %v3702_v24  ;;  %v883_v42 = vmul.f32 %v5028_v37, %v754_v22  ;;  %v1546_v15 = vld [vmem:[#allocation2 + $0x38] sm:$0x1]  ;;  %v786_v20 = vld [vmem:[#allocation2 + $0x48] sm:$0x1]  ;;  %v1175_v21 = vld [vmem:[#allocation2 + $0x49] sm:$0x1] }
  0xf2   : > { %v3316_v38 = vadd.f32 %v3188_v5, %v2929_v25  ;;  %v1272_v43 = vmul.f32 %v5037_v41, %v1143_v23  ;;  %v3189_v47 = vmul.f32 %v5061_v8, %v3060_v28  ;;  %v3576_v48 = vmul.f32 %v5055_v2, %v3447_v29  ;;  %v3464_v29 = vld [vmem:[#allocation2 + $0x49] sm:$0x1] }
  0xf3   : > { %v2543_v46 = vadd.f32 %v2415_v26, %v2157_v30  ;;  %v1771_v49 = vadd.f32 %v1643_v33, %v1384_v32  ;;  %4217 = vst.msk [vmem:[%s4658_s13 + $0xd] sm:$0x1] %vm326_vm0, %v4089_v36  ;;  %v3963_v54 = vmul.f32 %v5064_v10, %v3834_v31  ;;  %v2416_v55 = vmul.f32 %v5050_v57, %v2287_v35  ;;  %v2690_v26 = vld [vmem:[#allocation2 + $0x38] sm:$0x1]  ;;  %v2319_v33 = vld [vmem:[#allocation2 + $0x49] sm:$0x1] }
  0xf4   : > { %v3703_v53 = vadd.f32 %v3575_v14, %v3316_v38  ;;  %v1013_v58 = vadd.f32 %v5035_v40, %v883_v42  ;;  %v2803_v63 = vmul.f32 %v5052_v59, %v2674_v39  ;;  %v1659_v1 = vmul.f32 %v5040_v45, %v1530_v44  ;;  %v2706_v36 = vld [vmem:[#allocation2 + $0x4a] sm:$0x1] }
  0xf5   : > { %v2930_v61 = vadd.f32 %v2802_v27, %v2543_v46  ;;  %v2158_v62 = vadd.f32 %v2030_v34, %v1771_v49  ;;  %v2046_v6 = vmul.f32 %v5046_v51, %v1917_v50  ;;  %v899_v9 = vmul.f32 %v5028_v37, %v770_v52  ;;  %v3077_v27 = vld [vmem:[#allocation2 + $0x48] sm:$0x1]  ;;  %v1562_v42 = vld [vmem:[#allocation2 + $0x4a] sm:$0x1]  ;;  %v802_v49 = vld [vmem:[#allocation2 + $0x5a] sm:$0x1] }
  0xf6   : > { %v4090_v3 = vadd.f32 %v3962_v18, %v3703_v53  ;;  %v1400_v5 = vadd.f32 %v1272_v43, %v1013_v58  ;;  %v3190_v13 = vmul.f32 %v5061_v8, %v3061_v56  ;;  %v1288_v14 = vmul.f32 %v5037_v41, %v1159_v60  ;;  %v1191_v56 = vld [vmem:[#allocation2 + $0x5b] sm:$0x1]  ;;  %v3851_v60 = vld [vmem:[#allocation2 + $0x4a] sm:$0x1] }
  0xf7   : > { %v3317_v11 = vadd.f32 %v3189_v47, %v2930_v61  ;;  %v2544_v12 = vadd.f32 %v2416_v55, %v2158_v62  ;;  %v3577_v17 = vmul.f32 %v5055_v2, %v3448_v0  ;;  %v1029_v19 = vadd.f32 %v5035_v40, %v899_v9 }
  0xf8   : > { %4218 = vst.msk [vmem:[%s4658_s13 + $0xe] sm:$0x1] %vm326_vm0, %v4090_v3  ;;  %v1787_v18 = vadd.f32 %v1659_v1, %v1400_v5  ;;  %v3964_v24 = vmul.f32 %v5064_v10, %v3835_v4  ;;  %v2432_v25 = vmul.f32 %v5050_v57, %v2303_v7  ;;  %v1675_v31 = vmul.f32 %v5040_v45, %v1546_v15  ;;  %v3867_v3 = vld [vmem:[#allocation2 + $0x5c] sm:$0x1]  ;;  %v1965_v15 = vld [vmem:[#allocation2 + $0x6c] sm:$0x1] }
  0xf9   : > { %v3704_v22 = vadd.f32 %v3576_v48, %v3317_v11  ;;  %v2931_v23 = vadd.f32 %v2803_v63, %v2544_v12  ;;  %v1416_v30 = vadd.f32 %v1288_v14, %v1029_v19  ;;  %v2062_v32 = vmul.f32 %v5046_v51, %v1933_v16  ;;  %v1949_v48 = vld [vmem:[#allocation2 + $0x5a] sm:$0x1]  ;;  %v3480_v63 = vld [vmem:[#allocation2 + $0x5b] sm:$0x1]  ;;  %v1578_v14 = vld [vmem:[#allocation2 + $0x5c] sm:$0x1] }
  0xfa   : > { %v2174_v28 = vadd.f32 %v2046_v6, %v1787_v18  ;;  %v915_v38 = vmul.f32 %v5028_v37, %v786_v20  ;;  %v1304_v39 = vmul.f32 %v5037_v41, %v1175_v21  ;;  %v2819_v44 = vmul.f32 %v5052_v59, %v2690_v26  ;;  %v2335_v6 = vld [vmem:[#allocation2 + $0x5b] sm:$0x1]  ;;  %v818_v20 = vld [vmem:[#allocation2 + $0x6c] sm:$0x1]  ;;  %v1207_v21 = vld [vmem:[#allocation2 + $0x6d] sm:$0x1] }
  0xfb   : > { %v4091_v34 = vadd.f32 %v3963_v54, %v3704_v22  ;;  %v3318_v35 = vadd.f32 %v3190_v13, %v2931_v23  ;;  %v3206_v46 = vmul.f32 %v5061_v8, %v3077_v27  ;;  %v1803_v47 = vadd.f32 %v1675_v31, %v1416_v30  ;;  %v3093_v54 = vld [vmem:[#allocation2 + $0x5a] sm:$0x1]  ;;  %v2722_v26 = vld [vmem:[#allocation2 + $0x5c] sm:$0x1]  ;;  %v3109_v27 = vld [vmem:[#allocation2 + $0x6c] sm:$0x1] }
  0xfc   : > { %v2560_v43 = vadd.f32 %v2432_v25, %v2174_v28  ;;  %v3593_v52 = vmul.f32 %v5055_v2, %v3464_v29  ;;  %v2448_v53 = vmul.f32 %v5050_v57, %v2319_v33  ;;  %v1045_v55 = vadd.f32 %v5035_v40, %v915_v38  ;;  %v3496_v29 = vld [vmem:[#allocation2 + $0x6d] sm:$0x1] }
  0xfd   : > { %4219 = vst.msk [vmem:[%s4658_s13 + $0xf] sm:$0x1] %vm326_vm0, %v4091_v34  ;;  %v3705_v50 = vadd.f32 %v3577_v17, %v3318_v35  ;;  %v2190_v61 = vadd.f32 %v2062_v32, %v1803_v47  ;;  %v2835_v62 = vmul.f32 %v5052_v59, %v2706_v36  ;;  %v1691_v0 = vmul.f32 %v5040_v45, %v1562_v42  ;;  %v2351_v33 = vld [vmem:[#allocation2 + $0x6d] sm:$0x1]  ;;  %v2738_v36 = vld [vmem:[#allocation2 + $0x6e] sm:$0x1] }
  0xfe   : > { %v2947_v58 = vadd.f32 %v2819_v44, %v2560_v43  ;;  %v1432_v4 = vadd.f32 %v1304_v39, %v1045_v55  ;;  %v2078_v5 = vmul.f32 %v5046_v51, %v1949_v48  ;;  %v931_v7 = vmul.f32 %v5028_v37, %v802_v49  ;;  %v1594_v42 = vld [vmem:[#allocation2 + $0x6e] sm:$0x1]  ;;  %v1981_v48 = vld [vmem:[#allocation2 + $0x7e] sm:$0x1] }
  0xff   : > { %v4092_v1 = vadd.f32 %v3964_v24, %v3705_v50  ;;  %v2576_v11 = vadd.f32 %v2448_v53, %v2190_v61  ;;  %v3222_v12 = vmul.f32 %v5061_v8, %v3093_v54  ;;  %v1320_v13 = vmul.f32 %v5037_v41, %v1191_v56  ;;  %v834_v49 = vld [vmem:[#allocation2 + $0x7e] sm:$0x1]  ;;  %v1223_v56 = vld [vmem:[#allocation2 + $0x7f] sm:$0x1] }
 0x100   : > { %v3334_v9 = vadd.f32 %v3206_v46, %v2947_v58  ;;  %v3980_v16 = vmul.f32 %v5064_v10, %v3851_v60  ;;  %v3609_v17 = vmul.f32 %v5055_v2, %v3480_v63  ;;  %v1819_v18 = vadd.f32 %v1691_v0, %v1432_v4  ;;  %v3125_v54 = vld [vmem:[#allocation2 + $0x7e] sm:$0x1]  ;;  %v3883_v60 = vld [vmem:[#allocation2 + $0x6e] sm:$0x1]  ;;  %v3512_v63 = vld [vmem:[#allocation2 + $0x7f] sm:$0x1] }
 0x101   : > { %4220 = vst.msk [vmem:[%s4658_s13 + $0x10] sm:$0x1] %vm326_vm0, %v4092_v1  ;;  %v1061_v19 = vadd.f32 %v5035_v40, %v931_v7  ;;  %v2963_v23 = vadd.f32 %v2835_v62, %v2576_v11  ;;  %v3996_v24 = vmul.f32 %v5064_v10, %v3867_v3  ;;  %v2464_v25 = vmul.f32 %v5050_v57, %v2335_v6  ;;  %v3899_v3 = vld [vmem:[#allocation2 + $0x80] sm:$0x1]  ;;  %v2367_v6 = vld [vmem:[#allocation2 + $0x7f] sm:$0x1] }
 0x102   : > { %v3721_v22 = vadd.f32 %v3593_v52, %v3334_v9  ;;  %v2206_v28 = vadd.f32 %v2078_v5, %v1819_v18  ;;  %v1707_v31 = vmul.f32 %v5040_v45, %v1578_v14  ;;  %v2094_v32 = vmul.f32 %v5046_v51, %v1965_v15  ;;  %v1610_v14 = vld [vmem:[#allocation2 + $0x80] sm:$0x1]  ;;  %v1997_v15 = vld [vmem:[#allocation2 + $0x90] sm:$0x1] }
 0x103   : > { %v1448_v30 = vadd.f32 %v1320_v13, %v1061_v19  ;;  %v3350_v35 = vadd.f32 %v3222_v12, %v2963_v23  ;;  %v947_v38 = vmul.f32 %v5028_v37, %v818_v20  ;;  %v1336_v39 = vmul.f32 %v5037_v41, %v1207_v21  ;;  %v2754_v19 = vld [vmem:[#allocation2 + $0x80] sm:$0x1]  ;;  %v739_v21 = vld [vmem:[#allocation2 + $0x13] sm:$0x1] }
 0x104   : > { %v4108_v34 = vadd.f32 %v3980_v16, %v3721_v22  ;;  %v2592_v43 = vadd.f32 %v2464_v25, %v2206_v28  ;;  %v2851_v44 = vmul.f32 %v5052_v59, %v2722_v26  ;;  %v3238_v46 = vmul.f32 %v5061_v8, %v3109_v27  ;;  %v3141_v26 = vld [vmem:[#allocation2 + $0x90] sm:$0x1]  ;;  %v2383_v27 = vld [vmem:[#allocation2 + $0x91] sm:$0x1] }
 0x105   : > { %v1835_v47 = vadd.f32 %v1707_v31, %v1448_v30  ;;  %v3737_v50 = vadd.f32 %v3609_v17, %v3350_v35  ;;  %v3625_v52 = vmul.f32 %v5055_v2, %v3496_v29  ;;  %v2480_v53 = vmul.f32 %v5050_v57, %v2351_v33  ;;  %v3528_v29 = vld [vmem:[#allocation2 + $0x91] sm:$0x1]  ;;  %v1128_v33 = vld [vmem:[#allocation2 + $0x14] sm:$0x1] }
 0x106   : > { %4236 = vst.msk [vmem:[%s4658_s13 + $0x20] sm:$0x1] %vm326_vm0, %v4108_v34  ;;  %v1077_v55 = vadd.f32 %v5035_v40, %v947_v38  ;;  %v2979_v58 = vadd.f32 %v2851_v44, %v2592_v43  ;;  %v2867_v62 = vmul.f32 %v5052_v59, %v2738_v36  ;;  %v1723_v0 = vmul.f32 %v5040_v45, %v1594_v42  ;;  %v3915_v38 = vld [vmem:[#allocation2 + $0x92] sm:$0x1] }
 0x107   : > { %v2222_v61 = vadd.f32 %v2094_v32, %v1835_v47  ;;  %v4124_v1 = vadd.f32 %v3996_v24, %v3737_v50  ;;  %v2110_v5 = vmul.f32 %v5046_v51, %v1981_v48  ;;  %v963_v7 = vmul.f32 %v5028_v37, %v834_v49  ;;  %v1515_v48 = vld [vmem:[#allocation2 + $0x15] sm:$0x1]  ;;  %v740_v49 = vld [vmem:[#allocation2 + $0x14] sm:$0x1] }
 0x108   : > { %v1464_v4 = vadd.f32 %v1336_v39, %v1077_v55  ;;  %v3366_v9 = vadd.f32 %v3238_v46, %v2979_v58  ;;  %v3254_v12 = vmul.f32 %v5061_v8, %v3125_v54  ;;  %v1352_v13 = vmul.f32 %v5037_v41, %v1223_v56  ;;  %v2770_v39 = vld [vmem:[#allocation2 + $0x92] sm:$0x1]  ;;  %v3544_v54 = vld [vmem:[#allocation2 + $0xa3] sm:$0x1] }
 0x109   : > { %v2608_v11 = vadd.f32 %v2480_v53, %v2222_v61  ;;  %4252 = vst.msk [vmem:[%s4658_s13 + $0x30] sm:$0x1] %vm326_vm0, %v4124_v1  ;;  %v4012_v16 = vmul.f32 %v5064_v10, %v3883_v60  ;;  %v3641_v17 = vmul.f32 %v5055_v2, %v3512_v63  ;;  %v1093_v20 = vadd.f32 %v5035_v40, %v963_v7  ;;  %v3157_v53 = vld [vmem:[#allocation2 + $0xa2] sm:$0x1]  ;;  %v1902_v63 = vld [vmem:[#allocation2 + $0x25] sm:$0x1] }
 0x10a   : > { %v1851_v18 = vadd.f32 %v1723_v0, %v1464_v4  ;;  %v3753_v22 = vadd.f32 %v3625_v52, %v3366_v9  ;;  %v4028_v24 = vmul.f32 %v5064_v10, %v3899_v3  ;;  %v2496_v25 = vmul.f32 %v5050_v57, %v2367_v6  ;;  %v1129_v0 = vld [vmem:[#allocation2 + $0x15] sm:$0x1]  ;;  %v3931_v3 = vld [vmem:[#allocation2 + $0xa4] sm:$0x1]  ;;  %v2288_v6 = vld [vmem:[#allocation2 + $0x26] sm:$0x1] }
 0x10b   : > { %v2995_v23 = vadd.f32 %v2867_v62, %v2608_v11  ;;  %v1480_v30 = vadd.f32 %v1352_v13, %v1093_v20  ;;  %v1739_v31 = vmul.f32 %v5040_v45, %v1610_v14  ;;  %v2126_v32 = vmul.f32 %v5046_v51, %v1997_v15  ;;  %v2675_v14 = vld [vmem:[#allocation2 + $0x27] sm:$0x1]  ;;  %v1516_v15 = vld [vmem:[#allocation2 + $0x16] sm:$0x1] }
 0x10c   : > { %v2238_v28 = vadd.f32 %v2110_v5, %v1851_v18  ;;  %v4140_v34 = vadd.f32 %v4012_v16, %v3753_v22  ;;  %v2883_v36 = vmul.f32 %v5052_v59, %v2754_v19  ;;  %v868_v42 = vmul.f32 %v5028_v37, %v739_v21  ;;  %v3062_v18 = vld [vmem:[#allocation2 + $0x37] sm:$0x1]  ;;  %v741_v21 = vld [vmem:[#allocation2 + $0x15] sm:$0x1] }
 0x10d   : > { %v3382_v35 = vadd.f32 %v3254_v12, %v2995_v23  ;;  %v3270_v44 = vmul.f32 %v5061_v8, %v3141_v26  ;;  %v1867_v46 = vadd.f32 %v1739_v31, %v1480_v30  ;;  %v2512_v47 = vmul.f32 %v5050_v57, %v2383_v27  ;;  %v3449_v26 = vld [vmem:[#allocation2 + $0x38] sm:$0x1]  ;;  %v1903_v27 = vld [vmem:[#allocation2 + $0x26] sm:$0x1]  ;;  %v3836_v30 = vld [vmem:[#allocation2 + $0x39] sm:$0x1] }
 0x10e   : > { %v2624_v43 = vadd.f32 %v2496_v25, %v2238_v28  ;;  %4268 = vst.msk [vmem:[%s4658_s13 + $0x40] sm:$0x1] %vm326_vm0, %v4140_v34  ;;  %v3657_v52 = vmul.f32 %v5055_v2, %v3528_v29  ;;  %v998_v55 = vadd.f32 %v5035_v40, %v868_v42  ;;  %v1257_v56 = vmul.f32 %v5037_v41, %v1128_v33  ;;  %v1130_v33 = vld [vmem:[#allocation2 + $0x16] sm:$0x1] }
 0x10f   : > { %v3769_v50 = vadd.f32 %v3641_v17, %v3382_v35  ;;  %v4044_v60 = vmul.f32 %v5064_v10, %v3915_v38  ;;  %v2254_v61 = vadd.f32 %v2126_v32, %v1867_v46  ;;  %v2899_v62 = vmul.f32 %v5052_v59, %v2770_v39  ;;  %v2289_v38 = vld [vmem:[#allocation2 + $0x27] sm:$0x1]  ;;  %v2676_v39 = vld [vmem:[#allocation2 + $0x28] sm:$0x1] }
 0x110   : > { %v3011_v58 = vadd.f32 %v2883_v36, %v2624_v43  ;;  %v1385_v4 = vadd.f32 %v1257_v56, %v998_v55  ;;  %v1644_v5 = vmul.f32 %v5040_v45, %v1515_v48  ;;  %v869_v7 = vmul.f32 %v5028_v37, %v740_v49  ;;  %v1517_v48 = vld [vmem:[#allocation2 + $0x17] sm:$0x1]  ;;  %v742_v49 = vld [vmem:[#allocation2 + $0x16] sm:$0x1] }
 0x111   : > { %v4156_v1 = vadd.f32 %v4028_v24, %v3769_v50  ;;  %v2640_v11 = vadd.f32 %v2512_v47, %v2254_v61  ;;  %v3286_v12 = vmul.f32 %v5061_v8, %v3157_v53  ;;  %v3673_v13 = vmul.f32 %v5055_v2, %v3544_v54  ;;  %v3063_v53 = vld [vmem:[#allocation2 + $0x38] sm:$0x1]  ;;  %v3450_v54 = vld [vmem:[#allocation2 + $0x39] sm:$0x1] }
 0x112   : > { %v3398_v9 = vadd.f32 %v3270_v44, %v3011_v58  ;;  %v1772_v16 = vadd.f32 %v1644_v5, %v1385_v4  ;;  %v2031_v17 = vmul.f32 %v5046_v51, %v1902_v63  ;;  %v999_v19 = vadd.f32 %v5035_v40, %v869_v7  ;;  %v1904_v63 = vld [vmem:[#allocation2 + $0x27] sm:$0x1] }
 0x113   : > { %4284 = vst.msk [vmem:[%s4658_s13 + $0x50] sm:$0x1] %vm326_vm0, %v4156_v1  ;;  %v1258_v20 = vmul.f32 %v5037_v41, %v1129_v0  ;;  %v3027_v23 = vadd.f32 %v2899_v62, %v2640_v11  ;;  %v4060_v24 = vmul.f32 %v5064_v10, %v3931_v3  ;;  %v2417_v25 = vmul.f32 %v5050_v57, %v2288_v6  ;;  %v1131_v0 = vld [vmem:[#allocation2 + $0x17] sm:$0x1]  ;;  %v3837_v3 = vld [vmem:[#allocation2 + $0x3a] sm:$0x1] }
 0x114   : > { %v3785_v22 = vadd.f32 %v3657_v52, %v3398_v9  ;;  %v2159_v28 = vadd.f32 %v2031_v17, %v1772_v16  ;;  %v2804_v29 = vmul.f32 %v5052_v59, %v2675_v14  ;;  %v1645_v32 = vmul.f32 %v5040_v45, %v1516_v15  ;;  %v2290_v6 = vld [vmem:[#allocation2 + $0x28] sm:$0x1]  ;;  %v2677_v14 = vld [vmem:[#allocation2 + $0x29] sm:$0x1]  ;;  %v1518_v15 = vld [vmem:[#allocation2 + $0x18] sm:$0x1] }
 0x115   : > { %v1386_v31 = vadd.f32 %v1258_v20, %v999_v19  ;;  %v3414_v35 = vadd.f32 %v3286_v12, %v3027_v23  ;;  %v3191_v36 = vmul.f32 %v5061_v8, %v3062_v18  ;;  %v870_v42 = vmul.f32 %v5028_v37, %v741_v21  ;;  %v3064_v18 = vld [vmem:[#allocation2 + $0x39] sm:$0x1]  ;;  %v743_v21 = vld [vmem:[#allocation2 + $0x17] sm:$0x1] }
 0x116   : > { %v4172_v34 = vadd.f32 %v4044_v60, %v3785_v22  ;;  %v2545_v43 = vadd.f32 %v2417_v25, %v2159_v28  ;;  %v3578_v44 = vmul.f32 %v5055_v2, %v3449_v26  ;;  %v2032_v47 = vmul.f32 %v5046_v51, %v1903_v27  ;;  %v3451_v26 = vld [vmem:[#allocation2 + $0x3a] sm:$0x1]  ;;  %v1905_v27 = vld [vmem:[#allocation2 + $0x28] sm:$0x1] }
 0x117   : > { %v1773_v46 = vadd.f32 %v1645_v32, %v1386_v31  ;;  %v3801_v50 = vadd.f32 %v3673_v13, %v3414_v35  ;;  %v3965_v52 = vmul.f32 %v5064_v10, %v3836_v30  ;;  %v1000_v55 = vadd.f32 %v5035_v40, %v870_v42  ;;  %v3838_v30 = vld [vmem:[#allocation2 + $0x3b] sm:$0x1] }
 0x118   : > { %4300 = vst.msk [vmem:[%s4658_s13 + $0x60] sm:$0x1] %vm326_vm0, %v4172_v34  ;;  %v1259_v56 = vmul.f32 %v5037_v41, %v1130_v33  ;;  %v2932_v58 = vadd.f32 %v2804_v29, %v2545_v43  ;;  %v2418_v61 = vmul.f32 %v5050_v57, %v2289_v38  ;;  %v2805_v62 = vmul.f32 %v5052_v59, %v2676_v39  ;;  %v1132_v33 = vld [vmem:[#allocation2 + $0x18] sm:$0x1]  ;;  %v2291_v38 = vld [vmem:[#allocation2 + $0x29] sm:$0x1] }
 0x119   : > { %v2160_v60 = vadd.f32 %v2032_v47, %v1773_v46  ;;  %v4188_v1 = vadd.f32 %v4060_v24, %v3801_v50  ;;  %v1646_v5 = vmul.f32 %v5040_v45, %v1517_v48  ;;  %v871_v7 = vmul.f32 %v5028_v37, %v742_v49  ;;  %v2678_v39 = vld [vmem:[#allocation2 + $0x2a] sm:$0x1]  ;;  %v1519_v48 = vld [vmem:[#allocation2 + $0x19] sm:$0x1]  ;;  %v744_v49 = vld [vmem:[#allocation2 + $0x18] sm:$0x1] }
 0x11a   : > { %v1387_v4 = vadd.f32 %v1259_v56, %v1000_v55  ;;  %v3319_v9 = vadd.f32 %v3191_v36, %v2932_v58  ;;  %v3192_v12 = vmul.f32 %v5061_v8, %v3063_v53  ;;  %v3579_v13 = vmul.f32 %v5055_v2, %v3450_v54  ;;  %v3065_v53 = vld [vmem:[#allocation2 + $0x3a] sm:$0x1]  ;;  %v3452_v54 = vld [vmem:[#allocation2 + $0x3b] sm:$0x1] }
 0x11b   : > { %v2546_v11 = vadd.f32 %v2418_v61, %v2160_v60  ;;  %4316 = vst.msk [vmem:[%s4658_s13 + $0x70] sm:$0x1] %vm326_vm0, %v4188_v1  ;;  %v2033_v17 = vmul.f32 %v5046_v51, %v1904_v63  ;;  %v1001_v19 = vadd.f32 %v5035_v40, %v871_v7  ;;  %v1260_v20 = vmul.f32 %v5037_v41, %v1131_v0  ;;  %v1906_v63 = vld [vmem:[#allocation2 + $0x29] sm:$0x1]  ;;  %v1133_v0 = vld [vmem:[#allocation2 + $0x19] sm:$0x1] }
 0x11c   : > { %v1774_v16 = vadd.f32 %v1646_v5, %v1387_v4  ;;  %v3706_v22 = vadd.f32 %v3578_v44, %v3319_v9  ;;  %v3966_v24 = vmul.f32 %v5064_v10, %v3837_v3  ;;  %v2419_v25 = vmul.f32 %v5050_v57, %v2290_v6  ;;  %v3839_v3 = vld [vmem:[#allocation2 + $0x3c] sm:$0x1]  ;;  %v2292_v6 = vld [vmem:[#allocation2 + $0x2a] sm:$0x1] }
 0x11d   : > { %v2933_v23 = vadd.f32 %v2805_v62, %v2546_v11  ;;  %v2806_v29 = vmul.f32 %v5052_v59, %v2677_v14  ;;  %v1388_v31 = vadd.f32 %v1260_v20, %v1001_v19  ;;  %v1647_v32 = vmul.f32 %v5040_v45, %v1518_v15  ;;  %v2679_v14 = vld [vmem:[#allocation2 + $0x2b] sm:$0x1]  ;;  %v1520_v15 = vld [vmem:[#allocation2 + $0x1a] sm:$0x1] }
 0x11e   : > { %v2161_v28 = vadd.f32 %v2033_v17, %v1774_v16  ;;  %v4093_v34 = vadd.f32 %v3965_v52, %v3706_v22  ;;  %v3193_v36 = vmul.f32 %v5061_v8, %v3064_v18  ;;  %v872_v42 = vmul.f32 %v5028_v37, %v743_v21  ;;  %v3066_v18 = vld [vmem:[#allocation2 + $0x3b] sm:$0x1]  ;;  %v745_v21 = vld [vmem:[#allocation2 + $0x19] sm:$0x1] }
 0x11f   : > { %v3320_v35 = vadd.f32 %v3192_v12, %v2933_v23  ;;  %v3580_v44 = vmul.f32 %v5055_v2, %v3451_v26  ;;  %v1775_v46 = vadd.f32 %v1647_v32, %v1388_v31  ;;  %v2034_v47 = vmul.f32 %v5046_v51, %v1905_v27  ;;  %v3453_v26 = vld [vmem:[#allocation2 + $0x3c] sm:$0x1]  ;;  %v1907_v27 = vld [vmem:[#allocation2 + $0x2a] sm:$0x1] }
 0x120   : > { %v2547_v43 = vadd.f32 %v2419_v25, %v2161_v28  ;;  %4221 = vst.msk [vmem:[%s4658_s13 + $0x11] sm:$0x1] %vm326_vm0, %v4093_v34  ;;  %v3967_v52 = vmul.f32 %v5064_v10, %v3838_v30  ;;  %v1002_v55 = vadd.f32 %v5035_v40, %v872_v42  ;;  %v1261_v56 = vmul.f32 %v5037_v41, %v1132_v33  ;;  %v3840_v30 = vld [vmem:[#allocation2 + $0x3d] sm:$0x1]  ;;  %v1134_v33 = vld [vmem:[#allocation2 + $0x1a] sm:$0x1] }
 0x121   : > { %v3707_v50 = vadd.f32 %v3579_v13, %v3320_v35  ;;  %v2162_v60 = vadd.f32 %v2034_v47, %v1775_v46  ;;  %v2420_v61 = vmul.f32 %v5050_v57, %v2291_v38  ;;  %v2807_v62 = vmul.f32 %v5052_v59, %v2678_v39  ;;  %v2293_v38 = vld [vmem:[#allocation2 + $0x2b] sm:$0x1]  ;;  %v2680_v39 = vld [vmem:[#allocation2 + $0x2c] sm:$0x1] }
 0x122   : > { %v2934_v58 = vadd.f32 %v2806_v29, %v2547_v43  ;;  %v1389_v4 = vadd.f32 %v1261_v56, %v1002_v55  ;;  %v1648_v5 = vmul.f32 %v5040_v45, %v1519_v48  ;;  %v873_v7 = vmul.f32 %v5028_v37, %v744_v49  ;;  %v1521_v48 = vld [vmem:[#allocation2 + $0x1b] sm:$0x1]  ;;  %v746_v49 = vld [vmem:[#allocation2 + $0x1a] sm:$0x1] }
 0x123   : > { %v4094_v1 = vadd.f32 %v3966_v24, %v3707_v50  ;;  %v2548_v11 = vadd.f32 %v2420_v61, %v2162_v60  ;;  %v3194_v12 = vmul.f32 %v5061_v8, %v3065_v53  ;;  %v3581_v13 = vmul.f32 %v5055_v2, %v3452_v54  ;;  %v3067_v53 = vld [vmem:[#allocation2 + $0x3c] sm:$0x1]  ;;  %v3454_v54 = vld [vmem:[#allocation2 + $0x3d] sm:$0x1] }
 0x124   : > { %v3321_v9 = vadd.f32 %v3193_v36, %v2934_v58  ;;  %v1776_v16 = vadd.f32 %v1648_v5, %v1389_v4  ;;  %v2035_v17 = vmul.f32 %v5046_v51, %v1906_v63  ;;  %v1003_v19 = vadd.f32 %v5035_v40, %v873_v7  ;;  %v1908_v63 = vld [vmem:[#allocation2 + $0x2b] sm:$0x1] }
 0x125   : > { %4222 = vst.msk [vmem:[%s4658_s13 + $0x12] sm:$0x1] %vm326_vm0, %v4094_v1  ;;  %v1262_v20 = vmul.f32 %v5037_v41, %v1133_v0  ;;  %v2935_v23 = vadd.f32 %v2807_v62, %v2548_v11  ;;  %v3968_v24 = vmul.f32 %v5064_v10, %v3839_v3  ;;  %v2421_v25 = vmul.f32 %v5050_v57, %v2292_v6  ;;  %v1135_v0 = vld [vmem:[#allocation2 + $0x1b] sm:$0x1]  ;;  %v3841_v3 = vld [vmem:[#allocation2 + $0x3e] sm:$0x1] }
 0x126   : > { %v3708_v22 = vadd.f32 %v3580_v44, %v3321_v9  ;;  %v2163_v28 = vadd.f32 %v2035_v17, %v1776_v16  ;;  %v2808_v29 = vmul.f32 %v5052_v59, %v2679_v14  ;;  %v1649_v32 = vmul.f32 %v5040_v45, %v1520_v15  ;;  %v2294_v6 = vld [vmem:[#allocation2 + $0x2c] sm:$0x1]  ;;  %v2681_v14 = vld [vmem:[#allocation2 + $0x2d] sm:$0x1]  ;;  %v1522_v15 = vld [vmem:[#allocation2 + $0x1c] sm:$0x1] }
 0x127   : > { %v1390_v31 = vadd.f32 %v1262_v20, %v1003_v19  ;;  %v3322_v35 = vadd.f32 %v3194_v12, %v2935_v23  ;;  %v3195_v36 = vmul.f32 %v5061_v8, %v3066_v18  ;;  %v874_v42 = vmul.f32 %v5028_v37, %v745_v21  ;;  %v3068_v18 = vld [vmem:[#allocation2 + $0x3d] sm:$0x1]  ;;  %v747_v21 = vld [vmem:[#allocation2 + $0x1b] sm:$0x1] }
 0x128   : > { %v4095_v34 = vadd.f32 %v3967_v52, %v3708_v22  ;;  %v2549_v43 = vadd.f32 %v2421_v25, %v2163_v28  ;;  %v3582_v44 = vmul.f32 %v5055_v2, %v3453_v26  ;;  %v2036_v47 = vmul.f32 %v5046_v51, %v1907_v27  ;;  %v3455_v26 = vld [vmem:[#allocation2 + $0x3e] sm:$0x1]  ;;  %v1909_v27 = vld [vmem:[#allocation2 + $0x2c] sm:$0x1] }
 0x129   : > { %v1777_v46 = vadd.f32 %v1649_v32, %v1390_v31  ;;  %v3709_v50 = vadd.f32 %v3581_v13, %v3322_v35  ;;  %v3969_v52 = vmul.f32 %v5064_v10, %v3840_v30  ;;  %v1004_v55 = vadd.f32 %v5035_v40, %v874_v42  ;;  %v3842_v30 = vld [vmem:[#allocation2 + $0x3f] sm:$0x1] }
 0x12a   : > { %4223 = vst.msk [vmem:[%s4658_s13 + $0x13] sm:$0x1] %vm326_vm0, %v4095_v34  ;;  %v1263_v56 = vmul.f32 %v5037_v41, %v1134_v33  ;;  %v2936_v58 = vadd.f32 %v2808_v29, %v2549_v43  ;;  %v2422_v61 = vmul.f32 %v5050_v57, %v2293_v38  ;;  %v2809_v62 = vmul.f32 %v5052_v59, %v2680_v39  ;;  %v1136_v33 = vld [vmem:[#allocation2 + $0x1c] sm:$0x1]  ;;  %v2295_v38 = vld [vmem:[#allocation2 + $0x2d] sm:$0x1] }
 0x12b   : > { %v2164_v60 = vadd.f32 %v2036_v47, %v1777_v46  ;;  %v4096_v1 = vadd.f32 %v3968_v24, %v3709_v50  ;;  %v1650_v5 = vmul.f32 %v5040_v45, %v1521_v48  ;;  %v875_v7 = vmul.f32 %v5028_v37, %v746_v49  ;;  %v2682_v39 = vld [vmem:[#allocation2 + $0x2e] sm:$0x1]  ;;  %v1523_v48 = vld [vmem:[#allocation2 + $0x1d] sm:$0x1]  ;;  %v748_v49 = vld [vmem:[#allocation2 + $0x1c] sm:$0x1] }
 0x12c   : > { %v1391_v4 = vadd.f32 %v1263_v56, %v1004_v55  ;;  %v3323_v9 = vadd.f32 %v3195_v36, %v2936_v58  ;;  %v3196_v12 = vmul.f32 %v5061_v8, %v3067_v53  ;;  %v3583_v13 = vmul.f32 %v5055_v2, %v3454_v54  ;;  %v3069_v53 = vld [vmem:[#allocation2 + $0x3e] sm:$0x1]  ;;  %v3456_v54 = vld [vmem:[#allocation2 + $0x3f] sm:$0x1] }
 0x12d   : > { %v2550_v11 = vadd.f32 %v2422_v61, %v2164_v60  ;;  %4224 = vst.msk [vmem:[%s4658_s13 + $0x14] sm:$0x1] %vm326_vm0, %v4096_v1  ;;  %v2037_v17 = vmul.f32 %v5046_v51, %v1908_v63  ;;  %v1005_v19 = vadd.f32 %v5035_v40, %v875_v7  ;;  %v1264_v20 = vmul.f32 %v5037_v41, %v1135_v0  ;;  %v1910_v63 = vld [vmem:[#allocation2 + $0x2d] sm:$0x1]  ;;  %v1137_v0 = vld [vmem:[#allocation2 + $0x1d] sm:$0x1] }
 0x12e   : > { %v1778_v16 = vadd.f32 %v1650_v5, %v1391_v4  ;;  %v3710_v22 = vadd.f32 %v3582_v44, %v3323_v9  ;;  %v3970_v24 = vmul.f32 %v5064_v10, %v3841_v3  ;;  %v2423_v25 = vmul.f32 %v5050_v57, %v2294_v6  ;;  %v3843_v3 = vld [vmem:[#allocation2 + $0x40] sm:$0x1]  ;;  %v2296_v6 = vld [vmem:[#allocation2 + $0x2e] sm:$0x1] }
 0x12f   : > { %v2937_v23 = vadd.f32 %v2809_v62, %v2550_v11  ;;  %v2810_v29 = vmul.f32 %v5052_v59, %v2681_v14  ;;  %v1392_v31 = vadd.f32 %v1264_v20, %v1005_v19  ;;  %v1651_v32 = vmul.f32 %v5040_v45, %v1522_v15  ;;  %v2683_v14 = vld [vmem:[#allocation2 + $0x2f] sm:$0x1]  ;;  %v1524_v15 = vld [vmem:[#allocation2 + $0x1e] sm:$0x1] }
 0x130   : > { %v2165_v28 = vadd.f32 %v2037_v17, %v1778_v16  ;;  %v4097_v34 = vadd.f32 %v3969_v52, %v3710_v22  ;;  %v3197_v36 = vmul.f32 %v5061_v8, %v3068_v18  ;;  %v876_v42 = vmul.f32 %v5028_v37, %v747_v21  ;;  %v3070_v18 = vld [vmem:[#allocation2 + $0x3f] sm:$0x1]  ;;  %v749_v21 = vld [vmem:[#allocation2 + $0x1d] sm:$0x1] }
 0x131   : > { %v3324_v35 = vadd.f32 %v3196_v12, %v2937_v23  ;;  %v3584_v44 = vmul.f32 %v5055_v2, %v3455_v26  ;;  %v1779_v46 = vadd.f32 %v1651_v32, %v1392_v31  ;;  %v2038_v47 = vmul.f32 %v5046_v51, %v1909_v27  ;;  %v3457_v26 = vld [vmem:[#allocation2 + $0x40] sm:$0x1]  ;;  %v1911_v27 = vld [vmem:[#allocation2 + $0x2e] sm:$0x1] }
 0x132   : > { %v2551_v43 = vadd.f32 %v2423_v25, %v2165_v28  ;;  %4225 = vst.msk [vmem:[%s4658_s13 + $0x15] sm:$0x1] %vm326_vm0, %v4097_v34  ;;  %v3971_v52 = vmul.f32 %v5064_v10, %v3842_v30  ;;  %v1006_v55 = vadd.f32 %v5035_v40, %v876_v42  ;;  %v1265_v56 = vmul.f32 %v5037_v41, %v1136_v33  ;;  %v3844_v30 = vld [vmem:[#allocation2 + $0x41] sm:$0x1]  ;;  %v1138_v33 = vld [vmem:[#allocation2 + $0x1e] sm:$0x1] }
 0x133   : > { %v3711_v50 = vadd.f32 %v3583_v13, %v3324_v35  ;;  %v2166_v60 = vadd.f32 %v2038_v47, %v1779_v46  ;;  %v2424_v61 = vmul.f32 %v5050_v57, %v2295_v38  ;;  %v2811_v62 = vmul.f32 %v5052_v59, %v2682_v39  ;;  %v2297_v38 = vld [vmem:[#allocation2 + $0x2f] sm:$0x1]  ;;  %v2684_v39 = vld [vmem:[#allocation2 + $0x30] sm:$0x1] }
 0x134   : > { %v2938_v58 = vadd.f32 %v2810_v29, %v2551_v43  ;;  %v1393_v4 = vadd.f32 %v1265_v56, %v1006_v55  ;;  %v1652_v5 = vmul.f32 %v5040_v45, %v1523_v48  ;;  %v877_v7 = vmul.f32 %v5028_v37, %v748_v49  ;;  %v1525_v48 = vld [vmem:[#allocation2 + $0x1f] sm:$0x1]  ;;  %v750_v49 = vld [vmem:[#allocation2 + $0x1e] sm:$0x1] }
 0x135   : > { %v4098_v1 = vadd.f32 %v3970_v24, %v3711_v50  ;;  %v2552_v11 = vadd.f32 %v2424_v61, %v2166_v60  ;;  %v3198_v12 = vmul.f32 %v5061_v8, %v3069_v53  ;;  %v3585_v13 = vmul.f32 %v5055_v2, %v3456_v54  ;;  %v3071_v53 = vld [vmem:[#allocation2 + $0x40] sm:$0x1]  ;;  %v3458_v54 = vld [vmem:[#allocation2 + $0x41] sm:$0x1] }
 0x136   : > { %v3325_v9 = vadd.f32 %v3197_v36, %v2938_v58  ;;  %v1780_v16 = vadd.f32 %v1652_v5, %v1393_v4  ;;  %v2039_v17 = vmul.f32 %v5046_v51, %v1910_v63  ;;  %v1007_v19 = vadd.f32 %v5035_v40, %v877_v7  ;;  %v1912_v63 = vld [vmem:[#allocation2 + $0x2f] sm:$0x1] }
 0x137   : > { %4226 = vst.msk [vmem:[%s4658_s13 + $0x16] sm:$0x1] %vm326_vm0, %v4098_v1  ;;  %v1266_v20 = vmul.f32 %v5037_v41, %v1137_v0  ;;  %v2939_v23 = vadd.f32 %v2811_v62, %v2552_v11  ;;  %v3972_v24 = vmul.f32 %v5064_v10, %v3843_v3  ;;  %v2425_v25 = vmul.f32 %v5050_v57, %v2296_v6  ;;  %v1139_v0 = vld [vmem:[#allocation2 + $0x1f] sm:$0x1]  ;;  %v3845_v3 = vld [vmem:[#allocation2 + $0x42] sm:$0x1] }
 0x138   : > { %v3712_v22 = vadd.f32 %v3584_v44, %v3325_v9  ;;  %v2167_v28 = vadd.f32 %v2039_v17, %v1780_v16  ;;  %v2812_v29 = vmul.f32 %v5052_v59, %v2683_v14  ;;  %v1653_v32 = vmul.f32 %v5040_v45, %v1524_v15  ;;  %v2298_v6 = vld [vmem:[#allocation2 + $0x30] sm:$0x1]  ;;  %v2685_v14 = vld [vmem:[#allocation2 + $0x31] sm:$0x1]  ;;  %v1526_v15 = vld [vmem:[#allocation2 + $0x20] sm:$0x1] }
 0x139   : > { %v1394_v31 = vadd.f32 %v1266_v20, %v1007_v19  ;;  %v3326_v35 = vadd.f32 %v3198_v12, %v2939_v23  ;;  %v3199_v36 = vmul.f32 %v5061_v8, %v3070_v18  ;;  %v878_v42 = vmul.f32 %v5028_v37, %v749_v21  ;;  %v3072_v18 = vld [vmem:[#allocation2 + $0x41] sm:$0x1]  ;;  %v751_v21 = vld [vmem:[#allocation2 + $0x1f] sm:$0x1] }
 0x13a   : > { %v4099_v34 = vadd.f32 %v3971_v52, %v3712_v22  ;;  %v2553_v43 = vadd.f32 %v2425_v25, %v2167_v28  ;;  %v3586_v44 = vmul.f32 %v5055_v2, %v3457_v26  ;;  %v2040_v47 = vmul.f32 %v5046_v51, %v1911_v27  ;;  %v3459_v26 = vld [vmem:[#allocation2 + $0x42] sm:$0x1]  ;;  %v1913_v27 = vld [vmem:[#allocation2 + $0x30] sm:$0x1] }
 0x13b   : > { %v1781_v46 = vadd.f32 %v1653_v32, %v1394_v31  ;;  %v3713_v50 = vadd.f32 %v3585_v13, %v3326_v35  ;;  %v3973_v52 = vmul.f32 %v5064_v10, %v3844_v30  ;;  %v1008_v55 = vadd.f32 %v5035_v40, %v878_v42  ;;  %v3846_v30 = vld [vmem:[#allocation2 + $0x43] sm:$0x1] }
 0x13c   : > { %4227 = vst.msk [vmem:[%s4658_s13 + $0x17] sm:$0x1] %vm326_vm0, %v4099_v34  ;;  %v1267_v56 = vmul.f32 %v5037_v41, %v1138_v33  ;;  %v2940_v58 = vadd.f32 %v2812_v29, %v2553_v43  ;;  %v2426_v61 = vmul.f32 %v5050_v57, %v2297_v38  ;;  %v2813_v62 = vmul.f32 %v5052_v59, %v2684_v39  ;;  %v1140_v33 = vld [vmem:[#allocation2 + $0x20] sm:$0x1]  ;;  %v2299_v38 = vld [vmem:[#allocation2 + $0x31] sm:$0x1] }
 0x13d   : > { %v2168_v60 = vadd.f32 %v2040_v47, %v1781_v46  ;;  %v4100_v1 = vadd.f32 %v3972_v24, %v3713_v50  ;;  %v1654_v5 = vmul.f32 %v5040_v45, %v1525_v48  ;;  %v879_v7 = vmul.f32 %v5028_v37, %v750_v49  ;;  %v2686_v39 = vld [vmem:[#allocation2 + $0x32] sm:$0x1]  ;;  %v1527_v48 = vld [vmem:[#allocation2 + $0x21] sm:$0x1]  ;;  %v752_v49 = vld [vmem:[#allocation2 + $0x20] sm:$0x1] }
 0x13e   : > { %v1395_v4 = vadd.f32 %v1267_v56, %v1008_v55  ;;  %v3327_v9 = vadd.f32 %v3199_v36, %v2940_v58  ;;  %v3200_v12 = vmul.f32 %v5061_v8, %v3071_v53  ;;  %v3587_v13 = vmul.f32 %v5055_v2, %v3458_v54  ;;  %v3073_v53 = vld [vmem:[#allocation2 + $0x42] sm:$0x1]  ;;  %v3460_v54 = vld [vmem:[#allocation2 + $0x43] sm:$0x1] }
 0x13f   : > { %v2554_v11 = vadd.f32 %v2426_v61, %v2168_v60  ;;  %4228 = vst.msk [vmem:[%s4658_s13 + $0x18] sm:$0x1] %vm326_vm0, %v4100_v1  ;;  %v2041_v17 = vmul.f32 %v5046_v51, %v1912_v63  ;;  %v1009_v19 = vadd.f32 %v5035_v40, %v879_v7  ;;  %v1268_v20 = vmul.f32 %v5037_v41, %v1139_v0  ;;  %v1914_v63 = vld [vmem:[#allocation2 + $0x31] sm:$0x1]  ;;  %v1141_v0 = vld [vmem:[#allocation2 + $0x21] sm:$0x1] }
 0x140   : > { %v1782_v16 = vadd.f32 %v1654_v5, %v1395_v4  ;;  %v3714_v22 = vadd.f32 %v3586_v44, %v3327_v9  ;;  %v3974_v24 = vmul.f32 %v5064_v10, %v3845_v3  ;;  %v2427_v25 = vmul.f32 %v5050_v57, %v2298_v6  ;;  %v3847_v3 = vld [vmem:[#allocation2 + $0x44] sm:$0x1]  ;;  %v2300_v6 = vld [vmem:[#allocation2 + $0x32] sm:$0x1] }
 0x141   : > { %v2941_v23 = vadd.f32 %v2813_v62, %v2554_v11  ;;  %v2814_v29 = vmul.f32 %v5052_v59, %v2685_v14  ;;  %v1396_v31 = vadd.f32 %v1268_v20, %v1009_v19  ;;  %v1655_v32 = vmul.f32 %v5040_v45, %v1526_v15  ;;  %v2687_v14 = vld [vmem:[#allocation2 + $0x33] sm:$0x1]  ;;  %v1528_v15 = vld [vmem:[#allocation2 + $0x22] sm:$0x1]  ;;  %v753_v20 = vld [vmem:[#allocation2 + $0x21] sm:$0x1] }
 0x142   : > { %v2169_v28 = vadd.f32 %v2041_v17, %v1782_v16  ;;  %v4101_v34 = vadd.f32 %v3973_v52, %v3714_v22  ;;  %v3201_v36 = vmul.f32 %v5061_v8, %v3072_v18  ;;  %v880_v42 = vmul.f32 %v5028_v37, %v751_v21  ;;  %v1142_v21 = vld [vmem:[#allocation2 + $0x22] sm:$0x1] }
 0x143   : > { %v3328_v35 = vadd.f32 %v3200_v12, %v2941_v23  ;;  %v3588_v44 = vmul.f32 %v5055_v2, %v3459_v26  ;;  %v1783_v46 = vadd.f32 %v1655_v32, %v1396_v31  ;;  %v2042_v47 = vmul.f32 %v5046_v51, %v1913_v27  ;;  %v3074_v26 = vld [vmem:[#allocation2 + $0x43] sm:$0x1]  ;;  %v1915_v27 = vld [vmem:[#allocation2 + $0x32] sm:$0x1] }
 0x144   : > { %v2555_v43 = vadd.f32 %v2427_v25, %v2169_v28  ;;  %4229 = vst.msk [vmem:[%s4658_s13 + $0x19] sm:$0x1] %vm326_vm0, %v4101_v34  ;;  %v3975_v52 = vmul.f32 %v5064_v10, %v3846_v30  ;;  %v1010_v55 = vadd.f32 %v5035_v40, %v880_v42  ;;  %v1269_v56 = vmul.f32 %v5037_v41, %v1140_v33  ;;  %v3461_v30 = vld [vmem:[#allocation2 + $0x44] sm:$0x1]  ;;  %v1529_v33 = vld [vmem:[#allocation2 + $0x23] sm:$0x1] }
 0x145   : > { %v3715_v50 = vadd.f32 %v3587_v13, %v3328_v35  ;;  %v2170_v60 = vadd.f32 %v2042_v47, %v1783_v46  ;;  %v2428_v61 = vmul.f32 %v5050_v57, %v2299_v38  ;;  %v2815_v62 = vmul.f32 %v5052_v59, %v2686_v39  ;;  %v2301_v38 = vld [vmem:[#allocation2 + $0x33] sm:$0x1] }
 0x146   : > { %v2942_v58 = vadd.f32 %v2814_v29, %v2555_v43  ;;  %v1397_v4 = vadd.f32 %v1269_v56, %v1010_v55  ;;  %v1656_v5 = vmul.f32 %v5040_v45, %v1527_v48  ;;  %v881_v7 = vmul.f32 %v5028_v37, %v752_v49  ;;  %v2688_v48 = vld [vmem:[#allocation2 + $0x34] sm:$0x1]  ;;  %v755_v49 = vld [vmem:[#allocation2 + $0x25] sm:$0x1] }
 0x147   : > { %v4102_v1 = vadd.f32 %v3974_v24, %v3715_v50  ;;  %v2556_v11 = vadd.f32 %v2428_v61, %v2170_v60  ;;  %v3202_v12 = vmul.f32 %v5061_v8, %v3073_v53  ;;  %v3589_v13 = vmul.f32 %v5055_v2, %v3460_v54  ;;  %v3075_v53 = vld [vmem:[#allocation2 + $0x44] sm:$0x1]  ;;  %v3462_v54 = vld [vmem:[#allocation2 + $0x45] sm:$0x1] }
 0x148   : > { %v3329_v9 = vadd.f32 %v3201_v36, %v2942_v58  ;;  %v1784_v16 = vadd.f32 %v1656_v5, %v1397_v4  ;;  %v2043_v17 = vmul.f32 %v5046_v51, %v1914_v63  ;;  %v1011_v18 = vadd.f32 %v5035_v40, %v881_v7  ;;  %v3848_v36 = vld [vmem:[#allocation2 + $0x45] sm:$0x1]  ;;  %v1916_v63 = vld [vmem:[#allocation2 + $0x33] sm:$0x1]  ;;  %v3849_v4 = vld [vmem:[#allocation2 + $0x46] sm:$0x1] }
 0x149   : > { %4230 = vst.msk [vmem:[%s4658_s13 + $0x1a] sm:$0x1] %vm326_vm0, %v4102_v1  ;;  %v1270_v19 = vmul.f32 %v5037_v41, %v1141_v0  ;;  %v2943_v23 = vadd.f32 %v2815_v62, %v2556_v11  ;;  %v3976_v24 = vmul.f32 %v5064_v10, %v3847_v3  ;;  %v2429_v25 = vmul.f32 %v5050_v57, %v2300_v6  ;;  %v1144_v0 = vld [vmem:[#allocation2 + $0x26] sm:$0x1]  ;;  %v2302_v6 = vld [vmem:[#allocation2 + $0x34] sm:$0x1] }
 0x14a   : > { %v3716_v22 = vadd.f32 %v3588_v44, %v3329_v9  ;;  %v2171_v28 = vadd.f32 %v2043_v17, %v1784_v16  ;;  %v2816_v29 = vmul.f32 %v5052_v59, %v2687_v14  ;;  %v1657_v32 = vmul.f32 %v5040_v45, %v1528_v15  ;;  %v2689_v14 = vld [vmem:[#allocation2 + $0x35] sm:$0x1]  ;;  %v1531_v15 = vld [vmem:[#allocation2 + $0x27] sm:$0x1] }
 0x14b   : > { %v1398_v31 = vadd.f32 %v1270_v19, %v1011_v18  ;;  %v3330_v35 = vadd.f32 %v3202_v12, %v2943_v23  ;;  %v882_v39 = vmul.f32 %v5028_v37, %v753_v20  ;;  %v1271_v42 = vmul.f32 %v5037_v41, %v1142_v21  ;;  %v3076_v18 = vld [vmem:[#allocation2 + $0x45] sm:$0x1]  ;;  %v756_v21 = vld [vmem:[#allocation2 + $0x26] sm:$0x1] }
 0x14c   : > { %v4103_v34 = vadd.f32 %v3975_v52, %v3716_v22  ;;  %v2557_v43 = vadd.f32 %v2429_v25, %v2171_v28  ;;  %v3203_v44 = vmul.f32 %v5061_v8, %v3074_v26  ;;  %v2044_v47 = vmul.f32 %v5046_v51, %v1915_v27  ;;  %v3463_v26 = vld [vmem:[#allocation2 + $0x46] sm:$0x1]  ;;  %v1918_v27 = vld [vmem:[#allocation2 + $0x37] sm:$0x1] }
 0x14d   : > { %v1785_v46 = vadd.f32 %v1657_v32, %v1398_v31  ;;  %v3717_v50 = vadd.f32 %v3589_v13, %v3330_v35  ;;  %v3590_v52 = vmul.f32 %v5055_v2, %v3461_v30  ;;  %v1012_v55 = vadd.f32 %v5035_v40, %v882_v39  ;;  %v3850_v30 = vld [vmem:[#allocation2 + $0x47] sm:$0x1]  ;;  %v2691_v39 = vld [vmem:[#allocation2 + $0x39] sm:$0x1] }
 0x14e   : > { %4231 = vst.msk [vmem:[%s4658_s13 + $0x1b] sm:$0x1] %vm326_vm0, %v4103_v34  ;;  %v1658_v56 = vmul.f32 %v5040_v45, %v1529_v33  ;;  %v2944_v58 = vadd.f32 %v2816_v29, %v2557_v43  ;;  %v3977_v60 = vmul.f32 %v5064_v10, %v3848_v36  ;;  %v2430_v62 = vmul.f32 %v5050_v57, %v2301_v38  ;;  %v1145_v33 = vld [vmem:[#allocation2 + $0x27] sm:$0x1]  ;;  %v2304_v38 = vld [vmem:[#allocation2 + $0x38] sm:$0x1] }
 0x14f   : > { %v2172_v61 = vadd.f32 %v2044_v47, %v1785_v46  ;;  %v4104_v1 = vadd.f32 %v3976_v24, %v3717_v50  ;;  %v2817_v3 = vmul.f32 %v5052_v59, %v2688_v48  ;;  %v1399_v5 = vadd.f32 %v1271_v42, %v1012_v55  ;;  %v1532_v48 = vld [vmem:[#allocation2 + $0x28] sm:$0x1] }
 0x150   : > { %v884_v7 = vmul.f32 %v5028_v37, %v755_v49  ;;  %v3331_v9 = vadd.f32 %v3203_v44, %v2944_v58  ;;  %v3204_v12 = vmul.f32 %v5061_v8, %v3075_v53  ;;  %v3591_v13 = vmul.f32 %v5055_v2, %v3462_v54  ;;  %v757_v49 = vld [vmem:[#allocation2 + $0x27] sm:$0x1]  ;;  %v3078_v53 = vld [vmem:[#allocation2 + $0x49] sm:$0x1]  ;;  %v3465_v54 = vld [vmem:[#allocation2 + $0x4a] sm:$0x1] }
 0x151   : > { %v2558_v11 = vadd.f32 %v2430_v62, %v2172_v61  ;;  %4232 = vst.msk [vmem:[%s4658_s13 + $0x1c] sm:$0x1] %vm326_vm0, %v4104_v1  ;;  %v1786_v16 = vadd.f32 %v1658_v56, %v1399_v5  ;;  %v2045_v17 = vmul.f32 %v5046_v51, %v1916_v63  ;;  %v1273_v20 = vmul.f32 %v5037_v41, %v1144_v0  ;;  %v1919_v63 = vld [vmem:[#allocation2 + $0x38] sm:$0x1]  ;;  %v1146_v0 = vld [vmem:[#allocation2 + $0x28] sm:$0x1] }
 0x152   : > { %v1014_v19 = vadd.f32 %v5035_v40, %v884_v7  ;;  %v3718_v22 = vadd.f32 %v3590_v52, %v3331_v9  ;;  %v3978_v24 = vmul.f32 %v5064_v10, %v3849_v4  ;;  %v2431_v25 = vmul.f32 %v5050_v57, %v2302_v6  ;;  %v2305_v6 = vld [vmem:[#allocation2 + $0x39] sm:$0x1] }
 0x153   : > { %v2945_v23 = vadd.f32 %v2817_v3, %v2558_v11  ;;  %v2173_v28 = vadd.f32 %v2045_v17, %v1786_v16  ;;  %v2818_v29 = vmul.f32 %v5052_v59, %v2689_v14  ;;  %v1660_v32 = vmul.f32 %v5040_v45, %v1531_v15  ;;  %v3852_v3 = vld [vmem:[#allocation2 + $0x4b] sm:$0x1]  ;;  %v2692_v14 = vld [vmem:[#allocation2 + $0x3a] sm:$0x1]  ;;  %v1533_v15 = vld [vmem:[#allocation2 + $0x29] sm:$0x1] }
 0x154   : > { %v1401_v31 = vadd.f32 %v1273_v20, %v1014_v19  ;;  %v4105_v34 = vadd.f32 %v3977_v60, %v3718_v22  ;;  %v3205_v36 = vmul.f32 %v5061_v8, %v3076_v18  ;;  %v885_v42 = vmul.f32 %v5028_v37, %v756_v21  ;;  %v3079_v18 = vld [vmem:[#allocation2 + $0x4a] sm:$0x1]  ;;  %v758_v21 = vld [vmem:[#allocation2 + $0x28] sm:$0x1] }
 0x155   : > { %v3332_v35 = vadd.f32 %v3204_v12, %v2945_v23  ;;  %v2559_v43 = vadd.f32 %v2431_v25, %v2173_v28  ;;  %v3592_v44 = vmul.f32 %v5055_v2, %v3463_v26  ;;  %v2047_v47 = vmul.f32 %v5046_v51, %v1918_v27  ;;  %v3466_v26 = vld [vmem:[#allocation2 + $0x4b] sm:$0x1]  ;;  %v1920_v27 = vld [vmem:[#allocation2 + $0x39] sm:$0x1] }
 0x156   : > { %v1788_v46 = vadd.f32 %v1660_v32, %v1401_v31  ;;  %4233 = vst.msk [vmem:[%s4658_s13 + $0x1d] sm:$0x1] %vm326_vm0, %v4105_v34  ;;  %v3979_v52 = vmul.f32 %v5064_v10, %v3850_v30  ;;  %v1015_v55 = vadd.f32 %v5035_v40, %v885_v42  ;;  %v1274_v56 = vmul.f32 %v5037_v41, %v1145_v33  ;;  %v3853_v30 = vld [vmem:[#allocation2 + $0x4c] sm:$0x1]  ;;  %v1147_v33 = vld [vmem:[#allocation2 + $0x29] sm:$0x1] }
 0x157   : > { %v3719_v50 = vadd.f32 %v3591_v13, %v3332_v35  ;;  %v2946_v58 = vadd.f32 %v2818_v29, %v2559_v43  ;;  %v2433_v61 = vmul.f32 %v5050_v57, %v2304_v38  ;;  %v2820_v62 = vmul.f32 %v5052_v59, %v2691_v39  ;;  %v2306_v38 = vld [vmem:[#allocation2 + $0x3a] sm:$0x1]  ;;  %v2693_v39 = vld [vmem:[#allocation2 + $0x3b] sm:$0x1] }
 0x158   : > { %v2175_v60 = vadd.f32 %v2047_v47, %v1788_v46  ;;  %v1402_v4 = vadd.f32 %v1274_v56, %v1015_v55  ;;  %v1661_v5 = vmul.f32 %v5040_v45, %v1532_v48  ;;  %v886_v7 = vmul.f32 %v5028_v37, %v757_v49  ;;  %v1534_v48 = vld [vmem:[#allocation2 + $0x2a] sm:$0x1]  ;;  %v759_v49 = vld [vmem:[#allocation2 + $0x29] sm:$0x1] }
 0x159   : > { %v4106_v1 = vadd.f32 %v3978_v24, %v3719_v50  ;;  %v3333_v9 = vadd.f32 %v3205_v36, %v2946_v58  ;;  %v3207_v12 = vmul.f32 %v5061_v8, %v3078_v53  ;;  %v3594_v13 = vmul.f32 %v5055_v2, %v3465_v54  ;;  %v3080_v53 = vld [vmem:[#allocation2 + $0x4b] sm:$0x1]  ;;  %v3467_v54 = vld [vmem:[#allocation2 + $0x4c] sm:$0x1] }
 0x15a   : > { %v2561_v11 = vadd.f32 %v2433_v61, %v2175_v60  ;;  %v1789_v16 = vadd.f32 %v1661_v5, %v1402_v4  ;;  %v2048_v17 = vmul.f32 %v5046_v51, %v1919_v63  ;;  %v1016_v19 = vadd.f32 %v5035_v40, %v886_v7  ;;  %v1921_v63 = vld [vmem:[#allocation2 + $0x3a] sm:$0x1] }
 0x15b   : > { %4234 = vst.msk [vmem:[%s4658_s13 + $0x1e] sm:$0x1] %vm326_vm0, %v4106_v1  ;;  %v1275_v20 = vmul.f32 %v5037_v41, %v1146_v0  ;;  %v3720_v22 = vadd.f32 %v3592_v44, %v3333_v9  ;;  %v3981_v24 = vmul.f32 %v5064_v10, %v3852_v3  ;;  %v2434_v25 = vmul.f32 %v5050_v57, %v2305_v6  ;;  %v1148_v0 = vld [vmem:[#allocation2 + $0x2a] sm:$0x1]  ;;  %v3854_v3 = vld [vmem:[#allocation2 + $0x4d] sm:$0x1] }
 0x15c   : > { %v2948_v23 = vadd.f32 %v2820_v62, %v2561_v11  ;;  %v2176_v28 = vadd.f32 %v2048_v17, %v1789_v16  ;;  %v2821_v29 = vmul.f32 %v5052_v59, %v2692_v14  ;;  %v1662_v32 = vmul.f32 %v5040_v45, %v1533_v15  ;;  %v2307_v6 = vld [vmem:[#allocation2 + $0x3b] sm:$0x1]  ;;  %v2694_v14 = vld [vmem:[#allocation2 + $0x3c] sm:$0x1]  ;;  %v1535_v15 = vld [vmem:[#allocation2 + $0x2b] sm:$0x1] }
 0x15d   : > { %v1403_v31 = vadd.f32 %v1275_v20, %v1016_v19  ;;  %v4107_v34 = vadd.f32 %v3979_v52, %v3720_v22  ;;  %v3208_v36 = vmul.f32 %v5061_v8, %v3079_v18  ;;  %v887_v42 = vmul.f32 %v5028_v37, %v758_v21  ;;  %v3081_v18 = vld [vmem:[#allocation2 + $0x4c] sm:$0x1]  ;;  %v760_v21 = vld [vmem:[#allocation2 + $0x2a] sm:$0x1] }
 0x15e   : > { %v3335_v35 = vadd.f32 %v3207_v12, %v2948_v23  ;;  %v2562_v43 = vadd.f32 %v2434_v25, %v2176_v28  ;;  %v3595_v44 = vmul.f32 %v5055_v2, %v3466_v26  ;;  %v2049_v47 = vmul.f32 %v5046_v51, %v1920_v27  ;;  %v3468_v26 = vld [vmem:[#allocation2 + $0x4d] sm:$0x1]  ;;  %v1922_v27 = vld [vmem:[#allocation2 + $0x3b] sm:$0x1] }
 0x15f   : > { %v1790_v46 = vadd.f32 %v1662_v32, %v1403_v31  ;;  %4235 = vst.msk [vmem:[%s4658_s13 + $0x1f] sm:$0x1] %vm326_vm0, %v4107_v34  ;;  %v3982_v52 = vmul.f32 %v5064_v10, %v3853_v30  ;;  %v1017_v55 = vadd.f32 %v5035_v40, %v887_v42  ;;  %v1276_v56 = vmul.f32 %v5037_v41, %v1147_v33  ;;  %v3855_v30 = vld [vmem:[#allocation2 + $0x4e] sm:$0x1]  ;;  %v1149_v33 = vld [vmem:[#allocation2 + $0x2b] sm:$0x1] }
 0x160   : > { %v3722_v50 = vadd.f32 %v3594_v13, %v3335_v35  ;;  %v2949_v58 = vadd.f32 %v2821_v29, %v2562_v43  ;;  %v2435_v61 = vmul.f32 %v5050_v57, %v2306_v38  ;;  %v2822_v62 = vmul.f32 %v5052_v59, %v2693_v39  ;;  %v2308_v38 = vld [vmem:[#allocation2 + $0x3c] sm:$0x1]  ;;  %v2695_v39 = vld [vmem:[#allocation2 + $0x3d] sm:$0x1] }
 0x161   : > { %v2177_v60 = vadd.f32 %v2049_v47, %v1790_v46  ;;  %v1404_v4 = vadd.f32 %v1276_v56, %v1017_v55  ;;  %v1663_v5 = vmul.f32 %v5040_v45, %v1534_v48  ;;  %v888_v7 = vmul.f32 %v5028_v37, %v759_v49  ;;  %v1536_v48 = vld [vmem:[#allocation2 + $0x2c] sm:$0x1]  ;;  %v761_v49 = vld [vmem:[#allocation2 + $0x2b] sm:$0x1] }
 0x162   : > { %v4109_v1 = vadd.f32 %v3981_v24, %v3722_v50  ;;  %v3336_v9 = vadd.f32 %v3208_v36, %v2949_v58  ;;  %v3209_v12 = vmul.f32 %v5061_v8, %v3080_v53  ;;  %v3596_v13 = vmul.f32 %v5055_v2, %v3467_v54  ;;  %v3082_v53 = vld [vmem:[#allocation2 + $0x4d] sm:$0x1]  ;;  %v3469_v54 = vld [vmem:[#allocation2 + $0x4e] sm:$0x1] }
 0x163   : > { %v2563_v11 = vadd.f32 %v2435_v61, %v2177_v60  ;;  %v1791_v16 = vadd.f32 %v1663_v5, %v1404_v4  ;;  %v2050_v17 = vmul.f32 %v5046_v51, %v1921_v63  ;;  %v1018_v19 = vadd.f32 %v5035_v40, %v888_v7  ;;  %v1923_v63 = vld [vmem:[#allocation2 + $0x3c] sm:$0x1] }
 0x164   : > { %4237 = vst.msk [vmem:[%s4658_s13 + $0x21] sm:$0x1] %vm326_vm0, %v4109_v1  ;;  %v1277_v20 = vmul.f32 %v5037_v41, %v1148_v0  ;;  %v3723_v22 = vadd.f32 %v3595_v44, %v3336_v9  ;;  %v3983_v24 = vmul.f32 %v5064_v10, %v3854_v3  ;;  %v2436_v25 = vmul.f32 %v5050_v57, %v2307_v6  ;;  %v1150_v0 = vld [vmem:[#allocation2 + $0x2c] sm:$0x1]  ;;  %v3856_v3 = vld [vmem:[#allocation2 + $0x4f] sm:$0x1] }
 0x165   : > { %v2950_v23 = vadd.f32 %v2822_v62, %v2563_v11  ;;  %v2178_v28 = vadd.f32 %v2050_v17, %v1791_v16  ;;  %v2823_v29 = vmul.f32 %v5052_v59, %v2694_v14  ;;  %v1664_v32 = vmul.f32 %v5040_v45, %v1535_v15  ;;  %v2309_v6 = vld [vmem:[#allocation2 + $0x3d] sm:$0x1]  ;;  %v2696_v14 = vld [vmem:[#allocation2 + $0x3e] sm:$0x1]  ;;  %v1537_v15 = vld [vmem:[#allocation2 + $0x2d] sm:$0x1] }
 0x166   : > { %v1405_v31 = vadd.f32 %v1277_v20, %v1018_v19  ;;  %v4110_v34 = vadd.f32 %v3982_v52, %v3723_v22  ;;  %v3210_v36 = vmul.f32 %v5061_v8, %v3081_v18  ;;  %v889_v42 = vmul.f32 %v5028_v37, %v760_v21  ;;  %v3083_v18 = vld [vmem:[#allocation2 + $0x4e] sm:$0x1]  ;;  %v762_v21 = vld [vmem:[#allocation2 + $0x2c] sm:$0x1] }
 0x167   : > { %v3337_v35 = vadd.f32 %v3209_v12, %v2950_v23  ;;  %v2564_v43 = vadd.f32 %v2436_v25, %v2178_v28  ;;  %v3597_v44 = vmul.f32 %v5055_v2, %v3468_v26  ;;  %v2051_v47 = vmul.f32 %v5046_v51, %v1922_v27  ;;  %v3470_v26 = vld [vmem:[#allocation2 + $0x4f] sm:$0x1]  ;;  %v1924_v27 = vld [vmem:[#allocation2 + $0x3d] sm:$0x1] }
 0x168   : > { %v1792_v46 = vadd.f32 %v1664_v32, %v1405_v31  ;;  %4238 = vst.msk [vmem:[%s4658_s13 + $0x22] sm:$0x1] %vm326_vm0, %v4110_v34  ;;  %v3984_v52 = vmul.f32 %v5064_v10, %v3855_v30  ;;  %v1019_v55 = vadd.f32 %v5035_v40, %v889_v42  ;;  %v1278_v56 = vmul.f32 %v5037_v41, %v1149_v33  ;;  %v3857_v30 = vld [vmem:[#allocation2 + $0x50] sm:$0x1]  ;;  %v1151_v33 = vld [vmem:[#allocation2 + $0x2d] sm:$0x1] }
 0x169   : > { %v3724_v50 = vadd.f32 %v3596_v13, %v3337_v35  ;;  %v2951_v58 = vadd.f32 %v2823_v29, %v2564_v43  ;;  %v2437_v61 = vmul.f32 %v5050_v57, %v2308_v38  ;;  %v2824_v62 = vmul.f32 %v5052_v59, %v2695_v39  ;;  %v2310_v38 = vld [vmem:[#allocation2 + $0x3e] sm:$0x1]  ;;  %v2697_v39 = vld [vmem:[#allocation2 + $0x3f] sm:$0x1] }
 0x16a   : > { %v2179_v60 = vadd.f32 %v2051_v47, %v1792_v46  ;;  %v1406_v4 = vadd.f32 %v1278_v56, %v1019_v55  ;;  %v1665_v5 = vmul.f32 %v5040_v45, %v1536_v48  ;;  %v890_v7 = vmul.f32 %v5028_v37, %v761_v49  ;;  %v1538_v48 = vld [vmem:[#allocation2 + $0x2e] sm:$0x1]  ;;  %v763_v49 = vld [vmem:[#allocation2 + $0x2d] sm:$0x1] }
 0x16b   : > { %v4111_v1 = vadd.f32 %v3983_v24, %v3724_v50  ;;  %v3338_v9 = vadd.f32 %v3210_v36, %v2951_v58  ;;  %v3211_v12 = vmul.f32 %v5061_v8, %v3082_v53  ;;  %v3598_v13 = vmul.f32 %v5055_v2, %v3469_v54  ;;  %v3084_v53 = vld [vmem:[#allocation2 + $0x4f] sm:$0x1]  ;;  %v3471_v54 = vld [vmem:[#allocation2 + $0x50] sm:$0x1] }
 0x16c   : > { %v2565_v11 = vadd.f32 %v2437_v61, %v2179_v60  ;;  %v1793_v16 = vadd.f32 %v1665_v5, %v1406_v4  ;;  %v2052_v17 = vmul.f32 %v5046_v51, %v1923_v63  ;;  %v1020_v19 = vadd.f32 %v5035_v40, %v890_v7  ;;  %v1925_v63 = vld [vmem:[#allocation2 + $0x3e] sm:$0x1] }
 0x16d   : > { %4239 = vst.msk [vmem:[%s4658_s13 + $0x23] sm:$0x1] %vm326_vm0, %v4111_v1  ;;  %v1279_v20 = vmul.f32 %v5037_v41, %v1150_v0  ;;  %v3725_v22 = vadd.f32 %v3597_v44, %v3338_v9  ;;  %v3985_v24 = vmul.f32 %v5064_v10, %v3856_v3  ;;  %v2438_v25 = vmul.f32 %v5050_v57, %v2309_v6  ;;  %v1152_v0 = vld [vmem:[#allocation2 + $0x2e] sm:$0x1]  ;;  %v3858_v3 = vld [vmem:[#allocation2 + $0x51] sm:$0x1] }
 0x16e   : > { %v2952_v23 = vadd.f32 %v2824_v62, %v2565_v11  ;;  %v2180_v28 = vadd.f32 %v2052_v17, %v1793_v16  ;;  %v2825_v29 = vmul.f32 %v5052_v59, %v2696_v14  ;;  %v1666_v32 = vmul.f32 %v5040_v45, %v1537_v15  ;;  %v2311_v6 = vld [vmem:[#allocation2 + $0x3f] sm:$0x1]  ;;  %v2698_v14 = vld [vmem:[#allocation2 + $0x40] sm:$0x1]  ;;  %v1539_v15 = vld [vmem:[#allocation2 + $0x2f] sm:$0x1] }
 0x16f   : > { %v1407_v31 = vadd.f32 %v1279_v20, %v1020_v19  ;;  %v4112_v34 = vadd.f32 %v3984_v52, %v3725_v22  ;;  %v3212_v36 = vmul.f32 %v5061_v8, %v3083_v18  ;;  %v891_v42 = vmul.f32 %v5028_v37, %v762_v21  ;;  %v3085_v18 = vld [vmem:[#allocation2 + $0x50] sm:$0x1]  ;;  %v764_v21 = vld [vmem:[#allocation2 + $0x2e] sm:$0x1] }
 0x170   : > { %v3339_v35 = vadd.f32 %v3211_v12, %v2952_v23  ;;  %v2566_v43 = vadd.f32 %v2438_v25, %v2180_v28  ;;  %v3599_v44 = vmul.f32 %v5055_v2, %v3470_v26  ;;  %v2053_v47 = vmul.f32 %v5046_v51, %v1924_v27  ;;  %v3472_v26 = vld [vmem:[#allocation2 + $0x51] sm:$0x1]  ;;  %v1926_v27 = vld [vmem:[#allocation2 + $0x3f] sm:$0x1] }
 0x171   : > { %v1794_v46 = vadd.f32 %v1666_v32, %v1407_v31  ;;  %4240 = vst.msk [vmem:[%s4658_s13 + $0x24] sm:$0x1] %vm326_vm0, %v4112_v34  ;;  %v3986_v52 = vmul.f32 %v5064_v10, %v3857_v30  ;;  %v1021_v55 = vadd.f32 %v5035_v40, %v891_v42  ;;  %v1280_v56 = vmul.f32 %v5037_v41, %v1151_v33  ;;  %v3859_v30 = vld [vmem:[#allocation2 + $0x52] sm:$0x1]  ;;  %v1153_v33 = vld [vmem:[#allocation2 + $0x2f] sm:$0x1] }
 0x172   : > { %v3726_v50 = vadd.f32 %v3598_v13, %v3339_v35  ;;  %v2953_v58 = vadd.f32 %v2825_v29, %v2566_v43  ;;  %v2439_v61 = vmul.f32 %v5050_v57, %v2310_v38  ;;  %v2826_v62 = vmul.f32 %v5052_v59, %v2697_v39  ;;  %v2312_v38 = vld [vmem:[#allocation2 + $0x40] sm:$0x1]  ;;  %v2699_v39 = vld [vmem:[#allocation2 + $0x41] sm:$0x1] }
 0x173   : > { %v2181_v60 = vadd.f32 %v2053_v47, %v1794_v46  ;;  %v1408_v4 = vadd.f32 %v1280_v56, %v1021_v55  ;;  %v1667_v5 = vmul.f32 %v5040_v45, %v1538_v48  ;;  %v892_v7 = vmul.f32 %v5028_v37, %v763_v49  ;;  %v1540_v48 = vld [vmem:[#allocation2 + $0x30] sm:$0x1]  ;;  %v765_v49 = vld [vmem:[#allocation2 + $0x2f] sm:$0x1] }
 0x174   : > { %v4113_v1 = vadd.f32 %v3985_v24, %v3726_v50  ;;  %v3340_v9 = vadd.f32 %v3212_v36, %v2953_v58  ;;  %v3213_v12 = vmul.f32 %v5061_v8, %v3084_v53  ;;  %v3600_v13 = vmul.f32 %v5055_v2, %v3471_v54  ;;  %v3086_v53 = vld [vmem:[#allocation2 + $0x51] sm:$0x1]  ;;  %v3473_v54 = vld [vmem:[#allocation2 + $0x52] sm:$0x1] }
 0x175   : > { %v2567_v11 = vadd.f32 %v2439_v61, %v2181_v60  ;;  %v1795_v16 = vadd.f32 %v1667_v5, %v1408_v4  ;;  %v2054_v17 = vmul.f32 %v5046_v51, %v1925_v63  ;;  %v1022_v19 = vadd.f32 %v5035_v40, %v892_v7  ;;  %v1927_v63 = vld [vmem:[#allocation2 + $0x40] sm:$0x1] }
 0x176   : > { %4241 = vst.msk [vmem:[%s4658_s13 + $0x25] sm:$0x1] %vm326_vm0, %v4113_v1  ;;  %v1281_v20 = vmul.f32 %v5037_v41, %v1152_v0  ;;  %v3727_v22 = vadd.f32 %v3599_v44, %v3340_v9  ;;  %v3987_v24 = vmul.f32 %v5064_v10, %v3858_v3  ;;  %v2440_v25 = vmul.f32 %v5050_v57, %v2311_v6  ;;  %v1154_v0 = vld [vmem:[#allocation2 + $0x30] sm:$0x1]  ;;  %v3860_v3 = vld [vmem:[#allocation2 + $0x53] sm:$0x1] }
 0x177   : > { %v2954_v23 = vadd.f32 %v2826_v62, %v2567_v11  ;;  %v2182_v28 = vadd.f32 %v2054_v17, %v1795_v16  ;;  %v2827_v29 = vmul.f32 %v5052_v59, %v2698_v14  ;;  %v1668_v32 = vmul.f32 %v5040_v45, %v1539_v15  ;;  %v2313_v6 = vld [vmem:[#allocation2 + $0x41] sm:$0x1]  ;;  %v2700_v14 = vld [vmem:[#allocation2 + $0x42] sm:$0x1]  ;;  %v1541_v15 = vld [vmem:[#allocation2 + $0x31] sm:$0x1] }
 0x178   : > { %v1409_v31 = vadd.f32 %v1281_v20, %v1022_v19  ;;  %v4114_v34 = vadd.f32 %v3986_v52, %v3727_v22  ;;  %v3214_v36 = vmul.f32 %v5061_v8, %v3085_v18  ;;  %v893_v42 = vmul.f32 %v5028_v37, %v764_v21  ;;  %v3087_v18 = vld [vmem:[#allocation2 + $0x52] sm:$0x1]  ;;  %v766_v21 = vld [vmem:[#allocation2 + $0x30] sm:$0x1] }
 0x179   : > { %v3341_v35 = vadd.f32 %v3213_v12, %v2954_v23  ;;  %v2568_v43 = vadd.f32 %v2440_v25, %v2182_v28  ;;  %v3601_v44 = vmul.f32 %v5055_v2, %v3472_v26  ;;  %v2055_v47 = vmul.f32 %v5046_v51, %v1926_v27  ;;  %v3474_v26 = vld [vmem:[#allocation2 + $0x53] sm:$0x1]  ;;  %v1928_v27 = vld [vmem:[#allocation2 + $0x41] sm:$0x1] }
 0x17a   : > { %v1796_v46 = vadd.f32 %v1668_v32, %v1409_v31  ;;  %4242 = vst.msk [vmem:[%s4658_s13 + $0x26] sm:$0x1] %vm326_vm0, %v4114_v34  ;;  %v3988_v52 = vmul.f32 %v5064_v10, %v3859_v30  ;;  %v1023_v55 = vadd.f32 %v5035_v40, %v893_v42  ;;  %v1282_v56 = vmul.f32 %v5037_v41, %v1153_v33  ;;  %v3861_v30 = vld [vmem:[#allocation2 + $0x54] sm:$0x1]  ;;  %v1155_v33 = vld [vmem:[#allocation2 + $0x31] sm:$0x1] }
 0x17b   : > { %v3728_v50 = vadd.f32 %v3600_v13, %v3341_v35  ;;  %v2955_v58 = vadd.f32 %v2827_v29, %v2568_v43  ;;  %v2441_v61 = vmul.f32 %v5050_v57, %v2312_v38  ;;  %v2828_v62 = vmul.f32 %v5052_v59, %v2699_v39  ;;  %v2314_v38 = vld [vmem:[#allocation2 + $0x42] sm:$0x1]  ;;  %v2701_v39 = vld [vmem:[#allocation2 + $0x43] sm:$0x1] }
 0x17c   : > { %v2183_v60 = vadd.f32 %v2055_v47, %v1796_v46  ;;  %v1410_v4 = vadd.f32 %v1282_v56, %v1023_v55  ;;  %v1669_v5 = vmul.f32 %v5040_v45, %v1540_v48  ;;  %v894_v7 = vmul.f32 %v5028_v37, %v765_v49  ;;  %v1542_v48 = vld [vmem:[#allocation2 + $0x32] sm:$0x1]  ;;  %v767_v49 = vld [vmem:[#allocation2 + $0x31] sm:$0x1] }
 0x17d   : > { %v4115_v1 = vadd.f32 %v3987_v24, %v3728_v50  ;;  %v3342_v9 = vadd.f32 %v3214_v36, %v2955_v58  ;;  %v3215_v12 = vmul.f32 %v5061_v8, %v3086_v53  ;;  %v3602_v13 = vmul.f32 %v5055_v2, %v3473_v54  ;;  %v3088_v53 = vld [vmem:[#allocation2 + $0x53] sm:$0x1]  ;;  %v3475_v54 = vld [vmem:[#allocation2 + $0x54] sm:$0x1] }
 0x17e   : > { %v2569_v11 = vadd.f32 %v2441_v61, %v2183_v60  ;;  %v1797_v16 = vadd.f32 %v1669_v5, %v1410_v4  ;;  %v2056_v17 = vmul.f32 %v5046_v51, %v1927_v63  ;;  %v1024_v19 = vadd.f32 %v5035_v40, %v894_v7  ;;  %v1929_v63 = vld [vmem:[#allocation2 + $0x42] sm:$0x1] }
 0x17f   : > { %4243 = vst.msk [vmem:[%s4658_s13 + $0x27] sm:$0x1] %vm326_vm0, %v4115_v1  ;;  %v1283_v20 = vmul.f32 %v5037_v41, %v1154_v0  ;;  %v3729_v22 = vadd.f32 %v3601_v44, %v3342_v9  ;;  %v3989_v24 = vmul.f32 %v5064_v10, %v3860_v3  ;;  %v2442_v25 = vmul.f32 %v5050_v57, %v2313_v6  ;;  %v1156_v0 = vld [vmem:[#allocation2 + $0x32] sm:$0x1]  ;;  %v3862_v3 = vld [vmem:[#allocation2 + $0x55] sm:$0x1] }
 0x180   : > { %v2956_v23 = vadd.f32 %v2828_v62, %v2569_v11  ;;  %v2184_v28 = vadd.f32 %v2056_v17, %v1797_v16  ;;  %v2829_v29 = vmul.f32 %v5052_v59, %v2700_v14  ;;  %v1670_v32 = vmul.f32 %v5040_v45, %v1541_v15  ;;  %v2315_v6 = vld [vmem:[#allocation2 + $0x43] sm:$0x1]  ;;  %v2702_v14 = vld [vmem:[#allocation2 + $0x44] sm:$0x1]  ;;  %v1543_v15 = vld [vmem:[#allocation2 + $0x33] sm:$0x1] }
 0x181   : > { %v1411_v31 = vadd.f32 %v1283_v20, %v1024_v19  ;;  %v4116_v34 = vadd.f32 %v3988_v52, %v3729_v22  ;;  %v3216_v36 = vmul.f32 %v5061_v8, %v3087_v18  ;;  %v895_v42 = vmul.f32 %v5028_v37, %v766_v21  ;;  %v3089_v18 = vld [vmem:[#allocation2 + $0x54] sm:$0x1]  ;;  %v768_v21 = vld [vmem:[#allocation2 + $0x32] sm:$0x1] }
 0x182   : > { %v3343_v35 = vadd.f32 %v3215_v12, %v2956_v23  ;;  %v2570_v43 = vadd.f32 %v2442_v25, %v2184_v28  ;;  %v3603_v44 = vmul.f32 %v5055_v2, %v3474_v26  ;;  %v2057_v47 = vmul.f32 %v5046_v51, %v1928_v27  ;;  %v3476_v26 = vld [vmem:[#allocation2 + $0x55] sm:$0x1]  ;;  %v1930_v27 = vld [vmem:[#allocation2 + $0x43] sm:$0x1] }
 0x183   : > { %v1798_v46 = vadd.f32 %v1670_v32, %v1411_v31  ;;  %4244 = vst.msk [vmem:[%s4658_s13 + $0x28] sm:$0x1] %vm326_vm0, %v4116_v34  ;;  %v3990_v52 = vmul.f32 %v5064_v10, %v3861_v30  ;;  %v1025_v55 = vadd.f32 %v5035_v40, %v895_v42  ;;  %v1284_v56 = vmul.f32 %v5037_v41, %v1155_v33  ;;  %v3863_v30 = vld [vmem:[#allocation2 + $0x56] sm:$0x1]  ;;  %v1157_v33 = vld [vmem:[#allocation2 + $0x33] sm:$0x1] }
 0x184   : > { %v3730_v50 = vadd.f32 %v3602_v13, %v3343_v35  ;;  %v2957_v58 = vadd.f32 %v2829_v29, %v2570_v43  ;;  %v2443_v61 = vmul.f32 %v5050_v57, %v2314_v38  ;;  %v2830_v62 = vmul.f32 %v5052_v59, %v2701_v39  ;;  %v2316_v38 = vld [vmem:[#allocation2 + $0x44] sm:$0x1]  ;;  %v2703_v39 = vld [vmem:[#allocation2 + $0x45] sm:$0x1] }
 0x185   : > { %v2185_v60 = vadd.f32 %v2057_v47, %v1798_v46  ;;  %v1412_v4 = vadd.f32 %v1284_v56, %v1025_v55  ;;  %v1671_v5 = vmul.f32 %v5040_v45, %v1542_v48  ;;  %v896_v7 = vmul.f32 %v5028_v37, %v767_v49  ;;  %v1544_v48 = vld [vmem:[#allocation2 + $0x34] sm:$0x1]  ;;  %v769_v49 = vld [vmem:[#allocation2 + $0x33] sm:$0x1] }
 0x186   : > { %v4117_v1 = vadd.f32 %v3989_v24, %v3730_v50  ;;  %v3344_v9 = vadd.f32 %v3216_v36, %v2957_v58  ;;  %v3217_v12 = vmul.f32 %v5061_v8, %v3088_v53  ;;  %v3604_v13 = vmul.f32 %v5055_v2, %v3475_v54  ;;  %v3090_v53 = vld [vmem:[#allocation2 + $0x55] sm:$0x1]  ;;  %v1158_v56 = vld [vmem:[#allocation2 + $0x34] sm:$0x1] }
 0x187   : > { %v2571_v11 = vadd.f32 %v2443_v61, %v2185_v60  ;;  %v1799_v16 = vadd.f32 %v1671_v5, %v1412_v4  ;;  %v2058_v17 = vmul.f32 %v5046_v51, %v1929_v63  ;;  %v1026_v19 = vadd.f32 %v5035_v40, %v896_v7  ;;  %v1931_v63 = vld [vmem:[#allocation2 + $0x44] sm:$0x1]  ;;  %v3864_v4 = vld [vmem:[#allocation2 + $0x57] sm:$0x1] }
 0x188   : > { %4245 = vst.msk [vmem:[%s4658_s13 + $0x29] sm:$0x1] %vm326_vm0, %v4117_v1  ;;  %v1285_v20 = vmul.f32 %v5037_v41, %v1156_v0  ;;  %v3731_v22 = vadd.f32 %v3603_v44, %v3344_v9  ;;  %v3991_v24 = vmul.f32 %v5064_v10, %v3862_v3  ;;  %v2444_v25 = vmul.f32 %v5050_v57, %v2315_v6  ;;  %v1545_v0 = vld [vmem:[#allocation2 + $0x35] sm:$0x1]  ;;  %v3477_v3 = vld [vmem:[#allocation2 + $0x56] sm:$0x1] }
 0x189   : > { %v2958_v23 = vadd.f32 %v2830_v62, %v2571_v11  ;;  %v2186_v28 = vadd.f32 %v2058_v17, %v1799_v16  ;;  %v2831_v29 = vmul.f32 %v5052_v59, %v2702_v14  ;;  %v1672_v32 = vmul.f32 %v5040_v45, %v1543_v15  ;;  %v2704_v14 = vld [vmem:[#allocation2 + $0x46] sm:$0x1] }
 0x18a   : > { %v1413_v31 = vadd.f32 %v1285_v20, %v1026_v19  ;;  %v4118_v34 = vadd.f32 %v3990_v52, %v3731_v22  ;;  %v3218_v36 = vmul.f32 %v5061_v8, %v3089_v18  ;;  %v897_v42 = vmul.f32 %v5028_v37, %v768_v21  ;;  %v3091_v18 = vld [vmem:[#allocation2 + $0x56] sm:$0x1]  ;;  %v771_v21 = vld [vmem:[#allocation2 + $0x37] sm:$0x1] }
 0x18b   : > { %v3345_v35 = vadd.f32 %v3217_v12, %v2958_v23  ;;  %v2572_v43 = vadd.f32 %v2444_v25, %v2186_v28  ;;  %v3605_v44 = vmul.f32 %v5055_v2, %v3476_v26  ;;  %v2059_v47 = vmul.f32 %v5046_v51, %v1930_v27  ;;  %v3478_v26 = vld [vmem:[#allocation2 + $0x57] sm:$0x1]  ;;  %v1932_v27 = vld [vmem:[#allocation2 + $0x45] sm:$0x1] }
 0x18c   : > { %v1800_v46 = vadd.f32 %v1672_v32, %v1413_v31  ;;  %4246 = vst.msk [vmem:[%s4658_s13 + $0x2a] sm:$0x1] %vm326_vm0, %v4118_v34  ;;  %v3992_v52 = vmul.f32 %v5064_v10, %v3863_v30  ;;  %v1027_v54 = vadd.f32 %v5035_v40, %v897_v42  ;;  %v1286_v55 = vmul.f32 %v5037_v41, %v1157_v33  ;;  %v3865_v31 = vld [vmem:[#allocation2 + $0x58] sm:$0x1] }
 0x18d   : > { %v3732_v50 = vadd.f32 %v3604_v13, %v3345_v35  ;;  %v2959_v58 = vadd.f32 %v2831_v29, %v2572_v43  ;;  %v2445_v61 = vmul.f32 %v5050_v57, %v2316_v38  ;;  %v2832_v62 = vmul.f32 %v5052_v59, %v2703_v39  ;;  %v2317_v13 = vld [vmem:[#allocation2 + $0x45] sm:$0x1]  ;;  %v1160_v33 = vld [vmem:[#allocation2 + $0x38] sm:$0x1]  ;;  %v2318_v38 = vld [vmem:[#allocation2 + $0x46] sm:$0x1] }
 0x18e   : > { %v2187_v60 = vadd.f32 %v2059_v47, %v1800_v46  ;;  %v1414_v5 = vadd.f32 %v1286_v55, %v1027_v54  ;;  %v1673_v6 = vmul.f32 %v5040_v45, %v1544_v48  ;;  %v898_v7 = vmul.f32 %v5028_v37, %v769_v49  ;;  %v2705_v39 = vld [vmem:[#allocation2 + $0x47] sm:$0x1]  ;;  %v1547_v48 = vld [vmem:[#allocation2 + $0x39] sm:$0x1]  ;;  %v772_v49 = vld [vmem:[#allocation2 + $0x38] sm:$0x1] }
 0x18f   : > { %v4119_v1 = vadd.f32 %v3991_v24, %v3732_v50  ;;  %v3346_v9 = vadd.f32 %v3218_v36, %v2959_v58  ;;  %v3219_v12 = vmul.f32 %v5061_v8, %v3090_v53  ;;  %v1287_v15 = vmul.f32 %v5037_v41, %v1158_v56  ;;  %v3092_v53 = vld [vmem:[#allocation2 + $0x57] sm:$0x1]  ;;  %v3479_v54 = vld [vmem:[#allocation2 + $0x58] sm:$0x1] }
 0x190   : > { %v2573_v11 = vadd.f32 %v2445_v61, %v2187_v60  ;;  %v1801_v16 = vadd.f32 %v1673_v6, %v1414_v5  ;;  %v2060_v17 = vmul.f32 %v5046_v51, %v1931_v63  ;;  %v1028_v19 = vadd.f32 %v5035_v40, %v898_v7  ;;  %v1934_v63 = vld [vmem:[#allocation2 + $0x49] sm:$0x1]  ;;  %v2320_v6 = vld [vmem:[#allocation2 + $0x4a] sm:$0x1] }
 0x191   : > { %4247 = vst.msk [vmem:[%s4658_s13 + $0x2b] sm:$0x1] %vm326_vm0, %v4119_v1  ;;  %v1674_v20 = vmul.f32 %v5040_v45, %v1545_v0  ;;  %v3733_v22 = vadd.f32 %v3605_v44, %v3346_v9  ;;  %v3606_v24 = vmul.f32 %v5055_v2, %v3477_v3  ;;  %v3993_v25 = vmul.f32 %v5064_v10, %v3864_v4  ;;  %v1161_v0 = vld [vmem:[#allocation2 + $0x39] sm:$0x1] }
 0x192   : > { %v2960_v23 = vadd.f32 %v2832_v62, %v2573_v11  ;;  %v2188_v28 = vadd.f32 %v2060_v17, %v1801_v16  ;;  %v2446_v29 = vmul.f32 %v5050_v57, %v2317_v13  ;;  %v2833_v30 = vmul.f32 %v5052_v59, %v2704_v14  ;;  %v3866_v3 = vld [vmem:[#allocation2 + $0x59] sm:$0x1]  ;;  %v2707_v14 = vld [vmem:[#allocation2 + $0x4b] sm:$0x1] }
 0x193   : > { %v1415_v32 = vadd.f32 %v1287_v15, %v1028_v19  ;;  %v4120_v34 = vadd.f32 %v3992_v52, %v3733_v22  ;;  %v3220_v36 = vmul.f32 %v5061_v8, %v3091_v18  ;;  %v900_v42 = vmul.f32 %v5028_v37, %v771_v21  ;;  %v1548_v15 = vld [vmem:[#allocation2 + $0x3a] sm:$0x1]  ;;  %v3094_v18 = vld [vmem:[#allocation2 + $0x5b] sm:$0x1]  ;;  %v773_v21 = vld [vmem:[#allocation2 + $0x39] sm:$0x1] }
 0x194   : > { %v3347_v35 = vadd.f32 %v3219_v12, %v2960_v23  ;;  %v2574_v43 = vadd.f32 %v2446_v29, %v2188_v28  ;;  %v3607_v44 = vmul.f32 %v5055_v2, %v3478_v26  ;;  %v2061_v47 = vmul.f32 %v5046_v51, %v1932_v27  ;;  %v3481_v26 = vld [vmem:[#allocation2 + $0x5c] sm:$0x1]  ;;  %v1935_v27 = vld [vmem:[#allocation2 + $0x4a] sm:$0x1] }
 0x195   : > { %v1802_v46 = vadd.f32 %v1674_v20, %v1415_v32  ;;  %4248 = vst.msk [vmem:[%s4658_s13 + $0x2c] sm:$0x1] %vm326_vm0, %v4120_v34  ;;  %v3994_v52 = vmul.f32 %v5064_v10, %v3865_v31  ;;  %v1030_v55 = vadd.f32 %v5035_v40, %v900_v42  ;;  %v1289_v56 = vmul.f32 %v5037_v41, %v1160_v33  ;;  %v1162_v33 = vld [vmem:[#allocation2 + $0x3a] sm:$0x1] }
 0x196   : > { %v3734_v50 = vadd.f32 %v3606_v24, %v3347_v35  ;;  %v2961_v58 = vadd.f32 %v2833_v30, %v2574_v43  ;;  %v2447_v61 = vmul.f32 %v5050_v57, %v2318_v38  ;;  %v2834_v62 = vmul.f32 %v5052_v59, %v2705_v39  ;;  %v3868_v30 = vld [vmem:[#allocation2 + $0x5d] sm:$0x1]  ;;  %v2321_v38 = vld [vmem:[#allocation2 + $0x4b] sm:$0x1]  ;;  %v2708_v39 = vld [vmem:[#allocation2 + $0x4c] sm:$0x1] }
 0x197   : > { %v2189_v60 = vadd.f32 %v2061_v47, %v1802_v46  ;;  %v1417_v4 = vadd.f32 %v1289_v56, %v1030_v55  ;;  %v1676_v5 = vmul.f32 %v5040_v45, %v1547_v48  ;;  %v901_v7 = vmul.f32 %v5028_v37, %v772_v49  ;;  %v1549_v48 = vld [vmem:[#allocation2 + $0x3b] sm:$0x1]  ;;  %v774_v49 = vld [vmem:[#allocation2 + $0x3a] sm:$0x1] }
 0x198   : > { %v4121_v1 = vadd.f32 %v3993_v25, %v3734_v50  ;;  %v3348_v9 = vadd.f32 %v3220_v36, %v2961_v58  ;;  %v3221_v12 = vmul.f32 %v5061_v8, %v3092_v53  ;;  %v3608_v13 = vmul.f32 %v5055_v2, %v3479_v54  ;;  %v3095_v53 = vld [vmem:[#allocation2 + $0x5c] sm:$0x1]  ;;  %v3482_v54 = vld [vmem:[#allocation2 + $0x5d] sm:$0x1] }
 0x199   : > { %v2575_v11 = vadd.f32 %v2447_v61, %v2189_v60  ;;  %v1804_v16 = vadd.f32 %v1676_v5, %v1417_v4  ;;  %v2063_v17 = vmul.f32 %v5046_v51, %v1934_v63  ;;  %v1031_v19 = vadd.f32 %v5035_v40, %v901_v7  ;;  %v1936_v63 = vld [vmem:[#allocation2 + $0x4b] sm:$0x1] }
 0x19a   : > { %4249 = vst.msk [vmem:[%s4658_s13 + $0x2d] sm:$0x1] %vm326_vm0, %v4121_v1  ;;  %v1290_v20 = vmul.f32 %v5037_v41, %v1161_v0  ;;  %v3735_v22 = vadd.f32 %v3607_v44, %v3348_v9  ;;  %v3995_v24 = vmul.f32 %v5064_v10, %v3866_v3  ;;  %v2449_v25 = vmul.f32 %v5050_v57, %v2320_v6  ;;  %v1163_v0 = vld [vmem:[#allocation2 + $0x3b] sm:$0x1]  ;;  %v3869_v3 = vld [vmem:[#allocation2 + $0x5e] sm:$0x1] }
 0x19b   : > { %v2962_v23 = vadd.f32 %v2834_v62, %v2575_v11  ;;  %v2191_v28 = vadd.f32 %v2063_v17, %v1804_v16  ;;  %v2836_v29 = vmul.f32 %v5052_v59, %v2707_v14  ;;  %v1677_v32 = vmul.f32 %v5040_v45, %v1548_v15  ;;  %v2322_v6 = vld [vmem:[#allocation2 + $0x4c] sm:$0x1]  ;;  %v2709_v14 = vld [vmem:[#allocation2 + $0x4d] sm:$0x1]  ;;  %v1550_v15 = vld [vmem:[#allocation2 + $0x3c] sm:$0x1] }
 0x19c   : > { %v1418_v31 = vadd.f32 %v1290_v20, %v1031_v19  ;;  %v4122_v34 = vadd.f32 %v3994_v52, %v3735_v22  ;;  %v3223_v36 = vmul.f32 %v5061_v8, %v3094_v18  ;;  %v902_v42 = vmul.f32 %v5028_v37, %v773_v21  ;;  %v3096_v18 = vld [vmem:[#allocation2 + $0x5d] sm:$0x1]  ;;  %v775_v21 = vld [vmem:[#allocation2 + $0x3b] sm:$0x1] }
 0x19d   : > { %v3349_v35 = vadd.f32 %v3221_v12, %v2962_v23  ;;  %v2577_v43 = vadd.f32 %v2449_v25, %v2191_v28  ;;  %v3610_v44 = vmul.f32 %v5055_v2, %v3481_v26  ;;  %v2064_v47 = vmul.f32 %v5046_v51, %v1935_v27  ;;  %v3483_v26 = vld [vmem:[#allocation2 + $0x5e] sm:$0x1]  ;;  %v1937_v27 = vld [vmem:[#allocation2 + $0x4c] sm:$0x1] }
 0x19e   : > { %v1805_v46 = vadd.f32 %v1677_v32, %v1418_v31  ;;  %4250 = vst.msk [vmem:[%s4658_s13 + $0x2e] sm:$0x1] %vm326_vm0, %v4122_v34  ;;  %v3997_v52 = vmul.f32 %v5064_v10, %v3868_v30  ;;  %v1032_v55 = vadd.f32 %v5035_v40, %v902_v42  ;;  %v1291_v56 = vmul.f32 %v5037_v41, %v1162_v33  ;;  %v3870_v30 = vld [vmem:[#allocation2 + $0x5f] sm:$0x1]  ;;  %v1164_v33 = vld [vmem:[#allocation2 + $0x3c] sm:$0x1] }
 0x19f   : > { %v3736_v50 = vadd.f32 %v3608_v13, %v3349_v35  ;;  %v2964_v58 = vadd.f32 %v2836_v29, %v2577_v43  ;;  %v2450_v61 = vmul.f32 %v5050_v57, %v2321_v38  ;;  %v2837_v62 = vmul.f32 %v5052_v59, %v2708_v39  ;;  %v2323_v38 = vld [vmem:[#allocation2 + $0x4d] sm:$0x1]  ;;  %v2710_v39 = vld [vmem:[#allocation2 + $0x4e] sm:$0x1] }
 0x1a0   : > { %v2192_v60 = vadd.f32 %v2064_v47, %v1805_v46  ;;  %v1419_v4 = vadd.f32 %v1291_v56, %v1032_v55  ;;  %v1678_v5 = vmul.f32 %v5040_v45, %v1549_v48  ;;  %v903_v7 = vmul.f32 %v5028_v37, %v774_v49  ;;  %v1551_v48 = vld [vmem:[#allocation2 + $0x3d] sm:$0x1]  ;;  %v776_v49 = vld [vmem:[#allocation2 + $0x3c] sm:$0x1] }
 0x1a1   : > { %v4123_v1 = vadd.f32 %v3995_v24, %v3736_v50  ;;  %v3351_v9 = vadd.f32 %v3223_v36, %v2964_v58  ;;  %v3224_v12 = vmul.f32 %v5061_v8, %v3095_v53  ;;  %v3611_v13 = vmul.f32 %v5055_v2, %v3482_v54  ;;  %v3097_v53 = vld [vmem:[#allocation2 + $0x5e] sm:$0x1]  ;;  %v3484_v54 = vld [vmem:[#allocation2 + $0x5f] sm:$0x1] }
 0x1a2   : > { %v2578_v11 = vadd.f32 %v2450_v61, %v2192_v60  ;;  %v1806_v16 = vadd.f32 %v1678_v5, %v1419_v4  ;;  %v2065_v17 = vmul.f32 %v5046_v51, %v1936_v63  ;;  %v1033_v19 = vadd.f32 %v5035_v40, %v903_v7  ;;  %v1938_v63 = vld [vmem:[#allocation2 + $0x4d] sm:$0x1] }
 0x1a3   : > { %4251 = vst.msk [vmem:[%s4658_s13 + $0x2f] sm:$0x1] %vm326_vm0, %v4123_v1  ;;  %v1292_v20 = vmul.f32 %v5037_v41, %v1163_v0  ;;  %v3738_v22 = vadd.f32 %v3610_v44, %v3351_v9  ;;  %v3998_v24 = vmul.f32 %v5064_v10, %v3869_v3  ;;  %v2451_v25 = vmul.f32 %v5050_v57, %v2322_v6  ;;  %v1165_v0 = vld [vmem:[#allocation2 + $0x3d] sm:$0x1]  ;;  %v3871_v3 = vld [vmem:[#allocation2 + $0x60] sm:$0x1] }
 0x1a4   : > { %v2965_v23 = vadd.f32 %v2837_v62, %v2578_v11  ;;  %v2193_v28 = vadd.f32 %v2065_v17, %v1806_v16  ;;  %v2838_v29 = vmul.f32 %v5052_v59, %v2709_v14  ;;  %v1679_v32 = vmul.f32 %v5040_v45, %v1550_v15  ;;  %v2324_v6 = vld [vmem:[#allocation2 + $0x4e] sm:$0x1]  ;;  %v2711_v14 = vld [vmem:[#allocation2 + $0x4f] sm:$0x1]  ;;  %v1552_v15 = vld [vmem:[#allocation2 + $0x3e] sm:$0x1] }
 0x1a5   : > { %v1420_v31 = vadd.f32 %v1292_v20, %v1033_v19  ;;  %v4125_v34 = vadd.f32 %v3997_v52, %v3738_v22  ;;  %v3225_v36 = vmul.f32 %v5061_v8, %v3096_v18  ;;  %v904_v42 = vmul.f32 %v5028_v37, %v775_v21  ;;  %v3098_v18 = vld [vmem:[#allocation2 + $0x5f] sm:$0x1]  ;;  %v777_v21 = vld [vmem:[#allocation2 + $0x3d] sm:$0x1] }
 0x1a6   : > { %v3352_v35 = vadd.f32 %v3224_v12, %v2965_v23  ;;  %v2579_v43 = vadd.f32 %v2451_v25, %v2193_v28  ;;  %v3612_v44 = vmul.f32 %v5055_v2, %v3483_v26  ;;  %v2066_v47 = vmul.f32 %v5046_v51, %v1937_v27  ;;  %v3485_v26 = vld [vmem:[#allocation2 + $0x60] sm:$0x1]  ;;  %v1939_v27 = vld [vmem:[#allocation2 + $0x4e] sm:$0x1] }
 0x1a7   : > { %v1807_v46 = vadd.f32 %v1679_v32, %v1420_v31  ;;  %4253 = vst.msk [vmem:[%s4658_s13 + $0x31] sm:$0x1] %vm326_vm0, %v4125_v34  ;;  %v3999_v52 = vmul.f32 %v5064_v10, %v3870_v30  ;;  %v1034_v55 = vadd.f32 %v5035_v40, %v904_v42  ;;  %v1293_v56 = vmul.f32 %v5037_v41, %v1164_v33  ;;  %v3872_v30 = vld [vmem:[#allocation2 + $0x61] sm:$0x1]  ;;  %v1166_v33 = vld [vmem:[#allocation2 + $0x3e] sm:$0x1] }
 0x1a8   : > { %v3739_v50 = vadd.f32 %v3611_v13, %v3352_v35  ;;  %v2966_v58 = vadd.f32 %v2838_v29, %v2579_v43  ;;  %v2452_v61 = vmul.f32 %v5050_v57, %v2323_v38  ;;  %v2839_v62 = vmul.f32 %v5052_v59, %v2710_v39  ;;  %v2325_v38 = vld [vmem:[#allocation2 + $0x4f] sm:$0x1]  ;;  %v2712_v39 = vld [vmem:[#allocation2 + $0x50] sm:$0x1] }
 0x1a9   : > { %v2194_v60 = vadd.f32 %v2066_v47, %v1807_v46  ;;  %v1421_v4 = vadd.f32 %v1293_v56, %v1034_v55  ;;  %v1680_v5 = vmul.f32 %v5040_v45, %v1551_v48  ;;  %v905_v7 = vmul.f32 %v5028_v37, %v776_v49  ;;  %v1553_v48 = vld [vmem:[#allocation2 + $0x3f] sm:$0x1]  ;;  %v778_v49 = vld [vmem:[#allocation2 + $0x3e] sm:$0x1] }
 0x1aa   : > { %v4126_v1 = vadd.f32 %v3998_v24, %v3739_v50  ;;  %v3353_v9 = vadd.f32 %v3225_v36, %v2966_v58  ;;  %v3226_v12 = vmul.f32 %v5061_v8, %v3097_v53  ;;  %v3613_v13 = vmul.f32 %v5055_v2, %v3484_v54  ;;  %v3099_v53 = vld [vmem:[#allocation2 + $0x60] sm:$0x1]  ;;  %v3486_v54 = vld [vmem:[#allocation2 + $0x61] sm:$0x1] }
 0x1ab   : > { %v2580_v11 = vadd.f32 %v2452_v61, %v2194_v60  ;;  %v1808_v16 = vadd.f32 %v1680_v5, %v1421_v4  ;;  %v2067_v17 = vmul.f32 %v5046_v51, %v1938_v63  ;;  %v1035_v19 = vadd.f32 %v5035_v40, %v905_v7  ;;  %v1940_v63 = vld [vmem:[#allocation2 + $0x4f] sm:$0x1] }
 0x1ac   : > { %4254 = vst.msk [vmem:[%s4658_s13 + $0x32] sm:$0x1] %vm326_vm0, %v4126_v1  ;;  %v1294_v20 = vmul.f32 %v5037_v41, %v1165_v0  ;;  %v3740_v22 = vadd.f32 %v3612_v44, %v3353_v9  ;;  %v4000_v24 = vmul.f32 %v5064_v10, %v3871_v3  ;;  %v2453_v25 = vmul.f32 %v5050_v57, %v2324_v6  ;;  %v1167_v0 = vld [vmem:[#allocation2 + $0x3f] sm:$0x1]  ;;  %v3873_v3 = vld [vmem:[#allocation2 + $0x62] sm:$0x1] }
 0x1ad   : > { %v2967_v23 = vadd.f32 %v2839_v62, %v2580_v11  ;;  %v2195_v28 = vadd.f32 %v2067_v17, %v1808_v16  ;;  %v2840_v29 = vmul.f32 %v5052_v59, %v2711_v14  ;;  %v1681_v32 = vmul.f32 %v5040_v45, %v1552_v15  ;;  %v2326_v6 = vld [vmem:[#allocation2 + $0x50] sm:$0x1]  ;;  %v2713_v14 = vld [vmem:[#allocation2 + $0x51] sm:$0x1]  ;;  %v1554_v15 = vld [vmem:[#allocation2 + $0x40] sm:$0x1] }
 0x1ae   : > { %v1422_v31 = vadd.f32 %v1294_v20, %v1035_v19  ;;  %v4127_v34 = vadd.f32 %v3999_v52, %v3740_v22  ;;  %v3227_v36 = vmul.f32 %v5061_v8, %v3098_v18  ;;  %v906_v42 = vmul.f32 %v5028_v37, %v777_v21  ;;  %v3100_v18 = vld [vmem:[#allocation2 + $0x61] sm:$0x1]  ;;  %v779_v21 = vld [vmem:[#allocation2 + $0x3f] sm:$0x1] }
 0x1af   : > { %v3354_v35 = vadd.f32 %v3226_v12, %v2967_v23  ;;  %v2581_v43 = vadd.f32 %v2453_v25, %v2195_v28  ;;  %v3614_v44 = vmul.f32 %v5055_v2, %v3485_v26  ;;  %v2068_v47 = vmul.f32 %v5046_v51, %v1939_v27  ;;  %v3487_v26 = vld [vmem:[#allocation2 + $0x62] sm:$0x1]  ;;  %v1941_v27 = vld [vmem:[#allocation2 + $0x50] sm:$0x1] }
 0x1b0   : > { %v1809_v46 = vadd.f32 %v1681_v32, %v1422_v31  ;;  %4255 = vst.msk [vmem:[%s4658_s13 + $0x33] sm:$0x1] %vm326_vm0, %v4127_v34  ;;  %v4001_v52 = vmul.f32 %v5064_v10, %v3872_v30  ;;  %v1036_v55 = vadd.f32 %v5035_v40, %v906_v42  ;;  %v1295_v56 = vmul.f32 %v5037_v41, %v1166_v33  ;;  %v3874_v30 = vld [vmem:[#allocation2 + $0x63] sm:$0x1]  ;;  %v1168_v33 = vld [vmem:[#allocation2 + $0x40] sm:$0x1] }
 0x1b1   : > { %v3741_v50 = vadd.f32 %v3613_v13, %v3354_v35  ;;  %v2968_v58 = vadd.f32 %v2840_v29, %v2581_v43  ;;  %v2454_v61 = vmul.f32 %v5050_v57, %v2325_v38  ;;  %v2841_v62 = vmul.f32 %v5052_v59, %v2712_v39  ;;  %v2327_v38 = vld [vmem:[#allocation2 + $0x51] sm:$0x1]  ;;  %v2714_v39 = vld [vmem:[#allocation2 + $0x52] sm:$0x1] }
 0x1b2   : > { %v2196_v60 = vadd.f32 %v2068_v47, %v1809_v46  ;;  %v1423_v4 = vadd.f32 %v1295_v56, %v1036_v55  ;;  %v1682_v5 = vmul.f32 %v5040_v45, %v1553_v48  ;;  %v907_v7 = vmul.f32 %v5028_v37, %v778_v49  ;;  %v1555_v48 = vld [vmem:[#allocation2 + $0x41] sm:$0x1]  ;;  %v780_v49 = vld [vmem:[#allocation2 + $0x40] sm:$0x1] }
 0x1b3   : > { %v4128_v1 = vadd.f32 %v4000_v24, %v3741_v50  ;;  %v3355_v9 = vadd.f32 %v3227_v36, %v2968_v58  ;;  %v3228_v12 = vmul.f32 %v5061_v8, %v3099_v53  ;;  %v3615_v13 = vmul.f32 %v5055_v2, %v3486_v54  ;;  %v3101_v53 = vld [vmem:[#allocation2 + $0x62] sm:$0x1]  ;;  %v3488_v54 = vld [vmem:[#allocation2 + $0x63] sm:$0x1] }
 0x1b4   : > { %v2582_v11 = vadd.f32 %v2454_v61, %v2196_v60  ;;  %v1810_v16 = vadd.f32 %v1682_v5, %v1423_v4  ;;  %v2069_v17 = vmul.f32 %v5046_v51, %v1940_v63  ;;  %v1037_v19 = vadd.f32 %v5035_v40, %v907_v7  ;;  %v1942_v63 = vld [vmem:[#allocation2 + $0x51] sm:$0x1] }
 0x1b5   : > { %4256 = vst.msk [vmem:[%s4658_s13 + $0x34] sm:$0x1] %vm326_vm0, %v4128_v1  ;;  %v1296_v20 = vmul.f32 %v5037_v41, %v1167_v0  ;;  %v3742_v22 = vadd.f32 %v3614_v44, %v3355_v9  ;;  %v4002_v24 = vmul.f32 %v5064_v10, %v3873_v3  ;;  %v2455_v25 = vmul.f32 %v5050_v57, %v2326_v6  ;;  %v1169_v0 = vld [vmem:[#allocation2 + $0x41] sm:$0x1]  ;;  %v3875_v3 = vld [vmem:[#allocation2 + $0x64] sm:$0x1] }
 0x1b6   : > { %v2969_v23 = vadd.f32 %v2841_v62, %v2582_v11  ;;  %v2197_v28 = vadd.f32 %v2069_v17, %v1810_v16  ;;  %v2842_v29 = vmul.f32 %v5052_v59, %v2713_v14  ;;  %v1683_v32 = vmul.f32 %v5040_v45, %v1554_v15  ;;  %v2328_v6 = vld [vmem:[#allocation2 + $0x52] sm:$0x1]  ;;  %v2715_v14 = vld [vmem:[#allocation2 + $0x53] sm:$0x1]  ;;  %v1556_v15 = vld [vmem:[#allocation2 + $0x42] sm:$0x1] }
 0x1b7   : > { %v1424_v31 = vadd.f32 %v1296_v20, %v1037_v19  ;;  %v4129_v34 = vadd.f32 %v4001_v52, %v3742_v22  ;;  %v3229_v36 = vmul.f32 %v5061_v8, %v3100_v18  ;;  %v908_v42 = vmul.f32 %v5028_v37, %v779_v21  ;;  %v3102_v18 = vld [vmem:[#allocation2 + $0x63] sm:$0x1]  ;;  %v781_v21 = vld [vmem:[#allocation2 + $0x41] sm:$0x1] }
 0x1b8   : > { %v3356_v35 = vadd.f32 %v3228_v12, %v2969_v23  ;;  %v2583_v43 = vadd.f32 %v2455_v25, %v2197_v28  ;;  %v3616_v44 = vmul.f32 %v5055_v2, %v3487_v26  ;;  %v2070_v47 = vmul.f32 %v5046_v51, %v1941_v27  ;;  %v3489_v26 = vld [vmem:[#allocation2 + $0x64] sm:$0x1]  ;;  %v1943_v27 = vld [vmem:[#allocation2 + $0x52] sm:$0x1] }
 0x1b9   : > { %v1811_v46 = vadd.f32 %v1683_v32, %v1424_v31  ;;  %4257 = vst.msk [vmem:[%s4658_s13 + $0x35] sm:$0x1] %vm326_vm0, %v4129_v34  ;;  %v4003_v52 = vmul.f32 %v5064_v10, %v3874_v30  ;;  %v1038_v55 = vadd.f32 %v5035_v40, %v908_v42  ;;  %v1297_v56 = vmul.f32 %v5037_v41, %v1168_v33  ;;  %v3876_v30 = vld [vmem:[#allocation2 + $0x65] sm:$0x1]  ;;  %v1170_v33 = vld [vmem:[#allocation2 + $0x42] sm:$0x1] }
 0x1ba   : > { %v3743_v50 = vadd.f32 %v3615_v13, %v3356_v35  ;;  %v2970_v58 = vadd.f32 %v2842_v29, %v2583_v43  ;;  %v2456_v61 = vmul.f32 %v5050_v57, %v2327_v38  ;;  %v2843_v62 = vmul.f32 %v5052_v59, %v2714_v39  ;;  %v2329_v38 = vld [vmem:[#allocation2 + $0x53] sm:$0x1]  ;;  %v2716_v39 = vld [vmem:[#allocation2 + $0x54] sm:$0x1] }
 0x1bb   : > { %v2198_v60 = vadd.f32 %v2070_v47, %v1811_v46  ;;  %v1425_v4 = vadd.f32 %v1297_v56, %v1038_v55  ;;  %v1684_v5 = vmul.f32 %v5040_v45, %v1555_v48  ;;  %v909_v7 = vmul.f32 %v5028_v37, %v780_v49  ;;  %v1557_v48 = vld [vmem:[#allocation2 + $0x43] sm:$0x1]  ;;  %v782_v49 = vld [vmem:[#allocation2 + $0x42] sm:$0x1] }
 0x1bc   : > { %v4130_v1 = vadd.f32 %v4002_v24, %v3743_v50  ;;  %v3357_v9 = vadd.f32 %v3229_v36, %v2970_v58  ;;  %v3230_v12 = vmul.f32 %v5061_v8, %v3101_v53  ;;  %v3617_v13 = vmul.f32 %v5055_v2, %v3488_v54  ;;  %v3103_v53 = vld [vmem:[#allocation2 + $0x64] sm:$0x1]  ;;  %v3490_v54 = vld [vmem:[#allocation2 + $0x65] sm:$0x1] }
 0x1bd   : > { %v2584_v11 = vadd.f32 %v2456_v61, %v2198_v60  ;;  %v1812_v16 = vadd.f32 %v1684_v5, %v1425_v4  ;;  %v2071_v17 = vmul.f32 %v5046_v51, %v1942_v63  ;;  %v1039_v19 = vadd.f32 %v5035_v40, %v909_v7  ;;  %v1944_v63 = vld [vmem:[#allocation2 + $0x53] sm:$0x1] }
 0x1be   : > { %4258 = vst.msk [vmem:[%s4658_s13 + $0x36] sm:$0x1] %vm326_vm0, %v4130_v1  ;;  %v1298_v20 = vmul.f32 %v5037_v41, %v1169_v0  ;;  %v3744_v22 = vadd.f32 %v3616_v44, %v3357_v9  ;;  %v4004_v24 = vmul.f32 %v5064_v10, %v3875_v3  ;;  %v2457_v25 = vmul.f32 %v5050_v57, %v2328_v6  ;;  %v1171_v0 = vld [vmem:[#allocation2 + $0x43] sm:$0x1]  ;;  %v3877_v3 = vld [vmem:[#allocation2 + $0x66] sm:$0x1] }
 0x1bf   : > { %v2971_v23 = vadd.f32 %v2843_v62, %v2584_v11  ;;  %v2199_v28 = vadd.f32 %v2071_v17, %v1812_v16  ;;  %v2844_v29 = vmul.f32 %v5052_v59, %v2715_v14  ;;  %v1685_v32 = vmul.f32 %v5040_v45, %v1556_v15  ;;  %v2330_v6 = vld [vmem:[#allocation2 + $0x54] sm:$0x1]  ;;  %v2717_v14 = vld [vmem:[#allocation2 + $0x55] sm:$0x1]  ;;  %v1558_v15 = vld [vmem:[#allocation2 + $0x44] sm:$0x1] }
 0x1c0   : > { %v1426_v31 = vadd.f32 %v1298_v20, %v1039_v19  ;;  %v4131_v34 = vadd.f32 %v4003_v52, %v3744_v22  ;;  %v3231_v36 = vmul.f32 %v5061_v8, %v3102_v18  ;;  %v910_v42 = vmul.f32 %v5028_v37, %v781_v21  ;;  %v3104_v18 = vld [vmem:[#allocation2 + $0x65] sm:$0x1]  ;;  %v783_v21 = vld [vmem:[#allocation2 + $0x43] sm:$0x1] }
 0x1c1   : > { %v3358_v35 = vadd.f32 %v3230_v12, %v2971_v23  ;;  %v2585_v43 = vadd.f32 %v2457_v25, %v2199_v28  ;;  %v3618_v44 = vmul.f32 %v5055_v2, %v3489_v26  ;;  %v2072_v47 = vmul.f32 %v5046_v51, %v1943_v27  ;;  %v3491_v26 = vld [vmem:[#allocation2 + $0x66] sm:$0x1]  ;;  %v1945_v27 = vld [vmem:[#allocation2 + $0x54] sm:$0x1] }
 0x1c2   : > { %v1813_v46 = vadd.f32 %v1685_v32, %v1426_v31  ;;  %4259 = vst.msk [vmem:[%s4658_s13 + $0x37] sm:$0x1] %vm326_vm0, %v4131_v34  ;;  %v4005_v52 = vmul.f32 %v5064_v10, %v3876_v30  ;;  %v1040_v55 = vadd.f32 %v5035_v40, %v910_v42  ;;  %v1299_v56 = vmul.f32 %v5037_v41, %v1170_v33  ;;  %v3878_v30 = vld [vmem:[#allocation2 + $0x67] sm:$0x1]  ;;  %v1172_v33 = vld [vmem:[#allocation2 + $0x44] sm:$0x1] }
 0x1c3   : > { %v3745_v50 = vadd.f32 %v3617_v13, %v3358_v35  ;;  %v2972_v58 = vadd.f32 %v2844_v29, %v2585_v43  ;;  %v2458_v61 = vmul.f32 %v5050_v57, %v2329_v38  ;;  %v2845_v62 = vmul.f32 %v5052_v59, %v2716_v39  ;;  %v2331_v38 = vld [vmem:[#allocation2 + $0x55] sm:$0x1]  ;;  %v2718_v39 = vld [vmem:[#allocation2 + $0x56] sm:$0x1] }
 0x1c4   : > { %v2200_v60 = vadd.f32 %v2072_v47, %v1813_v46  ;;  %v1427_v4 = vadd.f32 %v1299_v56, %v1040_v55  ;;  %v1686_v5 = vmul.f32 %v5040_v45, %v1557_v48  ;;  %v911_v7 = vmul.f32 %v5028_v37, %v782_v49  ;;  %v1559_v48 = vld [vmem:[#allocation2 + $0x45] sm:$0x1]  ;;  %v784_v49 = vld [vmem:[#allocation2 + $0x44] sm:$0x1] }
 0x1c5   : > { %v4132_v1 = vadd.f32 %v4004_v24, %v3745_v50  ;;  %v3359_v9 = vadd.f32 %v3231_v36, %v2972_v58  ;;  %v3232_v12 = vmul.f32 %v5061_v8, %v3103_v53  ;;  %v3619_v13 = vmul.f32 %v5055_v2, %v3490_v54  ;;  %v3105_v53 = vld [vmem:[#allocation2 + $0x66] sm:$0x1]  ;;  %v3492_v54 = vld [vmem:[#allocation2 + $0x67] sm:$0x1] }
 0x1c6   : > { %v2586_v11 = vadd.f32 %v2458_v61, %v2200_v60  ;;  %v1814_v16 = vadd.f32 %v1686_v5, %v1427_v4  ;;  %v2073_v17 = vmul.f32 %v5046_v51, %v1944_v63  ;;  %v1041_v19 = vadd.f32 %v5035_v40, %v911_v7  ;;  %v1946_v63 = vld [vmem:[#allocation2 + $0x55] sm:$0x1] }
 0x1c7   : > { %4260 = vst.msk [vmem:[%s4658_s13 + $0x38] sm:$0x1] %vm326_vm0, %v4132_v1  ;;  %v1300_v20 = vmul.f32 %v5037_v41, %v1171_v0  ;;  %v3746_v22 = vadd.f32 %v3618_v44, %v3359_v9  ;;  %v4006_v24 = vmul.f32 %v5064_v10, %v3877_v3  ;;  %v2459_v25 = vmul.f32 %v5050_v57, %v2330_v6  ;;  %v1173_v0 = vld [vmem:[#allocation2 + $0x45] sm:$0x1]  ;;  %v3879_v3 = vld [vmem:[#allocation2 + $0x68] sm:$0x1] }
 0x1c8   : > { %v2973_v23 = vadd.f32 %v2845_v62, %v2586_v11  ;;  %v2201_v28 = vadd.f32 %v2073_v17, %v1814_v16  ;;  %v2846_v29 = vmul.f32 %v5052_v59, %v2717_v14  ;;  %v1687_v32 = vmul.f32 %v5040_v45, %v1558_v15  ;;  %v2332_v6 = vld [vmem:[#allocation2 + $0x56] sm:$0x1]  ;;  %v2719_v14 = vld [vmem:[#allocation2 + $0x57] sm:$0x1]  ;;  %v1560_v15 = vld [vmem:[#allocation2 + $0x46] sm:$0x1] }
 0x1c9   : > { %v1428_v31 = vadd.f32 %v1300_v20, %v1041_v19  ;;  %v4133_v34 = vadd.f32 %v4005_v52, %v3746_v22  ;;  %v3233_v36 = vmul.f32 %v5061_v8, %v3104_v18  ;;  %v912_v42 = vmul.f32 %v5028_v37, %v783_v21  ;;  %v785_v20 = vld [vmem:[#allocation2 + $0x45] sm:$0x1]  ;;  %v1174_v21 = vld [vmem:[#allocation2 + $0x46] sm:$0x1] }
 0x1ca   : > { %v3360_v35 = vadd.f32 %v3232_v12, %v2973_v23  ;;  %v2587_v43 = vadd.f32 %v2459_v25, %v2201_v28  ;;  %v3620_v44 = vmul.f32 %v5055_v2, %v3491_v26  ;;  %v2074_v47 = vmul.f32 %v5046_v51, %v1945_v27  ;;  %v3106_v26 = vld [vmem:[#allocation2 + $0x67] sm:$0x1]  ;;  %v1947_v27 = vld [vmem:[#allocation2 + $0x56] sm:$0x1] }
 0x1cb   : > { %v1815_v46 = vadd.f32 %v1687_v32, %v1428_v31  ;;  %4261 = vst.msk [vmem:[%s4658_s13 + $0x39] sm:$0x1] %vm326_vm0, %v4133_v34  ;;  %v4007_v52 = vmul.f32 %v5064_v10, %v3878_v30  ;;  %v1042_v55 = vadd.f32 %v5035_v40, %v912_v42  ;;  %v1301_v56 = vmul.f32 %v5037_v41, %v1172_v33  ;;  %v3493_v30 = vld [vmem:[#allocation2 + $0x68] sm:$0x1]  ;;  %v1561_v33 = vld [vmem:[#allocation2 + $0x47] sm:$0x1] }
 0x1cc   : > { %v3747_v50 = vadd.f32 %v3619_v13, %v3360_v35  ;;  %v2974_v58 = vadd.f32 %v2846_v29, %v2587_v43  ;;  %v2460_v61 = vmul.f32 %v5050_v57, %v2331_v38  ;;  %v2847_v62 = vmul.f32 %v5052_v59, %v2718_v39  ;;  %v2333_v38 = vld [vmem:[#allocation2 + $0x57] sm:$0x1] }
 0x1cd   : > { %v2202_v60 = vadd.f32 %v2074_v47, %v1815_v46  ;;  %v1429_v4 = vadd.f32 %v1301_v56, %v1042_v55  ;;  %v1688_v5 = vmul.f32 %v5040_v45, %v1559_v48  ;;  %v913_v7 = vmul.f32 %v5028_v37, %v784_v49  ;;  %v2720_v48 = vld [vmem:[#allocation2 + $0x58] sm:$0x1]  ;;  %v787_v49 = vld [vmem:[#allocation2 + $0x49] sm:$0x1] }
 0x1ce   : > { %v4134_v1 = vadd.f32 %v4006_v24, %v3747_v50  ;;  %v3361_v9 = vadd.f32 %v3233_v36, %v2974_v58  ;;  %v3234_v12 = vmul.f32 %v5061_v8, %v3105_v53  ;;  %v3621_v13 = vmul.f32 %v5055_v2, %v3492_v54  ;;  %v3880_v36 = vld [vmem:[#allocation2 + $0x69] sm:$0x1]  ;;  %v3107_v53 = vld [vmem:[#allocation2 + $0x68] sm:$0x1] }
 0x1cf   : > { %v2588_v11 = vadd.f32 %v2460_v61, %v2202_v60  ;;  %v1816_v16 = vadd.f32 %v1688_v5, %v1429_v4  ;;  %v2075_v17 = vmul.f32 %v5046_v51, %v1946_v63  ;;  %v1043_v18 = vadd.f32 %v5035_v40, %v913_v7  ;;  %v3494_v54 = vld [vmem:[#allocation2 + $0x69] sm:$0x1]  ;;  %v1948_v63 = vld [vmem:[#allocation2 + $0x57] sm:$0x1]  ;;  %v3881_v4 = vld [vmem:[#allocation2 + $0x6a] sm:$0x1] }
 0x1d0   : > { %4262 = vst.msk [vmem:[%s4658_s13 + $0x3a] sm:$0x1] %vm326_vm0, %v4134_v1  ;;  %v1302_v19 = vmul.f32 %v5037_v41, %v1173_v0  ;;  %v3748_v22 = vadd.f32 %v3620_v44, %v3361_v9  ;;  %v4008_v24 = vmul.f32 %v5064_v10, %v3879_v3  ;;  %v2461_v25 = vmul.f32 %v5050_v57, %v2332_v6  ;;  %v1176_v0 = vld [vmem:[#allocation2 + $0x4a] sm:$0x1]  ;;  %v2334_v6 = vld [vmem:[#allocation2 + $0x58] sm:$0x1] }
 0x1d1   : > { %v2975_v23 = vadd.f32 %v2847_v62, %v2588_v11  ;;  %v2203_v28 = vadd.f32 %v2075_v17, %v1816_v16  ;;  %v2848_v29 = vmul.f32 %v5052_v59, %v2719_v14  ;;  %v1689_v32 = vmul.f32 %v5040_v45, %v1560_v15  ;;  %v2721_v14 = vld [vmem:[#allocation2 + $0x59] sm:$0x1]  ;;  %v1563_v15 = vld [vmem:[#allocation2 + $0x4b] sm:$0x1] }
 0x1d2   : > { %v1430_v31 = vadd.f32 %v1302_v19, %v1043_v18  ;;  %v4135_v34 = vadd.f32 %v4007_v52, %v3748_v22  ;;  %v914_v39 = vmul.f32 %v5028_v37, %v785_v20  ;;  %v1303_v42 = vmul.f32 %v5037_v41, %v1174_v21  ;;  %v3108_v18 = vld [vmem:[#allocation2 + $0x69] sm:$0x1]  ;;  %v788_v21 = vld [vmem:[#allocation2 + $0x4a] sm:$0x1] }
 0x1d3   : > { %v3362_v35 = vadd.f32 %v3234_v12, %v2975_v23  ;;  %v2589_v43 = vadd.f32 %v2461_v25, %v2203_v28  ;;  %v3235_v44 = vmul.f32 %v5061_v8, %v3106_v26  ;;  %v2076_v47 = vmul.f32 %v5046_v51, %v1947_v27  ;;  %v3495_v26 = vld [vmem:[#allocation2 + $0x6a] sm:$0x1]  ;;  %v1950_v27 = vld [vmem:[#allocation2 + $0x5b] sm:$0x1] }
 0x1d4   : > { %v1817_v46 = vadd.f32 %v1689_v32, %v1430_v31  ;;  %4263 = vst.msk [vmem:[%s4658_s13 + $0x3b] sm:$0x1] %vm326_vm0, %v4135_v34  ;;  %v3622_v52 = vmul.f32 %v5055_v2, %v3493_v30  ;;  %v1044_v55 = vadd.f32 %v5035_v40, %v914_v39  ;;  %v1690_v56 = vmul.f32 %v5040_v45, %v1561_v33  ;;  %v3882_v30 = vld [vmem:[#allocation2 + $0x6b] sm:$0x1]  ;;  %v2723_v39 = vld [vmem:[#allocation2 + $0x5d] sm:$0x1] }
 0x1d5   : > { %v3749_v50 = vadd.f32 %v3621_v13, %v3362_v35  ;;  %v2976_v58 = vadd.f32 %v2848_v29, %v2589_v43  ;;  %v4009_v60 = vmul.f32 %v5064_v10, %v3880_v36  ;;  %v2462_v62 = vmul.f32 %v5050_v57, %v2333_v38  ;;  %v1177_v33 = vld [vmem:[#allocation2 + $0x4b] sm:$0x1]  ;;  %v2336_v38 = vld [vmem:[#allocation2 + $0x5c] sm:$0x1] }
 0x1d6   : > { %v2204_v61 = vadd.f32 %v2076_v47, %v1817_v46  ;;  %v2849_v3 = vmul.f32 %v5052_v59, %v2720_v48  ;;  %v1431_v5 = vadd.f32 %v1303_v42, %v1044_v55  ;;  %v916_v7 = vmul.f32 %v5028_v37, %v787_v49  ;;  %v1564_v48 = vld [vmem:[#allocation2 + $0x4c] sm:$0x1]  ;;  %v789_v49 = vld [vmem:[#allocation2 + $0x4b] sm:$0x1] }
 0x1d7   : > { %v4136_v1 = vadd.f32 %v4008_v24, %v3749_v50  ;;  %v3363_v9 = vadd.f32 %v3235_v44, %v2976_v58  ;;  %v3236_v12 = vmul.f32 %v5061_v8, %v3107_v53  ;;  %v3623_v13 = vmul.f32 %v5055_v2, %v3494_v54  ;;  %v3110_v53 = vld [vmem:[#allocation2 + $0x6d] sm:$0x1]  ;;  %v3497_v54 = vld [vmem:[#allocation2 + $0x6e] sm:$0x1] }
 0x1d8   : > { %v2590_v11 = vadd.f32 %v2462_v62, %v2204_v61  ;;  %v1818_v16 = vadd.f32 %v1690_v56, %v1431_v5  ;;  %v2077_v17 = vmul.f32 %v5046_v51, %v1948_v63  ;;  %v1046_v19 = vadd.f32 %v5035_v40, %v916_v7  ;;  %v1951_v63 = vld [vmem:[#allocation2 + $0x5c] sm:$0x1] }
 0x1d9   : > { %4264 = vst.msk [vmem:[%s4658_s13 + $0x3c] sm:$0x1] %vm326_vm0, %v4136_v1  ;;  %v1305_v20 = vmul.f32 %v5037_v41, %v1176_v0  ;;  %v3750_v22 = vadd.f32 %v3622_v52, %v3363_v9  ;;  %v4010_v24 = vmul.f32 %v5064_v10, %v3881_v4  ;;  %v2463_v25 = vmul.f32 %v5050_v57, %v2334_v6  ;;  %v1178_v0 = vld [vmem:[#allocation2 + $0x4c] sm:$0x1]  ;;  %v2337_v6 = vld [vmem:[#allocation2 + $0x5d] sm:$0x1] }
 0x1da   : > { %v2977_v23 = vadd.f32 %v2849_v3, %v2590_v11  ;;  %v2205_v28 = vadd.f32 %v2077_v17, %v1818_v16  ;;  %v2850_v29 = vmul.f32 %v5052_v59, %v2721_v14  ;;  %v1692_v32 = vmul.f32 %v5040_v45, %v1563_v15  ;;  %v3884_v3 = vld [vmem:[#allocation2 + $0x6f] sm:$0x1]  ;;  %v2724_v14 = vld [vmem:[#allocation2 + $0x5e] sm:$0x1]  ;;  %v1565_v15 = vld [vmem:[#allocation2 + $0x4d] sm:$0x1] }
 0x1db   : > { %v1433_v31 = vadd.f32 %v1305_v20, %v1046_v19  ;;  %v4137_v34 = vadd.f32 %v4009_v60, %v3750_v22  ;;  %v3237_v36 = vmul.f32 %v5061_v8, %v3108_v18  ;;  %v917_v42 = vmul.f32 %v5028_v37, %v788_v21  ;;  %v3111_v18 = vld [vmem:[#allocation2 + $0x6e] sm:$0x1]  ;;  %v790_v21 = vld [vmem:[#allocation2 + $0x4c] sm:$0x1] }
 0x1dc   : > { %v3364_v35 = vadd.f32 %v3236_v12, %v2977_v23  ;;  %v2591_v43 = vadd.f32 %v2463_v25, %v2205_v28  ;;  %v3624_v44 = vmul.f32 %v5055_v2, %v3495_v26  ;;  %v2079_v47 = vmul.f32 %v5046_v51, %v1950_v27  ;;  %v3498_v26 = vld [vmem:[#allocation2 + $0x6f] sm:$0x1]  ;;  %v1952_v27 = vld [vmem:[#allocation2 + $0x5d] sm:$0x1] }
 0x1dd   : > { %v1820_v46 = vadd.f32 %v1692_v32, %v1433_v31  ;;  %4265 = vst.msk [vmem:[%s4658_s13 + $0x3d] sm:$0x1] %vm326_vm0, %v4137_v34  ;;  %v4011_v52 = vmul.f32 %v5064_v10, %v3882_v30  ;;  %v1047_v55 = vadd.f32 %v5035_v40, %v917_v42  ;;  %v1306_v56 = vmul.f32 %v5037_v41, %v1177_v33  ;;  %v3885_v30 = vld [vmem:[#allocation2 + $0x70] sm:$0x1]  ;;  %v1179_v33 = vld [vmem:[#allocation2 + $0x4d] sm:$0x1] }
 0x1de   : > { %v3751_v50 = vadd.f32 %v3623_v13, %v3364_v35  ;;  %v2978_v58 = vadd.f32 %v2850_v29, %v2591_v43  ;;  %v2465_v61 = vmul.f32 %v5050_v57, %v2336_v38  ;;  %v2852_v62 = vmul.f32 %v5052_v59, %v2723_v39  ;;  %v2338_v38 = vld [vmem:[#allocation2 + $0x5e] sm:$0x1]  ;;  %v2725_v39 = vld [vmem:[#allocation2 + $0x5f] sm:$0x1] }
 0x1df   : > { %v2207_v60 = vadd.f32 %v2079_v47, %v1820_v46  ;;  %v1434_v4 = vadd.f32 %v1306_v56, %v1047_v55  ;;  %v1693_v5 = vmul.f32 %v5040_v45, %v1564_v48  ;;  %v918_v7 = vmul.f32 %v5028_v37, %v789_v49  ;;  %v1566_v48 = vld [vmem:[#allocation2 + $0x4e] sm:$0x1]  ;;  %v791_v49 = vld [vmem:[#allocation2 + $0x4d] sm:$0x1] }
 0x1e0   : > { %v4138_v1 = vadd.f32 %v4010_v24, %v3751_v50  ;;  %v3365_v9 = vadd.f32 %v3237_v36, %v2978_v58  ;;  %v3239_v12 = vmul.f32 %v5061_v8, %v3110_v53  ;;  %v3626_v13 = vmul.f32 %v5055_v2, %v3497_v54  ;;  %v3112_v53 = vld [vmem:[#allocation2 + $0x6f] sm:$0x1]  ;;  %v3499_v54 = vld [vmem:[#allocation2 + $0x70] sm:$0x1] }
 0x1e1   : > { %v2593_v11 = vadd.f32 %v2465_v61, %v2207_v60  ;;  %v1821_v16 = vadd.f32 %v1693_v5, %v1434_v4  ;;  %v2080_v17 = vmul.f32 %v5046_v51, %v1951_v63  ;;  %v1048_v19 = vadd.f32 %v5035_v40, %v918_v7  ;;  %v1953_v63 = vld [vmem:[#allocation2 + $0x5e] sm:$0x1] }
 0x1e2   : > { %4266 = vst.msk [vmem:[%s4658_s13 + $0x3e] sm:$0x1] %vm326_vm0, %v4138_v1  ;;  %v1307_v20 = vmul.f32 %v5037_v41, %v1178_v0  ;;  %v3752_v22 = vadd.f32 %v3624_v44, %v3365_v9  ;;  %v4013_v24 = vmul.f32 %v5064_v10, %v3884_v3  ;;  %v2466_v25 = vmul.f32 %v5050_v57, %v2337_v6  ;;  %v1180_v0 = vld [vmem:[#allocation2 + $0x4e] sm:$0x1]  ;;  %v3886_v3 = vld [vmem:[#allocation2 + $0x71] sm:$0x1] }
 0x1e3   : > { %v2980_v23 = vadd.f32 %v2852_v62, %v2593_v11  ;;  %v2208_v28 = vadd.f32 %v2080_v17, %v1821_v16  ;;  %v2853_v29 = vmul.f32 %v5052_v59, %v2724_v14  ;;  %v1694_v32 = vmul.f32 %v5040_v45, %v1565_v15  ;;  %v2339_v6 = vld [vmem:[#allocation2 + $0x5f] sm:$0x1]  ;;  %v2726_v14 = vld [vmem:[#allocation2 + $0x60] sm:$0x1]  ;;  %v1567_v15 = vld [vmem:[#allocation2 + $0x4f] sm:$0x1] }
 0x1e4   : > { %v1435_v31 = vadd.f32 %v1307_v20, %v1048_v19  ;;  %v4139_v34 = vadd.f32 %v4011_v52, %v3752_v22  ;;  %v3240_v36 = vmul.f32 %v5061_v8, %v3111_v18  ;;  %v919_v42 = vmul.f32 %v5028_v37, %v790_v21  ;;  %v3113_v18 = vld [vmem:[#allocation2 + $0x70] sm:$0x1]  ;;  %v792_v21 = vld [vmem:[#allocation2 + $0x4e] sm:$0x1] }
 0x1e5   : > { %v3367_v35 = vadd.f32 %v3239_v12, %v2980_v23  ;;  %v2594_v43 = vadd.f32 %v2466_v25, %v2208_v28  ;;  %v3627_v44 = vmul.f32 %v5055_v2, %v3498_v26  ;;  %v2081_v47 = vmul.f32 %v5046_v51, %v1952_v27  ;;  %v3500_v26 = vld [vmem:[#allocation2 + $0x71] sm:$0x1]  ;;  %v1954_v27 = vld [vmem:[#allocation2 + $0x5f] sm:$0x1] }
 0x1e6   : > { %v1822_v46 = vadd.f32 %v1694_v32, %v1435_v31  ;;  %4267 = vst.msk [vmem:[%s4658_s13 + $0x3f] sm:$0x1] %vm326_vm0, %v4139_v34  ;;  %v4014_v52 = vmul.f32 %v5064_v10, %v3885_v30  ;;  %v1049_v55 = vadd.f32 %v5035_v40, %v919_v42  ;;  %v1308_v56 = vmul.f32 %v5037_v41, %v1179_v33  ;;  %v3887_v30 = vld [vmem:[#allocation2 + $0x72] sm:$0x1]  ;;  %v1181_v33 = vld [vmem:[#allocation2 + $0x4f] sm:$0x1] }
 0x1e7   : > { %v3754_v50 = vadd.f32 %v3626_v13, %v3367_v35  ;;  %v2981_v58 = vadd.f32 %v2853_v29, %v2594_v43  ;;  %v2467_v61 = vmul.f32 %v5050_v57, %v2338_v38  ;;  %v2854_v62 = vmul.f32 %v5052_v59, %v2725_v39  ;;  %v2340_v38 = vld [vmem:[#allocation2 + $0x60] sm:$0x1]  ;;  %v2727_v39 = vld [vmem:[#allocation2 + $0x61] sm:$0x1] }
 0x1e8   : > { %v2209_v60 = vadd.f32 %v2081_v47, %v1822_v46  ;;  %v1436_v4 = vadd.f32 %v1308_v56, %v1049_v55  ;;  %v1695_v5 = vmul.f32 %v5040_v45, %v1566_v48  ;;  %v920_v7 = vmul.f32 %v5028_v37, %v791_v49  ;;  %v1568_v48 = vld [vmem:[#allocation2 + $0x50] sm:$0x1]  ;;  %v793_v49 = vld [vmem:[#allocation2 + $0x4f] sm:$0x1] }
 0x1e9   : > { %v4141_v1 = vadd.f32 %v4013_v24, %v3754_v50  ;;  %v3368_v9 = vadd.f32 %v3240_v36, %v2981_v58  ;;  %v3241_v12 = vmul.f32 %v5061_v8, %v3112_v53  ;;  %v3628_v13 = vmul.f32 %v5055_v2, %v3499_v54  ;;  %v3114_v53 = vld [vmem:[#allocation2 + $0x71] sm:$0x1]  ;;  %v3501_v54 = vld [vmem:[#allocation2 + $0x72] sm:$0x1] }
 0x1ea   : > { %v2595_v11 = vadd.f32 %v2467_v61, %v2209_v60  ;;  %v1823_v16 = vadd.f32 %v1695_v5, %v1436_v4  ;;  %v2082_v17 = vmul.f32 %v5046_v51, %v1953_v63  ;;  %v1050_v19 = vadd.f32 %v5035_v40, %v920_v7  ;;  %v1955_v63 = vld [vmem:[#allocation2 + $0x60] sm:$0x1] }
 0x1eb   : > { %4269 = vst.msk [vmem:[%s4658_s13 + $0x41] sm:$0x1] %vm326_vm0, %v4141_v1  ;;  %v1309_v20 = vmul.f32 %v5037_v41, %v1180_v0  ;;  %v3755_v22 = vadd.f32 %v3627_v44, %v3368_v9  ;;  %v4015_v24 = vmul.f32 %v5064_v10, %v3886_v3  ;;  %v2468_v25 = vmul.f32 %v5050_v57, %v2339_v6  ;;  %v1182_v0 = vld [vmem:[#allocation2 + $0x50] sm:$0x1]  ;;  %v3888_v3 = vld [vmem:[#allocation2 + $0x73] sm:$0x1] }
 0x1ec   : > { %v2982_v23 = vadd.f32 %v2854_v62, %v2595_v11  ;;  %v2210_v28 = vadd.f32 %v2082_v17, %v1823_v16  ;;  %v2855_v29 = vmul.f32 %v5052_v59, %v2726_v14  ;;  %v1696_v32 = vmul.f32 %v5040_v45, %v1567_v15  ;;  %v2341_v6 = vld [vmem:[#allocation2 + $0x61] sm:$0x1]  ;;  %v2728_v14 = vld [vmem:[#allocation2 + $0x62] sm:$0x1]  ;;  %v1569_v15 = vld [vmem:[#allocation2 + $0x51] sm:$0x1] }
 0x1ed   : > { %v1437_v31 = vadd.f32 %v1309_v20, %v1050_v19  ;;  %v4142_v34 = vadd.f32 %v4014_v52, %v3755_v22  ;;  %v3242_v36 = vmul.f32 %v5061_v8, %v3113_v18  ;;  %v921_v42 = vmul.f32 %v5028_v37, %v792_v21  ;;  %v3115_v18 = vld [vmem:[#allocation2 + $0x72] sm:$0x1]  ;;  %v794_v21 = vld [vmem:[#allocation2 + $0x50] sm:$0x1] }
 0x1ee   : > { %v3369_v35 = vadd.f32 %v3241_v12, %v2982_v23  ;;  %v2596_v43 = vadd.f32 %v2468_v25, %v2210_v28  ;;  %v3629_v44 = vmul.f32 %v5055_v2, %v3500_v26  ;;  %v2083_v47 = vmul.f32 %v5046_v51, %v1954_v27  ;;  %v3502_v26 = vld [vmem:[#allocation2 + $0x73] sm:$0x1]  ;;  %v1956_v27 = vld [vmem:[#allocation2 + $0x61] sm:$0x1] }
 0x1ef   : > { %v1824_v46 = vadd.f32 %v1696_v32, %v1437_v31  ;;  %4270 = vst.msk [vmem:[%s4658_s13 + $0x42] sm:$0x1] %vm326_vm0, %v4142_v34  ;;  %v4016_v52 = vmul.f32 %v5064_v10, %v3887_v30  ;;  %v1051_v55 = vadd.f32 %v5035_v40, %v921_v42  ;;  %v1310_v56 = vmul.f32 %v5037_v41, %v1181_v33  ;;  %v3889_v30 = vld [vmem:[#allocation2 + $0x74] sm:$0x1]  ;;  %v1183_v33 = vld [vmem:[#allocation2 + $0x51] sm:$0x1] }
 0x1f0   : > { %v3756_v50 = vadd.f32 %v3628_v13, %v3369_v35  ;;  %v2983_v58 = vadd.f32 %v2855_v29, %v2596_v43  ;;  %v2469_v61 = vmul.f32 %v5050_v57, %v2340_v38  ;;  %v2856_v62 = vmul.f32 %v5052_v59, %v2727_v39  ;;  %v2342_v38 = vld [vmem:[#allocation2 + $0x62] sm:$0x1]  ;;  %v2729_v39 = vld [vmem:[#allocation2 + $0x63] sm:$0x1] }
 0x1f1   : > { %v2211_v60 = vadd.f32 %v2083_v47, %v1824_v46  ;;  %v1438_v4 = vadd.f32 %v1310_v56, %v1051_v55  ;;  %v1697_v5 = vmul.f32 %v5040_v45, %v1568_v48  ;;  %v922_v7 = vmul.f32 %v5028_v37, %v793_v49  ;;  %v1570_v48 = vld [vmem:[#allocation2 + $0x52] sm:$0x1]  ;;  %v795_v49 = vld [vmem:[#allocation2 + $0x51] sm:$0x1] }
 0x1f2   : > { %v4143_v1 = vadd.f32 %v4015_v24, %v3756_v50  ;;  %v3370_v9 = vadd.f32 %v3242_v36, %v2983_v58  ;;  %v3243_v12 = vmul.f32 %v5061_v8, %v3114_v53  ;;  %v3630_v13 = vmul.f32 %v5055_v2, %v3501_v54  ;;  %v3116_v53 = vld [vmem:[#allocation2 + $0x73] sm:$0x1]  ;;  %v3503_v54 = vld [vmem:[#allocation2 + $0x74] sm:$0x1] }
 0x1f3   : > { %v2597_v11 = vadd.f32 %v2469_v61, %v2211_v60  ;;  %v1825_v16 = vadd.f32 %v1697_v5, %v1438_v4  ;;  %v2084_v17 = vmul.f32 %v5046_v51, %v1955_v63  ;;  %v1052_v19 = vadd.f32 %v5035_v40, %v922_v7  ;;  %v1957_v63 = vld [vmem:[#allocation2 + $0x62] sm:$0x1] }
 0x1f4   : > { %4271 = vst.msk [vmem:[%s4658_s13 + $0x43] sm:$0x1] %vm326_vm0, %v4143_v1  ;;  %v1311_v20 = vmul.f32 %v5037_v41, %v1182_v0  ;;  %v3757_v22 = vadd.f32 %v3629_v44, %v3370_v9  ;;  %v4017_v24 = vmul.f32 %v5064_v10, %v3888_v3  ;;  %v2470_v25 = vmul.f32 %v5050_v57, %v2341_v6  ;;  %v1184_v0 = vld [vmem:[#allocation2 + $0x52] sm:$0x1]  ;;  %v3890_v3 = vld [vmem:[#allocation2 + $0x75] sm:$0x1] }
 0x1f5   : > { %v2984_v23 = vadd.f32 %v2856_v62, %v2597_v11  ;;  %v2212_v28 = vadd.f32 %v2084_v17, %v1825_v16  ;;  %v2857_v29 = vmul.f32 %v5052_v59, %v2728_v14  ;;  %v1698_v32 = vmul.f32 %v5040_v45, %v1569_v15  ;;  %v2343_v6 = vld [vmem:[#allocation2 + $0x63] sm:$0x1]  ;;  %v2730_v14 = vld [vmem:[#allocation2 + $0x64] sm:$0x1]  ;;  %v1571_v15 = vld [vmem:[#allocation2 + $0x53] sm:$0x1] }
 0x1f6   : > { %v1439_v31 = vadd.f32 %v1311_v20, %v1052_v19  ;;  %v4144_v34 = vadd.f32 %v4016_v52, %v3757_v22  ;;  %v3244_v36 = vmul.f32 %v5061_v8, %v3115_v18  ;;  %v923_v42 = vmul.f32 %v5028_v37, %v794_v21  ;;  %v3117_v18 = vld [vmem:[#allocation2 + $0x74] sm:$0x1]  ;;  %v796_v21 = vld [vmem:[#allocation2 + $0x52] sm:$0x1] }
 0x1f7   : > { %v3371_v35 = vadd.f32 %v3243_v12, %v2984_v23  ;;  %v2598_v43 = vadd.f32 %v2470_v25, %v2212_v28  ;;  %v3631_v44 = vmul.f32 %v5055_v2, %v3502_v26  ;;  %v2085_v47 = vmul.f32 %v5046_v51, %v1956_v27  ;;  %v3504_v26 = vld [vmem:[#allocation2 + $0x75] sm:$0x1]  ;;  %v1958_v27 = vld [vmem:[#allocation2 + $0x63] sm:$0x1] }
 0x1f8   : > { %v1826_v46 = vadd.f32 %v1698_v32, %v1439_v31  ;;  %4272 = vst.msk [vmem:[%s4658_s13 + $0x44] sm:$0x1] %vm326_vm0, %v4144_v34  ;;  %v4018_v52 = vmul.f32 %v5064_v10, %v3889_v30  ;;  %v1053_v55 = vadd.f32 %v5035_v40, %v923_v42  ;;  %v1312_v56 = vmul.f32 %v5037_v41, %v1183_v33  ;;  %v3891_v30 = vld [vmem:[#allocation2 + $0x76] sm:$0x1]  ;;  %v1185_v33 = vld [vmem:[#allocation2 + $0x53] sm:$0x1] }
 0x1f9   : > { %v3758_v50 = vadd.f32 %v3630_v13, %v3371_v35  ;;  %v2985_v58 = vadd.f32 %v2857_v29, %v2598_v43  ;;  %v2471_v61 = vmul.f32 %v5050_v57, %v2342_v38  ;;  %v2858_v62 = vmul.f32 %v5052_v59, %v2729_v39  ;;  %v2344_v38 = vld [vmem:[#allocation2 + $0x64] sm:$0x1]  ;;  %v2731_v39 = vld [vmem:[#allocation2 + $0x65] sm:$0x1] }
 0x1fa   : > { %v2213_v60 = vadd.f32 %v2085_v47, %v1826_v46  ;;  %v1440_v4 = vadd.f32 %v1312_v56, %v1053_v55  ;;  %v1699_v5 = vmul.f32 %v5040_v45, %v1570_v48  ;;  %v924_v7 = vmul.f32 %v5028_v37, %v795_v49  ;;  %v1572_v48 = vld [vmem:[#allocation2 + $0x54] sm:$0x1]  ;;  %v797_v49 = vld [vmem:[#allocation2 + $0x53] sm:$0x1] }
 0x1fb   : > { %v4145_v1 = vadd.f32 %v4017_v24, %v3758_v50  ;;  %v3372_v9 = vadd.f32 %v3244_v36, %v2985_v58  ;;  %v3245_v12 = vmul.f32 %v5061_v8, %v3116_v53  ;;  %v3632_v13 = vmul.f32 %v5055_v2, %v3503_v54  ;;  %v3118_v53 = vld [vmem:[#allocation2 + $0x75] sm:$0x1]  ;;  %v3505_v54 = vld [vmem:[#allocation2 + $0x76] sm:$0x1] }
 0x1fc   : > { %v2599_v11 = vadd.f32 %v2471_v61, %v2213_v60  ;;  %v1827_v16 = vadd.f32 %v1699_v5, %v1440_v4  ;;  %v2086_v17 = vmul.f32 %v5046_v51, %v1957_v63  ;;  %v1054_v19 = vadd.f32 %v5035_v40, %v924_v7  ;;  %v1959_v63 = vld [vmem:[#allocation2 + $0x64] sm:$0x1] }
 0x1fd   : > { %4273 = vst.msk [vmem:[%s4658_s13 + $0x45] sm:$0x1] %vm326_vm0, %v4145_v1  ;;  %v1313_v20 = vmul.f32 %v5037_v41, %v1184_v0  ;;  %v3759_v22 = vadd.f32 %v3631_v44, %v3372_v9  ;;  %v4019_v24 = vmul.f32 %v5064_v10, %v3890_v3  ;;  %v2472_v25 = vmul.f32 %v5050_v57, %v2343_v6  ;;  %v1186_v0 = vld [vmem:[#allocation2 + $0x54] sm:$0x1]  ;;  %v3892_v3 = vld [vmem:[#allocation2 + $0x77] sm:$0x1] }
 0x1fe   : > { %v2986_v23 = vadd.f32 %v2858_v62, %v2599_v11  ;;  %v2214_v28 = vadd.f32 %v2086_v17, %v1827_v16  ;;  %v2859_v29 = vmul.f32 %v5052_v59, %v2730_v14  ;;  %v1700_v32 = vmul.f32 %v5040_v45, %v1571_v15  ;;  %v2345_v6 = vld [vmem:[#allocation2 + $0x65] sm:$0x1]  ;;  %v2732_v14 = vld [vmem:[#allocation2 + $0x66] sm:$0x1]  ;;  %v1573_v15 = vld [vmem:[#allocation2 + $0x55] sm:$0x1] }
 0x1ff   : > { %v1441_v31 = vadd.f32 %v1313_v20, %v1054_v19  ;;  %v4146_v34 = vadd.f32 %v4018_v52, %v3759_v22  ;;  %v3246_v36 = vmul.f32 %v5061_v8, %v3117_v18  ;;  %v925_v42 = vmul.f32 %v5028_v37, %v796_v21  ;;  %v3119_v18 = vld [vmem:[#allocation2 + $0x76] sm:$0x1]  ;;  %v798_v21 = vld [vmem:[#allocation2 + $0x54] sm:$0x1] }
 0x200   : > { %v3373_v35 = vadd.f32 %v3245_v12, %v2986_v23  ;;  %v2600_v43 = vadd.f32 %v2472_v25, %v2214_v28  ;;  %v3633_v44 = vmul.f32 %v5055_v2, %v3504_v26  ;;  %v2087_v47 = vmul.f32 %v5046_v51, %v1958_v27  ;;  %v3506_v26 = vld [vmem:[#allocation2 + $0x77] sm:$0x1]  ;;  %v1960_v27 = vld [vmem:[#allocation2 + $0x65] sm:$0x1] }
 0x201   : > { %v1828_v46 = vadd.f32 %v1700_v32, %v1441_v31  ;;  %4274 = vst.msk [vmem:[%s4658_s13 + $0x46] sm:$0x1] %vm326_vm0, %v4146_v34  ;;  %v4020_v52 = vmul.f32 %v5064_v10, %v3891_v30  ;;  %v1055_v55 = vadd.f32 %v5035_v40, %v925_v42  ;;  %v1314_v56 = vmul.f32 %v5037_v41, %v1185_v33  ;;  %v3893_v30 = vld [vmem:[#allocation2 + $0x78] sm:$0x1]  ;;  %v1187_v33 = vld [vmem:[#allocation2 + $0x55] sm:$0x1] }
 0x202   : > { %v3760_v50 = vadd.f32 %v3632_v13, %v3373_v35  ;;  %v2987_v58 = vadd.f32 %v2859_v29, %v2600_v43  ;;  %v2473_v61 = vmul.f32 %v5050_v57, %v2344_v38  ;;  %v2860_v62 = vmul.f32 %v5052_v59, %v2731_v39  ;;  %v2346_v38 = vld [vmem:[#allocation2 + $0x66] sm:$0x1]  ;;  %v2733_v39 = vld [vmem:[#allocation2 + $0x67] sm:$0x1] }
 0x203   : > { %v2215_v60 = vadd.f32 %v2087_v47, %v1828_v46  ;;  %v1442_v4 = vadd.f32 %v1314_v56, %v1055_v55  ;;  %v1701_v5 = vmul.f32 %v5040_v45, %v1572_v48  ;;  %v926_v7 = vmul.f32 %v5028_v37, %v797_v49  ;;  %v1574_v48 = vld [vmem:[#allocation2 + $0x56] sm:$0x1]  ;;  %v799_v49 = vld [vmem:[#allocation2 + $0x55] sm:$0x1] }
 0x204   : > { %v4147_v1 = vadd.f32 %v4019_v24, %v3760_v50  ;;  %v3374_v9 = vadd.f32 %v3246_v36, %v2987_v58  ;;  %v3247_v12 = vmul.f32 %v5061_v8, %v3118_v53  ;;  %v3634_v13 = vmul.f32 %v5055_v2, %v3505_v54  ;;  %v3120_v53 = vld [vmem:[#allocation2 + $0x77] sm:$0x1]  ;;  %v3507_v54 = vld [vmem:[#allocation2 + $0x78] sm:$0x1] }
 0x205   : > { %v2601_v11 = vadd.f32 %v2473_v61, %v2215_v60  ;;  %v1829_v16 = vadd.f32 %v1701_v5, %v1442_v4  ;;  %v2088_v17 = vmul.f32 %v5046_v51, %v1959_v63  ;;  %v1056_v19 = vadd.f32 %v5035_v40, %v926_v7  ;;  %v1961_v63 = vld [vmem:[#allocation2 + $0x66] sm:$0x1] }
 0x206   : > { %4275 = vst.msk [vmem:[%s4658_s13 + $0x47] sm:$0x1] %vm326_vm0, %v4147_v1  ;;  %v1315_v20 = vmul.f32 %v5037_v41, %v1186_v0  ;;  %v3761_v22 = vadd.f32 %v3633_v44, %v3374_v9  ;;  %v4021_v24 = vmul.f32 %v5064_v10, %v3892_v3  ;;  %v2474_v25 = vmul.f32 %v5050_v57, %v2345_v6  ;;  %v1188_v0 = vld [vmem:[#allocation2 + $0x56] sm:$0x1]  ;;  %v3894_v3 = vld [vmem:[#allocation2 + $0x79] sm:$0x1] }
 0x207   : > { %v2988_v23 = vadd.f32 %v2860_v62, %v2601_v11  ;;  %v2216_v28 = vadd.f32 %v2088_v17, %v1829_v16  ;;  %v2861_v29 = vmul.f32 %v5052_v59, %v2732_v14  ;;  %v1702_v32 = vmul.f32 %v5040_v45, %v1573_v15  ;;  %v2347_v6 = vld [vmem:[#allocation2 + $0x67] sm:$0x1]  ;;  %v2734_v14 = vld [vmem:[#allocation2 + $0x68] sm:$0x1]  ;;  %v1575_v15 = vld [vmem:[#allocation2 + $0x57] sm:$0x1] }
 0x208   : > { %v1443_v31 = vadd.f32 %v1315_v20, %v1056_v19  ;;  %v4148_v34 = vadd.f32 %v4020_v52, %v3761_v22  ;;  %v3248_v36 = vmul.f32 %v5061_v8, %v3119_v18  ;;  %v927_v42 = vmul.f32 %v5028_v37, %v798_v21  ;;  %v3121_v18 = vld [vmem:[#allocation2 + $0x78] sm:$0x1]  ;;  %v800_v21 = vld [vmem:[#allocation2 + $0x56] sm:$0x1] }
 0x209   : > { %v3375_v35 = vadd.f32 %v3247_v12, %v2988_v23  ;;  %v2602_v43 = vadd.f32 %v2474_v25, %v2216_v28  ;;  %v3635_v44 = vmul.f32 %v5055_v2, %v3506_v26  ;;  %v2089_v47 = vmul.f32 %v5046_v51, %v1960_v27  ;;  %v3508_v26 = vld [vmem:[#allocation2 + $0x79] sm:$0x1]  ;;  %v1962_v27 = vld [vmem:[#allocation2 + $0x67] sm:$0x1] }
 0x20a   : > { %v1830_v46 = vadd.f32 %v1702_v32, %v1443_v31  ;;  %4276 = vst.msk [vmem:[%s4658_s13 + $0x48] sm:$0x1] %vm326_vm0, %v4148_v34  ;;  %v4022_v52 = vmul.f32 %v5064_v10, %v3893_v30  ;;  %v1057_v55 = vadd.f32 %v5035_v40, %v927_v42  ;;  %v1316_v56 = vmul.f32 %v5037_v41, %v1187_v33  ;;  %v3895_v30 = vld [vmem:[#allocation2 + $0x7a] sm:$0x1]  ;;  %v1189_v33 = vld [vmem:[#allocation2 + $0x57] sm:$0x1] }
 0x20b   : > { %v3762_v50 = vadd.f32 %v3634_v13, %v3375_v35  ;;  %v2989_v58 = vadd.f32 %v2861_v29, %v2602_v43  ;;  %v2475_v61 = vmul.f32 %v5050_v57, %v2346_v38  ;;  %v2862_v62 = vmul.f32 %v5052_v59, %v2733_v39  ;;  %v2348_v38 = vld [vmem:[#allocation2 + $0x68] sm:$0x1]  ;;  %v2735_v39 = vld [vmem:[#allocation2 + $0x69] sm:$0x1] }
 0x20c   : > { %v2217_v60 = vadd.f32 %v2089_v47, %v1830_v46  ;;  %v1444_v4 = vadd.f32 %v1316_v56, %v1057_v55  ;;  %v1703_v5 = vmul.f32 %v5040_v45, %v1574_v48  ;;  %v928_v7 = vmul.f32 %v5028_v37, %v799_v49  ;;  %v1576_v48 = vld [vmem:[#allocation2 + $0x58] sm:$0x1]  ;;  %v801_v49 = vld [vmem:[#allocation2 + $0x57] sm:$0x1] }
 0x20d   : > { %v4149_v1 = vadd.f32 %v4021_v24, %v3762_v50  ;;  %v3376_v9 = vadd.f32 %v3248_v36, %v2989_v58  ;;  %v3249_v12 = vmul.f32 %v5061_v8, %v3120_v53  ;;  %v3636_v13 = vmul.f32 %v5055_v2, %v3507_v54  ;;  %v3122_v53 = vld [vmem:[#allocation2 + $0x79] sm:$0x1]  ;;  %v1190_v56 = vld [vmem:[#allocation2 + $0x58] sm:$0x1] }
 0x20e   : > { %v2603_v11 = vadd.f32 %v2475_v61, %v2217_v60  ;;  %v1831_v16 = vadd.f32 %v1703_v5, %v1444_v4  ;;  %v2090_v17 = vmul.f32 %v5046_v51, %v1961_v63  ;;  %v1058_v19 = vadd.f32 %v5035_v40, %v928_v7  ;;  %v1963_v63 = vld [vmem:[#allocation2 + $0x68] sm:$0x1]  ;;  %v3896_v4 = vld [vmem:[#allocation2 + $0x7b] sm:$0x1] }
 0x20f   : > { %4277 = vst.msk [vmem:[%s4658_s13 + $0x49] sm:$0x1] %vm326_vm0, %v4149_v1  ;;  %v1317_v20 = vmul.f32 %v5037_v41, %v1188_v0  ;;  %v3763_v22 = vadd.f32 %v3635_v44, %v3376_v9  ;;  %v4023_v24 = vmul.f32 %v5064_v10, %v3894_v3  ;;  %v2476_v25 = vmul.f32 %v5050_v57, %v2347_v6  ;;  %v1577_v0 = vld [vmem:[#allocation2 + $0x59] sm:$0x1]  ;;  %v3509_v3 = vld [vmem:[#allocation2 + $0x7a] sm:$0x1] }
 0x210   : > { %v2990_v23 = vadd.f32 %v2862_v62, %v2603_v11  ;;  %v2218_v28 = vadd.f32 %v2090_v17, %v1831_v16  ;;  %v2863_v29 = vmul.f32 %v5052_v59, %v2734_v14  ;;  %v1704_v32 = vmul.f32 %v5040_v45, %v1575_v15  ;;  %v2736_v14 = vld [vmem:[#allocation2 + $0x6a] sm:$0x1] }
 0x211   : > { %v1445_v31 = vadd.f32 %v1317_v20, %v1058_v19  ;;  %v4150_v34 = vadd.f32 %v4022_v52, %v3763_v22  ;;  %v3250_v36 = vmul.f32 %v5061_v8, %v3121_v18  ;;  %v929_v42 = vmul.f32 %v5028_v37, %v800_v21  ;;  %v3123_v18 = vld [vmem:[#allocation2 + $0x7a] sm:$0x1]  ;;  %v803_v21 = vld [vmem:[#allocation2 + $0x5b] sm:$0x1] }
 0x212   : > { %v3377_v35 = vadd.f32 %v3249_v12, %v2990_v23  ;;  %v2604_v43 = vadd.f32 %v2476_v25, %v2218_v28  ;;  %v3637_v44 = vmul.f32 %v5055_v2, %v3508_v26  ;;  %v2091_v47 = vmul.f32 %v5046_v51, %v1962_v27  ;;  %v3510_v26 = vld [vmem:[#allocation2 + $0x7b] sm:$0x1]  ;;  %v1964_v27 = vld [vmem:[#allocation2 + $0x69] sm:$0x1] }
 0x213   : > { %v1832_v46 = vadd.f32 %v1704_v32, %v1445_v31  ;;  %4278 = vst.msk [vmem:[%s4658_s13 + $0x4a] sm:$0x1] %vm326_vm0, %v4150_v34  ;;  %v4024_v52 = vmul.f32 %v5064_v10, %v3895_v30  ;;  %v1059_v54 = vadd.f32 %v5035_v40, %v929_v42  ;;  %v1318_v55 = vmul.f32 %v5037_v41, %v1189_v33  ;;  %v3897_v31 = vld [vmem:[#allocation2 + $0x7c] sm:$0x1] }
 0x214   : > { %v3764_v50 = vadd.f32 %v3636_v13, %v3377_v35  ;;  %v2991_v58 = vadd.f32 %v2863_v29, %v2604_v43  ;;  %v2477_v61 = vmul.f32 %v5050_v57, %v2348_v38  ;;  %v2864_v62 = vmul.f32 %v5052_v59, %v2735_v39  ;;  %v2349_v13 = vld [vmem:[#allocation2 + $0x69] sm:$0x1]  ;;  %v1192_v33 = vld [vmem:[#allocation2 + $0x5c] sm:$0x1]  ;;  %v2350_v38 = vld [vmem:[#allocation2 + $0x6a] sm:$0x1] }
 0x215   : > { %v2219_v60 = vadd.f32 %v2091_v47, %v1832_v46  ;;  %v1446_v5 = vadd.f32 %v1318_v55, %v1059_v54  ;;  %v1705_v6 = vmul.f32 %v5040_v45, %v1576_v48  ;;  %v930_v7 = vmul.f32 %v5028_v37, %v801_v49  ;;  %v2737_v39 = vld [vmem:[#allocation2 + $0x6b] sm:$0x1]  ;;  %v1579_v48 = vld [vmem:[#allocation2 + $0x5d] sm:$0x1]  ;;  %v804_v49 = vld [vmem:[#allocation2 + $0x5c] sm:$0x1] }
 0x216   : > { %v4151_v1 = vadd.f32 %v4023_v24, %v3764_v50  ;;  %v3378_v9 = vadd.f32 %v3250_v36, %v2991_v58  ;;  %v3251_v12 = vmul.f32 %v5061_v8, %v3122_v53  ;;  %v1319_v15 = vmul.f32 %v5037_v41, %v1190_v56  ;;  %v3124_v53 = vld [vmem:[#allocation2 + $0x7b] sm:$0x1]  ;;  %v3511_v54 = vld [vmem:[#allocation2 + $0x7c] sm:$0x1] }
 0x217   : > { %v2605_v11 = vadd.f32 %v2477_v61, %v2219_v60  ;;  %v1833_v16 = vadd.f32 %v1705_v6, %v1446_v5  ;;  %v2092_v17 = vmul.f32 %v5046_v51, %v1963_v63  ;;  %v1060_v19 = vadd.f32 %v5035_v40, %v930_v7  ;;  %v1966_v63 = vld [vmem:[#allocation2 + $0x6d] sm:$0x1]  ;;  %v2352_v6 = vld [vmem:[#allocation2 + $0x6e] sm:$0x1] }
 0x218   : > { %4279 = vst.msk [vmem:[%s4658_s13 + $0x4b] sm:$0x1] %vm326_vm0, %v4151_v1  ;;  %v1706_v20 = vmul.f32 %v5040_v45, %v1577_v0  ;;  %v3765_v22 = vadd.f32 %v3637_v44, %v3378_v9  ;;  %v3638_v24 = vmul.f32 %v5055_v2, %v3509_v3  ;;  %v4025_v25 = vmul.f32 %v5064_v10, %v3896_v4  ;;  %v1193_v0 = vld [vmem:[#allocation2 + $0x5d] sm:$0x1] }
 0x219   : > { %v2992_v23 = vadd.f32 %v2864_v62, %v2605_v11  ;;  %v2220_v28 = vadd.f32 %v2092_v17, %v1833_v16  ;;  %v2478_v29 = vmul.f32 %v5050_v57, %v2349_v13  ;;  %v2865_v30 = vmul.f32 %v5052_v59, %v2736_v14  ;;  %v3898_v3 = vld [vmem:[#allocation2 + $0x7d] sm:$0x1]  ;;  %v2739_v14 = vld [vmem:[#allocation2 + $0x6f] sm:$0x1] }
 0x21a   : > { %v1447_v32 = vadd.f32 %v1319_v15, %v1060_v19  ;;  %v4152_v34 = vadd.f32 %v4024_v52, %v3765_v22  ;;  %v3252_v36 = vmul.f32 %v5061_v8, %v3123_v18  ;;  %v932_v42 = vmul.f32 %v5028_v37, %v803_v21  ;;  %v1580_v15 = vld [vmem:[#allocation2 + $0x5e] sm:$0x1]  ;;  %v3126_v18 = vld [vmem:[#allocation2 + $0x7f] sm:$0x1]  ;;  %v805_v21 = vld [vmem:[#allocation2 + $0x5d] sm:$0x1] }
 0x21b   : > { %v3379_v35 = vadd.f32 %v3251_v12, %v2992_v23  ;;  %v2606_v43 = vadd.f32 %v2478_v29, %v2220_v28  ;;  %v3639_v44 = vmul.f32 %v5055_v2, %v3510_v26  ;;  %v2093_v47 = vmul.f32 %v5046_v51, %v1964_v27  ;;  %v3513_v26 = vld [vmem:[#allocation2 + $0x80] sm:$0x1]  ;;  %v1967_v27 = vld [vmem:[#allocation2 + $0x6e] sm:$0x1] }
 0x21c   : > { %v1834_v46 = vadd.f32 %v1706_v20, %v1447_v32  ;;  %4280 = vst.msk [vmem:[%s4658_s13 + $0x4c] sm:$0x1] %vm326_vm0, %v4152_v34  ;;  %v4026_v52 = vmul.f32 %v5064_v10, %v3897_v31  ;;  %v1062_v55 = vadd.f32 %v5035_v40, %v932_v42  ;;  %v1321_v56 = vmul.f32 %v5037_v41, %v1192_v33  ;;  %v1194_v33 = vld [vmem:[#allocation2 + $0x5e] sm:$0x1] }
 0x21d   : > { %v3766_v50 = vadd.f32 %v3638_v24, %v3379_v35  ;;  %v2993_v58 = vadd.f32 %v2865_v30, %v2606_v43  ;;  %v2479_v61 = vmul.f32 %v5050_v57, %v2350_v38  ;;  %v2866_v62 = vmul.f32 %v5052_v59, %v2737_v39  ;;  %v3900_v30 = vld [vmem:[#allocation2 + $0x81] sm:$0x1]  ;;  %v2353_v38 = vld [vmem:[#allocation2 + $0x6f] sm:$0x1]  ;;  %v2740_v39 = vld [vmem:[#allocation2 + $0x70] sm:$0x1] }
 0x21e   : > { %v2221_v60 = vadd.f32 %v2093_v47, %v1834_v46  ;;  %v1449_v4 = vadd.f32 %v1321_v56, %v1062_v55  ;;  %v1708_v5 = vmul.f32 %v5040_v45, %v1579_v48  ;;  %v933_v7 = vmul.f32 %v5028_v37, %v804_v49  ;;  %v1581_v48 = vld [vmem:[#allocation2 + $0x5f] sm:$0x1]  ;;  %v806_v49 = vld [vmem:[#allocation2 + $0x5e] sm:$0x1] }
 0x21f   : > { %v4153_v1 = vadd.f32 %v4025_v25, %v3766_v50  ;;  %v3380_v9 = vadd.f32 %v3252_v36, %v2993_v58  ;;  %v3253_v12 = vmul.f32 %v5061_v8, %v3124_v53  ;;  %v3640_v13 = vmul.f32 %v5055_v2, %v3511_v54  ;;  %v3127_v53 = vld [vmem:[#allocation2 + $0x80] sm:$0x1]  ;;  %v3514_v54 = vld [vmem:[#allocation2 + $0x81] sm:$0x1] }
 0x220   : > { %v2607_v11 = vadd.f32 %v2479_v61, %v2221_v60  ;;  %v1836_v16 = vadd.f32 %v1708_v5, %v1449_v4  ;;  %v2095_v17 = vmul.f32 %v5046_v51, %v1966_v63  ;;  %v1063_v19 = vadd.f32 %v5035_v40, %v933_v7  ;;  %v1968_v63 = vld [vmem:[#allocation2 + $0x6f] sm:$0x1] }
 0x221   : > { %4281 = vst.msk [vmem:[%s4658_s13 + $0x4d] sm:$0x1] %vm326_vm0, %v4153_v1  ;;  %v1322_v20 = vmul.f32 %v5037_v41, %v1193_v0  ;;  %v3767_v22 = vadd.f32 %v3639_v44, %v3380_v9  ;;  %v4027_v24 = vmul.f32 %v5064_v10, %v3898_v3  ;;  %v2481_v25 = vmul.f32 %v5050_v57, %v2352_v6  ;;  %v1195_v0 = vld [vmem:[#allocation2 + $0x5f] sm:$0x1]  ;;  %v3901_v3 = vld [vmem:[#allocation2 + $0x82] sm:$0x1] }
 0x222   : > { %v2994_v23 = vadd.f32 %v2866_v62, %v2607_v11  ;;  %v2223_v28 = vadd.f32 %v2095_v17, %v1836_v16  ;;  %v2868_v29 = vmul.f32 %v5052_v59, %v2739_v14  ;;  %v1709_v32 = vmul.f32 %v5040_v45, %v1580_v15  ;;  %v2354_v6 = vld [vmem:[#allocation2 + $0x70] sm:$0x1]  ;;  %v2741_v14 = vld [vmem:[#allocation2 + $0x71] sm:$0x1]  ;;  %v1582_v15 = vld [vmem:[#allocation2 + $0x60] sm:$0x1] }
 0x223   : > { %v1450_v31 = vadd.f32 %v1322_v20, %v1063_v19  ;;  %v4154_v34 = vadd.f32 %v4026_v52, %v3767_v22  ;;  %v3255_v36 = vmul.f32 %v5061_v8, %v3126_v18  ;;  %v934_v42 = vmul.f32 %v5028_v37, %v805_v21  ;;  %v3128_v18 = vld [vmem:[#allocation2 + $0x81] sm:$0x1]  ;;  %v807_v21 = vld [vmem:[#allocation2 + $0x5f] sm:$0x1] }
 0x224   : > { %v3381_v35 = vadd.f32 %v3253_v12, %v2994_v23  ;;  %v2609_v43 = vadd.f32 %v2481_v25, %v2223_v28  ;;  %v3642_v44 = vmul.f32 %v5055_v2, %v3513_v26  ;;  %v2096_v47 = vmul.f32 %v5046_v51, %v1967_v27  ;;  %v3515_v26 = vld [vmem:[#allocation2 + $0x82] sm:$0x1]  ;;  %v1969_v27 = vld [vmem:[#allocation2 + $0x70] sm:$0x1] }
 0x225   : > { %v1837_v46 = vadd.f32 %v1709_v32, %v1450_v31  ;;  %4282 = vst.msk [vmem:[%s4658_s13 + $0x4e] sm:$0x1] %vm326_vm0, %v4154_v34  ;;  %v4029_v52 = vmul.f32 %v5064_v10, %v3900_v30  ;;  %v1064_v55 = vadd.f32 %v5035_v40, %v934_v42  ;;  %v1323_v56 = vmul.f32 %v5037_v41, %v1194_v33  ;;  %v3902_v30 = vld [vmem:[#allocation2 + $0x83] sm:$0x1]  ;;  %v1196_v33 = vld [vmem:[#allocation2 + $0x60] sm:$0x1] }
 0x226   : > { %v3768_v50 = vadd.f32 %v3640_v13, %v3381_v35  ;;  %v2996_v58 = vadd.f32 %v2868_v29, %v2609_v43  ;;  %v2482_v61 = vmul.f32 %v5050_v57, %v2353_v38  ;;  %v2869_v62 = vmul.f32 %v5052_v59, %v2740_v39  ;;  %v2355_v38 = vld [vmem:[#allocation2 + $0x71] sm:$0x1]  ;;  %v2742_v39 = vld [vmem:[#allocation2 + $0x72] sm:$0x1] }
 0x227   : > { %v2224_v60 = vadd.f32 %v2096_v47, %v1837_v46  ;;  %v1451_v4 = vadd.f32 %v1323_v56, %v1064_v55  ;;  %v1710_v5 = vmul.f32 %v5040_v45, %v1581_v48  ;;  %v935_v7 = vmul.f32 %v5028_v37, %v806_v49  ;;  %v1583_v48 = vld [vmem:[#allocation2 + $0x61] sm:$0x1]  ;;  %v808_v49 = vld [vmem:[#allocation2 + $0x60] sm:$0x1] }
 0x228   : > { %v4155_v1 = vadd.f32 %v4027_v24, %v3768_v50  ;;  %v3383_v9 = vadd.f32 %v3255_v36, %v2996_v58  ;;  %v3256_v12 = vmul.f32 %v5061_v8, %v3127_v53  ;;  %v3643_v13 = vmul.f32 %v5055_v2, %v3514_v54  ;;  %v3129_v53 = vld [vmem:[#allocation2 + $0x82] sm:$0x1]  ;;  %v3516_v54 = vld [vmem:[#allocation2 + $0x83] sm:$0x1] }
 0x229   : > { %v2610_v11 = vadd.f32 %v2482_v61, %v2224_v60  ;;  %v1838_v16 = vadd.f32 %v1710_v5, %v1451_v4  ;;  %v2097_v17 = vmul.f32 %v5046_v51, %v1968_v63  ;;  %v1065_v19 = vadd.f32 %v5035_v40, %v935_v7  ;;  %v1970_v63 = vld [vmem:[#allocation2 + $0x71] sm:$0x1] }
 0x22a   : > { %4283 = vst.msk [vmem:[%s4658_s13 + $0x4f] sm:$0x1] %vm326_vm0, %v4155_v1  ;;  %v1324_v20 = vmul.f32 %v5037_v41, %v1195_v0  ;;  %v3770_v22 = vadd.f32 %v3642_v44, %v3383_v9  ;;  %v4030_v24 = vmul.f32 %v5064_v10, %v3901_v3  ;;  %v2483_v25 = vmul.f32 %v5050_v57, %v2354_v6  ;;  %v1197_v0 = vld [vmem:[#allocation2 + $0x61] sm:$0x1]  ;;  %v3903_v3 = vld [vmem:[#allocation2 + $0x84] sm:$0x1] }
 0x22b   : > { %v2997_v23 = vadd.f32 %v2869_v62, %v2610_v11  ;;  %v2225_v28 = vadd.f32 %v2097_v17, %v1838_v16  ;;  %v2870_v29 = vmul.f32 %v5052_v59, %v2741_v14  ;;  %v1711_v32 = vmul.f32 %v5040_v45, %v1582_v15  ;;  %v2356_v6 = vld [vmem:[#allocation2 + $0x72] sm:$0x1]  ;;  %v2743_v14 = vld [vmem:[#allocation2 + $0x73] sm:$0x1]  ;;  %v1584_v15 = vld [vmem:[#allocation2 + $0x62] sm:$0x1] }
 0x22c   : > { %v1452_v31 = vadd.f32 %v1324_v20, %v1065_v19  ;;  %v4157_v34 = vadd.f32 %v4029_v52, %v3770_v22  ;;  %v3257_v36 = vmul.f32 %v5061_v8, %v3128_v18  ;;  %v936_v42 = vmul.f32 %v5028_v37, %v807_v21  ;;  %v3130_v18 = vld [vmem:[#allocation2 + $0x83] sm:$0x1]  ;;  %v809_v21 = vld [vmem:[#allocation2 + $0x61] sm:$0x1] }
 0x22d   : > { %v3384_v35 = vadd.f32 %v3256_v12, %v2997_v23  ;;  %v2611_v43 = vadd.f32 %v2483_v25, %v2225_v28  ;;  %v3644_v44 = vmul.f32 %v5055_v2, %v3515_v26  ;;  %v2098_v47 = vmul.f32 %v5046_v51, %v1969_v27  ;;  %v3517_v26 = vld [vmem:[#allocation2 + $0x84] sm:$0x1]  ;;  %v1971_v27 = vld [vmem:[#allocation2 + $0x72] sm:$0x1] }
 0x22e   : > { %v1839_v46 = vadd.f32 %v1711_v32, %v1452_v31  ;;  %4285 = vst.msk [vmem:[%s4658_s13 + $0x51] sm:$0x1] %vm326_vm0, %v4157_v34  ;;  %v4031_v52 = vmul.f32 %v5064_v10, %v3902_v30  ;;  %v1066_v55 = vadd.f32 %v5035_v40, %v936_v42  ;;  %v1325_v56 = vmul.f32 %v5037_v41, %v1196_v33  ;;  %v3904_v30 = vld [vmem:[#allocation2 + $0x85] sm:$0x1]  ;;  %v1198_v33 = vld [vmem:[#allocation2 + $0x62] sm:$0x1] }
 0x22f   : > { %v3771_v50 = vadd.f32 %v3643_v13, %v3384_v35  ;;  %v2998_v58 = vadd.f32 %v2870_v29, %v2611_v43  ;;  %v2484_v61 = vmul.f32 %v5050_v57, %v2355_v38  ;;  %v2871_v62 = vmul.f32 %v5052_v59, %v2742_v39  ;;  %v2357_v38 = vld [vmem:[#allocation2 + $0x73] sm:$0x1]  ;;  %v2744_v39 = vld [vmem:[#allocation2 + $0x74] sm:$0x1] }
 0x230   : > { %v2226_v60 = vadd.f32 %v2098_v47, %v1839_v46  ;;  %v1453_v4 = vadd.f32 %v1325_v56, %v1066_v55  ;;  %v1712_v5 = vmul.f32 %v5040_v45, %v1583_v48  ;;  %v937_v7 = vmul.f32 %v5028_v37, %v808_v49  ;;  %v1585_v48 = vld [vmem:[#allocation2 + $0x63] sm:$0x1]  ;;  %v810_v49 = vld [vmem:[#allocation2 + $0x62] sm:$0x1] }
 0x231   : > { %v4158_v1 = vadd.f32 %v4030_v24, %v3771_v50  ;;  %v3385_v9 = vadd.f32 %v3257_v36, %v2998_v58  ;;  %v3258_v12 = vmul.f32 %v5061_v8, %v3129_v53  ;;  %v3645_v13 = vmul.f32 %v5055_v2, %v3516_v54  ;;  %v3131_v53 = vld [vmem:[#allocation2 + $0x84] sm:$0x1]  ;;  %v3518_v54 = vld [vmem:[#allocation2 + $0x85] sm:$0x1] }
 0x232   : > { %v2612_v11 = vadd.f32 %v2484_v61, %v2226_v60  ;;  %v1840_v16 = vadd.f32 %v1712_v5, %v1453_v4  ;;  %v2099_v17 = vmul.f32 %v5046_v51, %v1970_v63  ;;  %v1067_v19 = vadd.f32 %v5035_v40, %v937_v7  ;;  %v1972_v63 = vld [vmem:[#allocation2 + $0x73] sm:$0x1] }
 0x233   : > { %4286 = vst.msk [vmem:[%s4658_s13 + $0x52] sm:$0x1] %vm326_vm0, %v4158_v1  ;;  %v1326_v20 = vmul.f32 %v5037_v41, %v1197_v0  ;;  %v3772_v22 = vadd.f32 %v3644_v44, %v3385_v9  ;;  %v4032_v24 = vmul.f32 %v5064_v10, %v3903_v3  ;;  %v2485_v25 = vmul.f32 %v5050_v57, %v2356_v6  ;;  %v1199_v0 = vld [vmem:[#allocation2 + $0x63] sm:$0x1]  ;;  %v3905_v3 = vld [vmem:[#allocation2 + $0x86] sm:$0x1] }
 0x234   : > { %v2999_v23 = vadd.f32 %v2871_v62, %v2612_v11  ;;  %v2227_v28 = vadd.f32 %v2099_v17, %v1840_v16  ;;  %v2872_v29 = vmul.f32 %v5052_v59, %v2743_v14  ;;  %v1713_v32 = vmul.f32 %v5040_v45, %v1584_v15  ;;  %v2358_v6 = vld [vmem:[#allocation2 + $0x74] sm:$0x1]  ;;  %v2745_v14 = vld [vmem:[#allocation2 + $0x75] sm:$0x1]  ;;  %v1586_v15 = vld [vmem:[#allocation2 + $0x64] sm:$0x1] }
 0x235   : > { %v1454_v31 = vadd.f32 %v1326_v20, %v1067_v19  ;;  %v4159_v34 = vadd.f32 %v4031_v52, %v3772_v22  ;;  %v3259_v36 = vmul.f32 %v5061_v8, %v3130_v18  ;;  %v938_v42 = vmul.f32 %v5028_v37, %v809_v21  ;;  %v3132_v18 = vld [vmem:[#allocation2 + $0x85] sm:$0x1]  ;;  %v811_v21 = vld [vmem:[#allocation2 + $0x63] sm:$0x1] }
 0x236   : > { %v3386_v35 = vadd.f32 %v3258_v12, %v2999_v23  ;;  %v2613_v43 = vadd.f32 %v2485_v25, %v2227_v28  ;;  %v3646_v44 = vmul.f32 %v5055_v2, %v3517_v26  ;;  %v2100_v47 = vmul.f32 %v5046_v51, %v1971_v27  ;;  %v3519_v26 = vld [vmem:[#allocation2 + $0x86] sm:$0x1]  ;;  %v1973_v27 = vld [vmem:[#allocation2 + $0x74] sm:$0x1] }
 0x237   : > { %v1841_v46 = vadd.f32 %v1713_v32, %v1454_v31  ;;  %4287 = vst.msk [vmem:[%s4658_s13 + $0x53] sm:$0x1] %vm326_vm0, %v4159_v34  ;;  %v4033_v52 = vmul.f32 %v5064_v10, %v3904_v30  ;;  %v1068_v55 = vadd.f32 %v5035_v40, %v938_v42  ;;  %v1327_v56 = vmul.f32 %v5037_v41, %v1198_v33  ;;  %v3906_v30 = vld [vmem:[#allocation2 + $0x87] sm:$0x1]  ;;  %v1200_v33 = vld [vmem:[#allocation2 + $0x64] sm:$0x1] }
 0x238   : > { %v3773_v50 = vadd.f32 %v3645_v13, %v3386_v35  ;;  %v3000_v58 = vadd.f32 %v2872_v29, %v2613_v43  ;;  %v2486_v61 = vmul.f32 %v5050_v57, %v2357_v38  ;;  %v2873_v62 = vmul.f32 %v5052_v59, %v2744_v39  ;;  %v2359_v38 = vld [vmem:[#allocation2 + $0x75] sm:$0x1]  ;;  %v2746_v39 = vld [vmem:[#allocation2 + $0x76] sm:$0x1] }
 0x239   : > { %v2228_v60 = vadd.f32 %v2100_v47, %v1841_v46  ;;  %v1455_v4 = vadd.f32 %v1327_v56, %v1068_v55  ;;  %v1714_v5 = vmul.f32 %v5040_v45, %v1585_v48  ;;  %v939_v7 = vmul.f32 %v5028_v37, %v810_v49  ;;  %v1587_v48 = vld [vmem:[#allocation2 + $0x65] sm:$0x1]  ;;  %v812_v49 = vld [vmem:[#allocation2 + $0x64] sm:$0x1] }
 0x23a   : > { %v4160_v1 = vadd.f32 %v4032_v24, %v3773_v50  ;;  %v3387_v9 = vadd.f32 %v3259_v36, %v3000_v58  ;;  %v3260_v12 = vmul.f32 %v5061_v8, %v3131_v53  ;;  %v3647_v13 = vmul.f32 %v5055_v2, %v3518_v54  ;;  %v3133_v53 = vld [vmem:[#allocation2 + $0x86] sm:$0x1]  ;;  %v3520_v54 = vld [vmem:[#allocation2 + $0x87] sm:$0x1] }
 0x23b   : > { %v2614_v11 = vadd.f32 %v2486_v61, %v2228_v60  ;;  %v1842_v16 = vadd.f32 %v1714_v5, %v1455_v4  ;;  %v2101_v17 = vmul.f32 %v5046_v51, %v1972_v63  ;;  %v1069_v19 = vadd.f32 %v5035_v40, %v939_v7  ;;  %v1974_v63 = vld [vmem:[#allocation2 + $0x75] sm:$0x1] }
 0x23c   : > { %4288 = vst.msk [vmem:[%s4658_s13 + $0x54] sm:$0x1] %vm326_vm0, %v4160_v1  ;;  %v1328_v20 = vmul.f32 %v5037_v41, %v1199_v0  ;;  %v3774_v22 = vadd.f32 %v3646_v44, %v3387_v9  ;;  %v4034_v24 = vmul.f32 %v5064_v10, %v3905_v3  ;;  %v2487_v25 = vmul.f32 %v5050_v57, %v2358_v6  ;;  %v1201_v0 = vld [vmem:[#allocation2 + $0x65] sm:$0x1]  ;;  %v3907_v3 = vld [vmem:[#allocation2 + $0x88] sm:$0x1] }
 0x23d   : > { %v3001_v23 = vadd.f32 %v2873_v62, %v2614_v11  ;;  %v2229_v28 = vadd.f32 %v2101_v17, %v1842_v16  ;;  %v2874_v29 = vmul.f32 %v5052_v59, %v2745_v14  ;;  %v1715_v32 = vmul.f32 %v5040_v45, %v1586_v15  ;;  %v2360_v6 = vld [vmem:[#allocation2 + $0x76] sm:$0x1]  ;;  %v2747_v14 = vld [vmem:[#allocation2 + $0x77] sm:$0x1]  ;;  %v1588_v15 = vld [vmem:[#allocation2 + $0x66] sm:$0x1] }
 0x23e   : > { %v1456_v31 = vadd.f32 %v1328_v20, %v1069_v19  ;;  %v4161_v34 = vadd.f32 %v4033_v52, %v3774_v22  ;;  %v3261_v36 = vmul.f32 %v5061_v8, %v3132_v18  ;;  %v940_v42 = vmul.f32 %v5028_v37, %v811_v21  ;;  %v3134_v18 = vld [vmem:[#allocation2 + $0x87] sm:$0x1]  ;;  %v813_v21 = vld [vmem:[#allocation2 + $0x65] sm:$0x1] }
 0x23f   : > { %v3388_v35 = vadd.f32 %v3260_v12, %v3001_v23  ;;  %v2615_v43 = vadd.f32 %v2487_v25, %v2229_v28  ;;  %v3648_v44 = vmul.f32 %v5055_v2, %v3519_v26  ;;  %v2102_v47 = vmul.f32 %v5046_v51, %v1973_v27  ;;  %v3521_v26 = vld [vmem:[#allocation2 + $0x88] sm:$0x1]  ;;  %v1975_v27 = vld [vmem:[#allocation2 + $0x76] sm:$0x1] }
 0x240   : > { %v1843_v46 = vadd.f32 %v1715_v32, %v1456_v31  ;;  %4289 = vst.msk [vmem:[%s4658_s13 + $0x55] sm:$0x1] %vm326_vm0, %v4161_v34  ;;  %v4035_v52 = vmul.f32 %v5064_v10, %v3906_v30  ;;  %v1070_v55 = vadd.f32 %v5035_v40, %v940_v42  ;;  %v1329_v56 = vmul.f32 %v5037_v41, %v1200_v33  ;;  %v3908_v30 = vld [vmem:[#allocation2 + $0x89] sm:$0x1]  ;;  %v1202_v33 = vld [vmem:[#allocation2 + $0x66] sm:$0x1] }
 0x241   : > { %v3775_v50 = vadd.f32 %v3647_v13, %v3388_v35  ;;  %v3002_v58 = vadd.f32 %v2874_v29, %v2615_v43  ;;  %v2488_v61 = vmul.f32 %v5050_v57, %v2359_v38  ;;  %v2875_v62 = vmul.f32 %v5052_v59, %v2746_v39  ;;  %v2361_v38 = vld [vmem:[#allocation2 + $0x77] sm:$0x1]  ;;  %v2748_v39 = vld [vmem:[#allocation2 + $0x78] sm:$0x1] }
 0x242   : > { %v2230_v60 = vadd.f32 %v2102_v47, %v1843_v46  ;;  %v1457_v4 = vadd.f32 %v1329_v56, %v1070_v55  ;;  %v1716_v5 = vmul.f32 %v5040_v45, %v1587_v48  ;;  %v941_v7 = vmul.f32 %v5028_v37, %v812_v49  ;;  %v1589_v48 = vld [vmem:[#allocation2 + $0x67] sm:$0x1]  ;;  %v814_v49 = vld [vmem:[#allocation2 + $0x66] sm:$0x1] }
 0x243   : > { %v4162_v1 = vadd.f32 %v4034_v24, %v3775_v50  ;;  %v3389_v9 = vadd.f32 %v3261_v36, %v3002_v58  ;;  %v3262_v12 = vmul.f32 %v5061_v8, %v3133_v53  ;;  %v3649_v13 = vmul.f32 %v5055_v2, %v3520_v54  ;;  %v3135_v53 = vld [vmem:[#allocation2 + $0x88] sm:$0x1]  ;;  %v3522_v54 = vld [vmem:[#allocation2 + $0x89] sm:$0x1] }
 0x244   : > { %v2616_v11 = vadd.f32 %v2488_v61, %v2230_v60  ;;  %v1844_v16 = vadd.f32 %v1716_v5, %v1457_v4  ;;  %v2103_v17 = vmul.f32 %v5046_v51, %v1974_v63  ;;  %v1071_v19 = vadd.f32 %v5035_v40, %v941_v7  ;;  %v1976_v63 = vld [vmem:[#allocation2 + $0x77] sm:$0x1] }
 0x245   : > { %4290 = vst.msk [vmem:[%s4658_s13 + $0x56] sm:$0x1] %vm326_vm0, %v4162_v1  ;;  %v1330_v20 = vmul.f32 %v5037_v41, %v1201_v0  ;;  %v3776_v22 = vadd.f32 %v3648_v44, %v3389_v9  ;;  %v4036_v24 = vmul.f32 %v5064_v10, %v3907_v3  ;;  %v2489_v25 = vmul.f32 %v5050_v57, %v2360_v6  ;;  %v1203_v0 = vld [vmem:[#allocation2 + $0x67] sm:$0x1]  ;;  %v3909_v3 = vld [vmem:[#allocation2 + $0x8a] sm:$0x1] }
 0x246   : > { %v3003_v23 = vadd.f32 %v2875_v62, %v2616_v11  ;;  %v2231_v28 = vadd.f32 %v2103_v17, %v1844_v16  ;;  %v2876_v29 = vmul.f32 %v5052_v59, %v2747_v14  ;;  %v1717_v32 = vmul.f32 %v5040_v45, %v1588_v15  ;;  %v2362_v6 = vld [vmem:[#allocation2 + $0x78] sm:$0x1]  ;;  %v2749_v14 = vld [vmem:[#allocation2 + $0x79] sm:$0x1]  ;;  %v1590_v15 = vld [vmem:[#allocation2 + $0x68] sm:$0x1] }
 0x247   : > { %v1458_v31 = vadd.f32 %v1330_v20, %v1071_v19  ;;  %v4163_v34 = vadd.f32 %v4035_v52, %v3776_v22  ;;  %v3263_v36 = vmul.f32 %v5061_v8, %v3134_v18  ;;  %v942_v42 = vmul.f32 %v5028_v37, %v813_v21  ;;  %v3136_v18 = vld [vmem:[#allocation2 + $0x89] sm:$0x1]  ;;  %v815_v21 = vld [vmem:[#allocation2 + $0x67] sm:$0x1] }
 0x248   : > { %v3390_v35 = vadd.f32 %v3262_v12, %v3003_v23  ;;  %v2617_v43 = vadd.f32 %v2489_v25, %v2231_v28  ;;  %v3650_v44 = vmul.f32 %v5055_v2, %v3521_v26  ;;  %v2104_v47 = vmul.f32 %v5046_v51, %v1975_v27  ;;  %v3523_v26 = vld [vmem:[#allocation2 + $0x8a] sm:$0x1]  ;;  %v1977_v27 = vld [vmem:[#allocation2 + $0x78] sm:$0x1] }
 0x249   : > { %v1845_v46 = vadd.f32 %v1717_v32, %v1458_v31  ;;  %4291 = vst.msk [vmem:[%s4658_s13 + $0x57] sm:$0x1] %vm326_vm0, %v4163_v34  ;;  %v4037_v52 = vmul.f32 %v5064_v10, %v3908_v30  ;;  %v1072_v55 = vadd.f32 %v5035_v40, %v942_v42  ;;  %v1331_v56 = vmul.f32 %v5037_v41, %v1202_v33  ;;  %v3910_v30 = vld [vmem:[#allocation2 + $0x8b] sm:$0x1]  ;;  %v1204_v33 = vld [vmem:[#allocation2 + $0x68] sm:$0x1] }
 0x24a   : > { %v3777_v50 = vadd.f32 %v3649_v13, %v3390_v35  ;;  %v3004_v58 = vadd.f32 %v2876_v29, %v2617_v43  ;;  %v2490_v61 = vmul.f32 %v5050_v57, %v2361_v38  ;;  %v2877_v62 = vmul.f32 %v5052_v59, %v2748_v39  ;;  %v2363_v38 = vld [vmem:[#allocation2 + $0x79] sm:$0x1]  ;;  %v2750_v39 = vld [vmem:[#allocation2 + $0x7a] sm:$0x1] }
 0x24b   : > { %v2232_v60 = vadd.f32 %v2104_v47, %v1845_v46  ;;  %v1459_v4 = vadd.f32 %v1331_v56, %v1072_v55  ;;  %v1718_v5 = vmul.f32 %v5040_v45, %v1589_v48  ;;  %v943_v7 = vmul.f32 %v5028_v37, %v814_v49  ;;  %v1591_v48 = vld [vmem:[#allocation2 + $0x69] sm:$0x1]  ;;  %v816_v49 = vld [vmem:[#allocation2 + $0x68] sm:$0x1] }
 0x24c   : > { %v4164_v1 = vadd.f32 %v4036_v24, %v3777_v50  ;;  %v3391_v9 = vadd.f32 %v3263_v36, %v3004_v58  ;;  %v3264_v12 = vmul.f32 %v5061_v8, %v3135_v53  ;;  %v3651_v13 = vmul.f32 %v5055_v2, %v3522_v54  ;;  %v3137_v53 = vld [vmem:[#allocation2 + $0x8a] sm:$0x1]  ;;  %v3524_v54 = vld [vmem:[#allocation2 + $0x8b] sm:$0x1] }
 0x24d   : > { %v2618_v11 = vadd.f32 %v2490_v61, %v2232_v60  ;;  %v1846_v16 = vadd.f32 %v1718_v5, %v1459_v4  ;;  %v2105_v17 = vmul.f32 %v5046_v51, %v1976_v63  ;;  %v1073_v19 = vadd.f32 %v5035_v40, %v943_v7  ;;  %v1978_v63 = vld [vmem:[#allocation2 + $0x79] sm:$0x1] }
 0x24e   : > { %4292 = vst.msk [vmem:[%s4658_s13 + $0x58] sm:$0x1] %vm326_vm0, %v4164_v1  ;;  %v1332_v20 = vmul.f32 %v5037_v41, %v1203_v0  ;;  %v3778_v22 = vadd.f32 %v3650_v44, %v3391_v9  ;;  %v4038_v24 = vmul.f32 %v5064_v10, %v3909_v3  ;;  %v2491_v25 = vmul.f32 %v5050_v57, %v2362_v6  ;;  %v1205_v0 = vld [vmem:[#allocation2 + $0x69] sm:$0x1]  ;;  %v3911_v3 = vld [vmem:[#allocation2 + $0x8c] sm:$0x1] }
 0x24f   : > { %v3005_v23 = vadd.f32 %v2877_v62, %v2618_v11  ;;  %v2233_v28 = vadd.f32 %v2105_v17, %v1846_v16  ;;  %v2878_v29 = vmul.f32 %v5052_v59, %v2749_v14  ;;  %v1719_v32 = vmul.f32 %v5040_v45, %v1590_v15  ;;  %v2364_v6 = vld [vmem:[#allocation2 + $0x7a] sm:$0x1]  ;;  %v2751_v14 = vld [vmem:[#allocation2 + $0x7b] sm:$0x1]  ;;  %v1592_v15 = vld [vmem:[#allocation2 + $0x6a] sm:$0x1] }
 0x250   : > { %v1460_v31 = vadd.f32 %v1332_v20, %v1073_v19  ;;  %v4165_v34 = vadd.f32 %v4037_v52, %v3778_v22  ;;  %v3265_v36 = vmul.f32 %v5061_v8, %v3136_v18  ;;  %v944_v42 = vmul.f32 %v5028_v37, %v815_v21  ;;  %v817_v20 = vld [vmem:[#allocation2 + $0x69] sm:$0x1]  ;;  %v1206_v21 = vld [vmem:[#allocation2 + $0x6a] sm:$0x1] }
 0x251   : > { %v3392_v35 = vadd.f32 %v3264_v12, %v3005_v23  ;;  %v2619_v43 = vadd.f32 %v2491_v25, %v2233_v28  ;;  %v3652_v44 = vmul.f32 %v5055_v2, %v3523_v26  ;;  %v2106_v47 = vmul.f32 %v5046_v51, %v1977_v27  ;;  %v3138_v26 = vld [vmem:[#allocation2 + $0x8b] sm:$0x1]  ;;  %v1979_v27 = vld [vmem:[#allocation2 + $0x7a] sm:$0x1] }
 0x252   : > { %v1847_v46 = vadd.f32 %v1719_v32, %v1460_v31  ;;  %4293 = vst.msk [vmem:[%s4658_s13 + $0x59] sm:$0x1] %vm326_vm0, %v4165_v34  ;;  %v4039_v52 = vmul.f32 %v5064_v10, %v3910_v30  ;;  %v1074_v55 = vadd.f32 %v5035_v40, %v944_v42  ;;  %v1333_v56 = vmul.f32 %v5037_v41, %v1204_v33  ;;  %v3525_v30 = vld [vmem:[#allocation2 + $0x8c] sm:$0x1]  ;;  %v1593_v33 = vld [vmem:[#allocation2 + $0x6b] sm:$0x1] }
 0x253   : > { %v3779_v50 = vadd.f32 %v3651_v13, %v3392_v35  ;;  %v3006_v58 = vadd.f32 %v2878_v29, %v2619_v43  ;;  %v2492_v61 = vmul.f32 %v5050_v57, %v2363_v38  ;;  %v2879_v62 = vmul.f32 %v5052_v59, %v2750_v39  ;;  %v2365_v38 = vld [vmem:[#allocation2 + $0x7b] sm:$0x1] }
 0x254   : > { %v2234_v60 = vadd.f32 %v2106_v47, %v1847_v46  ;;  %v1461_v4 = vadd.f32 %v1333_v56, %v1074_v55  ;;  %v1720_v5 = vmul.f32 %v5040_v45, %v1591_v48  ;;  %v945_v7 = vmul.f32 %v5028_v37, %v816_v49  ;;  %v2752_v48 = vld [vmem:[#allocation2 + $0x7c] sm:$0x1]  ;;  %v819_v49 = vld [vmem:[#allocation2 + $0x6d] sm:$0x1] }
 0x255   : > { %v4166_v1 = vadd.f32 %v4038_v24, %v3779_v50  ;;  %v3393_v9 = vadd.f32 %v3265_v36, %v3006_v58  ;;  %v3266_v12 = vmul.f32 %v5061_v8, %v3137_v53  ;;  %v3653_v13 = vmul.f32 %v5055_v2, %v3524_v54  ;;  %v3912_v36 = vld [vmem:[#allocation2 + $0x8d] sm:$0x1]  ;;  %v3139_v53 = vld [vmem:[#allocation2 + $0x8c] sm:$0x1] }
 0x256   : > { %v2620_v11 = vadd.f32 %v2492_v61, %v2234_v60  ;;  %v1848_v16 = vadd.f32 %v1720_v5, %v1461_v4  ;;  %v2107_v17 = vmul.f32 %v5046_v51, %v1978_v63  ;;  %v1075_v18 = vadd.f32 %v5035_v40, %v945_v7  ;;  %v3526_v54 = vld [vmem:[#allocation2 + $0x8d] sm:$0x1]  ;;  %v1980_v63 = vld [vmem:[#allocation2 + $0x7b] sm:$0x1]  ;;  %v3913_v4 = vld [vmem:[#allocation2 + $0x8e] sm:$0x1] }
 0x257   : > { %4294 = vst.msk [vmem:[%s4658_s13 + $0x5a] sm:$0x1] %vm326_vm0, %v4166_v1  ;;  %v1334_v19 = vmul.f32 %v5037_v41, %v1205_v0  ;;  %v3780_v22 = vadd.f32 %v3652_v44, %v3393_v9  ;;  %v4040_v24 = vmul.f32 %v5064_v10, %v3911_v3  ;;  %v2493_v25 = vmul.f32 %v5050_v57, %v2364_v6  ;;  %v1208_v0 = vld [vmem:[#allocation2 + $0x6e] sm:$0x1]  ;;  %v2366_v6 = vld [vmem:[#allocation2 + $0x7c] sm:$0x1] }
 0x258   : > { %v3007_v23 = vadd.f32 %v2879_v62, %v2620_v11  ;;  %v2235_v28 = vadd.f32 %v2107_v17, %v1848_v16  ;;  %v2880_v29 = vmul.f32 %v5052_v59, %v2751_v14  ;;  %v1721_v32 = vmul.f32 %v5040_v45, %v1592_v15  ;;  %v2753_v14 = vld [vmem:[#allocation2 + $0x7d] sm:$0x1]  ;;  %v1595_v15 = vld [vmem:[#allocation2 + $0x6f] sm:$0x1] }
 0x259   : > { %v1462_v31 = vadd.f32 %v1334_v19, %v1075_v18  ;;  %v4167_v34 = vadd.f32 %v4039_v52, %v3780_v22  ;;  %v946_v39 = vmul.f32 %v5028_v37, %v817_v20  ;;  %v1335_v42 = vmul.f32 %v5037_v41, %v1206_v21  ;;  %v3140_v18 = vld [vmem:[#allocation2 + $0x8d] sm:$0x1]  ;;  %v820_v21 = vld [vmem:[#allocation2 + $0x6e] sm:$0x1] }
 0x25a   : > { %v3394_v35 = vadd.f32 %v3266_v12, %v3007_v23  ;;  %v2621_v43 = vadd.f32 %v2493_v25, %v2235_v28  ;;  %v3267_v44 = vmul.f32 %v5061_v8, %v3138_v26  ;;  %v2108_v47 = vmul.f32 %v5046_v51, %v1979_v27  ;;  %v3527_v26 = vld [vmem:[#allocation2 + $0x8e] sm:$0x1]  ;;  %v1982_v27 = vld [vmem:[#allocation2 + $0x7f] sm:$0x1] }
 0x25b   : > { %v1849_v46 = vadd.f32 %v1721_v32, %v1462_v31  ;;  %4295 = vst.msk [vmem:[%s4658_s13 + $0x5b] sm:$0x1] %vm326_vm0, %v4167_v34  ;;  %v3654_v52 = vmul.f32 %v5055_v2, %v3525_v30  ;;  %v1076_v55 = vadd.f32 %v5035_v40, %v946_v39  ;;  %v1722_v56 = vmul.f32 %v5040_v45, %v1593_v33  ;;  %v3914_v30 = vld [vmem:[#allocation2 + $0x8f] sm:$0x1]  ;;  %v2755_v39 = vld [vmem:[#allocation2 + $0x81] sm:$0x1] }
 0x25c   : > { %v3781_v50 = vadd.f32 %v3653_v13, %v3394_v35  ;;  %v3008_v58 = vadd.f32 %v2880_v29, %v2621_v43  ;;  %v4041_v60 = vmul.f32 %v5064_v10, %v3912_v36  ;;  %v2494_v62 = vmul.f32 %v5050_v57, %v2365_v38  ;;  %v1209_v33 = vld [vmem:[#allocation2 + $0x6f] sm:$0x1]  ;;  %v2368_v38 = vld [vmem:[#allocation2 + $0x80] sm:$0x1] }
 0x25d   : > { %v2236_v61 = vadd.f32 %v2108_v47, %v1849_v46  ;;  %v2881_v3 = vmul.f32 %v5052_v59, %v2752_v48  ;;  %v1463_v5 = vadd.f32 %v1335_v42, %v1076_v55  ;;  %v948_v7 = vmul.f32 %v5028_v37, %v819_v49  ;;  %v1596_v48 = vld [vmem:[#allocation2 + $0x70] sm:$0x1]  ;;  %v821_v49 = vld [vmem:[#allocation2 + $0x6f] sm:$0x1] }
 0x25e   : > { %v4168_v1 = vadd.f32 %v4040_v24, %v3781_v50  ;;  %v3395_v9 = vadd.f32 %v3267_v44, %v3008_v58  ;;  %v3268_v12 = vmul.f32 %v5061_v8, %v3139_v53  ;;  %v3655_v13 = vmul.f32 %v5055_v2, %v3526_v54  ;;  %v3142_v53 = vld [vmem:[#allocation2 + $0x91] sm:$0x1]  ;;  %v3529_v54 = vld [vmem:[#allocation2 + $0x92] sm:$0x1] }
 0x25f   : > { %v2622_v11 = vadd.f32 %v2494_v62, %v2236_v61  ;;  %v1850_v16 = vadd.f32 %v1722_v56, %v1463_v5  ;;  %v2109_v17 = vmul.f32 %v5046_v51, %v1980_v63  ;;  %v1078_v19 = vadd.f32 %v5035_v40, %v948_v7  ;;  %v1983_v63 = vld [vmem:[#allocation2 + $0x80] sm:$0x1] }
 0x260   : > { %4296 = vst.msk [vmem:[%s4658_s13 + $0x5c] sm:$0x1] %vm326_vm0, %v4168_v1  ;;  %v1337_v20 = vmul.f32 %v5037_v41, %v1208_v0  ;;  %v3782_v22 = vadd.f32 %v3654_v52, %v3395_v9  ;;  %v4042_v24 = vmul.f32 %v5064_v10, %v3913_v4  ;;  %v2495_v25 = vmul.f32 %v5050_v57, %v2366_v6  ;;  %v1210_v0 = vld [vmem:[#allocation2 + $0x70] sm:$0x1]  ;;  %v2369_v6 = vld [vmem:[#allocation2 + $0x81] sm:$0x1] }
 0x261   : > { %v3009_v23 = vadd.f32 %v2881_v3, %v2622_v11  ;;  %v2237_v28 = vadd.f32 %v2109_v17, %v1850_v16  ;;  %v2882_v29 = vmul.f32 %v5052_v59, %v2753_v14  ;;  %v1724_v32 = vmul.f32 %v5040_v45, %v1595_v15  ;;  %v3916_v3 = vld [vmem:[#allocation2 + $0x93] sm:$0x1]  ;;  %v2756_v14 = vld [vmem:[#allocation2 + $0x82] sm:$0x1]  ;;  %v1597_v15 = vld [vmem:[#allocation2 + $0x71] sm:$0x1] }
 0x262   : > { %v1465_v31 = vadd.f32 %v1337_v20, %v1078_v19  ;;  %v4169_v34 = vadd.f32 %v4041_v60, %v3782_v22  ;;  %v3269_v36 = vmul.f32 %v5061_v8, %v3140_v18  ;;  %v949_v42 = vmul.f32 %v5028_v37, %v820_v21  ;;  %v3143_v18 = vld [vmem:[#allocation2 + $0x92] sm:$0x1]  ;;  %v822_v21 = vld [vmem:[#allocation2 + $0x70] sm:$0x1] }
 0x263   : > { %v3396_v35 = vadd.f32 %v3268_v12, %v3009_v23  ;;  %v2623_v43 = vadd.f32 %v2495_v25, %v2237_v28  ;;  %v3656_v44 = vmul.f32 %v5055_v2, %v3527_v26  ;;  %v2111_v47 = vmul.f32 %v5046_v51, %v1982_v27  ;;  %v3530_v26 = vld [vmem:[#allocation2 + $0x93] sm:$0x1]  ;;  %v1984_v27 = vld [vmem:[#allocation2 + $0x81] sm:$0x1] }
 0x264   : > { %v1852_v46 = vadd.f32 %v1724_v32, %v1465_v31  ;;  %4297 = vst.msk [vmem:[%s4658_s13 + $0x5d] sm:$0x1] %vm326_vm0, %v4169_v34  ;;  %v4043_v52 = vmul.f32 %v5064_v10, %v3914_v30  ;;  %v1079_v55 = vadd.f32 %v5035_v40, %v949_v42  ;;  %v1338_v56 = vmul.f32 %v5037_v41, %v1209_v33  ;;  %v3917_v30 = vld [vmem:[#allocation2 + $0x94] sm:$0x1]  ;;  %v1211_v33 = vld [vmem:[#allocation2 + $0x71] sm:$0x1] }
 0x265   : > { %v3783_v50 = vadd.f32 %v3655_v13, %v3396_v35  ;;  %v3010_v58 = vadd.f32 %v2882_v29, %v2623_v43  ;;  %v2497_v61 = vmul.f32 %v5050_v57, %v2368_v38  ;;  %v2884_v62 = vmul.f32 %v5052_v59, %v2755_v39  ;;  %v2370_v38 = vld [vmem:[#allocation2 + $0x82] sm:$0x1]  ;;  %v2757_v39 = vld [vmem:[#allocation2 + $0x83] sm:$0x1] }
 0x266   : > { %v2239_v60 = vadd.f32 %v2111_v47, %v1852_v46  ;;  %v1466_v4 = vadd.f32 %v1338_v56, %v1079_v55  ;;  %v1725_v5 = vmul.f32 %v5040_v45, %v1596_v48  ;;  %v950_v7 = vmul.f32 %v5028_v37, %v821_v49  ;;  %v1598_v48 = vld [vmem:[#allocation2 + $0x72] sm:$0x1]  ;;  %v823_v49 = vld [vmem:[#allocation2 + $0x71] sm:$0x1] }
 0x267   : > { %v4170_v1 = vadd.f32 %v4042_v24, %v3783_v50  ;;  %v3397_v9 = vadd.f32 %v3269_v36, %v3010_v58  ;;  %v3271_v12 = vmul.f32 %v5061_v8, %v3142_v53  ;;  %v3658_v13 = vmul.f32 %v5055_v2, %v3529_v54  ;;  %v3144_v53 = vld [vmem:[#allocation2 + $0x93] sm:$0x1]  ;;  %v3531_v54 = vld [vmem:[#allocation2 + $0x94] sm:$0x1] }
 0x268   : > { %v2625_v11 = vadd.f32 %v2497_v61, %v2239_v60  ;;  %v1853_v16 = vadd.f32 %v1725_v5, %v1466_v4  ;;  %v2112_v17 = vmul.f32 %v5046_v51, %v1983_v63  ;;  %v1080_v19 = vadd.f32 %v5035_v40, %v950_v7  ;;  %v1985_v63 = vld [vmem:[#allocation2 + $0x82] sm:$0x1] }
 0x269   : > { %4298 = vst.msk [vmem:[%s4658_s13 + $0x5e] sm:$0x1] %vm326_vm0, %v4170_v1  ;;  %v1339_v20 = vmul.f32 %v5037_v41, %v1210_v0  ;;  %v3784_v22 = vadd.f32 %v3656_v44, %v3397_v9  ;;  %v4045_v24 = vmul.f32 %v5064_v10, %v3916_v3  ;;  %v2498_v25 = vmul.f32 %v5050_v57, %v2369_v6  ;;  %v1212_v0 = vld [vmem:[#allocation2 + $0x72] sm:$0x1]  ;;  %v3918_v3 = vld [vmem:[#allocation2 + $0x95] sm:$0x1] }
 0x26a   : > { %v3012_v23 = vadd.f32 %v2884_v62, %v2625_v11  ;;  %v2240_v28 = vadd.f32 %v2112_v17, %v1853_v16  ;;  %v2885_v29 = vmul.f32 %v5052_v59, %v2756_v14  ;;  %v1726_v32 = vmul.f32 %v5040_v45, %v1597_v15  ;;  %v2371_v6 = vld [vmem:[#allocation2 + $0x83] sm:$0x1]  ;;  %v2758_v14 = vld [vmem:[#allocation2 + $0x84] sm:$0x1]  ;;  %v1599_v15 = vld [vmem:[#allocation2 + $0x73] sm:$0x1] }
 0x26b   : > { %v1467_v31 = vadd.f32 %v1339_v20, %v1080_v19  ;;  %v4171_v34 = vadd.f32 %v4043_v52, %v3784_v22  ;;  %v3272_v36 = vmul.f32 %v5061_v8, %v3143_v18  ;;  %v951_v42 = vmul.f32 %v5028_v37, %v822_v21  ;;  %v3145_v18 = vld [vmem:[#allocation2 + $0x94] sm:$0x1]  ;;  %v824_v21 = vld [vmem:[#allocation2 + $0x72] sm:$0x1] }
 0x26c   : > { %v3399_v35 = vadd.f32 %v3271_v12, %v3012_v23  ;;  %v2626_v43 = vadd.f32 %v2498_v25, %v2240_v28  ;;  %v3659_v44 = vmul.f32 %v5055_v2, %v3530_v26  ;;  %v2113_v47 = vmul.f32 %v5046_v51, %v1984_v27  ;;  %v3532_v26 = vld [vmem:[#allocation2 + $0x95] sm:$0x1]  ;;  %v1986_v27 = vld [vmem:[#allocation2 + $0x83] sm:$0x1] }
 0x26d   : > { %v1854_v46 = vadd.f32 %v1726_v32, %v1467_v31  ;;  %4299 = vst.msk [vmem:[%s4658_s13 + $0x5f] sm:$0x1] %vm326_vm0, %v4171_v34  ;;  %v4046_v52 = vmul.f32 %v5064_v10, %v3917_v30  ;;  %v1081_v55 = vadd.f32 %v5035_v40, %v951_v42  ;;  %v1340_v56 = vmul.f32 %v5037_v41, %v1211_v33  ;;  %v3919_v30 = vld [vmem:[#allocation2 + $0x96] sm:$0x1]  ;;  %v1213_v33 = vld [vmem:[#allocation2 + $0x73] sm:$0x1] }
 0x26e   : > { %v3786_v50 = vadd.f32 %v3658_v13, %v3399_v35  ;;  %v3013_v58 = vadd.f32 %v2885_v29, %v2626_v43  ;;  %v2499_v61 = vmul.f32 %v5050_v57, %v2370_v38  ;;  %v2886_v62 = vmul.f32 %v5052_v59, %v2757_v39  ;;  %v2372_v38 = vld [vmem:[#allocation2 + $0x84] sm:$0x1]  ;;  %v2759_v39 = vld [vmem:[#allocation2 + $0x85] sm:$0x1] }
 0x26f   : > { %v2241_v60 = vadd.f32 %v2113_v47, %v1854_v46  ;;  %v1468_v4 = vadd.f32 %v1340_v56, %v1081_v55  ;;  %v1727_v5 = vmul.f32 %v5040_v45, %v1598_v48  ;;  %v952_v7 = vmul.f32 %v5028_v37, %v823_v49  ;;  %v1600_v48 = vld [vmem:[#allocation2 + $0x74] sm:$0x1]  ;;  %v825_v49 = vld [vmem:[#allocation2 + $0x73] sm:$0x1] }
 0x270   : > { %v4173_v1 = vadd.f32 %v4045_v24, %v3786_v50  ;;  %v3400_v9 = vadd.f32 %v3272_v36, %v3013_v58  ;;  %v3273_v12 = vmul.f32 %v5061_v8, %v3144_v53  ;;  %v3660_v13 = vmul.f32 %v5055_v2, %v3531_v54  ;;  %v3146_v53 = vld [vmem:[#allocation2 + $0x95] sm:$0x1]  ;;  %v3533_v54 = vld [vmem:[#allocation2 + $0x96] sm:$0x1] }
 0x271   : > { %v2627_v11 = vadd.f32 %v2499_v61, %v2241_v60  ;;  %v1855_v16 = vadd.f32 %v1727_v5, %v1468_v4  ;;  %v2114_v17 = vmul.f32 %v5046_v51, %v1985_v63  ;;  %v1082_v19 = vadd.f32 %v5035_v40, %v952_v7  ;;  %v1987_v63 = vld [vmem:[#allocation2 + $0x84] sm:$0x1] }
 0x272   : > { %4301 = vst.msk [vmem:[%s4658_s13 + $0x61] sm:$0x1] %vm326_vm0, %v4173_v1  ;;  %v1341_v20 = vmul.f32 %v5037_v41, %v1212_v0  ;;  %v3787_v22 = vadd.f32 %v3659_v44, %v3400_v9  ;;  %v4047_v24 = vmul.f32 %v5064_v10, %v3918_v3  ;;  %v2500_v25 = vmul.f32 %v5050_v57, %v2371_v6  ;;  %v1214_v0 = vld [vmem:[#allocation2 + $0x74] sm:$0x1]  ;;  %v3920_v3 = vld [vmem:[#allocation2 + $0x97] sm:$0x1] }
 0x273   : > { %v3014_v23 = vadd.f32 %v2886_v62, %v2627_v11  ;;  %v2242_v28 = vadd.f32 %v2114_v17, %v1855_v16  ;;  %v2887_v29 = vmul.f32 %v5052_v59, %v2758_v14  ;;  %v1728_v32 = vmul.f32 %v5040_v45, %v1599_v15  ;;  %v2373_v6 = vld [vmem:[#allocation2 + $0x85] sm:$0x1]  ;;  %v2760_v14 = vld [vmem:[#allocation2 + $0x86] sm:$0x1]  ;;  %v1601_v15 = vld [vmem:[#allocation2 + $0x75] sm:$0x1] }
 0x274   : > { %v1469_v31 = vadd.f32 %v1341_v20, %v1082_v19  ;;  %v4174_v34 = vadd.f32 %v4046_v52, %v3787_v22  ;;  %v3274_v36 = vmul.f32 %v5061_v8, %v3145_v18  ;;  %v953_v42 = vmul.f32 %v5028_v37, %v824_v21  ;;  %v3147_v18 = vld [vmem:[#allocation2 + $0x96] sm:$0x1]  ;;  %v826_v21 = vld [vmem:[#allocation2 + $0x74] sm:$0x1] }
 0x275   : > { %v3401_v35 = vadd.f32 %v3273_v12, %v3014_v23  ;;  %v2628_v43 = vadd.f32 %v2500_v25, %v2242_v28  ;;  %v3661_v44 = vmul.f32 %v5055_v2, %v3532_v26  ;;  %v2115_v47 = vmul.f32 %v5046_v51, %v1986_v27  ;;  %v3534_v26 = vld [vmem:[#allocation2 + $0x97] sm:$0x1]  ;;  %v1988_v27 = vld [vmem:[#allocation2 + $0x85] sm:$0x1] }
 0x276   : > { %v1856_v46 = vadd.f32 %v1728_v32, %v1469_v31  ;;  %4302 = vst.msk [vmem:[%s4658_s13 + $0x62] sm:$0x1] %vm326_vm0, %v4174_v34  ;;  %v4048_v52 = vmul.f32 %v5064_v10, %v3919_v30  ;;  %v1083_v55 = vadd.f32 %v5035_v40, %v953_v42  ;;  %v1342_v56 = vmul.f32 %v5037_v41, %v1213_v33  ;;  %v3921_v30 = vld [vmem:[#allocation2 + $0x98] sm:$0x1]  ;;  %v1215_v33 = vld [vmem:[#allocation2 + $0x75] sm:$0x1] }
 0x277   : > { %v3788_v50 = vadd.f32 %v3660_v13, %v3401_v35  ;;  %v3015_v58 = vadd.f32 %v2887_v29, %v2628_v43  ;;  %v2501_v61 = vmul.f32 %v5050_v57, %v2372_v38  ;;  %v2888_v62 = vmul.f32 %v5052_v59, %v2759_v39  ;;  %v2374_v38 = vld [vmem:[#allocation2 + $0x86] sm:$0x1]  ;;  %v2761_v39 = vld [vmem:[#allocation2 + $0x87] sm:$0x1] }
 0x278   : > { %v2243_v60 = vadd.f32 %v2115_v47, %v1856_v46  ;;  %v1470_v4 = vadd.f32 %v1342_v56, %v1083_v55  ;;  %v1729_v5 = vmul.f32 %v5040_v45, %v1600_v48  ;;  %v954_v7 = vmul.f32 %v5028_v37, %v825_v49  ;;  %v1602_v48 = vld [vmem:[#allocation2 + $0x76] sm:$0x1]  ;;  %v827_v49 = vld [vmem:[#allocation2 + $0x75] sm:$0x1] }
 0x279   : > { %v4175_v1 = vadd.f32 %v4047_v24, %v3788_v50  ;;  %v3402_v9 = vadd.f32 %v3274_v36, %v3015_v58  ;;  %v3275_v12 = vmul.f32 %v5061_v8, %v3146_v53  ;;  %v3662_v13 = vmul.f32 %v5055_v2, %v3533_v54  ;;  %v3148_v53 = vld [vmem:[#allocation2 + $0x97] sm:$0x1]  ;;  %v3535_v54 = vld [vmem:[#allocation2 + $0x98] sm:$0x1] }
 0x27a   : > { %v2629_v11 = vadd.f32 %v2501_v61, %v2243_v60  ;;  %v1857_v16 = vadd.f32 %v1729_v5, %v1470_v4  ;;  %v2116_v17 = vmul.f32 %v5046_v51, %v1987_v63  ;;  %v1084_v19 = vadd.f32 %v5035_v40, %v954_v7  ;;  %v1989_v63 = vld [vmem:[#allocation2 + $0x86] sm:$0x1] }
 0x27b   : > { %4303 = vst.msk [vmem:[%s4658_s13 + $0x63] sm:$0x1] %vm326_vm0, %v4175_v1  ;;  %v1343_v20 = vmul.f32 %v5037_v41, %v1214_v0  ;;  %v3789_v22 = vadd.f32 %v3661_v44, %v3402_v9  ;;  %v4049_v24 = vmul.f32 %v5064_v10, %v3920_v3  ;;  %v2502_v25 = vmul.f32 %v5050_v57, %v2373_v6  ;;  %v1216_v0 = vld [vmem:[#allocation2 + $0x76] sm:$0x1]  ;;  %v3922_v3 = vld [vmem:[#allocation2 + $0x99] sm:$0x1] }
 0x27c   : > { %v3016_v23 = vadd.f32 %v2888_v62, %v2629_v11  ;;  %v2244_v28 = vadd.f32 %v2116_v17, %v1857_v16  ;;  %v2889_v29 = vmul.f32 %v5052_v59, %v2760_v14  ;;  %v1730_v32 = vmul.f32 %v5040_v45, %v1601_v15  ;;  %v2375_v6 = vld [vmem:[#allocation2 + $0x87] sm:$0x1]  ;;  %v2762_v14 = vld [vmem:[#allocation2 + $0x88] sm:$0x1]  ;;  %v1603_v15 = vld [vmem:[#allocation2 + $0x77] sm:$0x1] }
 0x27d   : > { %v1471_v31 = vadd.f32 %v1343_v20, %v1084_v19  ;;  %v4176_v34 = vadd.f32 %v4048_v52, %v3789_v22  ;;  %v3276_v36 = vmul.f32 %v5061_v8, %v3147_v18  ;;  %v955_v42 = vmul.f32 %v5028_v37, %v826_v21  ;;  %v3149_v18 = vld [vmem:[#allocation2 + $0x98] sm:$0x1]  ;;  %v828_v21 = vld [vmem:[#allocation2 + $0x76] sm:$0x1] }
 0x27e   : > { %v3403_v35 = vadd.f32 %v3275_v12, %v3016_v23  ;;  %v2630_v43 = vadd.f32 %v2502_v25, %v2244_v28  ;;  %v3663_v44 = vmul.f32 %v5055_v2, %v3534_v26  ;;  %v2117_v47 = vmul.f32 %v5046_v51, %v1988_v27  ;;  %v3536_v26 = vld [vmem:[#allocation2 + $0x99] sm:$0x1]  ;;  %v1990_v27 = vld [vmem:[#allocation2 + $0x87] sm:$0x1] }
 0x27f   : > { %v1858_v46 = vadd.f32 %v1730_v32, %v1471_v31  ;;  %4304 = vst.msk [vmem:[%s4658_s13 + $0x64] sm:$0x1] %vm326_vm0, %v4176_v34  ;;  %v4050_v52 = vmul.f32 %v5064_v10, %v3921_v30  ;;  %v1085_v55 = vadd.f32 %v5035_v40, %v955_v42  ;;  %v1344_v56 = vmul.f32 %v5037_v41, %v1215_v33  ;;  %v3923_v30 = vld [vmem:[#allocation2 + $0x9a] sm:$0x1]  ;;  %v1217_v33 = vld [vmem:[#allocation2 + $0x77] sm:$0x1] }
 0x280   : > { %v3790_v50 = vadd.f32 %v3662_v13, %v3403_v35  ;;  %v3017_v58 = vadd.f32 %v2889_v29, %v2630_v43  ;;  %v2503_v61 = vmul.f32 %v5050_v57, %v2374_v38  ;;  %v2890_v62 = vmul.f32 %v5052_v59, %v2761_v39  ;;  %v2376_v38 = vld [vmem:[#allocation2 + $0x88] sm:$0x1]  ;;  %v2763_v39 = vld [vmem:[#allocation2 + $0x89] sm:$0x1] }
 0x281   : > { %v2245_v60 = vadd.f32 %v2117_v47, %v1858_v46  ;;  %v1472_v4 = vadd.f32 %v1344_v56, %v1085_v55  ;;  %v1731_v5 = vmul.f32 %v5040_v45, %v1602_v48  ;;  %v956_v7 = vmul.f32 %v5028_v37, %v827_v49  ;;  %v1604_v48 = vld [vmem:[#allocation2 + $0x78] sm:$0x1]  ;;  %v829_v49 = vld [vmem:[#allocation2 + $0x77] sm:$0x1] }
 0x282   : > { %v4177_v1 = vadd.f32 %v4049_v24, %v3790_v50  ;;  %v3404_v9 = vadd.f32 %v3276_v36, %v3017_v58  ;;  %v3277_v12 = vmul.f32 %v5061_v8, %v3148_v53  ;;  %v3664_v13 = vmul.f32 %v5055_v2, %v3535_v54  ;;  %v3150_v53 = vld [vmem:[#allocation2 + $0x99] sm:$0x1]  ;;  %v3537_v54 = vld [vmem:[#allocation2 + $0x9a] sm:$0x1] }
 0x283   : > { %v2631_v11 = vadd.f32 %v2503_v61, %v2245_v60  ;;  %v1859_v16 = vadd.f32 %v1731_v5, %v1472_v4  ;;  %v2118_v17 = vmul.f32 %v5046_v51, %v1989_v63  ;;  %v1086_v19 = vadd.f32 %v5035_v40, %v956_v7  ;;  %v1991_v63 = vld [vmem:[#allocation2 + $0x88] sm:$0x1] }
 0x284   : > { %4305 = vst.msk [vmem:[%s4658_s13 + $0x65] sm:$0x1] %vm326_vm0, %v4177_v1  ;;  %v1345_v20 = vmul.f32 %v5037_v41, %v1216_v0  ;;  %v3791_v22 = vadd.f32 %v3663_v44, %v3404_v9  ;;  %v4051_v24 = vmul.f32 %v5064_v10, %v3922_v3  ;;  %v2504_v25 = vmul.f32 %v5050_v57, %v2375_v6  ;;  %v1218_v0 = vld [vmem:[#allocation2 + $0x78] sm:$0x1]  ;;  %v3924_v3 = vld [vmem:[#allocation2 + $0x9b] sm:$0x1] }
 0x285   : > { %v3018_v23 = vadd.f32 %v2890_v62, %v2631_v11  ;;  %v2246_v28 = vadd.f32 %v2118_v17, %v1859_v16  ;;  %v2891_v29 = vmul.f32 %v5052_v59, %v2762_v14  ;;  %v1732_v32 = vmul.f32 %v5040_v45, %v1603_v15  ;;  %v2377_v6 = vld [vmem:[#allocation2 + $0x89] sm:$0x1]  ;;  %v2764_v14 = vld [vmem:[#allocation2 + $0x8a] sm:$0x1]  ;;  %v1605_v15 = vld [vmem:[#allocation2 + $0x79] sm:$0x1] }
 0x286   : > { %v1473_v31 = vadd.f32 %v1345_v20, %v1086_v19  ;;  %v4178_v34 = vadd.f32 %v4050_v52, %v3791_v22  ;;  %v3278_v36 = vmul.f32 %v5061_v8, %v3149_v18  ;;  %v957_v42 = vmul.f32 %v5028_v37, %v828_v21  ;;  %v3151_v18 = vld [vmem:[#allocation2 + $0x9a] sm:$0x1]  ;;  %v830_v21 = vld [vmem:[#allocation2 + $0x78] sm:$0x1] }
 0x287   : > { %v3405_v35 = vadd.f32 %v3277_v12, %v3018_v23  ;;  %v2632_v43 = vadd.f32 %v2504_v25, %v2246_v28  ;;  %v3665_v44 = vmul.f32 %v5055_v2, %v3536_v26  ;;  %v2119_v47 = vmul.f32 %v5046_v51, %v1990_v27  ;;  %v3538_v26 = vld [vmem:[#allocation2 + $0x9b] sm:$0x1]  ;;  %v1992_v27 = vld [vmem:[#allocation2 + $0x89] sm:$0x1] }
 0x288   : > { %v1860_v46 = vadd.f32 %v1732_v32, %v1473_v31  ;;  %4306 = vst.msk [vmem:[%s4658_s13 + $0x66] sm:$0x1] %vm326_vm0, %v4178_v34  ;;  %v4052_v52 = vmul.f32 %v5064_v10, %v3923_v30  ;;  %v1087_v55 = vadd.f32 %v5035_v40, %v957_v42  ;;  %v1346_v56 = vmul.f32 %v5037_v41, %v1217_v33  ;;  %v3925_v30 = vld [vmem:[#allocation2 + $0x9c] sm:$0x1]  ;;  %v1219_v33 = vld [vmem:[#allocation2 + $0x79] sm:$0x1] }
 0x289   : > { %v3792_v50 = vadd.f32 %v3664_v13, %v3405_v35  ;;  %v3019_v58 = vadd.f32 %v2891_v29, %v2632_v43  ;;  %v2505_v61 = vmul.f32 %v5050_v57, %v2376_v38  ;;  %v2892_v62 = vmul.f32 %v5052_v59, %v2763_v39  ;;  %v2378_v38 = vld [vmem:[#allocation2 + $0x8a] sm:$0x1]  ;;  %v2765_v39 = vld [vmem:[#allocation2 + $0x8b] sm:$0x1] }
 0x28a   : > { %v2247_v60 = vadd.f32 %v2119_v47, %v1860_v46  ;;  %v1474_v4 = vadd.f32 %v1346_v56, %v1087_v55  ;;  %v1733_v5 = vmul.f32 %v5040_v45, %v1604_v48  ;;  %v958_v7 = vmul.f32 %v5028_v37, %v829_v49  ;;  %v1606_v48 = vld [vmem:[#allocation2 + $0x7a] sm:$0x1]  ;;  %v831_v49 = vld [vmem:[#allocation2 + $0x79] sm:$0x1] }
 0x28b   : > { %v4179_v1 = vadd.f32 %v4051_v24, %v3792_v50  ;;  %v3406_v9 = vadd.f32 %v3278_v36, %v3019_v58  ;;  %v3279_v12 = vmul.f32 %v5061_v8, %v3150_v53  ;;  %v3666_v13 = vmul.f32 %v5055_v2, %v3537_v54  ;;  %v3152_v53 = vld [vmem:[#allocation2 + $0x9b] sm:$0x1]  ;;  %v3539_v54 = vld [vmem:[#allocation2 + $0x9c] sm:$0x1] }
 0x28c   : > { %v2633_v11 = vadd.f32 %v2505_v61, %v2247_v60  ;;  %v1861_v16 = vadd.f32 %v1733_v5, %v1474_v4  ;;  %v2120_v17 = vmul.f32 %v5046_v51, %v1991_v63  ;;  %v1088_v19 = vadd.f32 %v5035_v40, %v958_v7  ;;  %v1993_v63 = vld [vmem:[#allocation2 + $0x8a] sm:$0x1] }
 0x28d   : > { %4307 = vst.msk [vmem:[%s4658_s13 + $0x67] sm:$0x1] %vm326_vm0, %v4179_v1  ;;  %v1347_v20 = vmul.f32 %v5037_v41, %v1218_v0  ;;  %v3793_v22 = vadd.f32 %v3665_v44, %v3406_v9  ;;  %v4053_v24 = vmul.f32 %v5064_v10, %v3924_v3  ;;  %v2506_v25 = vmul.f32 %v5050_v57, %v2377_v6  ;;  %v1220_v0 = vld [vmem:[#allocation2 + $0x7a] sm:$0x1]  ;;  %v3926_v3 = vld [vmem:[#allocation2 + $0x9d] sm:$0x1] }
 0x28e   : > { %v3020_v23 = vadd.f32 %v2892_v62, %v2633_v11  ;;  %v2248_v28 = vadd.f32 %v2120_v17, %v1861_v16  ;;  %v2893_v29 = vmul.f32 %v5052_v59, %v2764_v14  ;;  %v1734_v32 = vmul.f32 %v5040_v45, %v1605_v15  ;;  %v2379_v6 = vld [vmem:[#allocation2 + $0x8b] sm:$0x1]  ;;  %v2766_v14 = vld [vmem:[#allocation2 + $0x8c] sm:$0x1]  ;;  %v1607_v15 = vld [vmem:[#allocation2 + $0x7b] sm:$0x1] }
 0x28f   : > { %v1475_v31 = vadd.f32 %v1347_v20, %v1088_v19  ;;  %v4180_v34 = vadd.f32 %v4052_v52, %v3793_v22  ;;  %v3280_v36 = vmul.f32 %v5061_v8, %v3151_v18  ;;  %v959_v42 = vmul.f32 %v5028_v37, %v830_v21  ;;  %v3153_v18 = vld [vmem:[#allocation2 + $0x9c] sm:$0x1]  ;;  %v832_v21 = vld [vmem:[#allocation2 + $0x7a] sm:$0x1] }
 0x290   : > { %v3407_v35 = vadd.f32 %v3279_v12, %v3020_v23  ;;  %v2634_v43 = vadd.f32 %v2506_v25, %v2248_v28  ;;  %v3667_v44 = vmul.f32 %v5055_v2, %v3538_v26  ;;  %v2121_v47 = vmul.f32 %v5046_v51, %v1992_v27  ;;  %v3540_v26 = vld [vmem:[#allocation2 + $0x9d] sm:$0x1]  ;;  %v1994_v27 = vld [vmem:[#allocation2 + $0x8b] sm:$0x1] }
 0x291   : > { %v1862_v46 = vadd.f32 %v1734_v32, %v1475_v31  ;;  %4308 = vst.msk [vmem:[%s4658_s13 + $0x68] sm:$0x1] %vm326_vm0, %v4180_v34  ;;  %v4054_v52 = vmul.f32 %v5064_v10, %v3925_v30  ;;  %v1089_v55 = vadd.f32 %v5035_v40, %v959_v42  ;;  %v1348_v56 = vmul.f32 %v5037_v41, %v1219_v33  ;;  %v3927_v30 = vld [vmem:[#allocation2 + $0x9e] sm:$0x1]  ;;  %v1221_v33 = vld [vmem:[#allocation2 + $0x7b] sm:$0x1] }
 0x292   : > { %v3794_v50 = vadd.f32 %v3666_v13, %v3407_v35  ;;  %v3021_v58 = vadd.f32 %v2893_v29, %v2634_v43  ;;  %v2507_v61 = vmul.f32 %v5050_v57, %v2378_v38  ;;  %v2894_v62 = vmul.f32 %v5052_v59, %v2765_v39  ;;  %v2380_v38 = vld [vmem:[#allocation2 + $0x8c] sm:$0x1]  ;;  %v2767_v39 = vld [vmem:[#allocation2 + $0x8d] sm:$0x1] }
 0x293   : > { %v2249_v60 = vadd.f32 %v2121_v47, %v1862_v46  ;;  %v1476_v4 = vadd.f32 %v1348_v56, %v1089_v55  ;;  %v1735_v5 = vmul.f32 %v5040_v45, %v1606_v48  ;;  %v960_v7 = vmul.f32 %v5028_v37, %v831_v49  ;;  %v1608_v48 = vld [vmem:[#allocation2 + $0x7c] sm:$0x1]  ;;  %v833_v49 = vld [vmem:[#allocation2 + $0x7b] sm:$0x1] }
 0x294   : > { %v4181_v1 = vadd.f32 %v4053_v24, %v3794_v50  ;;  %v3408_v9 = vadd.f32 %v3280_v36, %v3021_v58  ;;  %v3281_v12 = vmul.f32 %v5061_v8, %v3152_v53  ;;  %v3668_v13 = vmul.f32 %v5055_v2, %v3539_v54  ;;  %v3154_v53 = vld [vmem:[#allocation2 + $0x9d] sm:$0x1]  ;;  %v1222_v56 = vld [vmem:[#allocation2 + $0x7c] sm:$0x1] }
 0x295   : > { %v2635_v11 = vadd.f32 %v2507_v61, %v2249_v60  ;;  %v1863_v16 = vadd.f32 %v1735_v5, %v1476_v4  ;;  %v2122_v17 = vmul.f32 %v5046_v51, %v1993_v63  ;;  %v1090_v19 = vadd.f32 %v5035_v40, %v960_v7  ;;  %v1995_v63 = vld [vmem:[#allocation2 + $0x8c] sm:$0x1]  ;;  %v3928_v4 = vld [vmem:[#allocation2 + $0x9f] sm:$0x1] }
 0x296   : > { %4309 = vst.msk [vmem:[%s4658_s13 + $0x69] sm:$0x1] %vm326_vm0, %v4181_v1  ;;  %v1349_v20 = vmul.f32 %v5037_v41, %v1220_v0  ;;  %v3795_v22 = vadd.f32 %v3667_v44, %v3408_v9  ;;  %v4055_v24 = vmul.f32 %v5064_v10, %v3926_v3  ;;  %v2508_v25 = vmul.f32 %v5050_v57, %v2379_v6  ;;  %v1609_v0 = vld [vmem:[#allocation2 + $0x7d] sm:$0x1]  ;;  %v3541_v3 = vld [vmem:[#allocation2 + $0x9e] sm:$0x1] }
 0x297   : > { %v3022_v23 = vadd.f32 %v2894_v62, %v2635_v11  ;;  %v2250_v28 = vadd.f32 %v2122_v17, %v1863_v16  ;;  %v2895_v29 = vmul.f32 %v5052_v59, %v2766_v14  ;;  %v1736_v32 = vmul.f32 %v5040_v45, %v1607_v15  ;;  %v2768_v14 = vld [vmem:[#allocation2 + $0x8e] sm:$0x1] }
 0x298   : > { %v1477_v31 = vadd.f32 %v1349_v20, %v1090_v19  ;;  %v4182_v34 = vadd.f32 %v4054_v52, %v3795_v22  ;;  %v3282_v36 = vmul.f32 %v5061_v8, %v3153_v18  ;;  %v961_v42 = vmul.f32 %v5028_v37, %v832_v21  ;;  %v3155_v18 = vld [vmem:[#allocation2 + $0x9e] sm:$0x1]  ;;  %v835_v21 = vld [vmem:[#allocation2 + $0x7f] sm:$0x1] }
 0x299   : > { %v3409_v35 = vadd.f32 %v3281_v12, %v3022_v23  ;;  %v2636_v43 = vadd.f32 %v2508_v25, %v2250_v28  ;;  %v3669_v44 = vmul.f32 %v5055_v2, %v3540_v26  ;;  %v2123_v47 = vmul.f32 %v5046_v51, %v1994_v27  ;;  %v3542_v26 = vld [vmem:[#allocation2 + $0x9f] sm:$0x1]  ;;  %v1996_v27 = vld [vmem:[#allocation2 + $0x8d] sm:$0x1] }
 0x29a   : > { %v1864_v46 = vadd.f32 %v1736_v32, %v1477_v31  ;;  %4310 = vst.msk [vmem:[%s4658_s13 + $0x6a] sm:$0x1] %vm326_vm0, %v4182_v34  ;;  %v4056_v52 = vmul.f32 %v5064_v10, %v3927_v30  ;;  %v1091_v54 = vadd.f32 %v5035_v40, %v961_v42  ;;  %v1350_v55 = vmul.f32 %v5037_v41, %v1221_v33  ;;  %v2382_v32 = vld [vmem:[#allocation2 + $0x8e] sm:$0x1]  ;;  %v1224_v33 = vld [vmem:[#allocation2 + $0x80] sm:$0x1] }
 0x29b   : > { %v3796_v50 = vadd.f32 %v3668_v13, %v3409_v35  ;;  %v3023_v58 = vadd.f32 %v2895_v29, %v2636_v43  ;;  %v2509_v61 = vmul.f32 %v5050_v57, %v2380_v38  ;;  %v2896_v62 = vmul.f32 %v5052_v59, %v2767_v39  ;;  %v2381_v13 = vld [vmem:[#allocation2 + $0x8d] sm:$0x1]  ;;  %v2769_v38 = vld [vmem:[#allocation2 + $0x8f] sm:$0x1]  ;;  %v1611_v42 = vld [vmem:[#allocation2 + $0x81] sm:$0x1] }
 0x29c   : > { %v2251_v60 = vadd.f32 %v2123_v47, %v1864_v46  ;;  %v1478_v5 = vadd.f32 %v1350_v55, %v1091_v54  ;;  %v1737_v6 = vmul.f32 %v5040_v45, %v1608_v48  ;;  %v962_v7 = vmul.f32 %v5028_v37, %v833_v49  ;;  %v1998_v48 = vld [vmem:[#allocation2 + $0x91] sm:$0x1]  ;;  %v836_v49 = vld [vmem:[#allocation2 + $0x80] sm:$0x1]  ;;  %v3156_v54 = vld [vmem:[#allocation2 + $0x9f] sm:$0x1] }
 0x29d   : > { %v4183_v1 = vadd.f32 %v4055_v24, %v3796_v50  ;;  %v3410_v9 = vadd.f32 %v3282_v36, %v3023_v58  ;;  %v3283_v12 = vmul.f32 %v5061_v8, %v3154_v53  ;;  %v1351_v15 = vmul.f32 %v5037_v41, %v1222_v56  ;;  %v3929_v53 = vld [vmem:[#allocation2 + $0xa0] sm:$0x1] }
 0x29e   : > { %v2637_v11 = vadd.f32 %v2509_v61, %v2251_v60  ;;  %v1865_v16 = vadd.f32 %v1737_v6, %v1478_v5  ;;  %v2124_v17 = vmul.f32 %v5046_v51, %v1995_v63  ;;  %v1092_v19 = vadd.f32 %v5035_v40, %v962_v7  ;;  %v2384_v6 = vld [vmem:[#allocation2 + $0x92] sm:$0x1] }
 0x29f   : > { %4311 = vst.msk [vmem:[%s4658_s13 + $0x6b] sm:$0x1] %vm326_vm0, %v4183_v1  ;;  %v1738_v20 = vmul.f32 %v5040_v45, %v1609_v0  ;;  %v3797_v22 = vadd.f32 %v3669_v44, %v3410_v9  ;;  %v3670_v24 = vmul.f32 %v5055_v2, %v3541_v3  ;;  %v4057_v25 = vmul.f32 %v5064_v10, %v3928_v4  ;;  %v1225_v0 = vld [vmem:[#allocation2 + $0x81] sm:$0x1] }
 0x2a0   : > { %v3024_v23 = vadd.f32 %v2896_v62, %v2637_v11  ;;  %v2252_v28 = vadd.f32 %v2124_v17, %v1865_v16  ;;  %v2510_v29 = vmul.f32 %v5050_v57, %v2381_v13  ;;  %v2897_v30 = vmul.f32 %v5052_v59, %v2768_v14  ;;  %v3543_v62 = vld [vmem:[#allocation2 + $0xa0] sm:$0x1]  ;;  %v3930_v3 = vld [vmem:[#allocation2 + $0xa1] sm:$0x1]  ;;  %v1612_v14 = vld [vmem:[#allocation2 + $0x82] sm:$0x1] }
 0x2a1   : > { %v1479_v31 = vadd.f32 %v1351_v15, %v1092_v19  ;;  %v4184_v34 = vadd.f32 %v4056_v52, %v3797_v22  ;;  %v3284_v36 = vmul.f32 %v5061_v8, %v3155_v18  ;;  %v964_v39 = vmul.f32 %v5028_v37, %v835_v21  ;;  %v1999_v15 = vld [vmem:[#allocation2 + $0x92] sm:$0x1]  ;;  %v2771_v18 = vld [vmem:[#allocation2 + $0x93] sm:$0x1]  ;;  %v837_v21 = vld [vmem:[#allocation2 + $0x81] sm:$0x1] }
 0x2a2   : > { %v3411_v35 = vadd.f32 %v3283_v12, %v3024_v23  ;;  %v2638_v43 = vadd.f32 %v2510_v29, %v2252_v28  ;;  %v3671_v44 = vmul.f32 %v5055_v2, %v3542_v26  ;;  %v2125_v47 = vmul.f32 %v5046_v51, %v1996_v27  ;;  %v3158_v26 = vld [vmem:[#allocation2 + $0xa3] sm:$0x1]  ;;  %v3545_v27 = vld [vmem:[#allocation2 + $0xa4] sm:$0x1]  ;;  %v3932_v29 = vld [vmem:[#allocation2 + $0xa5] sm:$0x1] }
 0x2a3   : > { %v1866_v46 = vadd.f32 %v1738_v20, %v1479_v31  ;;  %4312 = vst.msk [vmem:[%s4658_s13 + $0x6c] sm:$0x1] %vm326_vm0, %v4184_v34  ;;  %v2511_v52 = vmul.f32 %v5050_v57, %v2382_v32  ;;  %v1094_v55 = vadd.f32 %v5035_v40, %v964_v39  ;;  %v1353_v56 = vmul.f32 %v5037_v41, %v1224_v33  ;;  %v1226_v33 = vld [vmem:[#allocation2 + $0x82] sm:$0x1] }
 0x2a4   : > { %v3798_v50 = vadd.f32 %v3670_v24, %v3411_v35  ;;  %v3025_v58 = vadd.f32 %v2897_v30, %v2638_v43  ;;  %v2898_v61 = vmul.f32 %v5052_v59, %v2769_v38  ;;  %v1740_v63 = vmul.f32 %v5040_v45, %v1611_v42  ;;  %v2385_v38 = vld [vmem:[#allocation2 + $0x93] sm:$0x1]  ;;  %v1613_v42 = vld [vmem:[#allocation2 + $0x83] sm:$0x1] }
 0x2a5   : > { %v2253_v60 = vadd.f32 %v2125_v47, %v1866_v46  ;;  %v1481_v4 = vadd.f32 %v1353_v56, %v1094_v55  ;;  %v2127_v5 = vmul.f32 %v5046_v51, %v1998_v48  ;;  %v965_v7 = vmul.f32 %v5028_v37, %v836_v49  ;;  %v2000_v48 = vld [vmem:[#allocation2 + $0x93] sm:$0x1]  ;;  %v838_v49 = vld [vmem:[#allocation2 + $0x82] sm:$0x1] }
 0x2a6   : > { %v4185_v1 = vadd.f32 %v4057_v25, %v3798_v50  ;;  %v3412_v9 = vadd.f32 %v3284_v36, %v3025_v58  ;;  %v4058_v11 = vmul.f32 %v5064_v10, %v3929_v53  ;;  %v3285_v13 = vmul.f32 %v5061_v8, %v3156_v54  ;;  %v3159_v54 = vld [vmem:[#allocation2 + $0xa4] sm:$0x1] }
 0x2a7   : > { %v2639_v12 = vadd.f32 %v2511_v52, %v2253_v60  ;;  %v3672_v16 = vmul.f32 %v5055_v2, %v3543_v62  ;;  %v1868_v17 = vadd.f32 %v1740_v63, %v1481_v4  ;;  %v1095_v19 = vadd.f32 %v5035_v40, %v965_v7  ;;  %v2772_v52 = vld [vmem:[#allocation2 + $0x94] sm:$0x1]  ;;  %v3546_v62 = vld [vmem:[#allocation2 + $0xa5] sm:$0x1] }
 0x2a8   : > { %4313 = vst.msk [vmem:[%s4658_s13 + $0x6d] sm:$0x1] %vm326_vm0, %v4185_v1  ;;  %v1354_v20 = vmul.f32 %v5037_v41, %v1225_v0  ;;  %v3799_v22 = vadd.f32 %v3671_v44, %v3412_v9  ;;  %v4059_v24 = vmul.f32 %v5064_v10, %v3930_v3  ;;  %v2513_v25 = vmul.f32 %v5050_v57, %v2384_v6  ;;  %v1227_v0 = vld [vmem:[#allocation2 + $0x83] sm:$0x1]  ;;  %v3933_v3 = vld [vmem:[#allocation2 + $0xa6] sm:$0x1] }
 0x2a9   : > { %v3026_v23 = vadd.f32 %v2898_v61, %v2639_v12  ;;  %v2255_v28 = vadd.f32 %v2127_v5, %v1868_v17  ;;  %v1741_v31 = vmul.f32 %v5040_v45, %v1612_v14  ;;  %v2128_v32 = vmul.f32 %v5046_v51, %v1999_v15  ;;  %v2386_v6 = vld [vmem:[#allocation2 + $0x94] sm:$0x1]  ;;  %v1614_v14 = vld [vmem:[#allocation2 + $0x84] sm:$0x1] }
 0x2aa   : > { %v1482_v30 = vadd.f32 %v1354_v20, %v1095_v19  ;;  %v4186_v34 = vadd.f32 %v4058_v11, %v3799_v22  ;;  %v2900_v36 = vmul.f32 %v5052_v59, %v2771_v18  ;;  %v966_v39 = vmul.f32 %v5028_v37, %v837_v21  ;;  %v2001_v15 = vld [vmem:[#allocation2 + $0x94] sm:$0x1]  ;;  %v2773_v18 = vld [vmem:[#allocation2 + $0x95] sm:$0x1]  ;;  %v839_v21 = vld [vmem:[#allocation2 + $0x83] sm:$0x1] }
 0x2ab   : > { %v3413_v35 = vadd.f32 %v3285_v13, %v3026_v23  ;;  %v2641_v43 = vadd.f32 %v2513_v25, %v2255_v28  ;;  %v3287_v44 = vmul.f32 %v5061_v8, %v3158_v26  ;;  %v3674_v46 = vmul.f32 %v5055_v2, %v3545_v27  ;;  %v3160_v26 = vld [vmem:[#allocation2 + $0xa5] sm:$0x1]  ;;  %v3547_v27 = vld [vmem:[#allocation2 + $0xa6] sm:$0x1] }
 0x2ac   : > { %v1869_v47 = vadd.f32 %v1741_v31, %v1482_v30  ;;  %4314 = vst.msk [vmem:[%s4658_s13 + $0x6e] sm:$0x1] %vm326_vm0, %v4186_v34  ;;  %v4061_v53 = vmul.f32 %v5064_v10, %v3932_v29  ;;  %v1096_v55 = vadd.f32 %v5035_v40, %v966_v39  ;;  %v1355_v56 = vmul.f32 %v5037_v41, %v1226_v33  ;;  %v3934_v29 = vld [vmem:[#allocation2 + $0xa7] sm:$0x1]  ;;  %v1228_v33 = vld [vmem:[#allocation2 + $0x84] sm:$0x1] }
 0x2ad   : > { %v3800_v50 = vadd.f32 %v3672_v16, %v3413_v35  ;;  %v3028_v58 = vadd.f32 %v2900_v36, %v2641_v43  ;;  %v2514_v61 = vmul.f32 %v5050_v57, %v2385_v38  ;;  %v1742_v63 = vmul.f32 %v5040_v45, %v1613_v42  ;;  %v2387_v38 = vld [vmem:[#allocation2 + $0x95] sm:$0x1]  ;;  %v1615_v42 = vld [vmem:[#allocation2 + $0x85] sm:$0x1] }
 0x2ae   : > { %v2256_v60 = vadd.f32 %v2128_v32, %v1869_v47  ;;  %v1483_v4 = vadd.f32 %v1355_v56, %v1096_v55  ;;  %v2129_v5 = vmul.f32 %v5046_v51, %v2000_v48  ;;  %v967_v7 = vmul.f32 %v5028_v37, %v838_v49  ;;  %v2002_v48 = vld [vmem:[#allocation2 + $0x95] sm:$0x1]  ;;  %v840_v49 = vld [vmem:[#allocation2 + $0x84] sm:$0x1] }
 0x2af   : > { %v4187_v1 = vadd.f32 %v4059_v24, %v3800_v50  ;;  %v3415_v9 = vadd.f32 %v3287_v44, %v3028_v58  ;;  %v2901_v12 = vmul.f32 %v5052_v59, %v2772_v52  ;;  %v3288_v13 = vmul.f32 %v5061_v8, %v3159_v54  ;;  %v2774_v52 = vld [vmem:[#allocation2 + $0x96] sm:$0x1]  ;;  %v3161_v54 = vld [vmem:[#allocation2 + $0xa6] sm:$0x1] }
 0x2b0   : > { %v2642_v11 = vadd.f32 %v2514_v61, %v2256_v60  ;;  %v3675_v16 = vmul.f32 %v5055_v2, %v3546_v62  ;;  %v1870_v17 = vadd.f32 %v1742_v63, %v1483_v4  ;;  %v1097_v19 = vadd.f32 %v5035_v40, %v967_v7  ;;  %v3548_v62 = vld [vmem:[#allocation2 + $0xa7] sm:$0x1] }
 0x2b1   : > { %4315 = vst.msk [vmem:[%s4658_s13 + $0x6f] sm:$0x1] %vm326_vm0, %v4187_v1  ;;  %v1356_v20 = vmul.f32 %v5037_v41, %v1227_v0  ;;  %v3802_v22 = vadd.f32 %v3674_v46, %v3415_v9  ;;  %v4062_v24 = vmul.f32 %v5064_v10, %v3933_v3  ;;  %v2515_v25 = vmul.f32 %v5050_v57, %v2386_v6  ;;  %v1229_v0 = vld [vmem:[#allocation2 + $0x85] sm:$0x1]  ;;  %v3935_v3 = vld [vmem:[#allocation2 + $0xa8] sm:$0x1] }
 0x2b2   : > { %v3029_v23 = vadd.f32 %v2901_v12, %v2642_v11  ;;  %v2257_v28 = vadd.f32 %v2129_v5, %v1870_v17  ;;  %v1743_v31 = vmul.f32 %v5040_v45, %v1614_v14  ;;  %v2130_v32 = vmul.f32 %v5046_v51, %v2001_v15  ;;  %v2388_v6 = vld [vmem:[#allocation2 + $0x96] sm:$0x1]  ;;  %v1616_v14 = vld [vmem:[#allocation2 + $0x86] sm:$0x1] }
 0x2b3   : > { %v1484_v30 = vadd.f32 %v1356_v20, %v1097_v19  ;;  %v4189_v34 = vadd.f32 %v4061_v53, %v3802_v22  ;;  %v2902_v36 = vmul.f32 %v5052_v59, %v2773_v18  ;;  %v968_v39 = vmul.f32 %v5028_v37, %v839_v21  ;;  %v2003_v15 = vld [vmem:[#allocation2 + $0x96] sm:$0x1]  ;;  %v2775_v18 = vld [vmem:[#allocation2 + $0x97] sm:$0x1]  ;;  %v841_v21 = vld [vmem:[#allocation2 + $0x85] sm:$0x1] }
 0x2b4   : > { %v3416_v35 = vadd.f32 %v3288_v13, %v3029_v23  ;;  %v2643_v43 = vadd.f32 %v2515_v25, %v2257_v28  ;;  %v3289_v44 = vmul.f32 %v5061_v8, %v3160_v26  ;;  %v3676_v46 = vmul.f32 %v5055_v2, %v3547_v27  ;;  %v3162_v26 = vld [vmem:[#allocation2 + $0xa7] sm:$0x1]  ;;  %v3549_v27 = vld [vmem:[#allocation2 + $0xa8] sm:$0x1] }
 0x2b5   : > { %v1871_v47 = vadd.f32 %v1743_v31, %v1484_v30  ;;  %4317 = vst.msk [vmem:[%s4658_s13 + $0x71] sm:$0x1] %vm326_vm0, %v4189_v34  ;;  %v4063_v53 = vmul.f32 %v5064_v10, %v3934_v29  ;;  %v1098_v55 = vadd.f32 %v5035_v40, %v968_v39  ;;  %v1357_v56 = vmul.f32 %v5037_v41, %v1228_v33  ;;  %v3936_v29 = vld [vmem:[#allocation2 + $0xa9] sm:$0x1]  ;;  %v1230_v33 = vld [vmem:[#allocation2 + $0x86] sm:$0x1] }
 0x2b6   : > { %v3803_v50 = vadd.f32 %v3675_v16, %v3416_v35  ;;  %v3030_v58 = vadd.f32 %v2902_v36, %v2643_v43  ;;  %v2516_v61 = vmul.f32 %v5050_v57, %v2387_v38  ;;  %v1744_v63 = vmul.f32 %v5040_v45, %v1615_v42  ;;  %v2389_v38 = vld [vmem:[#allocation2 + $0x97] sm:$0x1]  ;;  %v1617_v42 = vld [vmem:[#allocation2 + $0x87] sm:$0x1] }
 0x2b7   : > { %v2258_v60 = vadd.f32 %v2130_v32, %v1871_v47  ;;  %v1485_v4 = vadd.f32 %v1357_v56, %v1098_v55  ;;  %v2131_v5 = vmul.f32 %v5046_v51, %v2002_v48  ;;  %v969_v7 = vmul.f32 %v5028_v37, %v840_v49  ;;  %v2004_v48 = vld [vmem:[#allocation2 + $0x97] sm:$0x1]  ;;  %v842_v49 = vld [vmem:[#allocation2 + $0x86] sm:$0x1] }
 0x2b8   : > { %v4190_v1 = vadd.f32 %v4062_v24, %v3803_v50  ;;  %v3417_v9 = vadd.f32 %v3289_v44, %v3030_v58  ;;  %v2903_v12 = vmul.f32 %v5052_v59, %v2774_v52  ;;  %v3290_v13 = vmul.f32 %v5061_v8, %v3161_v54  ;;  %v2776_v52 = vld [vmem:[#allocation2 + $0x98] sm:$0x1]  ;;  %v3163_v54 = vld [vmem:[#allocation2 + $0xa8] sm:$0x1] }
 0x2b9   : > { %v2644_v11 = vadd.f32 %v2516_v61, %v2258_v60  ;;  %v3677_v16 = vmul.f32 %v5055_v2, %v3548_v62  ;;  %v1872_v17 = vadd.f32 %v1744_v63, %v1485_v4  ;;  %v1099_v19 = vadd.f32 %v5035_v40, %v969_v7  ;;  %v3550_v62 = vld [vmem:[#allocation2 + $0xa9] sm:$0x1] }
 0x2ba   : > { %4318 = vst.msk [vmem:[%s4658_s13 + $0x72] sm:$0x1] %vm326_vm0, %v4190_v1  ;;  %v1358_v20 = vmul.f32 %v5037_v41, %v1229_v0  ;;  %v3804_v22 = vadd.f32 %v3676_v46, %v3417_v9  ;;  %v4064_v24 = vmul.f32 %v5064_v10, %v3935_v3  ;;  %v2517_v25 = vmul.f32 %v5050_v57, %v2388_v6  ;;  %v1231_v0 = vld [vmem:[#allocation2 + $0x87] sm:$0x1]  ;;  %v3937_v3 = vld [vmem:[#allocation2 + $0xaa] sm:$0x1] }
 0x2bb   : > { %v3031_v23 = vadd.f32 %v2903_v12, %v2644_v11  ;;  %v2259_v28 = vadd.f32 %v2131_v5, %v1872_v17  ;;  %v1745_v31 = vmul.f32 %v5040_v45, %v1616_v14  ;;  %v2132_v32 = vmul.f32 %v5046_v51, %v2003_v15  ;;  %v2390_v6 = vld [vmem:[#allocation2 + $0x98] sm:$0x1]  ;;  %v1618_v14 = vld [vmem:[#allocation2 + $0x88] sm:$0x1] }
 0x2bc   : > { %v1486_v30 = vadd.f32 %v1358_v20, %v1099_v19  ;;  %v4191_v34 = vadd.f32 %v4063_v53, %v3804_v22  ;;  %v2904_v36 = vmul.f32 %v5052_v59, %v2775_v18  ;;  %v970_v39 = vmul.f32 %v5028_v37, %v841_v21  ;;  %v2005_v15 = vld [vmem:[#allocation2 + $0x98] sm:$0x1]  ;;  %v2777_v18 = vld [vmem:[#allocation2 + $0x99] sm:$0x1]  ;;  %v843_v21 = vld [vmem:[#allocation2 + $0x87] sm:$0x1] }
 0x2bd   : > { %v3418_v35 = vadd.f32 %v3290_v13, %v3031_v23  ;;  %v2645_v43 = vadd.f32 %v2517_v25, %v2259_v28  ;;  %v3291_v44 = vmul.f32 %v5061_v8, %v3162_v26  ;;  %v3678_v46 = vmul.f32 %v5055_v2, %v3549_v27  ;;  %v3164_v26 = vld [vmem:[#allocation2 + $0xa9] sm:$0x1]  ;;  %v3551_v27 = vld [vmem:[#allocation2 + $0xaa] sm:$0x1] }
 0x2be   : > { %v1873_v47 = vadd.f32 %v1745_v31, %v1486_v30  ;;  %4319 = vst.msk [vmem:[%s4658_s13 + $0x73] sm:$0x1] %vm326_vm0, %v4191_v34  ;;  %v4065_v53 = vmul.f32 %v5064_v10, %v3936_v29  ;;  %v1100_v55 = vadd.f32 %v5035_v40, %v970_v39  ;;  %v1359_v56 = vmul.f32 %v5037_v41, %v1230_v33  ;;  %v3938_v29 = vld [vmem:[#allocation2 + $0xab] sm:$0x1]  ;;  %v1232_v33 = vld [vmem:[#allocation2 + $0x88] sm:$0x1] }
 0x2bf   : > { %v3805_v50 = vadd.f32 %v3677_v16, %v3418_v35  ;;  %v3032_v58 = vadd.f32 %v2904_v36, %v2645_v43  ;;  %v2518_v61 = vmul.f32 %v5050_v57, %v2389_v38  ;;  %v1746_v63 = vmul.f32 %v5040_v45, %v1617_v42  ;;  %v2391_v38 = vld [vmem:[#allocation2 + $0x99] sm:$0x1]  ;;  %v1619_v42 = vld [vmem:[#allocation2 + $0x89] sm:$0x1] }
 0x2c0   : > { %v2260_v60 = vadd.f32 %v2132_v32, %v1873_v47  ;;  %v1487_v4 = vadd.f32 %v1359_v56, %v1100_v55  ;;  %v2133_v5 = vmul.f32 %v5046_v51, %v2004_v48  ;;  %v971_v7 = vmul.f32 %v5028_v37, %v842_v49  ;;  %v2006_v48 = vld [vmem:[#allocation2 + $0x99] sm:$0x1]  ;;  %v844_v49 = vld [vmem:[#allocation2 + $0x88] sm:$0x1] }
 0x2c1   : > { %v4192_v1 = vadd.f32 %v4064_v24, %v3805_v50  ;;  %v3419_v9 = vadd.f32 %v3291_v44, %v3032_v58  ;;  %v2905_v12 = vmul.f32 %v5052_v59, %v2776_v52  ;;  %v3292_v13 = vmul.f32 %v5061_v8, %v3163_v54  ;;  %v2778_v52 = vld [vmem:[#allocation2 + $0x9a] sm:$0x1]  ;;  %v3165_v54 = vld [vmem:[#allocation2 + $0xaa] sm:$0x1] }
 0x2c2   : > { %v2646_v11 = vadd.f32 %v2518_v61, %v2260_v60  ;;  %v3679_v16 = vmul.f32 %v5055_v2, %v3550_v62  ;;  %v1874_v17 = vadd.f32 %v1746_v63, %v1487_v4  ;;  %v1101_v19 = vadd.f32 %v5035_v40, %v971_v7  ;;  %v3552_v62 = vld [vmem:[#allocation2 + $0xab] sm:$0x1] }
 0x2c3   : > { %4320 = vst.msk [vmem:[%s4658_s13 + $0x74] sm:$0x1] %vm326_vm0, %v4192_v1  ;;  %v1360_v20 = vmul.f32 %v5037_v41, %v1231_v0  ;;  %v3806_v22 = vadd.f32 %v3678_v46, %v3419_v9  ;;  %v4066_v24 = vmul.f32 %v5064_v10, %v3937_v3  ;;  %v2519_v25 = vmul.f32 %v5050_v57, %v2390_v6  ;;  %v1233_v0 = vld [vmem:[#allocation2 + $0x89] sm:$0x1]  ;;  %v3939_v3 = vld [vmem:[#allocation2 + $0xac] sm:$0x1] }
 0x2c4   : > { %v3033_v23 = vadd.f32 %v2905_v12, %v2646_v11  ;;  %v2261_v28 = vadd.f32 %v2133_v5, %v1874_v17  ;;  %v1747_v31 = vmul.f32 %v5040_v45, %v1618_v14  ;;  %v2134_v32 = vmul.f32 %v5046_v51, %v2005_v15  ;;  %v2392_v6 = vld [vmem:[#allocation2 + $0x9a] sm:$0x1]  ;;  %v1620_v14 = vld [vmem:[#allocation2 + $0x8a] sm:$0x1] }
 0x2c5   : > { %v1488_v30 = vadd.f32 %v1360_v20, %v1101_v19  ;;  %v4193_v34 = vadd.f32 %v4065_v53, %v3806_v22  ;;  %v2906_v36 = vmul.f32 %v5052_v59, %v2777_v18  ;;  %v972_v39 = vmul.f32 %v5028_v37, %v843_v21  ;;  %v2007_v15 = vld [vmem:[#allocation2 + $0x9a] sm:$0x1]  ;;  %v2779_v18 = vld [vmem:[#allocation2 + $0x9b] sm:$0x1]  ;;  %v845_v21 = vld [vmem:[#allocation2 + $0x89] sm:$0x1] }
 0x2c6   : > { %v3420_v35 = vadd.f32 %v3292_v13, %v3033_v23  ;;  %v2647_v43 = vadd.f32 %v2519_v25, %v2261_v28  ;;  %v3293_v44 = vmul.f32 %v5061_v8, %v3164_v26  ;;  %v3680_v46 = vmul.f32 %v5055_v2, %v3551_v27  ;;  %v3166_v26 = vld [vmem:[#allocation2 + $0xab] sm:$0x1]  ;;  %v3553_v27 = vld [vmem:[#allocation2 + $0xac] sm:$0x1] }
 0x2c7   : > { %v1875_v47 = vadd.f32 %v1747_v31, %v1488_v30  ;;  %4321 = vst.msk [vmem:[%s4658_s13 + $0x75] sm:$0x1] %vm326_vm0, %v4193_v34  ;;  %v4067_v53 = vmul.f32 %v5064_v10, %v3938_v29  ;;  %v1102_v55 = vadd.f32 %v5035_v40, %v972_v39  ;;  %v1361_v56 = vmul.f32 %v5037_v41, %v1232_v33  ;;  %v3940_v29 = vld [vmem:[#allocation2 + $0xad] sm:$0x1]  ;;  %v1234_v33 = vld [vmem:[#allocation2 + $0x8a] sm:$0x1] }
 0x2c8   : > { %v3807_v50 = vadd.f32 %v3679_v16, %v3420_v35  ;;  %v3034_v58 = vadd.f32 %v2906_v36, %v2647_v43  ;;  %v2520_v61 = vmul.f32 %v5050_v57, %v2391_v38  ;;  %v1748_v63 = vmul.f32 %v5040_v45, %v1619_v42  ;;  %v2393_v38 = vld [vmem:[#allocation2 + $0x9b] sm:$0x1]  ;;  %v1621_v42 = vld [vmem:[#allocation2 + $0x8b] sm:$0x1] }
 0x2c9   : > { %v2262_v60 = vadd.f32 %v2134_v32, %v1875_v47  ;;  %v1489_v4 = vadd.f32 %v1361_v56, %v1102_v55  ;;  %v2135_v5 = vmul.f32 %v5046_v51, %v2006_v48  ;;  %v973_v7 = vmul.f32 %v5028_v37, %v844_v49  ;;  %v2008_v48 = vld [vmem:[#allocation2 + $0x9b] sm:$0x1]  ;;  %v846_v49 = vld [vmem:[#allocation2 + $0x8a] sm:$0x1] }
 0x2ca   : > { %v4194_v1 = vadd.f32 %v4066_v24, %v3807_v50  ;;  %v3421_v9 = vadd.f32 %v3293_v44, %v3034_v58  ;;  %v2907_v12 = vmul.f32 %v5052_v59, %v2778_v52  ;;  %v3294_v13 = vmul.f32 %v5061_v8, %v3165_v54  ;;  %v2780_v52 = vld [vmem:[#allocation2 + $0x9c] sm:$0x1]  ;;  %v3167_v54 = vld [vmem:[#allocation2 + $0xac] sm:$0x1] }
 0x2cb   : > { %v2648_v11 = vadd.f32 %v2520_v61, %v2262_v60  ;;  %v3681_v16 = vmul.f32 %v5055_v2, %v3552_v62  ;;  %v1876_v17 = vadd.f32 %v1748_v63, %v1489_v4  ;;  %v1103_v19 = vadd.f32 %v5035_v40, %v973_v7  ;;  %v3554_v62 = vld [vmem:[#allocation2 + $0xad] sm:$0x1] }
 0x2cc   : > { %4322 = vst.msk [vmem:[%s4658_s13 + $0x76] sm:$0x1] %vm326_vm0, %v4194_v1  ;;  %v1362_v20 = vmul.f32 %v5037_v41, %v1233_v0  ;;  %v3808_v22 = vadd.f32 %v3680_v46, %v3421_v9  ;;  %v4068_v24 = vmul.f32 %v5064_v10, %v3939_v3  ;;  %v2521_v25 = vmul.f32 %v5050_v57, %v2392_v6  ;;  %v1235_v0 = vld [vmem:[#allocation2 + $0x8b] sm:$0x1]  ;;  %v3941_v3 = vld [vmem:[#allocation2 + $0xae] sm:$0x1] }
 0x2cd   : > { %v3035_v23 = vadd.f32 %v2907_v12, %v2648_v11  ;;  %v2263_v28 = vadd.f32 %v2135_v5, %v1876_v17  ;;  %v1749_v31 = vmul.f32 %v5040_v45, %v1620_v14  ;;  %v2136_v32 = vmul.f32 %v5046_v51, %v2007_v15  ;;  %v2394_v6 = vld [vmem:[#allocation2 + $0x9c] sm:$0x1]  ;;  %v1622_v14 = vld [vmem:[#allocation2 + $0x8c] sm:$0x1] }
 0x2ce   : > { %v1490_v30 = vadd.f32 %v1362_v20, %v1103_v19  ;;  %v4195_v34 = vadd.f32 %v4067_v53, %v3808_v22  ;;  %v2908_v36 = vmul.f32 %v5052_v59, %v2779_v18  ;;  %v974_v39 = vmul.f32 %v5028_v37, %v845_v21  ;;  %v2009_v15 = vld [vmem:[#allocation2 + $0x9c] sm:$0x1]  ;;  %v2781_v18 = vld [vmem:[#allocation2 + $0x9d] sm:$0x1]  ;;  %v847_v21 = vld [vmem:[#allocation2 + $0x8b] sm:$0x1] }
 0x2cf   : > { %v3422_v35 = vadd.f32 %v3294_v13, %v3035_v23  ;;  %v2649_v43 = vadd.f32 %v2521_v25, %v2263_v28  ;;  %v3295_v44 = vmul.f32 %v5061_v8, %v3166_v26  ;;  %v3682_v46 = vmul.f32 %v5055_v2, %v3553_v27  ;;  %v3168_v26 = vld [vmem:[#allocation2 + $0xad] sm:$0x1]  ;;  %v3555_v27 = vld [vmem:[#allocation2 + $0xae] sm:$0x1] }
 0x2d0   : > { %v1877_v47 = vadd.f32 %v1749_v31, %v1490_v30  ;;  %4323 = vst.msk [vmem:[%s4658_s13 + $0x77] sm:$0x1] %vm326_vm0, %v4195_v34  ;;  %v4069_v53 = vmul.f32 %v5064_v10, %v3940_v29  ;;  %v1104_v55 = vadd.f32 %v5035_v40, %v974_v39  ;;  %v1363_v56 = vmul.f32 %v5037_v41, %v1234_v33  ;;  %v3942_v29 = vld [vmem:[#allocation2 + $0xaf] sm:$0x1]  ;;  %v1236_v33 = vld [vmem:[#allocation2 + $0x8c] sm:$0x1] }
 0x2d1   : > { %v3809_v50 = vadd.f32 %v3681_v16, %v3422_v35  ;;  %v3036_v58 = vadd.f32 %v2908_v36, %v2649_v43  ;;  %v2522_v61 = vmul.f32 %v5050_v57, %v2393_v38  ;;  %v1750_v63 = vmul.f32 %v5040_v45, %v1621_v42  ;;  %v2395_v38 = vld [vmem:[#allocation2 + $0x9d] sm:$0x1]  ;;  %v1623_v42 = vld [vmem:[#allocation2 + $0x8d] sm:$0x1] }
 0x2d2   : > { %v2264_v60 = vadd.f32 %v2136_v32, %v1877_v47  ;;  %v1491_v4 = vadd.f32 %v1363_v56, %v1104_v55  ;;  %v2137_v5 = vmul.f32 %v5046_v51, %v2008_v48  ;;  %v975_v7 = vmul.f32 %v5028_v37, %v846_v49  ;;  %v2010_v48 = vld [vmem:[#allocation2 + $0x9d] sm:$0x1]  ;;  %v848_v49 = vld [vmem:[#allocation2 + $0x8c] sm:$0x1] }
 0x2d3   : > { %v4196_v1 = vadd.f32 %v4068_v24, %v3809_v50  ;;  %v3423_v9 = vadd.f32 %v3295_v44, %v3036_v58  ;;  %v2909_v12 = vmul.f32 %v5052_v59, %v2780_v52  ;;  %v3296_v13 = vmul.f32 %v5061_v8, %v3167_v54  ;;  %v2782_v52 = vld [vmem:[#allocation2 + $0x9e] sm:$0x1]  ;;  %v3169_v54 = vld [vmem:[#allocation2 + $0xae] sm:$0x1] }
 0x2d4   : > { %v2650_v11 = vadd.f32 %v2522_v61, %v2264_v60  ;;  %v3683_v16 = vmul.f32 %v5055_v2, %v3554_v62  ;;  %v1878_v17 = vadd.f32 %v1750_v63, %v1491_v4  ;;  %v1105_v19 = vadd.f32 %v5035_v40, %v975_v7  ;;  %v3556_v62 = vld [vmem:[#allocation2 + $0xaf] sm:$0x1] }
 0x2d5   : > { %4324 = vst.msk [vmem:[%s4658_s13 + $0x78] sm:$0x1] %vm326_vm0, %v4196_v1  ;;  %v1364_v20 = vmul.f32 %v5037_v41, %v1235_v0  ;;  %v3810_v22 = vadd.f32 %v3682_v46, %v3423_v9  ;;  %v4070_v24 = vmul.f32 %v5064_v10, %v3941_v3  ;;  %v2523_v25 = vmul.f32 %v5050_v57, %v2394_v6  ;;  %v1237_v0 = vld [vmem:[#allocation2 + $0x8d] sm:$0x1]  ;;  %v3943_v3 = vld [vmem:[#allocation2 + $0xb0] sm:$0x1] }
 0x2d6   : > { %v3037_v23 = vadd.f32 %v2909_v12, %v2650_v11  ;;  %v2265_v28 = vadd.f32 %v2137_v5, %v1878_v17  ;;  %v1751_v31 = vmul.f32 %v5040_v45, %v1622_v14  ;;  %v2138_v32 = vmul.f32 %v5046_v51, %v2009_v15  ;;  %v2396_v6 = vld [vmem:[#allocation2 + $0x9e] sm:$0x1]  ;;  %v1624_v14 = vld [vmem:[#allocation2 + $0x8e] sm:$0x1] }
 0x2d7   : > { %v1492_v30 = vadd.f32 %v1364_v20, %v1105_v19  ;;  %v4197_v34 = vadd.f32 %v4069_v53, %v3810_v22  ;;  %v2910_v36 = vmul.f32 %v5052_v59, %v2781_v18  ;;  %v976_v39 = vmul.f32 %v5028_v37, %v847_v21  ;;  %v2011_v15 = vld [vmem:[#allocation2 + $0x9e] sm:$0x1]  ;;  %v849_v20 = vld [vmem:[#allocation2 + $0x8d] sm:$0x1]  ;;  %v1238_v21 = vld [vmem:[#allocation2 + $0x8e] sm:$0x1] }
 0x2d8   : > { %v3424_v35 = vadd.f32 %v3296_v13, %v3037_v23  ;;  %v2651_v43 = vadd.f32 %v2523_v25, %v2265_v28  ;;  %v3297_v44 = vmul.f32 %v5061_v8, %v3168_v26  ;;  %v3684_v46 = vmul.f32 %v5055_v2, %v3555_v27  ;;  %v2783_v26 = vld [vmem:[#allocation2 + $0x9f] sm:$0x1]  ;;  %v3170_v27 = vld [vmem:[#allocation2 + $0xaf] sm:$0x1] }
 0x2d9   : > { %v1879_v47 = vadd.f32 %v1751_v31, %v1492_v30  ;;  %4325 = vst.msk [vmem:[%s4658_s13 + $0x79] sm:$0x1] %vm326_vm0, %v4197_v34  ;;  %v4071_v53 = vmul.f32 %v5064_v10, %v3942_v29  ;;  %v1106_v55 = vadd.f32 %v5035_v40, %v976_v39  ;;  %v1365_v56 = vmul.f32 %v5037_v41, %v1236_v33 }
 0x2da   : > { %v3811_v50 = vadd.f32 %v3683_v16, %v3424_v35  ;;  %v3038_v58 = vadd.f32 %v2910_v36, %v2651_v43  ;;  %v2524_v61 = vmul.f32 %v5050_v57, %v2395_v38  ;;  %v1752_v63 = vmul.f32 %v5040_v45, %v1623_v42  ;;  %v3557_v35 = vld [vmem:[#allocation2 + $0xb0] sm:$0x1]  ;;  %v2397_v36 = vld [vmem:[#allocation2 + $0x9f] sm:$0x1] }
 0x2db   : > { %v2266_v60 = vadd.f32 %v2138_v32, %v1879_v47  ;;  %v1493_v4 = vadd.f32 %v1365_v56, %v1106_v55  ;;  %v2139_v5 = vmul.f32 %v5046_v51, %v2010_v48  ;;  %v977_v7 = vmul.f32 %v5028_v37, %v848_v49  ;;  %v1625_v32 = vld [vmem:[#allocation2 + $0x8f] sm:$0x1]  ;;  %v2012_v48 = vld [vmem:[#allocation2 + $0x9f] sm:$0x1] }
 0x2dc   : > { %v4198_v1 = vadd.f32 %v4070_v24, %v3811_v50  ;;  %v3425_v9 = vadd.f32 %v3297_v44, %v3038_v58  ;;  %v2911_v12 = vmul.f32 %v5052_v59, %v2782_v52  ;;  %v3298_v13 = vmul.f32 %v5061_v8, %v3169_v54  ;;  %v2784_v50 = vld [vmem:[#allocation2 + $0xa0] sm:$0x1] }
 0x2dd   : > { %v2652_v11 = vadd.f32 %v2524_v61, %v2266_v60  ;;  %v3685_v16 = vmul.f32 %v5055_v2, %v3556_v62  ;;  %v1880_v17 = vadd.f32 %v1752_v63, %v1493_v4  ;;  %v1107_v18 = vadd.f32 %v5035_v40, %v977_v7  ;;  %v2398_v58 = vld [vmem:[#allocation2 + $0xa0] sm:$0x1]  ;;  %v3558_v62 = vld [vmem:[#allocation2 + $0xb1] sm:$0x1]  ;;  %v2785_v4 = vld [vmem:[#allocation2 + $0xa1] sm:$0x1] }
 0x2de   : > { %4326 = vst.msk [vmem:[%s4658_s13 + $0x7a] sm:$0x1] %vm326_vm0, %v4198_v1  ;;  %v1366_v19 = vmul.f32 %v5037_v41, %v1237_v0  ;;  %v3812_v22 = vadd.f32 %v3684_v46, %v3425_v9  ;;  %v4072_v24 = vmul.f32 %v5064_v10, %v3943_v3  ;;  %v2525_v25 = vmul.f32 %v5050_v57, %v2396_v6  ;;  %v3944_v46 = vld [vmem:[#allocation2 + $0xb1] sm:$0x1] }
 0x2df   : > { %v3039_v23 = vadd.f32 %v2911_v12, %v2652_v11  ;;  %v2267_v28 = vadd.f32 %v2139_v5, %v1880_v17  ;;  %v1753_v30 = vmul.f32 %v5040_v45, %v1624_v14  ;;  %v2140_v31 = vmul.f32 %v5046_v51, %v2011_v15  ;;  %v3945_v5 = vld [vmem:[#allocation2 + $0xb2] sm:$0x1] }
 0x2e0   : > { %v1494_v29 = vadd.f32 %v1366_v19, %v1107_v18  ;;  %v4199_v33 = vadd.f32 %v4071_v53, %v3812_v22  ;;  %v978_v38 = vmul.f32 %v5028_v37, %v849_v20  ;;  %v1367_v39 = vmul.f32 %v5037_v41, %v1238_v21  ;;  %v3171_v53 = vld [vmem:[#allocation2 + $0xb0] sm:$0x1]  ;;  %v3559_v18 = vld [vmem:[#allocation2 + $0xb2] sm:$0x1]  ;;  %v3946_v21 = vld [vmem:[#allocation2 + $0xb3] sm:$0x1] }
 0x2e1   : > { %v3426_v34 = vadd.f32 %v3298_v13, %v3039_v23  ;;  %v2653_v42 = vadd.f32 %v2525_v25, %v2267_v28  ;;  %v2912_v43 = vmul.f32 %v5052_v59, %v2783_v26  ;;  %v3299_v44 = vmul.f32 %v5061_v8, %v3170_v27  ;;  %v3172_v13 = vld [vmem:[#allocation2 + $0xb1] sm:$0x1] }
 0x2e2   : > { %v1881_v47 = vadd.f32 %v1753_v30, %v1494_v29  ;;  %4327 = vst.msk [vmem:[%s4658_s13 + $0x7b] sm:$0x1] %vm326_vm0, %v4199_v33  ;;  %v1108_v52 = vadd.f32 %v5035_v40, %v978_v38  ;;  %v1754_v54 = vmul.f32 %v5040_v45, %v1625_v32  ;;  %v3686_v41 = vmul.f32 %v5055_v2, %v3557_v35 }
 0x2e3   : > { %v3813_v49 = vadd.f32 %v3685_v16, %v3426_v34  ;;  %v3040_v37 = vadd.f32 %v2912_v43, %v2653_v42  ;;  %v2526_v56 = vmul.f32 %v5050_v57, %v2397_v36  ;;  %v4073_v61 = vmul.f32 %v5064_v10, %v3944_v46 }
 0x2e4   : > { %v2268_v55 = vadd.f32 %v2140_v31, %v1881_v47  ;;  %v1495_v63 = vadd.f32 %v1367_v39, %v1108_v52  ;;  %v2141_v0 = vmul.f32 %v5046_v51, %v2012_v48  ;;  %v2913_v40 = vmul.f32 %v5052_v59, %v2784_v50 }
 0x2e5   : > { %v4200_v60 = vadd.f32 %v4072_v24, %v3813_v49  ;;  %v3427_v1 = vadd.f32 %v3299_v44, %v3040_v37  ;;  %v3300_v45 = vmul.f32 %v5061_v8, %v3171_v53  ;;  %v2527_v7 = vmul.f32 %v5050_v57, %v2398_v58 }
 0x2e6   : > { %v2654_v3 = vadd.f32 %v2526_v56, %v2268_v55  ;;  %v1882_v6 = vadd.f32 %v1754_v54, %v1495_v63  ;;  %v3687_v12 = vmul.f32 %v5055_v2, %v3558_v62  ;;  %v2914_v14 = vmul.f32 %v5052_v59, %v2785_v4 }
 0x2e7   : > { %4328 = vst.msk [vmem:[%s4658_s13 + $0x7c] sm:$0x1] %vm326_vm0, %v4200_v60  ;;  %v3814_v9 = vadd.f32 %v3686_v41, %v3427_v1  ;;  %v4074_v17 = vmul.f32 %v5064_v10, %v3945_v5  ;;  %v3301_v20 = vmul.f32 %v5061_v8, %v3172_v13  ;;  %v3688_v23 = vmul.f32 %v5055_v2, %v3559_v18 }
 0x2e8   : > { %v3041_v11 = vadd.f32 %v2913_v40, %v2654_v3  ;;  %v2269_v51 = vadd.f32 %v2141_v0, %v1882_v6  ;;  %v4075_v59 = vmul.f32 %v5064_v10, %v3946_v21 }
 0x2e9   : > { %v4201_v15 = vadd.f32 %v4073_v61, %v3814_v9 }
 0x2ea   : > { %v3428_v16 = vadd.f32 %v3300_v45, %v3041_v11  ;;  %v2655_v19 = vadd.f32 %v2527_v7, %v2269_v51 }
 0x2eb   : > { %4329 = vst.msk [vmem:[%s4658_s13 + $0x7d] sm:$0x1] %vm326_vm0, %v4201_v15 }
 0x2ec   : > { %v3815_v57 = vadd.f32 %v3687_v12, %v3428_v16  ;;  %v3042_v22 = vadd.f32 %v2914_v14, %v2655_v19 }
 0x2ee   : > { %v4202_v24 = vadd.f32 %v4074_v17, %v3815_v57  ;;  %v3429_v25 = vadd.f32 %v3301_v20, %v3042_v22 }
 0x2f0   : > { %4330 = vst.msk [vmem:[%s4658_s13 + $0x7e] sm:$0x1] %vm326_vm0, %v4202_v24  ;;  %v3816_v26 = vadd.f32 %v3688_v23, %v3429_v25 }
 0x2f2   : > { %v4203_v27 = vadd.f32 %v4075_v59, %v3816_v26 }
 0x2f4   : > { %4331 = vst.msk [vmem:[%s4658_s13 + $0x7f] sm:$0x1] %vm326_vm0, %v4203_v27 }
 0x2f5 PF: > { %s22_s26 = sadd.s32 1, %s4554_s26   ;;  %s6606_s25 = smov %s4550_s0 }
 0x2f6   : > { %p19_p3 = scmp.ge.s32.totalorder %s22_s26, 4   ;;  %s6607_s0 = smov %s6609_s1 }
 0x2f8   :  { %21 = sbr.rel (!%p19_p3) target bundleno = 17 (0x11), region = 97 }

</bundles_post_ra>
